<compile_context>
chip_gen: v7x
topology: tpu7x:2x2x1
jax: 0.10.0
libtpu: 0.0.40
codegen_flags: <defaults>
</compile_context>

<pallas_src>
import functools
import math

import jax
import jax.numpy as jnp
from jax.experimental import pallas as pl
from jax.experimental.pallas import tpu as pltpu

LN_EPS = 1e-5

_LAYER_W_NAMES = ("wqkv", "bqkv", "wo", "bo",
                  "ln1w", "ln1b", "w1", "b1", "w2", "b2", "ln2w", "ln2b")

_N_IN = 49  # tensor inputs to the fused kernel (excludes the 2 scalar-prefetch args)


def _ln(x, w, b):
    """LayerNorm with f32 statistics (works on jnp values in- and outside kernels)."""
    mu = jnp.mean(x, axis=-1, keepdims=True)
    var = jnp.mean((x - mu) ** 2, axis=-1, keepdims=True)
    return (x - mu) * jax.lax.rsqrt(var + LN_EPS) * w + b


# ---------------------------------------------------------------------------
# In-kernel helpers
# ---------------------------------------------------------------------------
def _encoder_layer(x, mask, w):
    """Single-head post-LN transformer layer. x: (B,S,H) f32, mask: (B,1,S) or None."""
    (wqkv, bqkv, wo, bo, ln1w, ln1b, w1, b1, w2, b2, ln2w, ln2b) = w
    B, S, H = x.shape
    xf = x.reshape(B * S, H)
    xb = xf.astype(jnp.bfloat16)

    # Fused QKV projection: one (B*S, H) @ (H, 3H) MXU matmul.
    qkv = jnp.dot(xb, wqkv[...], preferred_element_type=jnp.float32) + bqkv[...]
    q = qkv[:, :H] * (1.0 / math.sqrt(H))              # scale folded into Q
    k = qkv[:, H:2 * H]
    v = qkv[:, 2 * H:3 * H]

    qb = q.reshape(B, S, H).astype(jnp.bfloat16)
    kb = k.reshape(B, S, H).astype(jnp.bfloat16)
    vb = v.reshape(B, S, H).astype(jnp.bfloat16)

    s = jnp.einsum("bqd,bkd->bqk", qb, kb, preferred_element_type=jnp.float32)
    if mask is not None:
        s = s + mask
    m = jnp.max(s, axis=-1, keepdims=True)
    p = jnp.exp(s - m)
    p = p * pl.reciprocal(jnp.sum(p, axis=-1, keepdims=True), approx=True)
    ctx = jnp.einsum("bqk,bkd->bqd", p.astype(jnp.bfloat16), vb,
                     preferred_element_type=jnp.float32)

    attn = (jnp.dot(ctx.reshape(B * S, H).astype(jnp.bfloat16), wo[...],
                    preferred_element_type=jnp.float32) + bo[...])
    h = _ln(xf + attn, ln1w[...], ln1b[...])

    # TODO(synk): HF encoders use exact (erf) GELU; tanh approximation used here.
    f = jax.nn.gelu(jnp.dot(h.astype(jnp.bfloat16), w1[...],
                            preferred_element_type=jnp.float32) + b1[...],
                    approximate=True)
    f = jnp.dot(f.astype(jnp.bfloat16), w2[...],
                preferred_element_type=jnp.float32) + b2[...]
    return _ln(h + f, ln2w[...], ln2b[...]).reshape(B, S, H)


def _mlp(h, w1, b1, w2, b2, w3, b3):
    """Classifier: Linear-ReLU-Linear-ReLU-Linear (dropouts are identity in eval)."""
    h = jnp.maximum(jnp.dot(h.astype(jnp.bfloat16), w1[...],
                            preferred_element_type=jnp.float32) + b1[...], 0.0)
    h = jnp.maximum(jnp.dot(h.astype(jnp.bfloat16), w2[...],
                            preferred_element_type=jnp.float32) + b2[...], 0.0)
    return jnp.dot(h.astype(jnp.bfloat16), w3[...],
                   preferred_element_type=jnp.float32) + b3[...]


# ---------------------------------------------------------------------------
# The single fused kernel (grid = (n_layers,))
# ---------------------------------------------------------------------------
def _xnorm_kernel(is_ex_ref, ex_idx_ref, *args, weight):
    del ex_idx_ref  # only used inside BlockSpec index_maps
    refs = args[:_N_IN]
    out_ref = args[_N_IN]
    t_scr, a_scr = args[_N_IN + 1:]

    (t_init_ref, mask_ref, frames_ref,
     fp_lnw, fp_lnb, fp_w, fp_b) = refs[:7]
    text_w = refs[7:19]
    audio_w = refs[19:31]
    net_wab, net_bab = refs[31:33]
    nea_wab, nea_bab = refs[33:35]
    ex_lnw, ex_lnb = refs[35:37]
    tcls = refs[37:43]
    acls = refs[43:49]

    l = pl.program_id(0)
    n_layers = pl.num_programs(0)

    # ---- prologue (layer 0): seed text hidden, HuBERT feature projection ----
    @pl.when(l == 0)
    def _():
        t_scr[...] = t_init_ref[...]
        fr = frames_ref[...]                              # (B, S_a, FEAT)
        B, Sa, F = fr.shape
        x = _ln(fr.reshape(B * Sa, F), fp_lnw[...], fp_lnb[...])
        a = (jnp.dot(x.astype(jnp.bfloat16), fp_w[...],
                     preferred_element_type=jnp.float32) + fp_b[...])
        a_scr[...] = a.reshape(B, Sa, -1)

    # ---- encoder layer l for both streams ------------------------------------
    # TODO(synk): v7x could run text/audio stacks on separate TensorCores between
    # exchange points; kept single-core here for simplicity of the exchange sync.
    t_scr[...] = _encoder_layer(t_scr[...], mask_ref[...], text_w)
    a_scr[...] = _encoder_layer(a_scr[...], None, audio_w)

    # ---- NormEncoder + NormExchange at exchange layers ------------------------
    @pl.when(is_ex_ref[l] == 1)
    def _():
        t = t_scr[...]
        a = a_scr[...]
        H = t.shape[-1]
        tp = jnp.mean(t, axis=1)                          # (B, H) — includes padding,
        ap = jnp.mean(a, axis=1)                          # matching the PyTorch module
        # Fused gamma/beta projection: one (B, H) @ (H, 2H) matmul per stream.
        gb_t = jnp.dot(tp.astype(jnp.bfloat16), net_wab[...],
                       preferred_element_type=jnp.float32) + net_bab[...]
        gb_a = jnp.dot(ap.astype(jnp.bfloat16), nea_wab[...],
                       preferred_element_type=jnp.float32) + nea_bab[...]
        g_t, b_t = gb_t[:, :H], gb_t[:, H:]
        g_a, b_a = gb_a[:, :H], gb_a[:, H:]
        tn = _ln(t, ex_lnw[...], ex_lnb[...])
        an = _ln(a, ex_lnw[...], ex_lnb[...])
        t_scr[...] = t + g_a[:, None, :] * tn + b_a[:, None, :]
        a_scr[...] = a + g_t[:, None, :] * an + b_t[:, None, :]

    # ---- epilogue (last layer): pooling + classifiers + weighted fusion ------
    @pl.when(l == n_layers - 1)
    def _():
        t_pool = t_scr[...][:, 0, :]                      # CLS token
        a_pool = jnp.max(a_scr[...], axis=1)              # max over time
        t_logits = _mlp(t_pool, *tcls)
        a_logits = _mlp(a_pool, *acls)
        out_ref[...] = weight * t_logits + (1.0 - weight) * a_logits


# ---------------------------------------------------------------------------
# Parameter packing: stack per-layer / per-exchange weights, fuse QKV & gamma/beta
# projections, cast dense matmul operands to bf16.
# ---------------------------------------------------------------------------
def pack_params(params, exchange_layers):
    exchange_layers = tuple(exchange_layers)
    n_layers = len(params["text_layers"])
    H = params["norm_exchange"]["lnw"].shape[-1]

    def fuse_layer(lyr):
        return dict(
            wqkv=jnp.concatenate([lyr["wq"], lyr["wk"], lyr["wv"]],
                                 axis=1).astype(jnp.bfloat16),
            bqkv=jnp.concatenate([lyr["bq"], lyr["bk"], lyr["bv"]], axis=1),
            wo=lyr["wo"].astype(jnp.bfloat16), bo=lyr["bo"],
            ln1w=lyr["ln1w"], ln1b=lyr["ln1b"],
            w1=lyr["w1"].astype(jnp.bfloat16), b1=lyr["b1"],
            w2=lyr["w2"].astype(jnp.bfloat16), b2=lyr["b2"],
            ln2w=lyr["ln2w"], ln2b=lyr["ln2b"])

    def stack_layers(layers):
        fused = [fuse_layer(lyr) for lyr in layers]
        return [jnp.stack([f[n] for f in fused]) for n in _LAYER_W_NAMES]

    def stack_ne(mods):
        if mods:
            wab = jnp.stack([jnp.concatenate([m["wa"], m["wb"]], axis=1)
                             for m in mods]).astype(jnp.bfloat16)
            bab = jnp.stack([jnp.concatenate([m["ba"], m["bb"]], axis=1)
                             for m in mods])
            return [wab, bab]
        return [jnp.zeros((1, H, 2 * H), jnp.bfloat16),
                jnp.zeros((1, 1, 2 * H), jnp.float32)]

    def cls(p):
        return [p["w1"].astype(jnp.bfloat16), p["b1"],
                p["w2"].astype(jnp.bfloat16), p["b2"],
                p["w3"].astype(jnp.bfloat16), p["b3"]]

    is_ex = jnp.array([1 if i in exchange_layers else 0 for i in range(n_layers)],
                      jnp.int32)
    idx, cur = [], 0
    for i in range(n_layers):
        if i in exchange_layers:
            cur = exchange_layers.index(i)
        idx.append(cur)
    ex_idx = jnp.array(idx, jnp.int32)

    fp = params["audio_fp"]
    return dict(
        emb=params["text_emb"],
        fp=[fp["lnw"], fp["lnb"], fp["w"].astype(jnp.bfloat16), fp["b"]],
        text=stack_layers(params["text_layers"]),
        audio=stack_layers(params["audio_layers"]),
        ne_t=stack_ne(params["norm_enc_text"]),
        ne_a=stack_ne(params["norm_enc_audio"]),
        ex_ln=[params["norm_exchange"]["lnw"], params["norm_exchange"]["lnb"]],
        tcls=cls(params["text_classifier"]),
        acls=cls(params["audio_classifier"]),
        is_ex=is_ex, ex_idx=ex_idx,
    )


# ---------------------------------------------------------------------------
# Forward pass
# ---------------------------------------------------------------------------
def xnorm_forward(packed, input_ids, attention_mask, audio_frames, *, weight=0.5):
    B, S_t = input_ids.shape
    _, S_a, _ = audio_frames.shape
    emb = packed["emb"]
    H = emb["word"].shape[1]
    C = packed["tcls"][4].shape[1]
    n_layers = packed["text"][0].shape[0]

    # ---- text embeddings (gather is glue, not a Pallas hot path) -------------
    # TODO(synk): pretrained RoBERTa embeddings (token-type, padding-idx position
    # offsets, learned vocab) are external; synthetic word+pos embeddings here.
    t0 = jnp.take(emb["word"], input_ids, axis=0) + emb["pos"][None, :S_t, :]
    t0 = _ln(t0, emb["lnw"], emb["lnb"])

    # additive attention mask, broadcast over query positions
    add_mask = ((1.0 - attention_mask.astype(jnp.float32)) * -10000.0)[:, None, :]

    inputs = ([t0, add_mask, audio_frames] + packed["fp"]
              + packed["text"] + packed["audio"]
              + packed["ne_t"] + packed["ne_a"]
              + packed["ex_ln"] + packed["tcls"] + packed["acls"])
    assert len(inputs) == _N_IN

    def const_spec(a):
        nd = a.ndim
        return pl.BlockSpec(a.shape, lambda l, flg, exi, _n=nd: (0,) * _n)

    def layer_spec(a):   # leading (n_layers,) axis selected by grid index, squeezed
        nd = a.ndim
        return pl.BlockSpec((None,) + tuple(a.shape[1:]),
                            lambda l, flg, exi, _n=nd: (l,) + (0,) * (_n - 1))

    def exch_spec(a):    # leading (n_exchange,) axis selected via scalar-prefetch table
        nd = a.ndim
        return pl.BlockSpec((None,) + tuple(a.shape[1:]),
                            lambda l, flg, exi, _n=nd: (exi[l],) + (0,) * (_n - 1))

    in_specs = ([const_spec(a) for a in inputs[:7]]
                + [layer_spec(a) for a in inputs[7:31]]
                + [exch_spec(a) for a in inputs[31:35]]
                + [const_spec(a) for a in inputs[35:]])

    kern = functools.partial(_xnorm_kernel, weight=float(weight))
    return pl.pallas_call(
        kern,
        out_shape=jax.ShapeDtypeStruct((B, C), jnp.float32),
        grid_spec=pltpu.PrefetchScalarGridSpec(
            num_scalar_prefetch=2,
            grid=(n_layers,),
            in_specs=in_specs,
            out_specs=pl.BlockSpec((B, C), lambda l, flg, exi: (0, 0)),
            scratch_shapes=[pltpu.VMEM((B, S_t, H), jnp.float32),
                            pltpu.VMEM((B, S_a, H), jnp.float32)],
        ),
        compiler_params=pltpu.CompilerParams(
            dimension_semantics=("arbitrary",)),   # hidden states carried across layers
    )(packed["is_ex"], packed["ex_idx"], *inputs)


# ---------------------------------------------------------------------------
# Deterministic synthetic parameter initialization.
# ---------------------------------------------------------------------------
def init_params(key, *, vocab, max_pos, feat_dim, H, F, C, n_layers, n_exchange):
    keys = iter(jax.random.split(key, 512))
    nk = lambda: next(keys)
    dense = lambda din, dout: 0.02 * jax.random.normal(nk(), (din, dout), jnp.float32)
    bias = lambda d: jnp.zeros((1, d), jnp.float32)
    ln = lambda d: (jnp.ones((1, d), jnp.float32), jnp.zeros((1, d), jnp.float32))

    def enc_layer():
        ln1w, ln1b = ln(H)
        ln2w, ln2b = ln(H)
        return dict(wq=dense(H, H), bq=bias(H), wk=dense(H, H), bk=bias(H),
                    wv=dense(H, H), bv=bias(H), wo=dense(H, H), bo=bias(H),
                    ln1w=ln1w, ln1b=ln1b,
                    w1=dense(H, F), b1=bias(F), w2=dense(F, H), b2=bias(H),
                    ln2w=ln2w, ln2b=ln2b)

    def norm_enc():
        return dict(wa=dense(H, H), ba=bias(H), wb=dense(H, H), bb=bias(H))

    def classifier():
        return dict(w1=dense(H, H), b1=bias(H), w2=dense(H, H), b2=bias(H),
                    w3=dense(H, C), b3=bias(C))

    emb_lnw, emb_lnb = ln(H)
    fp_lnw, fp_lnb = ln(feat_dim)
    ex_lnw, ex_lnb = ln(H)
    return dict(
        text_emb=dict(word=0.02 * jax.random.normal(nk(), (vocab, H), jnp.float32),
                      pos=0.02 * jax.random.normal(nk(), (max_pos, H), jnp.float32),
                      lnw=emb_lnw, lnb=emb_lnb),
        audio_fp=dict(lnw=fp_lnw, lnb=fp_lnb, w=dense(feat_dim, H), b=bias(H)),
        text_layers=[enc_layer() for _ in range(n_layers)],
        audio_layers=[enc_layer() for _ in range(n_layers)],
        norm_enc_text=[norm_enc() for _ in range(n_exchange)],
        norm_enc_audio=[norm_enc() for _ in range(n_exchange)],
        norm_exchange=dict(lnw=ex_lnw, lnb=ex_lnb),
        text_classifier=classifier(),
        audio_classifier=classifier(),
    )


if __name__ == "__main__":
    # TODO(synk): HuBERT conv feature_extractor (Conv1d stack over raw waveform) is an
    # external pretrained module; inputs here are pre-extracted frames (B, S_a, FEAT).
    B, S_T, S_A = 2, 8, 16
    H, F, C = 128, 256, 4          # H=128 keeps the lane (last) dim dense
    FEAT, VOCAB, MAX_POS = 64, 100, 16
    N_LAYERS, EXCHANGE = 4, (0, 2, 3)

    key = jax.random.PRNGKey(0)
    k_param, k_ids, k_audio = jax.random.split(key, 3)
    params = init_params(k_param, vocab=VOCAB, max_pos=MAX_POS, feat_dim=FEAT,
                         H=H, F=F, C=C, n_layers=N_LAYERS, n_exchange=len(EXCHANGE))
    packed = pack_params(params, EXCHANGE)

    input_ids = jax.random.randint(k_ids, (B, S_T), 0, VOCAB)
    attention_mask = jnp.ones((B, S_T), jnp.int32).at[:, -2:].set(0)   # pad the tail
    audio_frames = jax.random.normal(k_audio, (B, S_A, FEAT), jnp.float32)

    fwd = jax.jit(functools.partial(xnorm_forward, weight=0.5))
    logits = jax.block_until_ready(fwd(packed, input_ids, attention_mask, audio_frames))
    assert logits.shape == (B, C) and logits.dtype == jnp.float32
    assert bool(jnp.all(jnp.isfinite(logits)))
    print("KERNEL_OK")
</pallas_src>

<mosaic_0001>
module attributes {stable_mosaic.version = 11 : i64} {
  func.func @_xnorm_kernel(%arg0: i32, %arg1: memref<4xi32, #tpu.memory_space<smem>>, %arg2: memref<4xi32, #tpu.memory_space<smem>>, %arg3: memref<2x8x128xf32, #tpu.memory_space<vmem>>, %arg4: memref<2x1x8xf32, #tpu.memory_space<vmem>>, %arg5: memref<2x16x64xf32, #tpu.memory_space<vmem>>, %arg6: memref<1x64xf32, #tpu.memory_space<vmem>>, %arg7: memref<1x64xf32, #tpu.memory_space<vmem>>, %arg8: memref<64x128xbf16, #tpu.memory_space<vmem>>, %arg9: memref<1x128xf32, #tpu.memory_space<vmem>>, %arg10: memref<1x128x384xbf16, #tpu.memory_space<vmem>>, %arg11: memref<1x1x384xf32, #tpu.memory_space<vmem>>, %arg12: memref<1x128x128xbf16, #tpu.memory_space<vmem>>, %arg13: memref<1x1x128xf32, #tpu.memory_space<vmem>>, %arg14: memref<1x1x128xf32, #tpu.memory_space<vmem>>, %arg15: memref<1x1x128xf32, #tpu.memory_space<vmem>>, %arg16: memref<1x128x256xbf16, #tpu.memory_space<vmem>>, %arg17: memref<1x1x256xf32, #tpu.memory_space<vmem>>, %arg18: memref<1x256x128xbf16, #tpu.memory_space<vmem>>, %arg19: memref<1x1x128xf32, #tpu.memory_space<vmem>>, %arg20: memref<1x1x128xf32, #tpu.memory_space<vmem>>, %arg21: memref<1x1x128xf32, #tpu.memory_space<vmem>>, %arg22: memref<1x128x384xbf16, #tpu.memory_space<vmem>>, %arg23: memref<1x1x384xf32, #tpu.memory_space<vmem>>, %arg24: memref<1x128x128xbf16, #tpu.memory_space<vmem>>, %arg25: memref<1x1x128xf32, #tpu.memory_space<vmem>>, %arg26: memref<1x1x128xf32, #tpu.memory_space<vmem>>, %arg27: memref<1x1x128xf32, #tpu.memory_space<vmem>>, %arg28: memref<1x128x256xbf16, #tpu.memory_space<vmem>>, %arg29: memref<1x1x256xf32, #tpu.memory_space<vmem>>, %arg30: memref<1x256x128xbf16, #tpu.memory_space<vmem>>, %arg31: memref<1x1x128xf32, #tpu.memory_space<vmem>>, %arg32: memref<1x1x128xf32, #tpu.memory_space<vmem>>, %arg33: memref<1x1x128xf32, #tpu.memory_space<vmem>>, %arg34: memref<1x128x256xbf16, #tpu.memory_space<vmem>>, %arg35: memref<1x1x256xf32, #tpu.memory_space<vmem>>, %arg36: memref<1x128x256xbf16, #tpu.memory_space<vmem>>, %arg37: memref<1x1x256xf32, #tpu.memory_space<vmem>>, %arg38: memref<1x128xf32, #tpu.memory_space<vmem>>, %arg39: memref<1x128xf32, #tpu.memory_space<vmem>>, %arg40: memref<128x128xbf16, #tpu.memory_space<vmem>>, %arg41: memref<1x128xf32, #tpu.memory_space<vmem>>, %arg42: memref<128x128xbf16, #tpu.memory_space<vmem>>, %arg43: memref<1x128xf32, #tpu.memory_space<vmem>>, %arg44: memref<128x4xbf16, #tpu.memory_space<vmem>>, %arg45: memref<1x4xf32, #tpu.memory_space<vmem>>, %arg46: memref<128x128xbf16, #tpu.memory_space<vmem>>, %arg47: memref<1x128xf32, #tpu.memory_space<vmem>>, %arg48: memref<128x128xbf16, #tpu.memory_space<vmem>>, %arg49: memref<1x128xf32, #tpu.memory_space<vmem>>, %arg50: memref<128x4xbf16, #tpu.memory_space<vmem>>, %arg51: memref<1x4xf32, #tpu.memory_space<vmem>>, %arg52: memref<2x4xf32, #tpu.memory_space<vmem>>, %arg53: memref<2x8x128xf32, #tpu.memory_space<vmem>>, %arg54: memref<2x16x128xf32, #tpu.memory_space<vmem>>) attributes {dimension_semantics = [#tpu.dimension_semantics<arbitrary>], iteration_bounds = array<i64: 4>, scalar_prefetch = 2 : i64, scratch_operands = 2 : i64, tpu.core_type = #tpu.core_type<tc>, window_params = [{pipeline_mode = #tpu.pipeline_mode<synchronous>, transform_indices = @transform_0, window_bounds = array<i64: 2, 8, 128>}, {pipeline_mode = #tpu.pipeline_mode<synchronous>, transform_indices = @transform_1, window_bounds = array<i64: 2, 1, 8>}, {pipeline_mode = #tpu.pipeline_mode<synchronous>, transform_indices = @transform_2, window_bounds = array<i64: 2, 16, 64>}, {pipeline_mode = #tpu.pipeline_mode<synchronous>, transform_indices = @transform_3, window_bounds = array<i64: 1, 64>}, {pipeline_mode = #tpu.pipeline_mode<synchronous>, transform_indices = @transform_4, window_bounds = array<i64: 1, 64>}, {pipeline_mode = #tpu.pipeline_mode<synchronous>, transform_indices = @transform_5, window_bounds = array<i64: 64, 128>}, {pipeline_mode = #tpu.pipeline_mode<synchronous>, transform_indices = @transform_6, window_bounds = array<i64: 1, 128>}, {transform_indices = @transform_7, window_bounds = array<i64: 1, 128, 384>}, {transform_indices = @transform_8, window_bounds = array<i64: 1, 1, 384>}, {transform_indices = @transform_9, window_bounds = array<i64: 1, 128, 128>}, {transform_indices = @transform_10, window_bounds = array<i64: 1, 1, 128>}, {transform_indices = @transform_11, window_bounds = array<i64: 1, 1, 128>}, {transform_indices = @transform_12, window_bounds = array<i64: 1, 1, 128>}, {transform_indices = @transform_13, window_bounds = array<i64: 1, 128, 256>}, {transform_indices = @transform_14, window_bounds = array<i64: 1, 1, 256>}, {transform_indices = @transform_15, window_bounds = array<i64: 1, 256, 128>}, {transform_indices = @transform_16, window_bounds = array<i64: 1, 1, 128>}, {transform_indices = @transform_17, window_bounds = array<i64: 1, 1, 128>}, {transform_indices = @transform_18, window_bounds = array<i64: 1, 1, 128>}, {transform_indices = @transform_19, window_bounds = array<i64: 1, 128, 384>}, {transform_indices = @transform_20, window_bounds = array<i64: 1, 1, 384>}, {transform_indices = @transform_21, window_bounds = array<i64: 1, 128, 128>}, {transform_indices = @transform_22, window_bounds = array<i64: 1, 1, 128>}, {transform_indices = @transform_23, window_bounds = array<i64: 1, 1, 128>}, {transform_indices = @transform_24, window_bounds = array<i64: 1, 1, 128>}, {transform_indices = @transform_25, window_bounds = array<i64: 1, 128, 256>}, {transform_indices = @transform_26, window_bounds = array<i64: 1, 1, 256>}, {transform_indices = @transform_27, window_bounds = array<i64: 1, 256, 128>}, {transform_indices = @transform_28, window_bounds = array<i64: 1, 1, 128>}, {transform_indices = @transform_29, window_bounds = array<i64: 1, 1, 128>}, {transform_indices = @transform_30, window_bounds = array<i64: 1, 1, 128>}, {transform_indices = @transform_31, window_bounds = array<i64: 1, 128, 256>}, {transform_indices = @transform_32, window_bounds = array<i64: 1, 1, 256>}, {transform_indices = @transform_33, window_bounds = array<i64: 1, 128, 256>}, {transform_indices = @transform_34, window_bounds = array<i64: 1, 1, 256>}, {pipeline_mode = #tpu.pipeline_mode<synchronous>, transform_indices = @transform_35, window_bounds = array<i64: 1, 128>}, {pipeline_mode = #tpu.pipeline_mode<synchronous>, transform_indices = @transform_36, window_bounds = array<i64: 1, 128>}, {pipeline_mode = #tpu.pipeline_mode<synchronous>, transform_indices = @transform_37, window_bounds = array<i64: 128, 128>}, {pipeline_mode = #tpu.pipeline_mode<synchronous>, transform_indices = @transform_38, window_bounds = array<i64: 1, 128>}, {pipeline_mode = #tpu.pipeline_mode<synchronous>, transform_indices = @transform_39, window_bounds = array<i64: 128, 128>}, {pipeline_mode = #tpu.pipeline_mode<synchronous>, transform_indices = @transform_40, window_bounds = array<i64: 1, 128>}, {pipeline_mode = #tpu.pipeline_mode<synchronous>, transform_indices = @transform_41, window_bounds = array<i64: 128, 4>}, {pipeline_mode = #tpu.pipeline_mode<synchronous>, transform_indices = @transform_42, window_bounds = array<i64: 1, 4>}, {pipeline_mode = #tpu.pipeline_mode<synchronous>, transform_indices = @transform_43, window_bounds = array<i64: 128, 128>}, {pipeline_mode = #tpu.pipeline_mode<synchronous>, transform_indices = @transform_44, window_bounds = array<i64: 1, 128>}, {pipeline_mode = #tpu.pipeline_mode<synchronous>, transform_indices = @transform_45, window_bounds = array<i64: 128, 128>}, {pipeline_mode = #tpu.pipeline_mode<synchronous>, transform_indices = @transform_46, window_bounds = array<i64: 1, 128>}, {pipeline_mode = #tpu.pipeline_mode<synchronous>, transform_indices = @transform_47, window_bounds = array<i64: 128, 4>}, {pipeline_mode = #tpu.pipeline_mode<synchronous>, transform_indices = @transform_48, window_bounds = array<i64: 1, 4>}, {pipeline_mode = #tpu.pipeline_mode<synchronous>, transform_indices = @transform_49, window_bounds = array<i64: 2, 4>}]} {
    %c0_i32 = arith.constant 0 : i32
    %0 = arith.cmpi eq, %arg0, %c0_i32 : i32
    %1 = arith.extui %0 : i1 to i32
    %c0_i32_0 = arith.constant 0 : i32
    %2 = arith.cmpi ne, %1, %c0_i32_0 : i32
    scf.if %2 {
      %c0_134 = arith.constant 0 : index
      %c0_135 = arith.constant 0 : index
      %c0_136 = arith.constant 0 : index
      %270 = vector.load %arg3[%c0_134, %c0_135, %c0_136] : memref<2x8x128xf32, #tpu.memory_space<vmem>>, vector<2x8x128xf32>
      %c0_137 = arith.constant 0 : index
      %c0_138 = arith.constant 0 : index
      %c0_139 = arith.constant 0 : index
      %271 = vector.load %arg53[%c0_137, %c0_138, %c0_139] : memref<2x8x128xf32, #tpu.memory_space<vmem>>, vector<2x8x128xf32>
      tpu.vector_store %arg53[%c0_137, %c0_138, %c0_139], %270 {strides = array<i32>} : memref<2x8x128xf32, #tpu.memory_space<vmem>>, vector<2x8x128xf32>,
      %c0_140 = arith.constant 0 : index
      %c0_141 = arith.constant 0 : index
      %c0_142 = arith.constant 0 : index
      %272 = vector.load %arg5[%c0_140, %c0_141, %c0_142] : memref<2x16x64xf32, #tpu.memory_space<vmem>>, vector<2x16x64xf32>
      %273 = vector.shape_cast %272 : vector<2x16x64xf32> to vector<32x64xf32>
      %c0_143 = arith.constant 0 : index
      %c0_144 = arith.constant 0 : index
      %274 = vector.load %arg6[%c0_143, %c0_144] : memref<1x64xf32, #tpu.memory_space<vmem>>, vector<1x64xf32>
      %c0_145 = arith.constant 0 : index
      %c0_146 = arith.constant 0 : index
      %275 = vector.load %arg7[%c0_145, %c0_146] : memref<1x64xf32, #tpu.memory_space<vmem>>, vector<1x64xf32>
      %cst_147 = arith.constant dense<0.000000e+00> : vector<32xf32>
      %276 = vector.multi_reduction <add>, %273, %cst_147 [1] : vector<32x64xf32> to vector<32xf32>
      %277 = vector.shape_cast %276 : vector<32xf32> to vector<32x1xf32>
      %cst_148 = arith.constant 6.400000e+01 : f32
      %278 = vector.broadcast %cst_148 : f32 to vector<32x1xf32>
      %279 = arith.divf %277, %278 : vector<32x1xf32>
      %280 = vector.broadcast %279 : vector<32x1xf32> to vector<32x64xf32>
      %281 = arith.subf %273, %280 : vector<32x64xf32>
      %282 = arith.mulf %281, %281 : vector<32x64xf32>
      %cst_149 = arith.constant dense<0.000000e+00> : vector<32xf32>
      %283 = vector.multi_reduction <add>, %282, %cst_149 [1] : vector<32x64xf32> to vector<32xf32>
      %284 = vector.shape_cast %283 : vector<32xf32> to vector<32x1xf32>
      %cst_150 = arith.constant 6.400000e+01 : f32
      %285 = vector.broadcast %cst_150 : f32 to vector<32x1xf32>
      %286 = arith.divf %284, %285 : vector<32x1xf32>
      %287 = vector.broadcast %279 : vector<32x1xf32> to vector<32x64xf32>
      %288 = arith.subf %273, %287 : vector<32x64xf32>
      %cst_151 = arith.constant 9.99999974E-6 : f32
      %289 = vector.broadcast %cst_151 : f32 to vector<32x1xf32>
      %290 = arith.addf %286, %289 : vector<32x1xf32>
      %291 = math.rsqrt %290 : vector<32x1xf32>
      %292 = vector.broadcast %291 : vector<32x1xf32> to vector<32x64xf32>
      %293 = arith.mulf %288, %292 : vector<32x64xf32>
      %294 = vector.broadcast %274 : vector<1x64xf32> to vector<32x64xf32>
      %295 = arith.mulf %293, %294 : vector<32x64xf32>
      %296 = vector.broadcast %275 : vector<1x64xf32> to vector<32x64xf32>
      %297 = arith.addf %295, %296 : vector<32x64xf32>
      %298 = arith.truncf %297 : vector<32x64xf32> to vector<32x64xbf16>
      %c0_152 = arith.constant 0 : index
      %c0_153 = arith.constant 0 : index
      %299 = vector.load %arg8[%c0_152, %c0_153] : memref<64x128xbf16, #tpu.memory_space<vmem>>, vector<64x128xbf16>
      %cst_154 = arith.constant dense<0.000000e+00> : vector<32x128xf32>
      %300 = tpu.matmul %298, %299, %cst_154 {dimension_numbers = #tpu.dot_dimension_numbers<[1], [0], [0], [1], [0, 0, 1, 1], [], []>} : vector<32x64xbf16>, vector<64x128xbf16>, vector<32x128xf32> -> vector<32x128xf32>
      %c0_155 = arith.constant 0 : index
      %c0_156 = arith.constant 0 : index
      %301 = vector.load %arg9[%c0_155, %c0_156] : memref<1x128xf32, #tpu.memory_space<vmem>>, vector<1x128xf32>
      %302 = vector.broadcast %301 : vector<1x128xf32> to vector<32x128xf32>
      %303 = arith.addf %300, %302 : vector<32x128xf32>
      %304 = vector.shape_cast %303 : vector<32x128xf32> to vector<2x16x128xf32>
      %c0_157 = arith.constant 0 : index
      %c0_158 = arith.constant 0 : index
      %c0_159 = arith.constant 0 : index
      %305 = vector.load %arg54[%c0_157, %c0_158, %c0_159] : memref<2x16x128xf32, #tpu.memory_space<vmem>>, vector<2x16x128xf32>
      tpu.vector_store %arg54[%c0_157, %c0_158, %c0_159], %304 {strides = array<i32>} : memref<2x16x128xf32, #tpu.memory_space<vmem>>, vector<2x16x128xf32>,
    } else {
    }
    %c0 = arith.constant 0 : index
    %c0_1 = arith.constant 0 : index
    %c0_2 = arith.constant 0 : index
    %3 = vector.load %arg53[%c0, %c0_1, %c0_2] : memref<2x8x128xf32, #tpu.memory_space<vmem>>, vector<2x8x128xf32>
    %c0_3 = arith.constant 0 : index
    %c0_4 = arith.constant 0 : index
    %c0_5 = arith.constant 0 : index
    %4 = vector.load %arg4[%c0_3, %c0_4, %c0_5] : memref<2x1x8xf32, #tpu.memory_space<vmem>>, vector<2x1x8xf32>
    %5 = vector.shape_cast %3 : vector<2x8x128xf32> to vector<16x128xf32>
    %6 = arith.truncf %5 : vector<16x128xf32> to vector<16x128xbf16>
    %c0_6 = arith.constant 0 : index
    %c0_7 = arith.constant 0 : index
    %c0_8 = arith.constant 0 : index
    %7 = vector.load %arg10[%c0_6, %c0_7, %c0_8] : memref<1x128x384xbf16, #tpu.memory_space<vmem>>, vector<1x128x384xbf16>
    %8 = vector.shape_cast %7 : vector<1x128x384xbf16> to vector<128x384xbf16>
    %cst = arith.constant dense<0.000000e+00> : vector<16x384xf32>
    %9 = tpu.matmul %6, %8, %cst {dimension_numbers = #tpu.dot_dimension_numbers<[1], [0], [0], [1], [0, 0, 1, 1], [], []>} : vector<16x128xbf16>, vector<128x384xbf16>, vector<16x384xf32> -> vector<16x384xf32>
    %c0_9 = arith.constant 0 : index
    %c0_10 = arith.constant 0 : index
    %c0_11 = arith.constant 0 : index
    %10 = vector.load %arg11[%c0_9, %c0_10, %c0_11] : memref<1x1x384xf32, #tpu.memory_space<vmem>>, vector<1x1x384xf32>
    %11 = vector.shape_cast %10 : vector<1x1x384xf32> to vector<1x384xf32>
    %12 = vector.broadcast %11 : vector<1x384xf32> to vector<16x384xf32>
    %13 = arith.addf %9, %12 : vector<16x384xf32>
    %14 = vector.extract_strided_slice %13 {offsets = [0, 0], sizes = [16, 128], strides = [1, 1]} : vector<16x384xf32> to vector<16x128xf32>
    %cst_12 = arith.constant 0.0883883461 : f32
    %15 = vector.broadcast %cst_12 : f32 to vector<16x128xf32>
    %16 = arith.mulf %14, %15 : vector<16x128xf32>
    %17 = vector.extract_strided_slice %13 {offsets = [0, 128], sizes = [16, 128], strides = [1, 1]} : vector<16x384xf32> to vector<16x128xf32>
    %18 = vector.extract_strided_slice %13 {offsets = [0, 256], sizes = [16, 128], strides = [1, 1]} : vector<16x384xf32> to vector<16x128xf32>
    %19 = vector.shape_cast %16 : vector<16x128xf32> to vector<2x8x128xf32>
    %20 = arith.truncf %19 : vector<2x8x128xf32> to vector<2x8x128xbf16>
    %21 = vector.shape_cast %17 : vector<16x128xf32> to vector<2x8x128xf32>
    %22 = arith.truncf %21 : vector<2x8x128xf32> to vector<2x8x128xbf16>
    %23 = vector.shape_cast %18 : vector<16x128xf32> to vector<2x8x128xf32>
    %24 = arith.truncf %23 : vector<2x8x128xf32> to vector<2x8x128xbf16>
    "tpu.trace_start"() <{level = 10 : i32, message = "bqd,bkd->bqk"}> : () -> ()
    %cst_13 = arith.constant dense<0.000000e+00> : vector<2x8x8xf32>
    %25 = tpu.matmul %20, %22, %cst_13 {dimension_numbers = #tpu.dot_dimension_numbers<[2], [2], [1], [1], [0, 0, 0, 1, 1, 1], [0], [0]>} : vector<2x8x128xbf16>, vector<2x8x128xbf16>, vector<2x8x8xf32> -> vector<2x8x8xf32>
    "tpu.trace_stop"() : () -> ()
    %26 = vector.broadcast %4 : vector<2x1x8xf32> to vector<2x8x8xf32>
    %27 = arith.addf %25, %26 : vector<2x8x8xf32>
    %cst_14 = arith.constant dense<0xFF800000> : vector<2x8xf32>
    %28 = vector.multi_reduction <maximumf>, %27, %cst_14 [2] : vector<2x8x8xf32> to vector<2x8xf32>
    %29 = vector.shape_cast %28 : vector<2x8xf32> to vector<2x8x1xf32>
    %30 = vector.broadcast %29 : vector<2x8x1xf32> to vector<2x8x8xf32>
    %31 = arith.subf %27, %30 : vector<2x8x8xf32>
    %32 = math.exp %31 : vector<2x8x8xf32>
    %cst_15 = arith.constant dense<0.000000e+00> : vector<2x8xf32>
    %33 = vector.multi_reduction <add>, %32, %cst_15 [2] : vector<2x8x8xf32> to vector<2x8xf32>
    %34 = vector.shape_cast %33 : vector<2x8xf32> to vector<2x8x1xf32>
    %35 = tpu.reciprocal %34 {approx = true} : vector<2x8x1xf32> -> vector<2x8x1xf32>
    %36 = vector.broadcast %35 : vector<2x8x1xf32> to vector<2x8x8xf32>
    %37 = arith.mulf %32, %36 : vector<2x8x8xf32>
    %38 = arith.truncf %37 : vector<2x8x8xf32> to vector<2x8x8xbf16>
    "tpu.trace_start"() <{level = 10 : i32, message = "bqk,bkd->bqd"}> : () -> ()
    %cst_16 = arith.constant dense<0.000000e+00> : vector<2x8x128xf32>
    %39 = tpu.matmul %38, %24, %cst_16 {dimension_numbers = #tpu.dot_dimension_numbers<[2], [1], [1], [2], [0, 0, 0, 1, 1, 2], [0], [0]>} : vector<2x8x8xbf16>, vector<2x8x128xbf16>, vector<2x8x128xf32> -> vector<2x8x128xf32>
    "tpu.trace_stop"() : () -> ()
    %40 = vector.shape_cast %39 : vector<2x8x128xf32> to vector<16x128xf32>
    %41 = arith.truncf %40 : vector<16x128xf32> to vector<16x128xbf16>
    %c0_17 = arith.constant 0 : index
    %c0_18 = arith.constant 0 : index
    %c0_19 = arith.constant 0 : index
    %42 = vector.load %arg12[%c0_17, %c0_18, %c0_19] : memref<1x128x128xbf16, #tpu.memory_space<vmem>>, vector<1x128x128xbf16>
    %43 = vector.shape_cast %42 : vector<1x128x128xbf16> to vector<128x128xbf16>
    %cst_20 = arith.constant dense<0.000000e+00> : vector<16x128xf32>
    %44 = tpu.matmul %41, %43, %cst_20 {dimension_numbers = #tpu.dot_dimension_numbers<[1], [0], [0], [1], [0, 0, 1, 1], [], []>} : vector<16x128xbf16>, vector<128x128xbf16>, vector<16x128xf32> -> vector<16x128xf32>
    %c0_21 = arith.constant 0 : index
    %c0_22 = arith.constant 0 : index
    %c0_23 = arith.constant 0 : index
    %45 = vector.load %arg13[%c0_21, %c0_22, %c0_23] : memref<1x1x128xf32, #tpu.memory_space<vmem>>, vector<1x1x128xf32>
    %46 = vector.shape_cast %45 : vector<1x1x128xf32> to vector<1x128xf32>
    %47 = vector.broadcast %46 : vector<1x128xf32> to vector<16x128xf32>
    %48 = arith.addf %44, %47 : vector<16x128xf32>
    %49 = arith.addf %5, %48 : vector<16x128xf32>
    %c0_24 = arith.constant 0 : index
    %c0_25 = arith.constant 0 : index
    %c0_26 = arith.constant 0 : index
    %50 = vector.load %arg14[%c0_24, %c0_25, %c0_26] : memref<1x1x128xf32, #tpu.memory_space<vmem>>, vector<1x1x128xf32>
    %51 = vector.shape_cast %50 : vector<1x1x128xf32> to vector<1x128xf32>
    %c0_27 = arith.constant 0 : index
    %c0_28 = arith.constant 0 : index
    %c0_29 = arith.constant 0 : index
    %52 = vector.load %arg15[%c0_27, %c0_28, %c0_29] : memref<1x1x128xf32, #tpu.memory_space<vmem>>, vector<1x1x128xf32>
    %53 = vector.shape_cast %52 : vector<1x1x128xf32> to vector<1x128xf32>
    %cst_30 = arith.constant dense<0.000000e+00> : vector<16xf32>
    %54 = vector.multi_reduction <add>, %49, %cst_30 [1] : vector<16x128xf32> to vector<16xf32>
    %55 = vector.shape_cast %54 : vector<16xf32> to vector<16x1xf32>
    %cst_31 = arith.constant 1.280000e+02 : f32
    %56 = vector.broadcast %cst_31 : f32 to vector<16x1xf32>
    %57 = arith.divf %55, %56 : vector<16x1xf32>
    %58 = vector.broadcast %57 : vector<16x1xf32> to vector<16x128xf32>
    %59 = arith.subf %49, %58 : vector<16x128xf32>
    %60 = arith.mulf %59, %59 : vector<16x128xf32>
    %cst_32 = arith.constant dense<0.000000e+00> : vector<16xf32>
    %61 = vector.multi_reduction <add>, %60, %cst_32 [1] : vector<16x128xf32> to vector<16xf32>
    %62 = vector.shape_cast %61 : vector<16xf32> to vector<16x1xf32>
    %cst_33 = arith.constant 1.280000e+02 : f32
    %63 = vector.broadcast %cst_33 : f32 to vector<16x1xf32>
    %64 = arith.divf %62, %63 : vector<16x1xf32>
    %65 = vector.broadcast %57 : vector<16x1xf32> to vector<16x128xf32>
    %66 = arith.subf %49, %65 : vector<16x128xf32>
    %cst_34 = arith.constant 9.99999974E-6 : f32
    %67 = vector.broadcast %cst_34 : f32 to vector<16x1xf32>
    %68 = arith.addf %64, %67 : vector<16x1xf32>
    %69 = math.rsqrt %68 : vector<16x1xf32>
    %70 = vector.broadcast %69 : vector<16x1xf32> to vector<16x128xf32>
    %71 = arith.mulf %66, %70 : vector<16x128xf32>
    %72 = vector.broadcast %51 : vector<1x128xf32> to vector<16x128xf32>
    %73 = arith.mulf %71, %72 : vector<16x128xf32>
    %74 = vector.broadcast %53 : vector<1x128xf32> to vector<16x128xf32>
    %75 = arith.addf %73, %74 : vector<16x128xf32>
    %76 = arith.truncf %75 : vector<16x128xf32> to vector<16x128xbf16>
    %c0_35 = arith.constant 0 : index
    %c0_36 = arith.constant 0 : index
    %c0_37 = arith.constant 0 : index
    %77 = vector.load %arg16[%c0_35, %c0_36, %c0_37] : memref<1x128x256xbf16, #tpu.memory_space<vmem>>, vector<1x128x256xbf16>
    %78 = vector.shape_cast %77 : vector<1x128x256xbf16> to vector<128x256xbf16>
    %cst_38 = arith.constant dense<0.000000e+00> : vector<16x256xf32>
    %79 = tpu.matmul %76, %78, %cst_38 {dimension_numbers = #tpu.dot_dimension_numbers<[1], [0], [0], [1], [0, 0, 1, 1], [], []>} : vector<16x128xbf16>, vector<128x256xbf16>, vector<16x256xf32> -> vector<16x256xf32>
    %c0_39 = arith.constant 0 : index
    %c0_40 = arith.constant 0 : index
    %c0_41 = arith.constant 0 : index
    %80 = vector.load %arg17[%c0_39, %c0_40, %c0_41] : memref<1x1x256xf32, #tpu.memory_space<vmem>>, vector<1x1x256xf32>
    %81 = vector.shape_cast %80 : vector<1x1x256xf32> to vector<1x256xf32>
    %82 = vector.broadcast %81 : vector<1x256xf32> to vector<16x256xf32>
    %83 = arith.addf %79, %82 : vector<16x256xf32>
    %84 = arith.mulf %83, %83 : vector<16x256xf32>
    %85 = arith.mulf %83, %84 : vector<16x256xf32>
    %cst_42 = arith.constant 4.471500e-02 : f32
    %86 = vector.broadcast %cst_42 : f32 to vector<16x256xf32>
    %87 = arith.mulf %86, %85 : vector<16x256xf32>
    %88 = arith.addf %83, %87 : vector<16x256xf32>
    %cst_43 = arith.constant 0.797884583 : f32
    %89 = vector.broadcast %cst_43 : f32 to vector<16x256xf32>
    %90 = arith.mulf %89, %88 : vector<16x256xf32>
    %91 = math.tanh %90 : vector<16x256xf32>
    %cst_44 = arith.constant 1.000000e+00 : f32
    %92 = vector.broadcast %cst_44 : f32 to vector<16x256xf32>
    %93 = arith.addf %92, %91 : vector<16x256xf32>
    %cst_45 = arith.constant 5.000000e-01 : f32
    %94 = vector.broadcast %cst_45 : f32 to vector<16x256xf32>
    %95 = arith.mulf %94, %93 : vector<16x256xf32>
    %96 = arith.mulf %83, %95 : vector<16x256xf32>
    %97 = arith.truncf %96 : vector<16x256xf32> to vector<16x256xbf16>
    %c0_46 = arith.constant 0 : index
    %c0_47 = arith.constant 0 : index
    %c0_48 = arith.constant 0 : index
    %98 = vector.load %arg18[%c0_46, %c0_47, %c0_48] : memref<1x256x128xbf16, #tpu.memory_space<vmem>>, vector<1x256x128xbf16>
    %99 = vector.shape_cast %98 : vector<1x256x128xbf16> to vector<256x128xbf16>
    %cst_49 = arith.constant dense<0.000000e+00> : vector<16x128xf32>
    %100 = tpu.matmul %97, %99, %cst_49 {dimension_numbers = #tpu.dot_dimension_numbers<[1], [0], [0], [1], [0, 0, 1, 1], [], []>} : vector<16x256xbf16>, vector<256x128xbf16>, vector<16x128xf32> -> vector<16x128xf32>
    %c0_50 = arith.constant 0 : index
    %c0_51 = arith.constant 0 : index
    %c0_52 = arith.constant 0 : index
    %101 = vector.load %arg19[%c0_50, %c0_51, %c0_52] : memref<1x1x128xf32, #tpu.memory_space<vmem>>, vector<1x1x128xf32>
    %102 = vector.shape_cast %101 : vector<1x1x128xf32> to vector<1x128xf32>
    %103 = vector.broadcast %102 : vector<1x128xf32> to vector<16x128xf32>
    %104 = arith.addf %100, %103 : vector<16x128xf32>
    %105 = arith.addf %75, %104 : vector<16x128xf32>
    %c0_53 = arith.constant 0 : index
    %c0_54 = arith.constant 0 : index
    %c0_55 = arith.constant 0 : index
    %106 = vector.load %arg20[%c0_53, %c0_54, %c0_55] : memref<1x1x128xf32, #tpu.memory_space<vmem>>, vector<1x1x128xf32>
    %107 = vector.shape_cast %106 : vector<1x1x128xf32> to vector<1x128xf32>
    %c0_56 = arith.constant 0 : index
    %c0_57 = arith.constant 0 : index
    %c0_58 = arith.constant 0 : index
    %108 = vector.load %arg21[%c0_56, %c0_57, %c0_58] : memref<1x1x128xf32, #tpu.memory_space<vmem>>, vector<1x1x128xf32>
    %109 = vector.shape_cast %108 : vector<1x1x128xf32> to vector<1x128xf32>
    %cst_59 = arith.constant dense<0.000000e+00> : vector<16xf32>
    %110 = vector.multi_reduction <add>, %105, %cst_59 [1] : vector<16x128xf32> to vector<16xf32>
    %111 = vector.shape_cast %110 : vector<16xf32> to vector<16x1xf32>
    %cst_60 = arith.constant 1.280000e+02 : f32
    %112 = vector.broadcast %cst_60 : f32 to vector<16x1xf32>
    %113 = arith.divf %111, %112 : vector<16x1xf32>
    %114 = vector.broadcast %113 : vector<16x1xf32> to vector<16x128xf32>
    %115 = arith.subf %105, %114 : vector<16x128xf32>
    %116 = arith.mulf %115, %115 : vector<16x128xf32>
    %cst_61 = arith.constant dense<0.000000e+00> : vector<16xf32>
    %117 = vector.multi_reduction <add>, %116, %cst_61 [1] : vector<16x128xf32> to vector<16xf32>
    %118 = vector.shape_cast %117 : vector<16xf32> to vector<16x1xf32>
    %cst_62 = arith.constant 1.280000e+02 : f32
    %119 = vector.broadcast %cst_62 : f32 to vector<16x1xf32>
    %120 = arith.divf %118, %119 : vector<16x1xf32>
    %121 = vector.broadcast %113 : vector<16x1xf32> to vector<16x128xf32>
    %122 = arith.subf %105, %121 : vector<16x128xf32>
    %cst_63 = arith.constant 9.99999974E-6 : f32
    %123 = vector.broadcast %cst_63 : f32 to vector<16x1xf32>
    %124 = arith.addf %120, %123 : vector<16x1xf32>
    %125 = math.rsqrt %124 : vector<16x1xf32>
    %126 = vector.broadcast %125 : vector<16x1xf32> to vector<16x128xf32>
    %127 = arith.mulf %122, %126 : vector<16x128xf32>
    %128 = vector.broadcast %107 : vector<1x128xf32> to vector<16x128xf32>
    %129 = arith.mulf %127, %128 : vector<16x128xf32>
    %130 = vector.broadcast %109 : vector<1x128xf32> to vector<16x128xf32>
    %131 = arith.addf %129, %130 : vector<16x128xf32>
    %132 = vector.shape_cast %131 : vector<16x128xf32> to vector<2x8x128xf32>
    %c0_64 = arith.constant 0 : index
    %c0_65 = arith.constant 0 : index
    %c0_66 = arith.constant 0 : index
    %133 = vector.load %arg53[%c0_64, %c0_65, %c0_66] : memref<2x8x128xf32, #tpu.memory_space<vmem>>, vector<2x8x128xf32>
    tpu.vector_store %arg53[%c0_64, %c0_65, %c0_66], %132 {strides = array<i32>} : memref<2x8x128xf32, #tpu.memory_space<vmem>>, vector<2x8x128xf32>,
    %c0_67 = arith.constant 0 : index
    %c0_68 = arith.constant 0 : index
    %c0_69 = arith.constant 0 : index
    %134 = vector.load %arg54[%c0_67, %c0_68, %c0_69] : memref<2x16x128xf32, #tpu.memory_space<vmem>>, vector<2x16x128xf32>
    %135 = vector.shape_cast %134 : vector<2x16x128xf32> to vector<32x128xf32>
    %136 = arith.truncf %135 : vector<32x128xf32> to vector<32x128xbf16>
    %c0_70 = arith.constant 0 : index
    %c0_71 = arith.constant 0 : index
    %c0_72 = arith.constant 0 : index
    %137 = vector.load %arg22[%c0_70, %c0_71, %c0_72] : memref<1x128x384xbf16, #tpu.memory_space<vmem>>, vector<1x128x384xbf16>
    %138 = vector.shape_cast %137 : vector<1x128x384xbf16> to vector<128x384xbf16>
    %cst_73 = arith.constant dense<0.000000e+00> : vector<32x384xf32>
    %139 = tpu.matmul %136, %138, %cst_73 {dimension_numbers = #tpu.dot_dimension_numbers<[1], [0], [0], [1], [0, 0, 1, 1], [], []>} : vector<32x128xbf16>, vector<128x384xbf16>, vector<32x384xf32> -> vector<32x384xf32>
    %c0_74 = arith.constant 0 : index
    %c0_75 = arith.constant 0 : index
    %c0_76 = arith.constant 0 : index
    %140 = vector.load %arg23[%c0_74, %c0_75, %c0_76] : memref<1x1x384xf32, #tpu.memory_space<vmem>>, vector<1x1x384xf32>
    %141 = vector.shape_cast %140 : vector<1x1x384xf32> to vector<1x384xf32>
    %142 = vector.broadcast %141 : vector<1x384xf32> to vector<32x384xf32>
    %143 = arith.addf %139, %142 : vector<32x384xf32>
    %144 = vector.extract_strided_slice %143 {offsets = [0, 0], sizes = [32, 128], strides = [1, 1]} : vector<32x384xf32> to vector<32x128xf32>
    %cst_77 = arith.constant 0.0883883461 : f32
    %145 = vector.broadcast %cst_77 : f32 to vector<32x128xf32>
    %146 = arith.mulf %144, %145 : vector<32x128xf32>
    %147 = vector.extract_strided_slice %143 {offsets = [0, 128], sizes = [32, 128], strides = [1, 1]} : vector<32x384xf32> to vector<32x128xf32>
    %148 = vector.extract_strided_slice %143 {offsets = [0, 256], sizes = [32, 128], strides = [1, 1]} : vector<32x384xf32> to vector<32x128xf32>
    %149 = vector.shape_cast %146 : vector<32x128xf32> to vector<2x16x128xf32>
    %150 = arith.truncf %149 : vector<2x16x128xf32> to vector<2x16x128xbf16>
    %151 = vector.shape_cast %147 : vector<32x128xf32> to vector<2x16x128xf32>
    %152 = arith.truncf %151 : vector<2x16x128xf32> to vector<2x16x128xbf16>
    %153 = vector.shape_cast %148 : vector<32x128xf32> to vector<2x16x128xf32>
    %154 = arith.truncf %153 : vector<2x16x128xf32> to vector<2x16x128xbf16>
    "tpu.trace_start"() <{level = 10 : i32, message = "bqd,bkd->bqk"}> : () -> ()
    %cst_78 = arith.constant dense<0.000000e+00> : vector<2x16x16xf32>
    %155 = tpu.matmul %150, %152, %cst_78 {dimension_numbers = #tpu.dot_dimension_numbers<[2], [2], [1], [1], [0, 0, 0, 1, 1, 1], [0], [0]>} : vector<2x16x128xbf16>, vector<2x16x128xbf16>, vector<2x16x16xf32> -> vector<2x16x16xf32>
    "tpu.trace_stop"() : () -> ()
    %cst_79 = arith.constant dense<0xFF800000> : vector<2x16xf32>
    %156 = vector.multi_reduction <maximumf>, %155, %cst_79 [2] : vector<2x16x16xf32> to vector<2x16xf32>
    %157 = vector.shape_cast %156 : vector<2x16xf32> to vector<2x16x1xf32>
    %158 = vector.broadcast %157 : vector<2x16x1xf32> to vector<2x16x16xf32>
    %159 = arith.subf %155, %158 : vector<2x16x16xf32>
    %160 = math.exp %159 : vector<2x16x16xf32>
    %cst_80 = arith.constant dense<0.000000e+00> : vector<2x16xf32>
    %161 = vector.multi_reduction <add>, %160, %cst_80 [2] : vector<2x16x16xf32> to vector<2x16xf32>
    %162 = vector.shape_cast %161 : vector<2x16xf32> to vector<2x16x1xf32>
    %163 = tpu.reciprocal %162 {approx = true} : vector<2x16x1xf32> -> vector<2x16x1xf32>
    %164 = vector.broadcast %163 : vector<2x16x1xf32> to vector<2x16x16xf32>
    %165 = arith.mulf %160, %164 : vector<2x16x16xf32>
    %166 = arith.truncf %165 : vector<2x16x16xf32> to vector<2x16x16xbf16>
    "tpu.trace_start"() <{level = 10 : i32, message = "bqk,bkd->bqd"}> : () -> ()
    %cst_81 = arith.constant dense<0.000000e+00> : vector<2x16x128xf32>
    %167 = tpu.matmul %166, %154, %cst_81 {dimension_numbers = #tpu.dot_dimension_numbers<[2], [1], [1], [2], [0, 0, 0, 1, 1, 2], [0], [0]>} : vector<2x16x16xbf16>, vector<2x16x128xbf16>, vector<2x16x128xf32> -> vector<2x16x128xf32>
    "tpu.trace_stop"() : () -> ()
    %168 = vector.shape_cast %167 : vector<2x16x128xf32> to vector<32x128xf32>
    %169 = arith.truncf %168 : vector<32x128xf32> to vector<32x128xbf16>
    %c0_82 = arith.constant 0 : index
    %c0_83 = arith.constant 0 : index
    %c0_84 = arith.constant 0 : index
    %170 = vector.load %arg24[%c0_82, %c0_83, %c0_84] : memref<1x128x128xbf16, #tpu.memory_space<vmem>>, vector<1x128x128xbf16>
    %171 = vector.shape_cast %170 : vector<1x128x128xbf16> to vector<128x128xbf16>
    %cst_85 = arith.constant dense<0.000000e+00> : vector<32x128xf32>
    %172 = tpu.matmul %169, %171, %cst_85 {dimension_numbers = #tpu.dot_dimension_numbers<[1], [0], [0], [1], [0, 0, 1, 1], [], []>} : vector<32x128xbf16>, vector<128x128xbf16>, vector<32x128xf32> -> vector<32x128xf32>
    %c0_86 = arith.constant 0 : index
    %c0_87 = arith.constant 0 : index
    %c0_88 = arith.constant 0 : index
    %173 = vector.load %arg25[%c0_86, %c0_87, %c0_88] : memref<1x1x128xf32, #tpu.memory_space<vmem>>, vector<1x1x128xf32>
    %174 = vector.shape_cast %173 : vector<1x1x128xf32> to vector<1x128xf32>
    %175 = vector.broadcast %174 : vector<1x128xf32> to vector<32x128xf32>
    %176 = arith.addf %172, %175 : vector<32x128xf32>
    %177 = arith.addf %135, %176 : vector<32x128xf32>
    %c0_89 = arith.constant 0 : index
    %c0_90 = arith.constant 0 : index
    %c0_91 = arith.constant 0 : index
    %178 = vector.load %arg26[%c0_89, %c0_90, %c0_91] : memref<1x1x128xf32, #tpu.memory_space<vmem>>, vector<1x1x128xf32>
    %179 = vector.shape_cast %178 : vector<1x1x128xf32> to vector<1x128xf32>
    %c0_92 = arith.constant 0 : index
    %c0_93 = arith.constant 0 : index
    %c0_94 = arith.constant 0 : index
    %180 = vector.load %arg27[%c0_92, %c0_93, %c0_94] : memref<1x1x128xf32, #tpu.memory_space<vmem>>, vector<1x1x128xf32>
    %181 = vector.shape_cast %180 : vector<1x1x128xf32> to vector<1x128xf32>
    %cst_95 = arith.constant dense<0.000000e+00> : vector<32xf32>
    %182 = vector.multi_reduction <add>, %177, %cst_95 [1] : vector<32x128xf32> to vector<32xf32>
    %183 = vector.shape_cast %182 : vector<32xf32> to vector<32x1xf32>
    %cst_96 = arith.constant 1.280000e+02 : f32
    %184 = vector.broadcast %cst_96 : f32 to vector<32x1xf32>
    %185 = arith.divf %183, %184 : vector<32x1xf32>
    %186 = vector.broadcast %185 : vector<32x1xf32> to vector<32x128xf32>
    %187 = arith.subf %177, %186 : vector<32x128xf32>
    %188 = arith.mulf %187, %187 : vector<32x128xf32>
    %cst_97 = arith.constant dense<0.000000e+00> : vector<32xf32>
    %189 = vector.multi_reduction <add>, %188, %cst_97 [1] : vector<32x128xf32> to vector<32xf32>
    %190 = vector.shape_cast %189 : vector<32xf32> to vector<32x1xf32>
    %cst_98 = arith.constant 1.280000e+02 : f32
    %191 = vector.broadcast %cst_98 : f32 to vector<32x1xf32>
    %192 = arith.divf %190, %191 : vector<32x1xf32>
    %193 = vector.broadcast %185 : vector<32x1xf32> to vector<32x128xf32>
    %194 = arith.subf %177, %193 : vector<32x128xf32>
    %cst_99 = arith.constant 9.99999974E-6 : f32
    %195 = vector.broadcast %cst_99 : f32 to vector<32x1xf32>
    %196 = arith.addf %192, %195 : vector<32x1xf32>
    %197 = math.rsqrt %196 : vector<32x1xf32>
    %198 = vector.broadcast %197 : vector<32x1xf32> to vector<32x128xf32>
    %199 = arith.mulf %194, %198 : vector<32x128xf32>
    %200 = vector.broadcast %179 : vector<1x128xf32> to vector<32x128xf32>
    %201 = arith.mulf %199, %200 : vector<32x128xf32>
    %202 = vector.broadcast %181 : vector<1x128xf32> to vector<32x128xf32>
    %203 = arith.addf %201, %202 : vector<32x128xf32>
    %204 = arith.truncf %203 : vector<32x128xf32> to vector<32x128xbf16>
    %c0_100 = arith.constant 0 : index
    %c0_101 = arith.constant 0 : index
    %c0_102 = arith.constant 0 : index
    %205 = vector.load %arg28[%c0_100, %c0_101, %c0_102] : memref<1x128x256xbf16, #tpu.memory_space<vmem>>, vector<1x128x256xbf16>
    %206 = vector.shape_cast %205 : vector<1x128x256xbf16> to vector<128x256xbf16>
    %cst_103 = arith.constant dense<0.000000e+00> : vector<32x256xf32>
    %207 = tpu.matmul %204, %206, %cst_103 {dimension_numbers = #tpu.dot_dimension_numbers<[1], [0], [0], [1], [0, 0, 1, 1], [], []>} : vector<32x128xbf16>, vector<128x256xbf16>, vector<32x256xf32> -> vector<32x256xf32>
    %c0_104 = arith.constant 0 : index
    %c0_105 = arith.constant 0 : index
    %c0_106 = arith.constant 0 : index
    %208 = vector.load %arg29[%c0_104, %c0_105, %c0_106] : memref<1x1x256xf32, #tpu.memory_space<vmem>>, vector<1x1x256xf32>
    %209 = vector.shape_cast %208 : vector<1x1x256xf32> to vector<1x256xf32>
    %210 = vector.broadcast %209 : vector<1x256xf32> to vector<32x256xf32>
    %211 = arith.addf %207, %210 : vector<32x256xf32>
    %212 = arith.mulf %211, %211 : vector<32x256xf32>
    %213 = arith.mulf %211, %212 : vector<32x256xf32>
    %cst_107 = arith.constant 4.471500e-02 : f32
    %214 = vector.broadcast %cst_107 : f32 to vector<32x256xf32>
    %215 = arith.mulf %214, %213 : vector<32x256xf32>
    %216 = arith.addf %211, %215 : vector<32x256xf32>
    %cst_108 = arith.constant 0.797884583 : f32
    %217 = vector.broadcast %cst_108 : f32 to vector<32x256xf32>
    %218 = arith.mulf %217, %216 : vector<32x256xf32>
    %219 = math.tanh %218 : vector<32x256xf32>
    %cst_109 = arith.constant 1.000000e+00 : f32
    %220 = vector.broadcast %cst_109 : f32 to vector<32x256xf32>
    %221 = arith.addf %220, %219 : vector<32x256xf32>
    %cst_110 = arith.constant 5.000000e-01 : f32
    %222 = vector.broadcast %cst_110 : f32 to vector<32x256xf32>
    %223 = arith.mulf %222, %221 : vector<32x256xf32>
    %224 = arith.mulf %211, %223 : vector<32x256xf32>
    %225 = arith.truncf %224 : vector<32x256xf32> to vector<32x256xbf16>
    %c0_111 = arith.constant 0 : index
    %c0_112 = arith.constant 0 : index
    %c0_113 = arith.constant 0 : index
    %226 = vector.load %arg30[%c0_111, %c0_112, %c0_113] : memref<1x256x128xbf16, #tpu.memory_space<vmem>>, vector<1x256x128xbf16>
    %227 = vector.shape_cast %226 : vector<1x256x128xbf16> to vector<256x128xbf16>
    %cst_114 = arith.constant dense<0.000000e+00> : vector<32x128xf32>
    %228 = tpu.matmul %225, %227, %cst_114 {dimension_numbers = #tpu.dot_dimension_numbers<[1], [0], [0], [1], [0, 0, 1, 1], [], []>} : vector<32x256xbf16>, vector<256x128xbf16>, vector<32x128xf32> -> vector<32x128xf32>
    %c0_115 = arith.constant 0 : index
    %c0_116 = arith.constant 0 : index
    %c0_117 = arith.constant 0 : index
    %229 = vector.load %arg31[%c0_115, %c0_116, %c0_117] : memref<1x1x128xf32, #tpu.memory_space<vmem>>, vector<1x1x128xf32>
    %230 = vector.shape_cast %229 : vector<1x1x128xf32> to vector<1x128xf32>
    %231 = vector.broadcast %230 : vector<1x128xf32> to vector<32x128xf32>
    %232 = arith.addf %228, %231 : vector<32x128xf32>
    %233 = arith.addf %203, %232 : vector<32x128xf32>
    %c0_118 = arith.constant 0 : index
    %c0_119 = arith.constant 0 : index
    %c0_120 = arith.constant 0 : index
    %234 = vector.load %arg32[%c0_118, %c0_119, %c0_120] : memref<1x1x128xf32, #tpu.memory_space<vmem>>, vector<1x1x128xf32>
    %235 = vector.shape_cast %234 : vector<1x1x128xf32> to vector<1x128xf32>
    %c0_121 = arith.constant 0 : index
    %c0_122 = arith.constant 0 : index
    %c0_123 = arith.constant 0 : index
    %236 = vector.load %arg33[%c0_121, %c0_122, %c0_123] : memref<1x1x128xf32, #tpu.memory_space<vmem>>, vector<1x1x128xf32>
    %237 = vector.shape_cast %236 : vector<1x1x128xf32> to vector<1x128xf32>
    %cst_124 = arith.constant dense<0.000000e+00> : vector<32xf32>
    %238 = vector.multi_reduction <add>, %233, %cst_124 [1] : vector<32x128xf32> to vector<32xf32>
    %239 = vector.shape_cast %238 : vector<32xf32> to vector<32x1xf32>
    %cst_125 = arith.constant 1.280000e+02 : f32
    %240 = vector.broadcast %cst_125 : f32 to vector<32x1xf32>
    %241 = arith.divf %239, %240 : vector<32x1xf32>
    %242 = vector.broadcast %241 : vector<32x1xf32> to vector<32x128xf32>
    %243 = arith.subf %233, %242 : vector<32x128xf32>
    %244 = arith.mulf %243, %243 : vector<32x128xf32>
    %cst_126 = arith.constant dense<0.000000e+00> : vector<32xf32>
    %245 = vector.multi_reduction <add>, %244, %cst_126 [1] : vector<32x128xf32> to vector<32xf32>
    %246 = vector.shape_cast %245 : vector<32xf32> to vector<32x1xf32>
    %cst_127 = arith.constant 1.280000e+02 : f32
    %247 = vector.broadcast %cst_127 : f32 to vector<32x1xf32>
    %248 = arith.divf %246, %247 : vector<32x1xf32>
    %249 = vector.broadcast %241 : vector<32x1xf32> to vector<32x128xf32>
    %250 = arith.subf %233, %249 : vector<32x128xf32>
    %cst_128 = arith.constant 9.99999974E-6 : f32
    %251 = vector.broadcast %cst_128 : f32 to vector<32x1xf32>
    %252 = arith.addf %248, %251 : vector<32x1xf32>
    %253 = math.rsqrt %252 : vector<32x1xf32>
    %254 = vector.broadcast %253 : vector<32x1xf32> to vector<32x128xf32>
    %255 = arith.mulf %250, %254 : vector<32x128xf32>
    %256 = vector.broadcast %235 : vector<1x128xf32> to vector<32x128xf32>
    %257 = arith.mulf %255, %256 : vector<32x128xf32>
    %258 = vector.broadcast %237 : vector<1x128xf32> to vector<32x128xf32>
    %259 = arith.addf %257, %258 : vector<32x128xf32>
    %260 = vector.shape_cast %259 : vector<32x128xf32> to vector<2x16x128xf32>
    %c0_129 = arith.constant 0 : index
    %c0_130 = arith.constant 0 : index
    %c0_131 = arith.constant 0 : index
    %261 = vector.load %arg54[%c0_129, %c0_130, %c0_131] : memref<2x16x128xf32, #tpu.memory_space<vmem>>, vector<2x16x128xf32>
    tpu.vector_store %arg54[%c0_129, %c0_130, %c0_131], %260 {strides = array<i32>} : memref<2x16x128xf32, #tpu.memory_space<vmem>>, vector<2x16x128xf32>,
    %262 = arith.index_cast %arg0 : i32 to index
    %263 = memref.load %arg1[%262] : memref<4xi32, #tpu.memory_space<smem>>
    %c1_i32 = arith.constant 1 : i32
    %264 = arith.cmpi eq, %263, %c1_i32 : i32
    %265 = arith.extui %264 : i1 to i32
    %c0_i32_132 = arith.constant 0 : i32
    %266 = arith.cmpi ne, %265, %c0_i32_132 : i32
    scf.if %266 {
      %c0_134 = arith.constant 0 : index
      %c0_135 = arith.constant 0 : index
      %c0_136 = arith.constant 0 : index
      %270 = vector.load %arg53[%c0_134, %c0_135, %c0_136] : memref<2x8x128xf32, #tpu.memory_space<vmem>>, vector<2x8x128xf32>
      %c0_137 = arith.constant 0 : index
      %c0_138 = arith.constant 0 : index
      %c0_139 = arith.constant 0 : index
      %271 = vector.load %arg54[%c0_137, %c0_138, %c0_139] : memref<2x16x128xf32, #tpu.memory_space<vmem>>, vector<2x16x128xf32>
      %cst_140 = arith.constant dense<0.000000e+00> : vector<2x128xf32>
      %272 = vector.multi_reduction <add>, %270, %cst_140 [1] : vector<2x8x128xf32> to vector<2x128xf32>
      %cst_141 = arith.constant 8.000000e+00 : f32
      %273 = vector.broadcast %cst_141 : f32 to vector<2x128xf32>
      %274 = arith.divf %272, %273 : vector<2x128xf32>
      %cst_142 = arith.constant dense<0.000000e+00> : vector<2x128xf32>
      %275 = vector.multi_reduction <add>, %271, %cst_142 [1] : vector<2x16x128xf32> to vector<2x128xf32>
      %cst_143 = arith.constant 1.600000e+01 : f32
      %276 = vector.broadcast %cst_143 : f32 to vector<2x128xf32>
      %277 = arith.divf %275, %276 : vector<2x128xf32>
      %278 = arith.truncf %274 : vector<2x128xf32> to vector<2x128xbf16>
      %c0_144 = arith.constant 0 : index
      %c0_145 = arith.constant 0 : index
      %c0_146 = arith.constant 0 : index
      %279 = vector.load %arg34[%c0_144, %c0_145, %c0_146] : memref<1x128x256xbf16, #tpu.memory_space<vmem>>, vector<1x128x256xbf16>
      %280 = vector.shape_cast %279 : vector<1x128x256xbf16> to vector<128x256xbf16>
      %cst_147 = arith.constant dense<0.000000e+00> : vector<2x256xf32>
      %281 = tpu.matmul %278, %280, %cst_147 {dimension_numbers = #tpu.dot_dimension_numbers<[1], [0], [0], [1], [0, 0, 1, 1], [], []>} : vector<2x128xbf16>, vector<128x256xbf16>, vector<2x256xf32> -> vector<2x256xf32>
      %c0_148 = arith.constant 0 : index
      %c0_149 = arith.constant 0 : index
      %c0_150 = arith.constant 0 : index
      %282 = vector.load %arg35[%c0_148, %c0_149, %c0_150] : memref<1x1x256xf32, #tpu.memory_space<vmem>>, vector<1x1x256xf32>
      %283 = vector.shape_cast %282 : vector<1x1x256xf32> to vector<1x256xf32>
      %284 = vector.broadcast %283 : vector<1x256xf32> to vector<2x256xf32>
      %285 = arith.addf %281, %284 : vector<2x256xf32>
      %286 = arith.truncf %277 : vector<2x128xf32> to vector<2x128xbf16>
      %c0_151 = arith.constant 0 : index
      %c0_152 = arith.constant 0 : index
      %c0_153 = arith.constant 0 : index
      %287 = vector.load %arg36[%c0_151, %c0_152, %c0_153] : memref<1x128x256xbf16, #tpu.memory_space<vmem>>, vector<1x128x256xbf16>
      %288 = vector.shape_cast %287 : vector<1x128x256xbf16> to vector<128x256xbf16>
      %cst_154 = arith.constant dense<0.000000e+00> : vector<2x256xf32>
      %289 = tpu.matmul %286, %288, %cst_154 {dimension_numbers = #tpu.dot_dimension_numbers<[1], [0], [0], [1], [0, 0, 1, 1], [], []>} : vector<2x128xbf16>, vector<128x256xbf16>, vector<2x256xf32> -> vector<2x256xf32>
      %c0_155 = arith.constant 0 : index
      %c0_156 = arith.constant 0 : index
      %c0_157 = arith.constant 0 : index
      %290 = vector.load %arg37[%c0_155, %c0_156, %c0_157] : memref<1x1x256xf32, #tpu.memory_space<vmem>>, vector<1x1x256xf32>
      %291 = vector.shape_cast %290 : vector<1x1x256xf32> to vector<1x256xf32>
      %292 = vector.broadcast %291 : vector<1x256xf32> to vector<2x256xf32>
      %293 = arith.addf %289, %292 : vector<2x256xf32>
      %294 = vector.extract_strided_slice %285 {offsets = [0, 0], sizes = [2, 128], strides = [1, 1]} : vector<2x256xf32> to vector<2x128xf32>
      %295 = vector.extract_strided_slice %285 {offsets = [0, 128], sizes = [2, 128], strides = [1, 1]} : vector<2x256xf32> to vector<2x128xf32>
      %296 = vector.extract_strided_slice %293 {offsets = [0, 0], sizes = [2, 128], strides = [1, 1]} : vector<2x256xf32> to vector<2x128xf32>
      %297 = vector.extract_strided_slice %293 {offsets = [0, 128], sizes = [2, 128], strides = [1, 1]} : vector<2x256xf32> to vector<2x128xf32>
      %c0_158 = arith.constant 0 : index
      %c0_159 = arith.constant 0 : index
      %298 = vector.load %arg38[%c0_158, %c0_159] : memref<1x128xf32, #tpu.memory_space<vmem>>, vector<1x128xf32>
      %c0_160 = arith.constant 0 : index
      %c0_161 = arith.constant 0 : index
      %299 = vector.load %arg39[%c0_160, %c0_161] : memref<1x128xf32, #tpu.memory_space<vmem>>, vector<1x128xf32>
      %cst_162 = arith.constant dense<0.000000e+00> : vector<2x8xf32>
      %300 = vector.multi_reduction <add>, %270, %cst_162 [2] : vector<2x8x128xf32> to vector<2x8xf32>
      %301 = vector.shape_cast %300 : vector<2x8xf32> to vector<2x8x1xf32>
      %cst_163 = arith.constant 1.280000e+02 : f32
      %302 = vector.broadcast %cst_163 : f32 to vector<2x8x1xf32>
      %303 = arith.divf %301, %302 : vector<2x8x1xf32>
      %304 = vector.broadcast %303 : vector<2x8x1xf32> to vector<2x8x128xf32>
      %305 = arith.subf %270, %304 : vector<2x8x128xf32>
      %306 = arith.mulf %305, %305 : vector<2x8x128xf32>
      %cst_164 = arith.constant dense<0.000000e+00> : vector<2x8xf32>
      %307 = vector.multi_reduction <add>, %306, %cst_164 [2] : vector<2x8x128xf32> to vector<2x8xf32>
      %308 = vector.shape_cast %307 : vector<2x8xf32> to vector<2x8x1xf32>
      %cst_165 = arith.constant 1.280000e+02 : f32
      %309 = vector.broadcast %cst_165 : f32 to vector<2x8x1xf32>
      %310 = arith.divf %308, %309 : vector<2x8x1xf32>
      %311 = vector.broadcast %303 : vector<2x8x1xf32> to vector<2x8x128xf32>
      %312 = arith.subf %270, %311 : vector<2x8x128xf32>
      %cst_166 = arith.constant 9.99999974E-6 : f32
      %313 = vector.broadcast %cst_166 : f32 to vector<2x8x1xf32>
      %314 = arith.addf %310, %313 : vector<2x8x1xf32>
      %315 = math.rsqrt %314 : vector<2x8x1xf32>
      %316 = vector.broadcast %315 : vector<2x8x1xf32> to vector<2x8x128xf32>
      %317 = arith.mulf %312, %316 : vector<2x8x128xf32>
      %318 = vector.shape_cast %298 : vector<1x128xf32> to vector<1x1x128xf32>
      %319 = vector.broadcast %318 : vector<1x1x128xf32> to vector<2x8x128xf32>
      %320 = arith.mulf %317, %319 : vector<2x8x128xf32>
      %321 = vector.shape_cast %299 : vector<1x128xf32> to vector<1x1x128xf32>
      %322 = vector.broadcast %321 : vector<1x1x128xf32> to vector<2x8x128xf32>
      %323 = arith.addf %320, %322 : vector<2x8x128xf32>
      %c0_167 = arith.constant 0 : index
      %c0_168 = arith.constant 0 : index
      %324 = vector.load %arg38[%c0_167, %c0_168] : memref<1x128xf32, #tpu.memory_space<vmem>>, vector<1x128xf32>
      %c0_169 = arith.constant 0 : index
      %c0_170 = arith.constant 0 : index
      %325 = vector.load %arg39[%c0_169, %c0_170] : memref<1x128xf32, #tpu.memory_space<vmem>>, vector<1x128xf32>
      %cst_171 = arith.constant dense<0.000000e+00> : vector<2x16xf32>
      %326 = vector.multi_reduction <add>, %271, %cst_171 [2] : vector<2x16x128xf32> to vector<2x16xf32>
      %327 = vector.shape_cast %326 : vector<2x16xf32> to vector<2x16x1xf32>
      %cst_172 = arith.constant 1.280000e+02 : f32
      %328 = vector.broadcast %cst_172 : f32 to vector<2x16x1xf32>
      %329 = arith.divf %327, %328 : vector<2x16x1xf32>
      %330 = vector.broadcast %329 : vector<2x16x1xf32> to vector<2x16x128xf32>
      %331 = arith.subf %271, %330 : vector<2x16x128xf32>
      %332 = arith.mulf %331, %331 : vector<2x16x128xf32>
      %cst_173 = arith.constant dense<0.000000e+00> : vector<2x16xf32>
      %333 = vector.multi_reduction <add>, %332, %cst_173 [2] : vector<2x16x128xf32> to vector<2x16xf32>
      %334 = vector.shape_cast %333 : vector<2x16xf32> to vector<2x16x1xf32>
      %cst_174 = arith.constant 1.280000e+02 : f32
      %335 = vector.broadcast %cst_174 : f32 to vector<2x16x1xf32>
      %336 = arith.divf %334, %335 : vector<2x16x1xf32>
      %337 = vector.broadcast %329 : vector<2x16x1xf32> to vector<2x16x128xf32>
      %338 = arith.subf %271, %337 : vector<2x16x128xf32>
      %cst_175 = arith.constant 9.99999974E-6 : f32
      %339 = vector.broadcast %cst_175 : f32 to vector<2x16x1xf32>
      %340 = arith.addf %336, %339 : vector<2x16x1xf32>
      %341 = math.rsqrt %340 : vector<2x16x1xf32>
      %342 = vector.broadcast %341 : vector<2x16x1xf32> to vector<2x16x128xf32>
      %343 = arith.mulf %338, %342 : vector<2x16x128xf32>
      %344 = vector.shape_cast %324 : vector<1x128xf32> to vector<1x1x128xf32>
      %345 = vector.broadcast %344 : vector<1x1x128xf32> to vector<2x16x128xf32>
      %346 = arith.mulf %343, %345 : vector<2x16x128xf32>
      %347 = vector.shape_cast %325 : vector<1x128xf32> to vector<1x1x128xf32>
      %348 = vector.broadcast %347 : vector<1x1x128xf32> to vector<2x16x128xf32>
      %349 = arith.addf %346, %348 : vector<2x16x128xf32>
      %350 = vector.shape_cast %296 : vector<2x128xf32> to vector<2x1x128xf32>
      %351 = vector.broadcast %350 : vector<2x1x128xf32> to vector<2x8x128xf32>
      %352 = arith.mulf %351, %323 : vector<2x8x128xf32>
      %353 = arith.addf %270, %352 : vector<2x8x128xf32>
      %354 = vector.shape_cast %297 : vector<2x128xf32> to vector<2x1x128xf32>
      %355 = vector.broadcast %354 : vector<2x1x128xf32> to vector<2x8x128xf32>
      %356 = arith.addf %353, %355 : vector<2x8x128xf32>
      %c0_176 = arith.constant 0 : index
      %c0_177 = arith.constant 0 : index
      %c0_178 = arith.constant 0 : index
      %357 = vector.load %arg53[%c0_176, %c0_177, %c0_178] : memref<2x8x128xf32, #tpu.memory_space<vmem>>, vector<2x8x128xf32>
      tpu.vector_store %arg53[%c0_176, %c0_177, %c0_178], %356 {strides = array<i32>} : memref<2x8x128xf32, #tpu.memory_space<vmem>>, vector<2x8x128xf32>,
      %358 = vector.shape_cast %294 : vector<2x128xf32> to vector<2x1x128xf32>
      %359 = vector.broadcast %358 : vector<2x1x128xf32> to vector<2x16x128xf32>
      %360 = arith.mulf %359, %349 : vector<2x16x128xf32>
      %361 = arith.addf %271, %360 : vector<2x16x128xf32>
      %362 = vector.shape_cast %295 : vector<2x128xf32> to vector<2x1x128xf32>
      %363 = vector.broadcast %362 : vector<2x1x128xf32> to vector<2x16x128xf32>
      %364 = arith.addf %361, %363 : vector<2x16x128xf32>
      %c0_179 = arith.constant 0 : index
      %c0_180 = arith.constant 0 : index
      %c0_181 = arith.constant 0 : index
      %365 = vector.load %arg54[%c0_179, %c0_180, %c0_181] : memref<2x16x128xf32, #tpu.memory_space<vmem>>, vector<2x16x128xf32>
      tpu.vector_store %arg54[%c0_179, %c0_180, %c0_181], %364 {strides = array<i32>} : memref<2x16x128xf32, #tpu.memory_space<vmem>>, vector<2x16x128xf32>,
    } else {
    }
    %c3_i32 = arith.constant 3 : i32
    %267 = arith.cmpi eq, %arg0, %c3_i32 : i32
    %268 = arith.extui %267 : i1 to i32
    %c0_i32_133 = arith.constant 0 : i32
    %269 = arith.cmpi ne, %268, %c0_i32_133 : i32
    scf.if %269 {
      %c0_134 = arith.constant 0 : index
      %c0_135 = arith.constant 0 : index
      %c0_136 = arith.constant 0 : index
      %270 = vector.load %arg53[%c0_134, %c0_135, %c0_136] : memref<2x8x128xf32, #tpu.memory_space<vmem>>, vector<2x8x128xf32>
      %271 = vector.extract_strided_slice %270 {offsets = [0, 0, 0], sizes = [2, 1, 128], strides = [1, 1, 1]} : vector<2x8x128xf32> to vector<2x1x128xf32>
      %272 = vector.shape_cast %271 : vector<2x1x128xf32> to vector<2x128xf32>
      %c0_137 = arith.constant 0 : index
      %c0_138 = arith.constant 0 : index
      %c0_139 = arith.constant 0 : index
      %273 = vector.load %arg54[%c0_137, %c0_138, %c0_139] : memref<2x16x128xf32, #tpu.memory_space<vmem>>, vector<2x16x128xf32>
      %cst_140 = arith.constant dense<0xFF800000> : vector<2x128xf32>
      %274 = vector.multi_reduction <maximumf>, %273, %cst_140 [1] : vector<2x16x128xf32> to vector<2x128xf32>
      %275 = arith.truncf %272 : vector<2x128xf32> to vector<2x128xbf16>
      %c0_141 = arith.constant 0 : index
      %c0_142 = arith.constant 0 : index
      %276 = vector.load %arg40[%c0_141, %c0_142] : memref<128x128xbf16, #tpu.memory_space<vmem>>, vector<128x128xbf16>
      %cst_143 = arith.constant dense<0.000000e+00> : vector<2x128xf32>
      %277 = tpu.matmul %275, %276, %cst_143 {dimension_numbers = #tpu.dot_dimension_numbers<[1], [0], [0], [1], [0, 0, 1, 1], [], []>} : vector<2x128xbf16>, vector<128x128xbf16>, vector<2x128xf32> -> vector<2x128xf32>
      %c0_144 = arith.constant 0 : index
      %c0_145 = arith.constant 0 : index
      %278 = vector.load %arg41[%c0_144, %c0_145] : memref<1x128xf32, #tpu.memory_space<vmem>>, vector<1x128xf32>
      %279 = vector.broadcast %278 : vector<1x128xf32> to vector<2x128xf32>
      %280 = arith.addf %277, %279 : vector<2x128xf32>
      %cst_146 = arith.constant 0.000000e+00 : f32
      %281 = vector.broadcast %cst_146 : f32 to vector<2x128xf32>
      %282 = arith.maximumf %280, %281 : vector<2x128xf32>
      %283 = arith.truncf %282 : vector<2x128xf32> to vector<2x128xbf16>
      %c0_147 = arith.constant 0 : index
      %c0_148 = arith.constant 0 : index
      %284 = vector.load %arg42[%c0_147, %c0_148] : memref<128x128xbf16, #tpu.memory_space<vmem>>, vector<128x128xbf16>
      %cst_149 = arith.constant dense<0.000000e+00> : vector<2x128xf32>
      %285 = tpu.matmul %283, %284, %cst_149 {dimension_numbers = #tpu.dot_dimension_numbers<[1], [0], [0], [1], [0, 0, 1, 1], [], []>} : vector<2x128xbf16>, vector<128x128xbf16>, vector<2x128xf32> -> vector<2x128xf32>
      %c0_150 = arith.constant 0 : index
      %c0_151 = arith.constant 0 : index
      %286 = vector.load %arg43[%c0_150, %c0_151] : memref<1x128xf32, #tpu.memory_space<vmem>>, vector<1x128xf32>
      %287 = vector.broadcast %286 : vector<1x128xf32> to vector<2x128xf32>
      %288 = arith.addf %285, %287 : vector<2x128xf32>
      %cst_152 = arith.constant 0.000000e+00 : f32
      %289 = vector.broadcast %cst_152 : f32 to vector<2x128xf32>
      %290 = arith.maximumf %288, %289 : vector<2x128xf32>
      %291 = arith.truncf %290 : vector<2x128xf32> to vector<2x128xbf16>
      %c0_153 = arith.constant 0 : index
      %c0_154 = arith.constant 0 : index
      %292 = vector.load %arg44[%c0_153, %c0_154] : memref<128x4xbf16, #tpu.memory_space<vmem>>, vector<128x4xbf16>
      %cst_155 = arith.constant dense<0.000000e+00> : vector<2x4xf32>
      %293 = tpu.matmul %291, %292, %cst_155 {dimension_numbers = #tpu.dot_dimension_numbers<[1], [0], [0], [1], [0, 0, 1, 1], [], []>} : vector<2x128xbf16>, vector<128x4xbf16>, vector<2x4xf32> -> vector<2x4xf32>
      %c0_156 = arith.constant 0 : index
      %c0_157 = arith.constant 0 : index
      %294 = vector.load %arg45[%c0_156, %c0_157] : memref<1x4xf32, #tpu.memory_space<vmem>>, vector<1x4xf32>
      %295 = vector.broadcast %294 : vector<1x4xf32> to vector<2x4xf32>
      %296 = arith.addf %293, %295 : vector<2x4xf32>
      %297 = arith.truncf %274 : vector<2x128xf32> to vector<2x128xbf16>
      %c0_158 = arith.constant 0 : index
      %c0_159 = arith.constant 0 : index
      %298 = vector.load %arg46[%c0_158, %c0_159] : memref<128x128xbf16, #tpu.memory_space<vmem>>, vector<128x128xbf16>
      %cst_160 = arith.constant dense<0.000000e+00> : vector<2x128xf32>
      %299 = tpu.matmul %297, %298, %cst_160 {dimension_numbers = #tpu.dot_dimension_numbers<[1], [0], [0], [1], [0, 0, 1, 1], [], []>} : vector<2x128xbf16>, vector<128x128xbf16>, vector<2x128xf32> -> vector<2x128xf32>
      %c0_161 = arith.constant 0 : index
      %c0_162 = arith.constant 0 : index
      %300 = vector.load %arg47[%c0_161, %c0_162] : memref<1x128xf32, #tpu.memory_space<vmem>>, vector<1x128xf32>
      %301 = vector.broadcast %300 : vector<1x128xf32> to vector<2x128xf32>
      %302 = arith.addf %299, %301 : vector<2x128xf32>
      %cst_163 = arith.constant 0.000000e+00 : f32
      %303 = vector.broadcast %cst_163 : f32 to vector<2x128xf32>
      %304 = arith.maximumf %302, %303 : vector<2x128xf32>
      %305 = arith.truncf %304 : vector<2x128xf32> to vector<2x128xbf16>
      %c0_164 = arith.constant 0 : index
      %c0_165 = arith.constant 0 : index
      %306 = vector.load %arg48[%c0_164, %c0_165] : memref<128x128xbf16, #tpu.memory_space<vmem>>, vector<128x128xbf16>
      %cst_166 = arith.constant dense<0.000000e+00> : vector<2x128xf32>
      %307 = tpu.matmul %305, %306, %cst_166 {dimension_numbers = #tpu.dot_dimension_numbers<[1], [0], [0], [1], [0, 0, 1, 1], [], []>} : vector<2x128xbf16>, vector<128x128xbf16>, vector<2x128xf32> -> vector<2x128xf32>
      %c0_167 = arith.constant 0 : index
      %c0_168 = arith.constant 0 : index
      %308 = vector.load %arg49[%c0_167, %c0_168] : memref<1x128xf32, #tpu.memory_space<vmem>>, vector<1x128xf32>
      %309 = vector.broadcast %308 : vector<1x128xf32> to vector<2x128xf32>
      %310 = arith.addf %307, %309 : vector<2x128xf32>
      %cst_169 = arith.constant 0.000000e+00 : f32
      %311 = vector.broadcast %cst_169 : f32 to vector<2x128xf32>
      %312 = arith.maximumf %310, %311 : vector<2x128xf32>
      %313 = arith.truncf %312 : vector<2x128xf32> to vector<2x128xbf16>
      %c0_170 = arith.constant 0 : index
      %c0_171 = arith.constant 0 : index
      %314 = vector.load %arg50[%c0_170, %c0_171] : memref<128x4xbf16, #tpu.memory_space<vmem>>, vector<128x4xbf16>
      %cst_172 = arith.constant dense<0.000000e+00> : vector<2x4xf32>
      %315 = tpu.matmul %313, %314, %cst_172 {dimension_numbers = #tpu.dot_dimension_numbers<[1], [0], [0], [1], [0, 0, 1, 1], [], []>} : vector<2x128xbf16>, vector<128x4xbf16>, vector<2x4xf32> -> vector<2x4xf32>
      %c0_173 = arith.constant 0 : index
      %c0_174 = arith.constant 0 : index
      %316 = vector.load %arg51[%c0_173, %c0_174] : memref<1x4xf32, #tpu.memory_space<vmem>>, vector<1x4xf32>
      %317 = vector.broadcast %316 : vector<1x4xf32> to vector<2x4xf32>
      %318 = arith.addf %315, %317 : vector<2x4xf32>
      %cst_175 = arith.constant 5.000000e-01 : f32
      %319 = vector.broadcast %cst_175 : f32 to vector<2x4xf32>
      %320 = arith.mulf %319, %296 : vector<2x4xf32>
      %cst_176 = arith.constant 5.000000e-01 : f32
      %321 = vector.broadcast %cst_176 : f32 to vector<2x4xf32>
      %322 = arith.mulf %321, %318 : vector<2x4xf32>
      %323 = arith.addf %320, %322 : vector<2x4xf32>
      %c0_177 = arith.constant 0 : index
      %c0_178 = arith.constant 0 : index
      %324 = vector.load %arg52[%c0_177, %c0_178] : memref<2x4xf32, #tpu.memory_space<vmem>>, vector<2x4xf32>
      tpu.vector_store %arg52[%c0_177, %c0_178], %323 {strides = array<i32>} : memref<2x4xf32, #tpu.memory_space<vmem>>, vector<2x4xf32>,
    } else {
    }
    return
  }
  func.func @transform_0(%arg0: i32, %arg1: memref<4xi32, #tpu.memory_space<smem>>, %arg2: memref<4xi32, #tpu.memory_space<smem>>) -> (i32, i32, i32) {
    %c0_i32 = arith.constant 0 : i32
    %c0_i32_0 = arith.constant 0 : i32
    %c0_i32_1 = arith.constant 0 : i32
    %c0_i32_2 = arith.constant 0 : i32
    return %c0_i32, %c0_i32_0, %c0_i32_1 : i32, i32, i32
  }
  func.func @transform_1(%arg0: i32, %arg1: memref<4xi32, #tpu.memory_space<smem>>, %arg2: memref<4xi32, #tpu.memory_space<smem>>) -> (i32, i32, i32) {
    %c0_i32 = arith.constant 0 : i32
    %c0_i32_0 = arith.constant 0 : i32
    %c0_i32_1 = arith.constant 0 : i32
    %c0_i32_2 = arith.constant 0 : i32
    return %c0_i32, %c0_i32_0, %c0_i32_1 : i32, i32, i32
  }
  func.func @transform_2(%arg0: i32, %arg1: memref<4xi32, #tpu.memory_space<smem>>, %arg2: memref<4xi32, #tpu.memory_space<smem>>) -> (i32, i32, i32) {
    %c0_i32 = arith.constant 0 : i32
    %c0_i32_0 = arith.constant 0 : i32
    %c0_i32_1 = arith.constant 0 : i32
    %c0_i32_2 = arith.constant 0 : i32
    return %c0_i32, %c0_i32_0, %c0_i32_1 : i32, i32, i32
  }
  func.func @transform_3(%arg0: i32, %arg1: memref<4xi32, #tpu.memory_space<smem>>, %arg2: memref<4xi32, #tpu.memory_space<smem>>) -> (i32, i32) {
    %c0_i32 = arith.constant 0 : i32
    %c0_i32_0 = arith.constant 0 : i32
    %c0_i32_1 = arith.constant 0 : i32
    return %c0_i32, %c0_i32_0 : i32, i32
  }
  func.func @transform_4(%arg0: i32, %arg1: memref<4xi32, #tpu.memory_space<smem>>, %arg2: memref<4xi32, #tpu.memory_space<smem>>) -> (i32, i32) {
    %c0_i32 = arith.constant 0 : i32
    %c0_i32_0 = arith.constant 0 : i32
    %c0_i32_1 = arith.constant 0 : i32
    return %c0_i32, %c0_i32_0 : i32, i32
  }
  func.func @transform_5(%arg0: i32, %arg1: memref<4xi32, #tpu.memory_space<smem>>, %arg2: memref<4xi32, #tpu.memory_space<smem>>) -> (i32, i32) {
    %c0_i32 = arith.constant 0 : i32
    %c0_i32_0 = arith.constant 0 : i32
    %c0_i32_1 = arith.constant 0 : i32
    return %c0_i32, %c0_i32_0 : i32, i32
  }
  func.func @transform_6(%arg0: i32, %arg1: memref<4xi32, #tpu.memory_space<smem>>, %arg2: memref<4xi32, #tpu.memory_space<smem>>) -> (i32, i32) {
    %c0_i32 = arith.constant 0 : i32
    %c0_i32_0 = arith.constant 0 : i32
    %c0_i32_1 = arith.constant 0 : i32
    return %c0_i32, %c0_i32_0 : i32, i32
  }
  func.func @transform_7(%arg0: i32, %arg1: memref<4xi32, #tpu.memory_space<smem>>, %arg2: memref<4xi32, #tpu.memory_space<smem>>) -> (i32, i32, i32) {
    %c0_i32 = arith.constant 0 : i32
    %c0_i32_0 = arith.constant 0 : i32
    %c0_i32_1 = arith.constant 0 : i32
    return %arg0, %c0_i32, %c0_i32_0 : i32, i32, i32
  }
  func.func @transform_8(%arg0: i32, %arg1: memref<4xi32, #tpu.memory_space<smem>>, %arg2: memref<4xi32, #tpu.memory_space<smem>>) -> (i32, i32, i32) {
    %c0_i32 = arith.constant 0 : i32
    %c0_i32_0 = arith.constant 0 : i32
    %c0_i32_1 = arith.constant 0 : i32
    return %arg0, %c0_i32, %c0_i32_0 : i32, i32, i32
  }
  func.func @transform_9(%arg0: i32, %arg1: memref<4xi32, #tpu.memory_space<smem>>, %arg2: memref<4xi32, #tpu.memory_space<smem>>) -> (i32, i32, i32) {
    %c0_i32 = arith.constant 0 : i32
    %c0_i32_0 = arith.constant 0 : i32
    %c0_i32_1 = arith.constant 0 : i32
    return %arg0, %c0_i32, %c0_i32_0 : i32, i32, i32
  }
  func.func @transform_10(%arg0: i32, %arg1: memref<4xi32, #tpu.memory_space<smem>>, %arg2: memref<4xi32, #tpu.memory_space<smem>>) -> (i32, i32, i32) {
    %c0_i32 = arith.constant 0 : i32
    %c0_i32_0 = arith.constant 0 : i32
    %c0_i32_1 = arith.constant 0 : i32
    return %arg0, %c0_i32, %c0_i32_0 : i32, i32, i32
  }
  func.func @transform_11(%arg0: i32, %arg1: memref<4xi32, #tpu.memory_space<smem>>, %arg2: memref<4xi32, #tpu.memory_space<smem>>) -> (i32, i32, i32) {
    %c0_i32 = arith.constant 0 : i32
    %c0_i32_0 = arith.constant 0 : i32
    %c0_i32_1 = arith.constant 0 : i32
    return %arg0, %c0_i32, %c0_i32_0 : i32, i32, i32
  }
  func.func @transform_12(%arg0: i32, %arg1: memref<4xi32, #tpu.memory_space<smem>>, %arg2: memref<4xi32, #tpu.memory_space<smem>>) -> (i32, i32, i32) {
    %c0_i32 = arith.constant 0 : i32
    %c0_i32_0 = arith.constant 0 : i32
    %c0_i32_1 = arith.constant 0 : i32
    return %arg0, %c0_i32, %c0_i32_0 : i32, i32, i32
  }
  func.func @transform_13(%arg0: i32, %arg1: memref<4xi32, #tpu.memory_space<smem>>, %arg2: memref<4xi32, #tpu.memory_space<smem>>) -> (i32, i32, i32) {
    %c0_i32 = arith.constant 0 : i32
    %c0_i32_0 = arith.constant 0 : i32
    %c0_i32_1 = arith.constant 0 : i32
    return %arg0, %c0_i32, %c0_i32_0 : i32, i32, i32
  }
  func.func @transform_14(%arg0: i32, %arg1: memref<4xi32, #tpu.memory_space<smem>>, %arg2: memref<4xi32, #tpu.memory_space<smem>>) -> (i32, i32, i32) {
    %c0_i32 = arith.constant 0 : i32
    %c0_i32_0 = arith.constant 0 : i32
    %c0_i32_1 = arith.constant 0 : i32
    return %arg0, %c0_i32, %c0_i32_0 : i32, i32, i32
  }
  func.func @transform_15(%arg0: i32, %arg1: memref<4xi32, #tpu.memory_space<smem>>, %arg2: memref<4xi32, #tpu.memory_space<smem>>) -> (i32, i32, i32) {
    %c0_i32 = arith.constant 0 : i32
    %c0_i32_0 = arith.constant 0 : i32
    %c0_i32_1 = arith.constant 0 : i32
    return %arg0, %c0_i32, %c0_i32_0 : i32, i32, i32
  }
  func.func @transform_16(%arg0: i32, %arg1: memref<4xi32, #tpu.memory_space<smem>>, %arg2: memref<4xi32, #tpu.memory_space<smem>>) -> (i32, i32, i32) {
    %c0_i32 = arith.constant 0 : i32
    %c0_i32_0 = arith.constant 0 : i32
    %c0_i32_1 = arith.constant 0 : i32
    return %arg0, %c0_i32, %c0_i32_0 : i32, i32, i32
  }
  func.func @transform_17(%arg0: i32, %arg1: memref<4xi32, #tpu.memory_space<smem>>, %arg2: memref<4xi32, #tpu.memory_space<smem>>) -> (i32, i32, i32) {
    %c0_i32 = arith.constant 0 : i32
    %c0_i32_0 = arith.constant 0 : i32
    %c0_i32_1 = arith.constant 0 : i32
    return %arg0, %c0_i32, %c0_i32_0 : i32, i32, i32
  }
  func.func @transform_18(%arg0: i32, %arg1: memref<4xi32, #tpu.memory_space<smem>>, %arg2: memref<4xi32, #tpu.memory_space<smem>>) -> (i32, i32, i32) {
    %c0_i32 = arith.constant 0 : i32
    %c0_i32_0 = arith.constant 0 : i32
    %c0_i32_1 = arith.constant 0 : i32
    return %arg0, %c0_i32, %c0_i32_0 : i32, i32, i32
  }
  func.func @transform_19(%arg0: i32, %arg1: memref<4xi32, #tpu.memory_space<smem>>, %arg2: memref<4xi32, #tpu.memory_space<smem>>) -> (i32, i32, i32) {
    %c0_i32 = arith.constant 0 : i32
    %c0_i32_0 = arith.constant 0 : i32
    %c0_i32_1 = arith.constant 0 : i32
    return %arg0, %c0_i32, %c0_i32_0 : i32, i32, i32
  }
  func.func @transform_20(%arg0: i32, %arg1: memref<4xi32, #tpu.memory_space<smem>>, %arg2: memref<4xi32, #tpu.memory_space<smem>>) -> (i32, i32, i32) {
    %c0_i32 = arith.constant 0 : i32
    %c0_i32_0 = arith.constant 0 : i32
    %c0_i32_1 = arith.constant 0 : i32
    return %arg0, %c0_i32, %c0_i32_0 : i32, i32, i32
  }
  func.func @transform_21(%arg0: i32, %arg1: memref<4xi32, #tpu.memory_space<smem>>, %arg2: memref<4xi32, #tpu.memory_space<smem>>) -> (i32, i32, i32) {
    %c0_i32 = arith.constant 0 : i32
    %c0_i32_0 = arith.constant 0 : i32
    %c0_i32_1 = arith.constant 0 : i32
    return %arg0, %c0_i32, %c0_i32_0 : i32, i32, i32
  }
  func.func @transform_22(%arg0: i32, %arg1: memref<4xi32, #tpu.memory_space<smem>>, %arg2: memref<4xi32, #tpu.memory_space<smem>>) -> (i32, i32, i32) {
    %c0_i32 = arith.constant 0 : i32
    %c0_i32_0 = arith.constant 0 : i32
    %c0_i32_1 = arith.constant 0 : i32
    return %arg0, %c0_i32, %c0_i32_0 : i32, i32, i32
  }
  func.func @transform_23(%arg0: i32, %arg1: memref<4xi32, #tpu.memory_space<smem>>, %arg2: memref<4xi32, #tpu.memory_space<smem>>) -> (i32, i32, i32) {
    %c0_i32 = arith.constant 0 : i32
    %c0_i32_0 = arith.constant 0 : i32
    %c0_i32_1 = arith.constant 0 : i32
    return %arg0, %c0_i32, %c0_i32_0 : i32, i32, i32
  }
  func.func @transform_24(%arg0: i32, %arg1: memref<4xi32, #tpu.memory_space<smem>>, %arg2: memref<4xi32, #tpu.memory_space<smem>>) -> (i32, i32, i32) {
    %c0_i32 = arith.constant 0 : i32
    %c0_i32_0 = arith.constant 0 : i32
    %c0_i32_1 = arith.constant 0 : i32
    return %arg0, %c0_i32, %c0_i32_0 : i32, i32, i32
  }
  func.func @transform_25(%arg0: i32, %arg1: memref<4xi32, #tpu.memory_space<smem>>, %arg2: memref<4xi32, #tpu.memory_space<smem>>) -> (i32, i32, i32) {
    %c0_i32 = arith.constant 0 : i32
    %c0_i32_0 = arith.constant 0 : i32
    %c0_i32_1 = arith.constant 0 : i32
    return %arg0, %c0_i32, %c0_i32_0 : i32, i32, i32
  }
  func.func @transform_26(%arg0: i32, %arg1: memref<4xi32, #tpu.memory_space<smem>>, %arg2: memref<4xi32, #tpu.memory_space<smem>>) -> (i32, i32, i32) {
    %c0_i32 = arith.constant 0 : i32
    %c0_i32_0 = arith.constant 0 : i32
    %c0_i32_1 = arith.constant 0 : i32
    return %arg0, %c0_i32, %c0_i32_0 : i32, i32, i32
  }
  func.func @transform_27(%arg0: i32, %arg1: memref<4xi32, #tpu.memory_space<smem>>, %arg2: memref<4xi32, #tpu.memory_space<smem>>) -> (i32, i32, i32) {
    %c0_i32 = arith.constant 0 : i32
    %c0_i32_0 = arith.constant 0 : i32
    %c0_i32_1 = arith.constant 0 : i32
    return %arg0, %c0_i32, %c0_i32_0 : i32, i32, i32
  }
  func.func @transform_28(%arg0: i32, %arg1: memref<4xi32, #tpu.memory_space<smem>>, %arg2: memref<4xi32, #tpu.memory_space<smem>>) -> (i32, i32, i32) {
    %c0_i32 = arith.constant 0 : i32
    %c0_i32_0 = arith.constant 0 : i32
    %c0_i32_1 = arith.constant 0 : i32
    return %arg0, %c0_i32, %c0_i32_0 : i32, i32, i32
  }
  func.func @transform_29(%arg0: i32, %arg1: memref<4xi32, #tpu.memory_space<smem>>, %arg2: memref<4xi32, #tpu.memory_space<smem>>) -> (i32, i32, i32) {
    %c0_i32 = arith.constant 0 : i32
    %c0_i32_0 = arith.constant 0 : i32
    %c0_i32_1 = arith.constant 0 : i32
    return %arg0, %c0_i32, %c0_i32_0 : i32, i32, i32
  }
  func.func @transform_30(%arg0: i32, %arg1: memref<4xi32, #tpu.memory_space<smem>>, %arg2: memref<4xi32, #tpu.memory_space<smem>>) -> (i32, i32, i32) {
    %c0_i32 = arith.constant 0 : i32
    %c0_i32_0 = arith.constant 0 : i32
    %c0_i32_1 = arith.constant 0 : i32
    return %arg0, %c0_i32, %c0_i32_0 : i32, i32, i32
  }
  func.func @transform_31(%arg0: i32, %arg1: memref<4xi32, #tpu.memory_space<smem>>, %arg2: memref<4xi32, #tpu.memory_space<smem>>) -> (i32, i32, i32) {
    %0 = arith.index_cast %arg0 : i32 to index
    %1 = memref.load %arg2[%0] : memref<4xi32, #tpu.memory_space<smem>>
    %c0_i32 = arith.constant 0 : i32
    %c0_i32_0 = arith.constant 0 : i32
    %c0_i32_1 = arith.constant 0 : i32
    return %1, %c0_i32, %c0_i32_0 : i32, i32, i32
  }
  func.func @transform_32(%arg0: i32, %arg1: memref<4xi32, #tpu.memory_space<smem>>, %arg2: memref<4xi32, #tpu.memory_space<smem>>) -> (i32, i32, i32) {
    %0 = arith.index_cast %arg0 : i32 to index
    %1 = memref.load %arg2[%0] : memref<4xi32, #tpu.memory_space<smem>>
    %c0_i32 = arith.constant 0 : i32
    %c0_i32_0 = arith.constant 0 : i32
    %c0_i32_1 = arith.constant 0 : i32
    return %1, %c0_i32, %c0_i32_0 : i32, i32, i32
  }
  func.func @transform_33(%arg0: i32, %arg1: memref<4xi32, #tpu.memory_space<smem>>, %arg2: memref<4xi32, #tpu.memory_space<smem>>) -> (i32, i32, i32) {
    %0 = arith.index_cast %arg0 : i32 to index
    %1 = memref.load %arg2[%0] : memref<4xi32, #tpu.memory_space<smem>>
    %c0_i32 = arith.constant 0 : i32
    %c0_i32_0 = arith.constant 0 : i32
    %c0_i32_1 = arith.constant 0 : i32
    return %1, %c0_i32, %c0_i32_0 : i32, i32, i32
  }
  func.func @transform_34(%arg0: i32, %arg1: memref<4xi32, #tpu.memory_space<smem>>, %arg2: memref<4xi32, #tpu.memory_space<smem>>) -> (i32, i32, i32) {
    %0 = arith.index_cast %arg0 : i32 to index
    %1 = memref.load %arg2[%0] : memref<4xi32, #tpu.memory_space<smem>>
    %c0_i32 = arith.constant 0 : i32
    %c0_i32_0 = arith.constant 0 : i32
    %c0_i32_1 = arith.constant 0 : i32
    return %1, %c0_i32, %c0_i32_0 : i32, i32, i32
  }
  func.func @transform_35(%arg0: i32, %arg1: memref<4xi32, #tpu.memory_space<smem>>, %arg2: memref<4xi32, #tpu.memory_space<smem>>) -> (i32, i32) {
    %c0_i32 = arith.constant 0 : i32
    %c0_i32_0 = arith.constant 0 : i32
    %c0_i32_1 = arith.constant 0 : i32
    return %c0_i32, %c0_i32_0 : i32, i32
  }
  func.func @transform_36(%arg0: i32, %arg1: memref<4xi32, #tpu.memory_space<smem>>, %arg2: memref<4xi32, #tpu.memory_space<smem>>) -> (i32, i32) {
    %c0_i32 = arith.constant 0 : i32
    %c0_i32_0 = arith.constant 0 : i32
    %c0_i32_1 = arith.constant 0 : i32
    return %c0_i32, %c0_i32_0 : i32, i32
  }
  func.func @transform_37(%arg0: i32, %arg1: memref<4xi32, #tpu.memory_space<smem>>, %arg2: memref<4xi32, #tpu.memory_space<smem>>) -> (i32, i32) {
    %c0_i32 = arith.constant 0 : i32
    %c0_i32_0 = arith.constant 0 : i32
    %c0_i32_1 = arith.constant 0 : i32
    return %c0_i32, %c0_i32_0 : i32, i32
  }
  func.func @transform_38(%arg0: i32, %arg1: memref<4xi32, #tpu.memory_space<smem>>, %arg2: memref<4xi32, #tpu.memory_space<smem>>) -> (i32, i32) {
    %c0_i32 = arith.constant 0 : i32
    %c0_i32_0 = arith.constant 0 : i32
    %c0_i32_1 = arith.constant 0 : i32
    return %c0_i32, %c0_i32_0 : i32, i32
  }
  func.func @transform_39(%arg0: i32, %arg1: memref<4xi32, #tpu.memory_space<smem>>, %arg2: memref<4xi32, #tpu.memory_space<smem>>) -> (i32, i32) {
    %c0_i32 = arith.constant 0 : i32
    %c0_i32_0 = arith.constant 0 : i32
    %c0_i32_1 = arith.constant 0 : i32
    return %c0_i32, %c0_i32_0 : i32, i32
  }
  func.func @transform_40(%arg0: i32, %arg1: memref<4xi32, #tpu.memory_space<smem>>, %arg2: memref<4xi32, #tpu.memory_space<smem>>) -> (i32, i32) {
    %c0_i32 = arith.constant 0 : i32
    %c0_i32_0 = arith.constant 0 : i32
    %c0_i32_1 = arith.constant 0 : i32
    return %c0_i32, %c0_i32_0 : i32, i32
  }
  func.func @transform_41(%arg0: i32, %arg1: memref<4xi32, #tpu.memory_space<smem>>, %arg2: memref<4xi32, #tpu.memory_space<smem>>) -> (i32, i32) {
    %c0_i32 = arith.constant 0 : i32
    %c0_i32_0 = arith.constant 0 : i32
    %c0_i32_1 = arith.constant 0 : i32
    return %c0_i32, %c0_i32_0 : i32, i32
  }
  func.func @transform_42(%arg0: i32, %arg1: memref<4xi32, #tpu.memory_space<smem>>, %arg2: memref<4xi32, #tpu.memory_space<smem>>) -> (i32, i32) {
    %c0_i32 = arith.constant 0 : i32
    %c0_i32_0 = arith.constant 0 : i32
    %c0_i32_1 = arith.constant 0 : i32
    return %c0_i32, %c0_i32_0 : i32, i32
  }
  func.func @transform_43(%arg0: i32, %arg1: memref<4xi32, #tpu.memory_space<smem>>, %arg2: memref<4xi32, #tpu.memory_space<smem>>) -> (i32, i32) {
    %c0_i32 = arith.constant 0 : i32
    %c0_i32_0 = arith.constant 0 : i32
    %c0_i32_1 = arith.constant 0 : i32
    return %c0_i32, %c0_i32_0 : i32, i32
  }
  func.func @transform_44(%arg0: i32, %arg1: memref<4xi32, #tpu.memory_space<smem>>, %arg2: memref<4xi32, #tpu.memory_space<smem>>) -> (i32, i32) {
    %c0_i32 = arith.constant 0 : i32
    %c0_i32_0 = arith.constant 0 : i32
    %c0_i32_1 = arith.constant 0 : i32
    return %c0_i32, %c0_i32_0 : i32, i32
  }
  func.func @transform_45(%arg0: i32, %arg1: memref<4xi32, #tpu.memory_space<smem>>, %arg2: memref<4xi32, #tpu.memory_space<smem>>) -> (i32, i32) {
    %c0_i32 = arith.constant 0 : i32
    %c0_i32_0 = arith.constant 0 : i32
    %c0_i32_1 = arith.constant 0 : i32
    return %c0_i32, %c0_i32_0 : i32, i32
  }
  func.func @transform_46(%arg0: i32, %arg1: memref<4xi32, #tpu.memory_space<smem>>, %arg2: memref<4xi32, #tpu.memory_space<smem>>) -> (i32, i32) {
    %c0_i32 = arith.constant 0 : i32
    %c0_i32_0 = arith.constant 0 : i32
    %c0_i32_1 = arith.constant 0 : i32
    return %c0_i32, %c0_i32_0 : i32, i32
  }
  func.func @transform_47(%arg0: i32, %arg1: memref<4xi32, #tpu.memory_space<smem>>, %arg2: memref<4xi32, #tpu.memory_space<smem>>) -> (i32, i32) {
    %c0_i32 = arith.constant 0 : i32
    %c0_i32_0 = arith.constant 0 : i32
    %c0_i32_1 = arith.constant 0 : i32
    return %c0_i32, %c0_i32_0 : i32, i32
  }
  func.func @transform_48(%arg0: i32, %arg1: memref<4xi32, #tpu.memory_space<smem>>, %arg2: memref<4xi32, #tpu.memory_space<smem>>) -> (i32, i32) {
    %c0_i32 = arith.constant 0 : i32
    %c0_i32_0 = arith.constant 0 : i32
    %c0_i32_1 = arith.constant 0 : i32
    return %c0_i32, %c0_i32_0 : i32, i32
  }
  func.func @transform_49(%arg0: i32, %arg1: memref<4xi32, #tpu.memory_space<smem>>, %arg2: memref<4xi32, #tpu.memory_space<smem>>) -> (i32, i32) {
    %c0_i32 = arith.constant 0 : i32
    %c0_i32_0 = arith.constant 0 : i32
    %c0_i32_1 = arith.constant 0 : i32
    return %c0_i32, %c0_i32_0 : i32, i32
  }
}

</mosaic_0001>

<bundles_post_ra>
// kernel: xnorm_forward.1
= control target key start
LH: loop header
LB: loop body
LE: loop exit
PB: predicated region body
PF: predicated region fallthrough
CT: control target
= control target key end

     0   :  { %s9851_s6 = smov 2   ;;  %s9852_s10 = smov 3   ;;  %s12081_s0 = inlined_call_operand.smem [shape: u32[52], index: -1, kind: input, shape index: {}] }
   0x1   :  { %s9966_s5 = sld [smem:[%s12081_s0]]   ;;  %s9853_s14 = smov 4  }
   0x2   :  { %s9971_s9 = sld [smem:[%s12081_s0 + %s9851_s6]]   ;;  %s9854_s18 = smov 5  }
   0x3   :  { %s9976_s13 = sld [smem:[%s12081_s0 + %s9852_s10]]   ;;  %s9855_s22 = smov 6  }
   0x4   :  { %s9981_s17 = sld [smem:[%s12081_s0 + %s9853_s14]]   ;;  %s9856_s26 = smov 7  }
   0x5   :  { %s9986_s21 = sld [smem:[%s12081_s0 + %s9854_s18]]   ;;  %s9857_s30 = smov 8  }
   0x6   :  { %s9991_s25 = sld [smem:[%s12081_s0 + %s9855_s22]]   ;;  %s9858_s4 = smov 9  }
   0x7   :  { %s9996_s29 = sld [smem:[%s12081_s0 + %s9856_s26]]   ;;  %s9859_s10 = smov 10  }
   0x8   :  { %12220 = sst [smem:[#allocation76_spill]] %s9971_s9  ;;  %s9860_s15 = smov 11  }
   0x9   :  { %12221 = sst [smem:[#allocation77_spill]] %s9976_s13  ;;  %s9861_s20 = smov 12  }
   0xa   :  { %12222 = sst [smem:[#allocation78_spill]] %s9981_s17  ;;  %s9862_s26 = smov 13  }
   0xb   :  { %12223 = sst [smem:[#allocation79_spill]] %s9986_s21  ;;  %s9863_s1 = smov 14  }
   0xc   :  { %12224 = sst [smem:[#allocation80_spill]] %s9991_s25  ;;  %s9864_s7 = smov 15  }
   0xd   :  { %12225 = sst [smem:[#allocation81_spill]] %s9996_s29  ;;  %s9866_s22 = smov 17  }
   0xe   :  { %s10001_s3 = sld [smem:[%s12081_s0 + %s9857_s30]]   ;;  %s9867_s28 = smov 18  }
   0xf   :  { %s10006_s8 = sld [smem:[%s12081_s0 + %s9858_s4]]   ;;  %s9896_s11 = smov 47  }
  0x10   :  { %s10011_s14 = sld [smem:[%s12081_s0 + %s9859_s10]]   ;;  %s9897_s18 = smov 48  }
  0x11   :  { %s10016_s19 = sld [smem:[%s12081_s0 + %s9860_s15]]   ;;  %s9865_s15 = smov 16  }
  0x12   :  { %s10021_s24 = sld [smem:[%s12081_s0 + %s9861_s20]]  }
  0x13   :  { %s10026_s30 = sld [smem:[%s12081_s0 + %s9862_s26]]  }
  0x14   :  { %12226 = sst [smem:[#allocation82_spill]] %s10001_s3 }
  0x15   :  { %12227 = sst [smem:[#allocation83_spill]] %s10006_s8 }
  0x16   :  { %12228 = sst [smem:[#allocation84_spill]] %s10011_s14 }
  0x17   :  { %12229 = sst [smem:[#allocation85_spill]] %s10016_s19 }
  0x18   :  { %12230 = sst [smem:[#allocation86_spill]] %s10021_s24 }
  0x19   :  { %12231 = sst [smem:[#allocation87_spill]] %s10026_s30  ;;  %s8547_s30 = scalar_lea.hbm %s9966_s5, 16 }
  0x1a   :  { %s10031_s6 = sld [smem:[%s12081_s0 + %s9863_s1]]   ;;  %s9895_s1 = smov 46  }
  0x1b   :  { %s10036_s12 = sld [smem:[%s12081_s0 + %s9864_s7]]   ;;  %s9868_s7 = smov 19  }
  0x1c   :  { %s10041_s20 = sld [smem:[%s12081_s0 + %s9865_s15]]   ;;  %s9869_s15 = smov 20  }
  0x1d   :  { %s10046_s27 = sld [smem:[%s12081_s0 + %s9866_s22]]   ;;  %s9870_s22 = smov 21  }
  0x1e   :  { %s10051_s4 = sld [smem:[%s12081_s0 + %s9867_s28]]   ;;  %s9871_s28 = smov 22  }
  0x1f   :  { %s10056_s13 = sld [smem:[%s12081_s0 + %s9868_s7]]   ;;  %s9872_s7 = smov 23  }
  0x20   :  { %12232 = sst [smem:[#allocation88_spill]] %s10031_s6  ;;  %p8548_p0 = scmp.ne.s32.totalorder %s9966_s5, %s8547_s30 }
  0x21   :  { %12233 = sst [smem:[#allocation89_spill]] %s10036_s12  ;;  %p8551_p1 = scmp.lt.u32.totalorder %s8547_s30, %s9966_s5 }
  0x22   :  { %12234 = sst [smem:[#allocation90_spill]] %s10041_s20 }
  0x23   :  { %12235 = sst [smem:[#allocation91_spill]] %s10046_s27  ;;  %p8553_p2 = pnand %p8551_p1, %p8548_p0 }
  0x24   :  { %12236 = sst [smem:[#allocation92_spill]] %s10051_s4 }
  0x25   :  { %12237 = sst [smem:[#allocation93_spill]] %s10056_s13 }
  0x26   :  { %s10061_s9 = sld [smem:[%s12081_s0 + %s9869_s15]]   ;;  %s9873_s15 = smov 24  }
  0x27   :  { %s10066_s17 = sld [smem:[%s12081_s0 + %s9870_s22]]   ;;  %s9874_s22 = smov 25  }
  0x28   :  { %s10071_s4 = sld [smem:[%s12081_s0 + %s9871_s28]]   ;;  %s9875_s28 = smov 26  }
  0x29   :  { %s10076_s13 = sld [smem:[%s12081_s0 + %s9872_s7]]   ;;  %s9876_s7 = smov 27  }
  0x2a   :  { %s10086_s20 = sld [smem:[%s12081_s0 + %s9874_s22]]   ;;  %s9878_s22 = smov 29  }
  0x2b   :  { %s10091_s12 = sld [smem:[%s12081_s0 + %s9875_s28]]   ;;  %s9879_s28 = smov 30  }
  0x2c   :  { %12238 = sst [smem:[#allocation94_spill]] %s10061_s9 }
  0x2d   :  { %12239 = sst [smem:[#allocation95_spill]] %s10066_s17 }
  0x2e   :  { %12240 = sst [smem:[#allocation96_spill]] %s10071_s4 }
  0x2f   :  { %12241 = sst [smem:[#allocation97_spill]] %s10076_s13 }
  0x30   :  { %s10081_s9 = sld [smem:[%s12081_s0 + %s9873_s15]]   ;;  %s9877_s15 = smov 28  }
  0x31   :  { %12243 = sst [smem:[#allocation99_spill]] %s10086_s20 }
  0x32   :  { %12244 = sst [smem:[#allocation100_spill]] %s10091_s12 }
  0x33   :  { %s10096_s13 = sld [smem:[%s12081_s0 + %s9876_s7]]   ;;  %s9880_s7 = smov 31  }
  0x34   :  { %s10106_s20 = sld [smem:[%s12081_s0 + %s9878_s22]]   ;;  %s9882_s22 = smov 33  }
  0x35   :  { %s10111_s12 = sld [smem:[%s12081_s0 + %s9879_s28]]   ;;  %s9883_s28 = smov 34  }
  0x36   :  { %12242 = sst [smem:[#allocation98_spill]] %s10081_s9 }
  0x37   :  { %s10101_s9 = sld [smem:[%s12081_s0 + %s9877_s15]]   ;;  %s9881_s15 = smov 32  }
  0x38   :  { %s10201_s27 = sld [smem:[%s12081_s0 + %s9897_s18]]  }
  0x39   :  { %12245 = sst [smem:[#allocation101_spill]] %s10096_s13 }
  0x3a   :  { %12247 = sst [smem:[#allocation103_spill]] %s10106_s20 }
  0x3b   :  { %12248 = sst [smem:[#allocation104_spill]] %s10111_s12 }
  0x3c   :  { %s10116_s13 = sld [smem:[%s12081_s0 + %s9880_s7]]   ;;  %s9884_s7 = smov 35  }
  0x3d   :  { %12246 = sst [smem:[#allocation102_spill]] %s10101_s9 }
  0x3e   :  { %s10121_s9 = sld [smem:[%s12081_s0 + %s9881_s15]]   ;;  %s9885_s15 = smov 36  }
  0x3f   :  { %s10126_s20 = sld [smem:[%s12081_s0 + %s9882_s22]]   ;;  %s9886_s22 = smov 37  }
  0x40   :  { %s10131_s12 = sld [smem:[%s12081_s0 + %s9883_s28]]   ;;  %s9887_s28 = smov 38  }
  0x41   :  { %12266 = sst [smem:[#allocation122_spill]] %s10201_s27 }
  0x42   :  { %12249 = sst [smem:[#allocation105_spill]] %s10116_s13 }
  0x43   :  { %s10136_s13 = sld [smem:[%s12081_s0 + %s9884_s7]]   ;;  %s9888_s7 = smov 39  }
  0x44   :  { %12250 = sst [smem:[#allocation106_spill]] %s10121_s9 }
  0x45   :  { %12251 = sst [smem:[#allocation107_spill]] %s10126_s20 }
  0x46   :  { %12252 = sst [smem:[#allocation108_spill]] %s10131_s12 }
  0x47   :  { %s10141_s9 = sld [smem:[%s12081_s0 + %s9885_s15]]   ;;  %s9889_s15 = smov 40  }
  0x48   :  { %s10146_s20 = sld [smem:[%s12081_s0 + %s9886_s22]]   ;;  %s9890_s22 = smov 41  }
  0x49   :  { %12253 = sst [smem:[#allocation109_spill]] %s10136_s13 }
  0x4a   :  { %s10151_s12 = sld [smem:[%s12081_s0 + %s9887_s28]]   ;;  %s9891_s28 = smov 42  }
  0x4b   :  { %s10156_s13 = sld [smem:[%s12081_s0 + %s9888_s7]]   ;;  %s9892_s7 = smov 43  }
  0x4c   :  { %s10166_s4 = sld [smem:[%s12081_s0 + %s9890_s22]]   ;;  %s9894_s22 = smov 45  }
  0x4d   :  { %12254 = sst [smem:[#allocation110_spill]] %s10141_s9 }
  0x4e   :  { %12255 = sst [smem:[#allocation111_spill]] %s10146_s20 }
  0x4f   :  { %s10161_s9 = sld [smem:[%s12081_s0 + %s9889_s15]]   ;;  %s9893_s15 = smov 44  }
  0x50   :  { %12256 = sst [smem:[#allocation112_spill]] %s10151_s12 }
  0x51   :  { %12257 = sst [smem:[#allocation113_spill]] %s10156_s13 }
  0x52   :  { %12259 = sst [smem:[#allocation115_spill]] %s10166_s4 }
  0x53   :  { %s10171_s17 = sld [smem:[%s12081_s0 + %s9891_s28]]  }
  0x54   :  { %s10176_s13 = sld [smem:[%s12081_s0 + %s9892_s7]]  }
  0x55   :  { %12258 = sst [smem:[#allocation114_spill]] %s10161_s9 }
  0x56   :  { %s10181_s23 = sld [smem:[%s12081_s0 + %s9893_s15]]  }
  0x57   :  { %s10186_s28 = sld [smem:[%s12081_s0 + %s9894_s22]]   ;;  %s9898_s22 = smov 49  }
  0x58   :  { %s10191_s7 = sld [smem:[%s12081_s0 + %s9895_s1]]   ;;  %s9899_s1 = smov 50  }
  0x59   :  { %12260 = sst [smem:[#allocation116_spill]] %s10171_s17 }
  0x5a   :  { %12261 = sst [smem:[#allocation117_spill]] %s10176_s13  ;;  %s9900_s13 = smov 51  }
  0x5b   :  { %s10196_s15 = sld [smem:[%s12081_s0 + %s9896_s11]]  }
  0x5c   :  { %12262 = sst [smem:[#allocation118_spill]] %s10181_s23 }
  0x5d   :  { %12263 = sst [smem:[#allocation119_spill]] %s10186_s28 }
  0x5e   :  { %12264 = sst [smem:[#allocation120_spill]] %s10191_s7 }
  0x5f   :  { %s10206_s19 = sld [smem:[%s12081_s0 + %s9898_s22]]  }
  0x60   :  { %s10211_s14 = sld [smem:[%s12081_s0 + %s9899_s1]]  }
  0x61   :  { %12265 = sst [smem:[#allocation121_spill]] %s10196_s15 }
  0x62   :  { %s10216_s8 = sld [smem:[%s12081_s0 + %s9900_s13]]  }
  0x65   :  { %12267 = sst [smem:[#allocation123_spill]] %s10206_s19 }
  0x66   :  { %12268 = sst [smem:[#allocation124_spill]] %s10211_s14 }
  0x68   :  { %12269 = sst [smem:[#allocation125_spill]] %s10216_s8 }
  0x69   :  { %8556 = shalt.err (!%p8553_p2)  }
  0x6a   :  { %s9901_s24 = smov [#allocation5]   ;;  %s9902_s6 = smov 1  }
  0x6b   :  { %109 = dma.hbm_to_smem %s9966_s5, 16, %s9901_s24, [#allocation4] }
  0x6c   :  { %s6951_s26 = sld [smem:[%s12081_s0 + %s9902_s6]]  }
  0x72   :  { %s8557_s1 = scalar_lea.hbm %s6951_s26, 16 }
  0x73   :  { %p8558_p3 = scmp.ne.s32.totalorder %s6951_s26, %s8557_s1  ;;  %p8561_p4 = scmp.lt.u32.totalorder %s8557_s1, %s6951_s26 }
  0x75   :  { %p8563_p5 = pnand %p8561_p4, %p8558_p3 }
  0x77   :  { %8566 = shalt.err (!%p8563_p5)  }
  0x78   :  { %s9903_s2 = smov [#allocation6]  }
  0x79   :  { %111 = dma.hbm_to_smem %s6951_s26, 16, %s9903_s2, [#allocation4] }
  0x7a   :  { %9721 = dma.done.wait [#allocation4], 32 }
  0x7b   :  { %9722 = vsyncadd [#allocation4], 4294967264 }
  0x7c   :  { %113 = sfence }
  0x7d   :  { %114 = vsyncpa [#allocation8], 0 }
  0x7e   :  { %115 = vsyncpa [#allocation11], 0 }
  0x7f   :  { %116 = vsyncpa [#allocation14], 0 }
  0x80   :  { %117 = vsyncpa [#allocation41], 0 }
  0x81   :  { %118 = vsyncpa [#allocation44], 0 }
  0x82   :  { %119 = vsyncpa [#allocation47], 0 }
  0x83   :  { %120 = vsyncpa [#allocation50], 0 }
  0x84   :  { %121 = vsyncpa [#allocation53], 0 }
  0x85   :  { %122 = vsyncpa [#allocation9], 0  ;;  %s10225_s0 = smov 0   ;;  %s10227_s5 = smov 0  }
  0x86   :  { %s10229_s10 = smov 0   ;;  %s10231_s13 = smov 0  }
  0x87   :  { %s10233_s11 = smov 0   ;;  %s10235_s16 = smov 0  }
  0x88   :  { %s10237_s30 = smov 0   ;;  %s10239_s24 = smov 0  }
  0x89   :  { %s10241_s6 = smov 0   ;;  %s10243_s18 = smov 0  }
  0x8a   :  { %s10245_s22 = smov 0   ;;  %s10247_s26 = smov 0  }
  0x8b   :  { %s10249_s1 = smov 0   ;;  %s10251_s2 = smov 0  }
  0x8c   :  { %s10253_s8 = smov 0   ;;  %s10255_s19 = smov 0  }
  0x8d LB: > { %s12270_s29 = sld [smem:[#allocation81_spill]]  ;;  %s12271_s28 = sld [smem:[#allocation119_spill]]  ;;  %s9813_s30 = sphi %s10237_s30, %s12468_s30   ;;  %s9809_s16 = sphi %s10235_s16, %s12467_s16   ;;  %s9805_s11 = sphi %s10233_s11, %s12466_s11   ;;  %s9801_s13 = sphi %s10231_s13, %s12465_s13   ;;  %s9797_s10 = sphi %s10229_s10, %s12479_s10   ;;  %s9793_s5 = sphi %s10227_s5, %s12478_s5   ;;  %s9789_s0 = sphi %s10225_s0, %s12463_s0   ;;  %s9849_s19 = sphi %s10255_s19, %s12462_s19   ;;  %s9845_s8 = sphi %s10253_s8, %s12476_s8   ;;  %s9841_s2 = sphi %s10251_s2, %s12475_s2   ;;  %s9837_s1 = sphi %s10249_s1, %s12474_s1   ;;  %s9833_s26 = sphi %s10247_s26, %s12473_s26   ;;  %s9829_s22 = sphi %s10245_s22, %s12472_s22   ;;  %s9825_s18 = sphi %s10243_s18, %s12471_s18   ;;  %s9821_s6 = sphi %s10241_s6, %s12470_s6   ;;  %s9817_s24 = sphi %s10239_s24, %s12469_s24  }
  0x8e   : > { %s12272_s17 = sld [smem:[#allocation116_spill]]  ;;  %s12273_s15 = sld [smem:[#allocation121_spill]] }
  0x8f   : > { %s12274_s9 = sld [smem:[#allocation114_spill]]  ;;  %s12276_s25 = sld [smem:[#allocation80_spill]] }
  0x90   : > { %s12275_s3 = sld [smem:[#allocation82_spill]]  ;;  %12277 = sst [smem:[#allocation126_spill]] %s9793_s5 }
  0x91   : > { %12278 = sst [smem:[#allocation127_spill]] %s9805_s11  ;;  %s10302_s14 = sadd.s32 4294967295, %s9849_s19  }
  0x92   : > { %12279 = sst [smem:[#allocation128_spill]] %s9809_s16  ;;  %s10305_s27 = sadd.s32 1, %s9849_s19  }
  0x93   : > { %12280 = sst [smem:[#allocation129_spill]] %s9817_s24  ;;  %s279_s7 = ssub.s32 %s9849_s19, %s10305_s27 }
  0x94   : > { %12281 = sst [smem:[#allocation130_spill]] %s9821_s6  ;;  %s282_s23 = sadd.s32 1, %s9845_s8 }
  0x95   : > { %12282 = sst [smem:[#allocation131_spill]] %s9829_s22  ;;  %p280_p6 = scmp.eq.s32.totalorder %s279_s7, 0 }
  0x96   : > { %12283 = sst [smem:[#allocation132_spill]] %s9833_s26  ;;  %p289_p7 = scmp.ne.s32.totalorder %s9845_s8, %s9841_s2 }
  0x97   : > { %12284 = sst [smem:[#allocation133_spill]] %s9841_s2  ;;  %p290_p8 = scmp.eq.s32.totalorder %s9849_s19, 0 }
  0x98   : > { %12285 = sst [smem:[#allocation134_spill]] %s9845_s8  ;;  %p295_p9 = scmp.ne.s32.totalorder %s9841_s2, %s9837_s1 }
  0x99   : > { %12286 = sst [smem:[#allocation135_spill]] %s10302_s14  ;;  %p10319_p10 = por %p290_p8, %p289_p7 }
  0x9a   : > { %12287 = sst [smem:[#allocation136_spill]] %s10305_s27  ;;  %p12139_p11 = scmp.eq.s32.totalorder %s10302_s14, 0 }
  0x9b   : > { %s10315_s4 = scalar_select %p280_p6, %s9845_s8, %s282_s23  }
  0x9c   : > { %s12289_s12 = scalar_select %p10319_p10, 1, 0 }
  0x9d   : > { %12288 = sst [smem:[#allocation137_spill]] %s10315_s4  ;;  %p10328_p12 = por %p12139_p11, %p295_p9 }
  0x9e   : > { %12290 = sst [smem:[#allocation138_spill]] %s12289_s12  ;;  %s908_s23 = sadd.s32 1, %s9833_s26 }
  0x9f   : > { %s903_s20 = sld [smem:[#allocation6 + %s9849_s19]]  ;;  %p915_p13 = scmp.ne.s32.totalorder %s9833_s26, %s9829_s22 }
  0xa0   : > { %s904_s7 = sld [smem:[#allocation6 + %s10305_s27]]  ;;  %p921_p0 = scmp.ne.s32.totalorder %s9829_s22, %s9825_s18 }
  0xa1   : > { %s12291_s21 = scalar_select %p10328_p12, 1, 0 }
  0xa2   : > { %s931_s1 = sld [smem:[#allocation6 + %s9849_s19]]  ;;  %p10340_p1 = por %p915_p13, %p290_p8 }
  0xa3   : > { %12292 = sst [smem:[#allocation139_spill]] %s12291_s21  ;;  %p10346_p2 = por %p921_p0, %p12139_p11 }
  0xa4   : > { %s932_s4 = sld [smem:[#allocation6 + %s10305_s27]]  ;;  %s936_s12 = sadd.s32 1, %s9821_s6 }
  0xa5   : > { %s12293_s2 = scalar_select %p10340_p1, 1, 0 }
  0xa6   : > { %s12295_s21 = scalar_select %p10346_p2, 1, 0 }
  0xa7   : > { %12294 = sst [smem:[#allocation140_spill]] %s12293_s2  ;;  %p943_p3 = scmp.ne.s32.totalorder %s9821_s6, %s9817_s24 }
  0xa8   : > { %12296 = sst [smem:[#allocation141_spill]] %s12295_s21  ;;  %s905_s18 = ssub.s32 %s903_s20, %s904_s7 }
  0xa9   : > { %p949_p4 = scmp.ne.s32.totalorder %s9817_s24, %s9813_s30  ;;  %p906_p5 = scmp.eq.s32.totalorder %s905_s18, 0 }
  0xaa   : > { %p10357_p6 = por %p943_p3, %p290_p8  ;;  %s959_s21 = sld [smem:[#allocation6 + %s9849_s19]] }
  0xab   : > { %p10363_p7 = por %p949_p4, %p12139_p11  ;;  %s933_s20 = ssub.s32 %s931_s1, %s932_s4 }
  0xac   : > { %s12297_s22 = scalar_select %p10357_p6, 1, 0 }
  0xad   : > { %s12298_s2 = scalar_select %p10363_p7, 1, 0 }
  0xae   : > { %s10369_s8 = scalar_select %p906_p5, %s9833_s26, %s908_s23  }
  0xaf   : > { %12299 = sst [smem:[#allocation142_spill]] %s12298_s2  ;;  %p934_p9 = scmp.eq.s32.totalorder %s933_s20, 0 }
  0xb0   : > { %12300 = sst [smem:[#allocation143_spill]] %s10369_s8  ;;  %s964_s7 = sadd.s32 1, %s9809_s16 }
  0xb1   : > { %s960_s30 = sld [smem:[#allocation6 + %s10305_s27]]  ;;  %p971_p13 = scmp.ne.s32.totalorder %s9809_s16, %s9805_s11 }
  0xb2   : > { %p977_p0 = scmp.ne.s32.totalorder %s9805_s11, %s9801_s13  ;;  %s987_s23 = sld [smem:[#allocation6 + %s9849_s19]] }
  0xb3   : > { %s10378_s18 = scalar_select %p934_p9, %s9821_s6, %s936_s12  }
  0xb4   : > { %p10382_p3 = por %p971_p13, %p290_p8  ;;  %p10388_p4 = por %p977_p0, %p12139_p11 }
  0xb5   : > { %12301 = sst [smem:[#allocation144_spill]] %s10378_s18  ;;  %s992_s8 = sadd.s32 1, %s9797_s10 }
  0xb6   : > { %s12302_s2 = scalar_select %p10382_p3, 1, 0 }
  0xb7   : > { %s12303_s4 = scalar_select %p10388_p4, 1, 0 }
  0xb8   : > { %s988_s1 = sld [smem:[#allocation6 + %s10305_s27]]  ;;  %s961_s20 = ssub.s32 %s959_s21, %s960_s30 }
  0xb9   : > { %12304 = sst [smem:[#allocation145_spill]] %s12303_s4  ;;  %p962_p5 = scmp.eq.s32.totalorder %s961_s20, 0 }
  0xba   : > { %p999_p7 = scmp.ne.s32.totalorder %s9797_s10, %s9793_s5  ;;  %p1005_p9 = scmp.ne.s32.totalorder %s9793_s5, %s9789_s0 }
  0xbb   : > { %p7003_p2 = scmp.ge.s32.totalorder %s9849_s19, 1  ;;  %p1331_p4 = scmp.lt.s32.totalorder %s9849_s19, 5 }
  0xbc   : > { %s10401_s12 = scalar_select %p962_p5, %s9809_s16, %s964_s7  }
  0xbd   : > { %p10405_p13 = por %p999_p7, %p290_p8  ;;  %p10411_p0 = por %p1005_p9, %p12139_p11 }
  0xbe   : > { %12305 = sst [smem:[#allocation146_spill]] %s10401_s12  ;;  %s989_s21 = ssub.s32 %s987_s23, %s988_s1 }
  0xbf   : > { %s12306_s13 = scalar_select %p10405_p13, 1, 0 }
  0xc0   : > { %s12308_s18 = scalar_select %p10411_p0, 1, 0 }
  0xc1   : > { %12307 = sst [smem:[#allocation147_spill]] %s12306_s13  ;;  %p990_p12 = scmp.eq.s32.totalorder %s989_s21, 0 }
  0xc2   : > { %12309 = sst [smem:[#allocation148_spill]] %s12308_s18  ;;  %p10417_p6 = pnand %p7003_p2, %p1331_p4 }
  0xc3   : > { %s10422_s30 = scalar_select %p990_p12, %s9797_s10, %s992_s8  }
  0xc4   : > { %s12310_s0 = scalar_select %p10417_p6, 1, 0 }
  0xc5   : > { %12312 = sst [smem:[#allocation150_spill]] %s10422_s30  ;;  %p7905_p8 = pneg %p10417_p6 }
  0xc6   : > { %12311 = sst [smem:[#allocation149_spill]] %s12310_s0  ;;  %s9904_s7 = smov [#allocation10]  }
  0xc7   : > { %s1364_s20 = sshll.u32 %s9904_s7, 4  ;;  %p10428_p7 = pnand %p7905_p8, %p12139_p11  ;;  %s1365_s20 = int_to_ptr.vmem [resolvable:$true] %s1364_s20 }
  0xc8   : > { %s9905_s23 = smov [#allocation12]   ;;  %s8567_s21 = scalar_lea.hbm %s12276_s25, 16 }
  0xc9   : > { %s1374_s1 = sshll.u32 %s9905_s23, 4  ;;  %p8568_p2 = scmp.ne.s32.totalorder %s12276_s25, %s8567_s21  ;;  %s10432_s1 = int_to_ptr.vmem [resolvable:$true] %s1374_s1 }
  0xca   : > { %p10438_p12 = pneg %p10428_p7  ;;  %p8574_p9 = scmp.lt.u32.totalorder %s8567_s21, %s12276_s25 }
  0xcc   : > { %p8570_p4 = pnand %p10438_p12, %p8568_p2 }
  0xce   : > { %p8571_p5 = pneg %p8570_p4 }
  0xd0   : > { %p8576_p8 = pnand %p8574_p9, %p8571_p5 }
  0xd2   : > { %8579 = shalt.err (!%p8576_p8)
}
  0xd3   : > { %s8580_s7 = scalar_lea.vmem %s1365_s20, 16  ;;  %s8587_s23 = scalar_lea.vmem %s1365_s20, 32 }
  0xd4   : > { %p8581_p3 = scmp.ne.s32.totalorder %s1365_s20, %s8580_s7  ;;  %p8588_p6 = scmp.lt.s32.totalorder %s1365_s20, %s1365_s20 }
  0xd5   : > { %p8589_p13 = scmp.lt.s32.totalorder %s8587_s23, %s8580_s7 }
  0xd6   : > { %p8583_p11 = pnand %p8581_p3, %p10438_p12 }
  0xd7   : > { %p8590_p1 = por %p8589_p13, %p8588_p6 }
  0xd8   : > { %p8584_p0 = pneg %p8583_p11 }
  0xda   : > { %p8591_p10 = pnand %p8590_p1, %p8584_p0 }
  0xdc   : > { %8594 = shalt.err (!%p8591_p10)
}
  0xdd   : > { %7911 = dma.hbm_to_vmem [thread:$0]  (!%p10428_p7), %s12276_s25, 16, %s1365_s20, [#allocation11]  }
  0xde   : > { %s8595_s21 = scalar_lea.hbm %s12270_s29, 512 }
  0xdf   : > { %p8596_p2 = scmp.ne.s32.totalorder %s12270_s29, %s8595_s21  ;;  %p8602_p11 = scmp.lt.u32.totalorder %s8595_s21, %s12270_s29 }
  0xe1   : > { %p8598_p4 = pnand %p8596_p2, %p10438_p12 }
  0xe3   : > { %p8599_p3 = pneg %p8598_p4 }
  0xe5   : > { %p8604_p5 = pnand %p8602_p11, %p8599_p3 }
  0xe7   : > { %8607 = shalt.err (!%p8604_p5)
}
  0xe8   : > { %s8608_s7 = scalar_lea.vmem %s10432_s1, 512  ;;  %p8616_p13 = scmp.lt.s32.totalorder %s10432_s1, %s10432_s1 }
  0xe9   : > { %p8609_p10 = scmp.ne.s32.totalorder %s10432_s1, %s8608_s7  ;;  %p8617_p0 = scmp.lt.s32.totalorder %s8608_s7, %s8608_s7 }
  0xeb   : > { %p8611_p1 = pnand %p8609_p10, %p10438_p12  ;;  %p8618_p9 = por %p8617_p0, %p8616_p13 }
  0xed   : > { %p8612_p6 = pneg %p8611_p1 }
  0xef   : > { %p8619_p8 = pnand %p8618_p9, %p8612_p6 }
  0xf1   : > { %8622 = shalt.err (!%p8619_p8)
}
  0xf2   : > { %s12150_s20 = smov 64   ;;  %s12151_s23 = smov 4  }
  0xf3   : > { %7914 = dma.hbm_to_vmem [thread:$0]  (!%p10428_p7), %s12270_s29, 512, %s10432_s1, [#allocation11], %s12150_s20, %s12150_s20, %s12151_s23  }
  0xf4   : > { %s9908_s21 = smov [#allocation13]   ;;  %s9909_s7 = smov [#allocation40]  }
  0xf5   : > { %s1388_s25 = sshll.u32 %s9908_s21, 4  ;;  %s1424_s30 = sshll.u32 %s9909_s7, 4  ;;  %s1389_s25 = int_to_ptr.vmem [resolvable:$true] %s1388_s25  ;;  %s10468_s30 = int_to_ptr.vmem [resolvable:$true] %s1424_s30 }
  0xf6   : > { %s8623_s27 = scalar_lea.hbm %s12275_s3, 16 }
  0xf7   : > { %p8624_p2 = scmp.ne.s32.totalorder %s12275_s3, %s8623_s27  ;;  %p8630_p11 = scmp.lt.u32.totalorder %s8623_s27, %s12275_s3 }
  0xf9   : > { %p8626_p4 = pnand %p8624_p2, %p10438_p12 }
  0xfb   : > { %p8627_p3 = pneg %p8626_p4 }
  0xfd   : > { %p8632_p5 = pnand %p8630_p11, %p8627_p3 }
  0xff   : > { %8635 = shalt.err (!%p8632_p5)
}
 0x100   : > { %s8636_s18 = scalar_lea.vmem %s1389_s25, 16  ;;  %s8643_s1 = scalar_lea.vmem %s1389_s25, 32 }
 0x101   : > { %p8637_p10 = scmp.ne.s32.totalorder %s1389_s25, %s8636_s18  ;;  %p8644_p13 = scmp.lt.s32.totalorder %s1389_s25, %s1389_s25 }
 0x102   : > { %p8645_p0 = scmp.lt.s32.totalorder %s8643_s1, %s8636_s18 }
 0x103   : > { %p8639_p1 = pnand %p8637_p10, %p10438_p12 }
 0x104   : > { %p8646_p9 = por %p8645_p0, %p8644_p13 }
 0x105   : > { %p8640_p6 = pneg %p8639_p1 }
 0x107   : > { %p8647_p8 = pnand %p8646_p9, %p8640_p6 }
 0x109   : > { %8650 = shalt.err (!%p8647_p8)
}
 0x10a   : > { %7917 = dma.hbm_to_vmem [thread:$0]  (!%p10428_p7), %s12275_s3, 16, %s1389_s25, [#allocation14]  }
 0x10b   : > { %s8651_s27 = scalar_lea.hbm %s12274_s9, 16 }
 0x10c   : > { %p8652_p2 = scmp.ne.s32.totalorder %s12274_s9, %s8651_s27  ;;  %p8658_p11 = scmp.lt.u32.totalorder %s8651_s27, %s12274_s9 }
 0x10e   : > { %p8654_p4 = pnand %p8652_p2, %p10438_p12 }
 0x110   : > { %p8655_p3 = pneg %p8654_p4 }
 0x112   : > { %p8660_p5 = pnand %p8658_p11, %p8655_p3 }
 0x114   : > { %8663 = shalt.err (!%p8660_p5)
}
 0x115   : > { %s8664_s18 = scalar_lea.vmem %s10468_s30, 16  ;;  %s8671_s21 = scalar_lea.vmem %s10468_s30, 32 }
 0x116   : > { %p8665_p10 = scmp.ne.s32.totalorder %s10468_s30, %s8664_s18  ;;  %p8672_p13 = scmp.lt.s32.totalorder %s10468_s30, %s10468_s30 }
 0x117   : > { %p8673_p0 = scmp.lt.s32.totalorder %s8671_s21, %s8664_s18 }
 0x118   : > { %p8667_p1 = pnand %p8665_p10, %p10438_p12 }
 0x119   : > { %p8674_p9 = por %p8673_p0, %p8672_p13 }
 0x11a   : > { %p8668_p6 = pneg %p8667_p1 }
 0x11c   : > { %p8675_p8 = pnand %p8674_p9, %p8668_p6 }
 0x11e   : > { %8678 = shalt.err (!%p8675_p8)
}
 0x11f   : > { %7926 = dma.hbm_to_vmem [thread:$0]  (!%p10428_p7), %s12274_s9, 16, %s10468_s30, [#allocation41]  }
 0x120   : > { %s9910_s25 = smov [#allocation43]   ;;  %s9911_s1 = smov [#allocation46]  }
 0x121   : > { %s1448_s7 = sshll.u32 %s9910_s25, 4  ;;  %s1472_s27 = sshll.u32 %s9911_s1, 4  ;;  %s1449_s7 = int_to_ptr.vmem [resolvable:$true] %s1448_s7  ;;  %s10496_s27 = int_to_ptr.vmem [resolvable:$true] %s1472_s27 }
 0x122   : > { %s8679_s18 = scalar_lea.hbm %s12272_s17, 16 }
 0x123   : > { %p8680_p2 = scmp.ne.s32.totalorder %s12272_s17, %s8679_s18  ;;  %p8686_p11 = scmp.lt.u32.totalorder %s8679_s18, %s12272_s17 }
 0x125   : > { %p8682_p4 = pnand %p8680_p2, %p10438_p12 }
 0x127   : > { %p8683_p3 = pneg %p8682_p4 }
 0x129   : > { %p8688_p5 = pnand %p8686_p11, %p8683_p3 }
 0x12b   : > { %8691 = shalt.err (!%p8688_p5)
}
 0x12c   : > { %s8692_s21 = scalar_lea.vmem %s1449_s7, 16  ;;  %s8699_s30 = scalar_lea.vmem %s1449_s7, 32 }
 0x12d   : > { %p8693_p10 = scmp.ne.s32.totalorder %s1449_s7, %s8692_s21  ;;  %p8700_p13 = scmp.lt.s32.totalorder %s1449_s7, %s1449_s7 }
 0x12e   : > { %p8701_p0 = scmp.lt.s32.totalorder %s8699_s30, %s8692_s21 }
 0x12f   : > { %p8695_p1 = pnand %p8693_p10, %p10438_p12 }
 0x130   : > { %p8702_p9 = por %p8701_p0, %p8700_p13 }
 0x131   : > { %p8696_p6 = pneg %p8695_p1 }
 0x133   : > { %p8703_p8 = pnand %p8702_p9, %p8696_p6 }
 0x135   : > { %8706 = shalt.err (!%p8703_p8)
}
 0x136   : > { %7932 = dma.hbm_to_vmem [thread:$0]  (!%p10428_p7), %s12272_s17, 16, %s1449_s7, [#allocation44]  }
 0x137   : > { %s8707_s25 = scalar_lea.hbm %s12271_s28, 1024 }
 0x138   : > { %p8708_p2 = scmp.ne.s32.totalorder %s12271_s28, %s8707_s25  ;;  %p8714_p11 = scmp.lt.u32.totalorder %s8707_s25, %s12271_s28 }
 0x13a   : > { %p8710_p4 = pnand %p8708_p2, %p10438_p12 }
 0x13c   : > { %p8711_p3 = pneg %p8710_p4 }
 0x13e   : > { %p8716_p5 = pnand %p8714_p11, %p8711_p3 }
 0x140   : > { %8719 = shalt.err (!%p8716_p5)
}
 0x141   : > { %s8720_s1 = scalar_lea.vmem %s10496_s27, 1024  ;;  %p8728_p13 = scmp.lt.s32.totalorder %s10496_s27, %s10496_s27 }
 0x142   : > { %p8721_p10 = scmp.ne.s32.totalorder %s10496_s27, %s8720_s1  ;;  %p8729_p0 = scmp.lt.s32.totalorder %s8720_s1, %s8720_s1 }
 0x144   : > { %p8723_p1 = pnand %p8721_p10, %p10438_p12  ;;  %p8730_p9 = por %p8729_p0, %p8728_p13 }
 0x146   : > { %p8724_p6 = pneg %p8723_p1 }
 0x148   : > { %p8731_p8 = pnand %p8730_p9, %p8724_p6 }
 0x14a   : > { %8734 = shalt.err (!%p8731_p8)
}
 0x14b   : > { %7938 = dma.hbm_to_vmem [thread:$0]  (!%p10428_p7), %s12271_s28, 1024, %s10496_s27, [#allocation47], %s12150_s20, %s12150_s20, %s12151_s23  }
 0x14c   : > { %s9912_s7 = smov [#allocation49]   ;;  %s9913_s21 = smov [#allocation7]  }
 0x14d   : > { %s1496_s18 = sshll.u32 %s9912_s7, 4  ;;  %s1353_s30 = sshll.u32 %s9913_s21, 4  ;;  %s1497_s18 = int_to_ptr.vmem [resolvable:$true] %s1496_s18  ;;  %s10526_s30 = int_to_ptr.vmem [resolvable:$true] %s1353_s30 }
 0x14e   : > { %s8735_s25 = scalar_lea.hbm %s12273_s15, 1024 }
 0x14f   : > { %p8736_p2 = scmp.ne.s32.totalorder %s12273_s15, %s8735_s25  ;;  %p8742_p11 = scmp.lt.u32.totalorder %s8735_s25, %s12273_s15 }
 0x151   : > { %p8738_p4 = pnand %p8736_p2, %p10438_p12 }
 0x153   : > { %p8739_p3 = pneg %p8738_p4 }
 0x155   : > { %p8744_p5 = pnand %p8742_p11, %p8739_p3 }
 0x157   : > { %8747 = shalt.err (!%p8744_p5)
}
 0x158   : > { %s8748_s1 = scalar_lea.vmem %s1497_s18, 1024  ;;  %p8756_p13 = scmp.lt.s32.totalorder %s1497_s18, %s1497_s18 }
 0x159   : > { %p8749_p10 = scmp.ne.s32.totalorder %s1497_s18, %s8748_s1  ;;  %p8757_p0 = scmp.lt.s32.totalorder %s8748_s1, %s8748_s1 }
 0x15b   : > { %p8751_p1 = pnand %p8749_p10, %p10438_p12  ;;  %p8758_p9 = por %p8757_p0, %p8756_p13 }
 0x15d   : > { %p8752_p6 = pneg %p8751_p1 }
 0x15f   : > { %p8759_p8 = pnand %p8758_p9, %p8752_p6 }
 0x161   : > { %8762 = shalt.err (!%p8759_p8)
}
 0x162   : > { %s12315_s27 = sld [smem:[#allocation79_spill]] }
 0x163   : > { %7944 = dma.hbm_to_vmem [thread:$0]  (!%p10428_p7), %s12273_s15, 1024, %s1497_s18, [#allocation50], %s12150_s20, %s12150_s20, %s12151_s23  }
 0x168   : > { %s8763_s7 = scalar_lea.hbm %s12315_s27, 16 }
 0x169   : > { %p8764_p2 = scmp.ne.s32.totalorder %s12315_s27, %s8763_s7  ;;  %p8770_p11 = scmp.lt.u32.totalorder %s8763_s7, %s12315_s27 }
 0x16b   : > { %p8766_p4 = pnand %p8764_p2, %p10438_p12 }
 0x16d   : > { %p8767_p3 = pneg %p8766_p4 }
 0x16f   : > { %p8772_p5 = pnand %p8770_p11, %p8767_p3 }
 0x171   : > { %8775 = shalt.err (!%p8772_p5)
}
 0x172   : > { %s8776_s21 = scalar_lea.vmem %s10526_s30, 16  ;;  %s8783_s25 = scalar_lea.vmem %s10526_s30, 32 }
 0x173   : > { %p8777_p10 = scmp.ne.s32.totalorder %s10526_s30, %s8776_s21  ;;  %p8784_p13 = scmp.lt.s32.totalorder %s10526_s30, %s10526_s30 }
 0x174   : > { %p8785_p0 = scmp.lt.s32.totalorder %s8783_s25, %s8776_s21 }
 0x175   : > { %p8779_p1 = pnand %p8777_p10, %p10438_p12 }
 0x176   : > { %p8786_p9 = por %p8785_p0, %p8784_p13 }
 0x177   : > { %p8780_p6 = pneg %p8779_p1 }
 0x179   : > { %p8787_p8 = pnand %p8786_p9, %p8780_p6 }
 0x17b   : > { %8790 = shalt.err (!%p8787_p8)
}
 0x17c   : > { %s12316_s18 = sld [smem:[#allocation111_spill]]  ;;  %s9914_s1 = smov [#allocation38]  }
 0x17d   : > { %7908 = dma.hbm_to_vmem [thread:$0]  (!%p10428_p7), %s12315_s27, 16, %s10526_s30, [#allocation8]  }
 0x17e   : > { %s1399_s20 = sshll.u32 %s9914_s1, 4  ;;  %s9915_s23 = smov [#allocation39]   ;;  %s1400_s20 = int_to_ptr.vmem [resolvable:$true] %s1399_s20 }
 0x17f   : > { %s1410_s3 = sshll.u32 %s9915_s23, 4  ;;  %s10557_s3 = int_to_ptr.vmem [resolvable:$true] %s1410_s3 }
 0x182   : > { %s12317_s7 = smov %s12316_s18  ;;  %s8791_s21 = scalar_lea.hbm %s12316_s18, 16 }
 0x183   : > { %p8792_p2 = scmp.ne.s32.totalorder %s12317_s7, %s8791_s21  ;;  %p8798_p11 = scmp.lt.u32.totalorder %s8791_s21, %s12317_s7 }
 0x185   : > { %p8794_p4 = pnand %p8792_p2, %p10438_p12 }
 0x187   : > { %p8795_p3 = pneg %p8794_p4 }
 0x189   : > { %p8800_p5 = pnand %p8798_p11, %p8795_p3 }
 0x18b   : > { %8803 = shalt.err (!%p8800_p5)
}
 0x18c   : > { %s8804_s25 = scalar_lea.vmem %s1400_s20, 16  ;;  %s8811_s30 = scalar_lea.vmem %s1400_s20, 32 }
 0x18d   : > { %p8805_p10 = scmp.ne.s32.totalorder %s1400_s20, %s8804_s25  ;;  %p8812_p13 = scmp.lt.s32.totalorder %s1400_s20, %s1400_s20 }
 0x18e   : > { %p8813_p0 = scmp.lt.s32.totalorder %s8811_s30, %s8804_s25 }
 0x18f   : > { %p8807_p1 = pnand %p8805_p10, %p10438_p12 }
 0x190   : > { %p8814_p9 = por %p8813_p0, %p8812_p13 }
 0x191   : > { %p8808_p6 = pneg %p8807_p1 }
 0x193   : > { %p8815_p8 = pnand %p8814_p9, %p8808_p6 }
 0x195   : > { %8818 = shalt.err (!%p8815_p8)
}
 0x196   : > { %s12318_s23 = sld [smem:[#allocation112_spill]] }
 0x197   : > { %7920 = dma.hbm_to_vmem [thread:$0]  (!%p10428_p7), %s12317_s7, 16, %s1400_s20, [#allocation11]  }
 0x19c   : > { %s8819_s18 = scalar_lea.hbm %s12318_s23, 16 }
 0x19d   : > { %p8820_p2 = scmp.ne.s32.totalorder %s12318_s23, %s8819_s18  ;;  %p8826_p11 = scmp.lt.u32.totalorder %s8819_s18, %s12318_s23 }
 0x19f   : > { %p8822_p4 = pnand %p8820_p2, %p10438_p12 }
 0x1a1   : > { %p8823_p3 = pneg %p8822_p4 }
 0x1a3   : > { %p8828_p5 = pnand %p8826_p11, %p8823_p3 }
 0x1a5   : > { %8831 = shalt.err (!%p8828_p5)
}
 0x1a6   : > { %s8832_s1 = scalar_lea.vmem %s10557_s3, 16  ;;  %s8839_s21 = scalar_lea.vmem %s10557_s3, 32 }
 0x1a7   : > { %p8833_p10 = scmp.ne.s32.totalorder %s10557_s3, %s8832_s1  ;;  %p8840_p13 = scmp.lt.s32.totalorder %s10557_s3, %s10557_s3 }
 0x1a8   : > { %p8841_p0 = scmp.lt.s32.totalorder %s8839_s21, %s8832_s1 }
 0x1a9   : > { %p8835_p1 = pnand %p8833_p10, %p10438_p12 }
 0x1aa   : > { %p8842_p9 = por %p8841_p0, %p8840_p13 }
 0x1ab   : > { %p8836_p6 = pneg %p8835_p1 }
 0x1ad   : > { %p8843_p8 = pnand %p8842_p9, %p8836_p6 }
 0x1af   : > { %8846 = shalt.err (!%p8843_p8)
}
 0x1b0   : > { %s12319_s20 = sld [smem:[#allocation115_spill]]  ;;  %s9916_s25 = smov [#allocation42]  }
 0x1b1   : > { %7923 = dma.hbm_to_vmem [thread:$0]  (!%p10428_p7), %s12318_s23, 16, %s10557_s3, [#allocation14]  }
 0x1b2   : > { %s1434_s30 = sshll.u32 %s9916_s25, 4  ;;  %s9917_s18 = smov [#allocation45]   ;;  %s1435_s30 = int_to_ptr.vmem [resolvable:$true] %s1434_s30 }
 0x1b3   : > { %s1462_s7 = sshll.u32 %s9917_s18, 4  ;;  %s10585_s7 = int_to_ptr.vmem [resolvable:$true] %s1462_s7 }
 0x1b6   : > { %s8847_s1 = scalar_lea.hbm %s12319_s20, 1024 }
 0x1b7   : > { %p8848_p2 = scmp.ne.s32.totalorder %s12319_s20, %s8847_s1  ;;  %p8854_p11 = scmp.lt.u32.totalorder %s8847_s1, %s12319_s20 }
 0x1b9   : > { %p8850_p4 = pnand %p8848_p2, %p10438_p12 }
 0x1bb   : > { %p8851_p3 = pneg %p8850_p4 }
 0x1bd   : > { %p8856_p5 = pnand %p8854_p11, %p8851_p3 }
 0x1bf   : > { %8859 = shalt.err (!%p8856_p5)
}
 0x1c0   : > { %s8860_s21 = scalar_lea.vmem %s1435_s30, 1024  ;;  %p8868_p13 = scmp.lt.s32.totalorder %s1435_s30, %s1435_s30 }
 0x1c1   : > { %p8861_p10 = scmp.ne.s32.totalorder %s1435_s30, %s8860_s21  ;;  %p8869_p0 = scmp.lt.s32.totalorder %s8860_s21, %s8860_s21 }
 0x1c3   : > { %p8863_p1 = pnand %p8861_p10, %p10438_p12  ;;  %p8870_p9 = por %p8869_p0, %p8868_p13 }
 0x1c5   : > { %p8864_p6 = pneg %p8863_p1 }
 0x1c7   : > { %p8871_p8 = pnand %p8870_p9, %p8864_p6 }
 0x1c9   : > { %8874 = shalt.err (!%p8871_p8)
}
 0x1ca   : > { %s12320_s3 = smov 4   ;;  %s12321_s25 = smov 64  }
 0x1cb   : > { %s12322_s18 = sld [smem:[#allocation118_spill]] }
 0x1cc   : > { %7929 = dma.hbm_to_vmem [thread:$0]  (!%p10428_p7), %s12319_s20, 1024, %s1435_s30, [#allocation41], %s12321_s25, %s12321_s25, %s12320_s3  }
 0x1d1   : > { %s12323_s9 = smov %s12322_s18  ;;  %s8875_s1 = scalar_lea.hbm %s12322_s18, 16 }
 0x1d2   : > { %p8876_p2 = scmp.ne.s32.totalorder %s12323_s9, %s8875_s1  ;;  %p8882_p11 = scmp.lt.u32.totalorder %s8875_s1, %s12323_s9 }
 0x1d4   : > { %p8878_p4 = pnand %p8876_p2, %p10438_p12 }
 0x1d6   : > { %p8879_p3 = pneg %p8878_p4 }
 0x1d8   : > { %p8884_p5 = pnand %p8882_p11, %p8879_p3 }
 0x1da   : > { %8887 = shalt.err (!%p8884_p5)
}
 0x1db   : > { %s8888_s21 = scalar_lea.vmem %s10585_s7, 16  ;;  %s8895_s15 = scalar_lea.vmem %s10585_s7, 32 }
 0x1dc   : > { %p8889_p10 = scmp.ne.s32.totalorder %s10585_s7, %s8888_s21  ;;  %p8896_p13 = scmp.lt.s32.totalorder %s10585_s7, %s10585_s7 }
 0x1dd   : > { %p8897_p0 = scmp.lt.s32.totalorder %s8895_s15, %s8888_s21 }
 0x1de   : > { %p8891_p1 = pnand %p8889_p10, %p10438_p12 }
 0x1df   : > { %p8898_p9 = por %p8897_p0, %p8896_p13 }
 0x1e0   : > { %p8892_p6 = pneg %p8891_p1 }
 0x1e2   : > { %p8899_p8 = pnand %p8898_p9, %p8892_p6 }
 0x1e4   : > { %8902 = shalt.err (!%p8899_p8)
}
 0x1e5   : > { %s12324_s30 = sld [smem:[#allocation120_spill]]  ;;  %s9918_s25 = smov [#allocation48]  }
 0x1e6   : > { %7935 = dma.hbm_to_vmem [thread:$0]  (!%p10428_p7), %s12323_s9, 16, %s10585_s7, [#allocation44]  }
 0x1e7   : > { %s1486_s18 = sshll.u32 %s9918_s25, 4  ;;  %s9919_s1 = smov [#allocation51]   ;;  %s1487_s18 = int_to_ptr.vmem [resolvable:$true] %s1486_s18 }
 0x1e8   : > { %s1510_s17 = sshll.u32 %s9919_s1, 4  ;;  %s10616_s17 = int_to_ptr.vmem [resolvable:$true] %s1510_s17 }
 0x1eb   : > { %s12325_s3 = smov %s12324_s30  ;;  %s8903_s15 = scalar_lea.hbm %s12324_s30, 16 }
 0x1ec   : > { %p8904_p2 = scmp.ne.s32.totalorder %s12325_s3, %s8903_s15  ;;  %p8910_p11 = scmp.lt.u32.totalorder %s8903_s15, %s12325_s3 }
 0x1ee   : > { %p8906_p4 = pnand %p8904_p2, %p10438_p12 }
 0x1f0   : > { %p8907_p3 = pneg %p8906_p4 }
 0x1f2   : > { %p8912_p5 = pnand %p8910_p11, %p8907_p3 }
 0x1f4   : > { %8915 = shalt.err (!%p8912_p5)
}
 0x1f5   : > { %s8916_s21 = scalar_lea.vmem %s1487_s18, 16  ;;  %s8923_s7 = scalar_lea.vmem %s1487_s18, 32 }
 0x1f6   : > { %p8917_p10 = scmp.ne.s32.totalorder %s1487_s18, %s8916_s21  ;;  %p8924_p13 = scmp.lt.s32.totalorder %s1487_s18, %s1487_s18 }
 0x1f7   : > { %p8925_p0 = scmp.lt.s32.totalorder %s8923_s7, %s8916_s21 }
 0x1f8   : > { %p8919_p1 = pnand %p8917_p10, %p10438_p12 }
 0x1f9   : > { %p8926_p9 = por %p8925_p0, %p8924_p13 }
 0x1fa   : > { %p8920_p6 = pneg %p8919_p1 }
 0x1fc   : > { %p8927_p8 = pnand %p8926_p9, %p8920_p6 }
 0x1fe   : > { %8930 = shalt.err (!%p8927_p8)
}
 0x1ff   : > { %s12326_s30 = sld [smem:[#allocation122_spill]] }
 0x200   : > { %7941 = dma.hbm_to_vmem [thread:$0]  (!%p10428_p7), %s12325_s3, 16, %s1487_s18, [#allocation47]  }
 0x205   : > { %s12327_s25 = smov %s12326_s30  ;;  %s8931_s1 = scalar_lea.hbm %s12326_s30, 16 }
 0x206   : > { %p8932_p2 = scmp.ne.s32.totalorder %s12327_s25, %s8931_s1  ;;  %p8938_p11 = scmp.lt.u32.totalorder %s8931_s1, %s12327_s25 }
 0x208   : > { %p8934_p4 = pnand %p8932_p2, %p10438_p12 }
 0x20a   : > { %p8935_p3 = pneg %p8934_p4 }
 0x20c   : > { %p8940_p5 = pnand %p8938_p11, %p8935_p3 }
 0x20e   : > { %8943 = shalt.err (!%p8940_p5)
}
 0x20f   : > { %s8944_s15 = scalar_lea.vmem %s10616_s17, 16  ;;  %s8951_s21 = scalar_lea.vmem %s10616_s17, 32 }
 0x210   : > { %p8945_p10 = scmp.ne.s32.totalorder %s10616_s17, %s8944_s15  ;;  %p8952_p13 = scmp.lt.s32.totalorder %s10616_s17, %s10616_s17 }
 0x211   : > { %p8953_p0 = scmp.lt.s32.totalorder %s8951_s21, %s8944_s15 }
 0x212   : > { %p8947_p1 = pnand %p8945_p10, %p10438_p12 }
 0x213   : > { %p8954_p9 = por %p8953_p0, %p8952_p13 }
 0x214   : > { %p8948_p6 = pneg %p8947_p1 }
 0x216   : > { %p8955_p8 = pnand %p8954_p9, %p8948_p6 }
 0x218   : > { %8958 = shalt.err (!%p8955_p8)
}
 0x219   : > { %s12328_s18 = sld [smem:[#allocation124_spill]]  ;;  %s9920_s30 = smov [#allocation52]  }
 0x21a   : > { %7947 = dma.hbm_to_vmem [thread:$0]  (!%p10428_p7), %s12327_s25, 16, %s10616_s17, [#allocation50]  }
 0x21b   : > { %s1524_s1 = sshll.u32 %s9920_s30, 4  ;;  %s1525_s1 = int_to_ptr.vmem [resolvable:$true] %s1524_s1 }
 0x21f   : > { %s12329_s7 = smov %s12328_s18  ;;  %s8959_s3 = scalar_lea.hbm %s12328_s18, 16 }
 0x220   : > { %p8960_p2 = scmp.ne.s32.totalorder %s12329_s7, %s8959_s3  ;;  %p8966_p11 = scmp.lt.u32.totalorder %s8959_s3, %s12329_s7 }
 0x222   : > { %p8962_p4 = pnand %p8960_p2, %p10438_p12 }
 0x224   : > { %p8963_p3 = pneg %p8962_p4 }
 0x226   : > { %p8968_p5 = pnand %p8966_p11, %p8963_p3 }
 0x228   : > { %8971 = shalt.err (!%p8968_p5)
}
 0x229   : > { %s8972_s15 = scalar_lea.vmem %s1525_s1, 16  ;;  %s8979_s21 = scalar_lea.vmem %s1525_s1, 32 }
 0x22a   : > { %p8973_p10 = scmp.ne.s32.totalorder %s1525_s1, %s8972_s15  ;;  %p8980_p13 = scmp.lt.s32.totalorder %s1525_s1, %s1525_s1 }
 0x22b   : > { %p8981_p0 = scmp.lt.s32.totalorder %s8979_s21, %s8972_s15 }
 0x22c   : > { %p8975_p1 = pnand %p8973_p10, %p10438_p12 }
 0x22d   : > { %p8982_p9 = por %p8981_p0, %p8980_p13 }
 0x22e   : > { %p8976_p6 = pneg %p8975_p1 }
 0x230   : > { %p8983_p8 = pnand %p8982_p9, %p8976_p6 }
 0x232   : > { %8986 = shalt.err (!%p8983_p8)
}
 0x233   : > { %7950 = dma.hbm_to_vmem [thread:$0]  (!%p10428_p7), %s12329_s7, 16, %s1525_s1, [#allocation53]  }
 0x234   : > { %p7019_p2 = scmp.ge.s32.totalorder %s9849_s19, 4 }
 0x235   : > { %s12330_s17 = sld [smem:[#allocation134_spill]] (!%p7019_p2)  ;;  %s12331_s8 = sld [smem:[#allocation83_spill]] (!%p7019_p2) }
 0x236   : > { %1531 = sbr.rel (%p7019_p2) target bundleno = 1181 (0x49d), region = 100  ;;  %s12333_s18 = sld [smem:[#allocation138_spill]] (!%p7019_p2) }
 0x237   : > { %s1535_s30 = sand.u32 (!%p7019_p2), 1, %s9849_s19   ;;  %s12164_s21 = smul.u32 (!%p7019_p2), 3072, %s9849_s19 }
 0x23b   : > { %s12332_s3 = smov (!%p7019_p2), %s12331_s8  ;;  %s10657_s15 = sand.u32 (!%p7019_p2), 1, %s12330_s17  }
 0x23c   : > { %s12163_s12 = smul.u32 (!%p7019_p2), 192, %s10657_s15  ;;  %s10664_s1 = scalar_lea.hbm (!%p7019_p2), %s12331_s8, %s12164_s21 }
 0x23d   : > { %s12168_s20 = smul.u32 3, %s10657_s15  ;;  %s10671_s17 = scalar_lea.sflag [#allocation8], %s1535_s30 }
 0x23e   : > { %s1539_s7 = scalar_lea.vmem [#allocation15], %s12163_s12  ;;  %s8987_s23 = scalar_lea.hbm %s10664_s1, 3072 }
 0x23f   : > { %s1546_s9 = sshll.u32 %s1539_s7, 4  ;;  %p8988_p7 = scmp.ne.s32.totalorder %s10664_s1, %s8987_s23  ;;  %s10668_s9 = int_to_ptr.vmem [resolvable:$true] %s1546_s9 }
 0x240   : > { %p12334_p12 = scmp.ne.s32.totalorder %s12333_s18, 0  ;;  %s8991_s25 = scalar_lea.hbm %s12332_s3, 12288 }
 0x241   : > { %p8992_p11 = scmp.lt.u32.totalorder %s10664_s1, %s12332_s3  ;;  %p8993_p5 = scmp.lt.u32.totalorder %s8991_s25, %s8987_s23 }
 0x242   : > { %p8989_p4 = pnand %p8988_p7, %p12334_p12  ;;  %p8995_p1 = scmp.lt.u32.totalorder %s8987_s23, %s10664_s1 }
 0x243   : > { %p8994_p10 = por %p8993_p5, %p8992_p11 }
 0x244   : > { %p8990_p3 = pneg %p8989_p4 }
 0x245   : > { %p8996_p6 = por %p8995_p1, %p8994_p10 }
 0x247   : > { %p8997_p13 = pnand %p8996_p6, %p8990_p3 }
 0x249   : > { %9000 = shalt.err (!%p8997_p13)
}
 0x24a   : > { %s9001_s7 = scalar_lea.vmem %s10668_s9, 3072  ;;  %s9921_s8 = smov [#allocation15]  }
 0x24b   : > { %p9002_p0 = scmp.ne.s32.totalorder %s10668_s9, %s9001_s7  ;;  %s9005_s30 = sshll.u32 %s9921_s8, 4  ;;  %s9006_s30 = int_to_ptr.vmem [resolvable:$false] %s9005_s30 }
 0x24c   : > { %s9007_s12 = scalar_lea.vmem %s9006_s30, 6144  ;;  %p9008_p2 = scmp.lt.s32.totalorder %s10668_s9, %s9006_s30 }
 0x24d   : > { %p9003_p9 = pnand %p9002_p0, %p12334_p12  ;;  %p9009_p7 = scmp.lt.s32.totalorder %s9007_s12, %s9001_s7 }
 0x24f   : > { %p9004_p8 = pneg %p9003_p9  ;;  %p9010_p4 = por %p9009_p7, %p9008_p2 }
 0x251   : > { %p9011_p11 = pnand %p9010_p4, %p9004_p8 }
 0x253   : > { %9014 = shalt.err (!%p9011_p11)
}
 0x254   : > { %s12169_s23 = smov 192   ;;  %s12335_s25 = sld [smem:[#allocation84_spill]] }
 0x255   : > { %s12172_s8 = smov 12   ;;  %s12173_s12 = smul.u32 48, %s9849_s19 }
 0x256   : > { %7817 = dma.hbm_to_vmem [thread:$0]  (%p12334_p12), %s10664_s1, 3072, %s10668_s9, %s10671_s17, %s12169_s23, %s12169_s23, %s12172_s8  }
 0x257   : > { %s1560_s7 = scalar_lea.vmem [#allocation16], %s12168_s20  ;;  %s12170_s21 = sshll.u32 %s10657_s15, 6 }
 0x258   : > { %s1568_s30 = sshll.u32 %s1560_s7, 4  ;;  %s1569_s30 = int_to_ptr.vmem [resolvable:$true] %s1568_s30 }
 0x25a   : > { %s1566_s3 = scalar_lea.hbm %s12335_s25, %s12173_s12  ;;  %s9019_s28 = scalar_lea.hbm %s12335_s25, 192 }
 0x25b   : > { %s9015_s27 = scalar_lea.hbm %s1566_s3, 48  ;;  %p9020_p1 = scmp.lt.u32.totalorder %s1566_s3, %s12335_s25 }
 0x25c   : > { %p9016_p3 = scmp.ne.s32.totalorder %s1566_s3, %s9015_s27  ;;  %p9021_p6 = scmp.lt.u32.totalorder %s9019_s28, %s9015_s27 }
 0x25d   : > { %p9023_p0 = scmp.lt.u32.totalorder %s9015_s27, %s1566_s3 }
 0x25e   : > { %p9017_p5 = pnand %p9016_p3, %p12334_p12  ;;  %p9022_p13 = por %p9021_p6, %p9020_p1 }
 0x260   : > { %p9018_p10 = pneg %p9017_p5  ;;  %p9024_p9 = por %p9023_p0, %p9022_p13 }
 0x262   : > { %p9025_p8 = pnand %p9024_p9, %p9018_p10 }
 0x264   : > { %9028 = shalt.err (!%p9025_p8)
}
 0x265   : > { %s9029_s9 = scalar_lea.vmem %s1569_s30, 48  ;;  %s9924_s1 = smov [#allocation16]  }
 0x266   : > { %p9030_p2 = scmp.ne.s32.totalorder %s1569_s30, %s9029_s9  ;;  %s9033_s7 = sshll.u32 %s9924_s1, 4  ;;  %s9034_s7 = int_to_ptr.vmem [resolvable:$false] %s9033_s7 }
 0x267   : > { %s9035_s20 = scalar_lea.vmem %s9034_s7, 96  ;;  %p9036_p11 = scmp.lt.s32.totalorder %s1569_s30, %s9034_s7 }
 0x268   : > { %p9031_p7 = pnand %p9030_p2, %p12334_p12  ;;  %p9037_p3 = scmp.lt.s32.totalorder %s9035_s20, %s9029_s9 }
 0x26a   : > { %p9032_p4 = pneg %p9031_p7  ;;  %p9038_p5 = por %p9037_p3, %p9036_p11 }
 0x26c   : > { %p9039_p1 = pnand %p9038_p5, %p9032_p4 }
 0x26e   : > { %9042 = shalt.err (!%p9039_p1)
}
 0x26f   : > { %s12336_s28 = sld [smem:[#allocation85_spill]]  ;;  %s12171_s27 = sshll.u32 %s9849_s19, 10 }
 0x270   : > { %7818 = dma.hbm_to_vmem [thread:$0]  (%p12334_p12), %s1566_s3, 48, %s1569_s30, %s10671_s17  }
 0x271   : > { %s1579_s20 = scalar_lea.vmem [#allocation17], %s12170_s21 }
 0x272   : > { %s1586_s9 = sshll.u32 %s1579_s20, 4  ;;  %s10718_s9 = int_to_ptr.vmem [resolvable:$true] %s1586_s9 }
 0x275   : > { %s10714_s1 = scalar_lea.hbm %s12336_s28, %s12171_s27  ;;  %s9047_s23 = scalar_lea.hbm %s12336_s28, 4096 }
 0x276   : > { %s9043_s7 = scalar_lea.hbm %s10714_s1, 1024  ;;  %p9048_p0 = scmp.lt.u32.totalorder %s10714_s1, %s12336_s28 }
 0x277   : > { %p9044_p10 = scmp.ne.s32.totalorder %s10714_s1, %s9043_s7  ;;  %p9049_p9 = scmp.lt.u32.totalorder %s9047_s23, %s9043_s7 }
 0x278   : > { %p9051_p2 = scmp.lt.u32.totalorder %s9043_s7, %s10714_s1 }
 0x279   : > { %p9045_p6 = pnand %p9044_p10, %p12334_p12  ;;  %p9050_p8 = por %p9049_p9, %p9048_p0 }
 0x27b   : > { %p9046_p13 = pneg %p9045_p6  ;;  %p9052_p7 = por %p9051_p2, %p9050_p8 }
 0x27d   : > { %p9053_p4 = pnand %p9052_p7, %p9046_p13 }
 0x27f   : > { %9056 = shalt.err (!%p9053_p4)
}
 0x280   : > { %s9057_s3 = scalar_lea.vmem %s10718_s9, 1024  ;;  %s9925_s30 = smov [#allocation17]  }
 0x281   : > { %p9058_p11 = scmp.ne.s32.totalorder %s10718_s9, %s9057_s3  ;;  %s9061_s20 = sshll.u32 %s9925_s30, 4  ;;  %s9062_s20 = int_to_ptr.vmem [resolvable:$false] %s9061_s20 }
 0x282   : > { %s9063_s21 = scalar_lea.vmem %s9062_s20, 2048  ;;  %p9064_p1 = scmp.lt.s32.totalorder %s10718_s9, %s9062_s20 }
 0x283   : > { %p9059_p3 = pnand %p9058_p11, %p12334_p12  ;;  %p9065_p10 = scmp.lt.s32.totalorder %s9063_s21, %s9057_s3 }
 0x285   : > { %p9060_p5 = pneg %p9059_p3  ;;  %p9066_p6 = por %p9065_p10, %p9064_p1 }
 0x287   : > { %p9067_p0 = pnand %p9066_p6, %p9060_p5 }
 0x289   : > { %9070 = shalt.err (!%p9067_p0)
}
 0x28a   : > { %s12174_s23 = smov 64   ;;  %s12337_s7 = sld [smem:[#allocation86_spill]] }
 0x28b   : > { %s12176_s27 = smov 4   ;;  %s10742_s21 = sshll.u32 %s9849_s19, 4 }
 0x28c   : > { %7819 = dma.hbm_to_vmem [thread:$0]  (%p12334_p12), %s10714_s1, 1024, %s10718_s9, %s10671_s17, %s12174_s23, %s12174_s23, %s12176_s27  }
 0x28d   : > { %s1599_s3 = scalar_lea.vmem [#allocation18], %s10657_s15 }
 0x28e   : > { %s1606_s30 = sshll.u32 %s1599_s3, 4  ;;  %s1607_s30 = int_to_ptr.vmem [resolvable:$true] %s1606_s30 }
 0x290   : > { %s1604_s20 = scalar_lea.hbm %s12337_s7, %s10742_s21  ;;  %s9075_s12 = scalar_lea.hbm %s12337_s7, 64 }
 0x291   : > { %s9071_s8 = scalar_lea.hbm %s1604_s20, 16  ;;  %p9076_p2 = scmp.lt.u32.totalorder %s1604_s20, %s12337_s7 }
 0x292   : > { %p9072_p13 = scmp.ne.s32.totalorder %s1604_s20, %s9071_s8  ;;  %p9077_p7 = scmp.lt.u32.totalorder %s9075_s12, %s9071_s8 }
 0x293   : > { %p9079_p11 = scmp.lt.u32.totalorder %s9071_s8, %s1604_s20 }
 0x294   : > { %p9073_p9 = pnand %p9072_p13, %p12334_p12  ;;  %p9078_p4 = por %p9077_p7, %p9076_p2 }
 0x296   : > { %p9074_p8 = pneg %p9073_p9  ;;  %p9080_p3 = por %p9079_p11, %p9078_p4 }
 0x298   : > { %p9081_p5 = pnand %p9080_p3, %p9074_p8 }
 0x29a   : > { %9084 = shalt.err (!%p9081_p5)
}
 0x29b   : > { %s9085_s1 = scalar_lea.vmem %s1607_s30, 16  ;;  %s9928_s9 = smov [#allocation18]  }
 0x29c   : > { %p9086_p1 = scmp.ne.s32.totalorder %s1607_s30, %s9085_s1  ;;  %s9089_s3 = sshll.u32 %s9928_s9, 4  ;;  %s9090_s3 = int_to_ptr.vmem [resolvable:$false] %s9089_s3 }
 0x29d   : > { %s9091_s23 = scalar_lea.vmem %s9090_s3, 32  ;;  %p9092_p0 = scmp.lt.s32.totalorder %s1607_s30, %s9090_s3 }
 0x29e   : > { %p9087_p10 = pnand %p9086_p1, %p12334_p12  ;;  %p9093_p13 = scmp.lt.s32.totalorder %s9091_s23, %s9085_s1 }
 0x2a0   : > { %p9088_p6 = pneg %p9087_p10  ;;  %p9094_p9 = por %p9093_p13, %p9092_p0 }
 0x2a2   : > { %p9095_p2 = pnand %p9094_p9, %p9088_p6 }
 0x2a4   : > { %9098 = shalt.err (!%p9095_p2)
}
 0x2a5   : > { %s12338_s8 = sld [smem:[#allocation87_spill]]  ;;  %s12340_s27 = sld [smem:[#allocation88_spill]] }
 0x2a6   : > { %7820 = dma.hbm_to_vmem [thread:$0]  (%p12334_p12), %s1604_s20, 16, %s1607_s30, %s10671_s17  }
 0x2a7   : > { %s1616_s23 = scalar_lea.vmem [#allocation19], %s10657_s15 }
 0x2a8   : > { %s1623_s1 = sshll.u32 %s1616_s23, 4  ;;  %s1624_s1 = int_to_ptr.vmem [resolvable:$true] %s1623_s1 }
 0x2ab   : > { %s12339_s12 = smov %s12338_s8  ;;  %s10758_s9 = scalar_lea.hbm %s12338_s8, %s10742_s21 }
 0x2ac   : > { %s10763_s3 = scalar_lea.hbm %s12340_s27, %s10742_s21  ;;  %s9099_s7 = scalar_lea.hbm %s10758_s9, 16 }
 0x2ad   : > { %p9100_p8 = scmp.ne.s32.totalorder %s10758_s9, %s9099_s7  ;;  %s9103_s25 = scalar_lea.hbm %s12339_s12, 64 }
 0x2ae   : > { %p9104_p11 = scmp.lt.u32.totalorder %s10758_s9, %s12339_s12  ;;  %p9105_p3 = scmp.lt.u32.totalorder %s9103_s25, %s9099_s7 }
 0x2af   : > { %p9101_p7 = pnand %p9100_p8, %p12334_p12  ;;  %p9107_p1 = scmp.lt.u32.totalorder %s9099_s7, %s10758_s9 }
 0x2b0   : > { %p9106_p5 = por %p9105_p3, %p9104_p11 }
 0x2b1   : > { %p9102_p4 = pneg %p9101_p7 }
 0x2b2   : > { %p9108_p10 = por %p9107_p1, %p9106_p5 }
 0x2b4   : > { %p9109_p6 = pnand %p9108_p10, %p9102_p4 }
 0x2b6   : > { %9112 = shalt.err (!%p9109_p6)
}
 0x2b7   : > { %s9113_s30 = scalar_lea.vmem %s1624_s1, 16  ;;  %s9929_s20 = smov [#allocation19]  }
 0x2b8   : > { %p9114_p0 = scmp.ne.s32.totalorder %s1624_s1, %s9113_s30  ;;  %s9117_s8 = sshll.u32 %s9929_s20, 4  ;;  %s9118_s8 = int_to_ptr.vmem [resolvable:$false] %s9117_s8 }
 0x2b9   : > { %s9119_s23 = scalar_lea.vmem %s9118_s8, 32  ;;  %p9120_p2 = scmp.lt.s32.totalorder %s1624_s1, %s9118_s8 }
 0x2ba   : > { %p9115_p13 = pnand %p9114_p0, %p12334_p12  ;;  %p9121_p8 = scmp.lt.s32.totalorder %s9119_s23, %s9113_s30 }
 0x2bc   : > { %p9116_p9 = pneg %p9115_p13  ;;  %p9122_p7 = por %p9121_p8, %p9120_p2 }
 0x2be   : > { %p9123_p3 = pnand %p9122_p7, %p9116_p9 }
 0x2c0   : > { %9126 = shalt.err (!%p9123_p3)
}
 0x2c1   : > { %7821 = dma.hbm_to_vmem [thread:$0]  (%p12334_p12), %s10758_s9, 16, %s1624_s1, %s10671_s17  }
 0x2c2   : > { %s1633_s25 = scalar_lea.vmem [#allocation20], %s10657_s15  ;;  %s10781_s30 = sshll.u32 %s10657_s15, 7 }
 0x2c3   : > { %s1640_s7 = sshll.u32 %s1633_s25, 4  ;;  %s9127_s20 = scalar_lea.hbm %s10763_s3, 16  ;;  %s1641_s7 = int_to_ptr.vmem [resolvable:$true] %s1640_s7 }
 0x2c4   : > { %p9128_p4 = scmp.ne.s32.totalorder %s10763_s3, %s9127_s20  ;;  %s9131_s8 = scalar_lea.hbm %s12340_s27, 64 }
 0x2c5   : > { %p9132_p1 = scmp.lt.u32.totalorder %s10763_s3, %s12340_s27  ;;  %p9133_p10 = scmp.lt.u32.totalorder %s9131_s8, %s9127_s20 }
 0x2c6   : > { %p9129_p11 = pnand %p9128_p4, %p12334_p12  ;;  %p9135_p0 = scmp.lt.u32.totalorder %s9127_s20, %s10763_s3 }
 0x2c7   : > { %p9134_p6 = por %p9133_p10, %p9132_p1 }
 0x2c8   : > { %p9130_p5 = pneg %p9129_p11 }
 0x2c9   : > { %p9136_p13 = por %p9135_p0, %p9134_p6 }
 0x2cb   : > { %p9137_p9 = pnand %p9136_p13, %p9130_p5 }
 0x2cd   : > { %9140 = shalt.err (!%p9137_p9)
}
 0x2ce   : > { %s9141_s23 = scalar_lea.vmem %s1641_s7, 16  ;;  %s9930_s9 = smov [#allocation20]  }
 0x2cf   : > { %p9142_p2 = scmp.ne.s32.totalorder %s1641_s7, %s9141_s23  ;;  %s9145_s1 = sshll.u32 %s9930_s9, 4  ;;  %s9146_s1 = int_to_ptr.vmem [resolvable:$false] %s9145_s1 }
 0x2d0   : > { %s9147_s25 = scalar_lea.vmem %s9146_s1, 32  ;;  %p9148_p3 = scmp.lt.s32.totalorder %s1641_s7, %s9146_s1 }
 0x2d1   : > { %p9143_p8 = pnand %p9142_p2, %p12334_p12  ;;  %p9149_p4 = scmp.lt.s32.totalorder %s9147_s25, %s9141_s23 }
 0x2d3   : > { %p9144_p7 = pneg %p9143_p8  ;;  %p9150_p11 = por %p9149_p4, %p9148_p3 }
 0x2d5   : > { %p9151_p1 = pnand %p9150_p11, %p9144_p7 }
 0x2d7   : > { %9154 = shalt.err (!%p9151_p1)
}
 0x2d8   : > { %s12341_s20 = sld [smem:[#allocation91_spill]]  ;;  %s10798_s8 = sshll.u32 %s9849_s19, 11 }
 0x2d9   : > { %7822 = dma.hbm_to_vmem [thread:$0]  (%p12334_p12), %s10763_s3, 16, %s1641_s7, %s10671_s17  }
 0x2da   : > { %s1666_s9 = scalar_lea.vmem [#allocation21], %s10781_s30 }
 0x2db   : > { %s1673_s1 = sshll.u32 %s1666_s9, 4  ;;  %s10805_s1 = int_to_ptr.vmem [resolvable:$true] %s1673_s1 }
 0x2de   : > { %s10803_s23 = scalar_lea.hbm %s12341_s20, %s10798_s8  ;;  %s9159_s12 = scalar_lea.hbm %s12341_s20, 8192 }
 0x2df   : > { %s9155_s25 = scalar_lea.hbm %s10803_s23, 2048  ;;  %p9160_p0 = scmp.lt.u32.totalorder %s10803_s23, %s12341_s20 }
 0x2e0   : > { %p9156_p5 = scmp.ne.s32.totalorder %s10803_s23, %s9155_s25  ;;  %p9161_p13 = scmp.lt.u32.totalorder %s9159_s12, %s9155_s25 }
 0x2e1   : > { %p9163_p2 = scmp.lt.u32.totalorder %s9155_s25, %s10803_s23 }
 0x2e2   : > { %p9157_p10 = pnand %p9156_p5, %p12334_p12  ;;  %p9162_p9 = por %p9161_p13, %p9160_p0 }
 0x2e4   : > { %p9158_p6 = pneg %p9157_p10  ;;  %p9164_p8 = por %p9163_p2, %p9162_p9 }
 0x2e6   : > { %p9165_p7 = pnand %p9164_p8, %p9158_p6 }
 0x2e8   : > { %9168 = shalt.err (!%p9165_p7)
}
 0x2e9   : > { %s9169_s3 = scalar_lea.vmem %s10805_s1, 2048  ;;  %s9931_s7 = smov [#allocation21]  }
 0x2ea   : > { %p9170_p3 = scmp.ne.s32.totalorder %s10805_s1, %s9169_s3  ;;  %s9173_s9 = sshll.u32 %s9931_s7, 4  ;;  %s9174_s9 = int_to_ptr.vmem [resolvable:$false] %s9173_s9 }
 0x2eb   : > { %s9175_s27 = scalar_lea.vmem %s9174_s9, 4096  ;;  %p9176_p1 = scmp.lt.s32.totalorder %s10805_s1, %s9174_s9 }
 0x2ec   : > { %p9171_p4 = pnand %p9170_p3, %p12334_p12  ;;  %p9177_p5 = scmp.lt.s32.totalorder %s9175_s27, %s9169_s3 }
 0x2ee   : > { %p9172_p11 = pneg %p9171_p4  ;;  %p9178_p10 = por %p9177_p5, %p9176_p1 }
 0x2f0   : > { %p9179_p0 = pnand %p9178_p10, %p9172_p11 }
 0x2f2   : > { %9182 = shalt.err (!%p9179_p0)
}
 0x2f3   : > { %s12342_s12 = smov 4   ;;  %s12343_s25 = smov 64  }
 0x2f4   : > { %s12344_s20 = sld [smem:[#allocation95_spill]]  ;;  %s12345_s7 = sld [smem:[#allocation96_spill]] }
 0x2f5   : > { %7823 = dma.hbm_to_vmem [thread:$0]  (%p12334_p12), %s10803_s23, 2048, %s10805_s1, %s10671_s17, %s12343_s25, %s12343_s25, %s12342_s12  }
 0x2f6   : > { %s12346_s27 = smul.u32 3072, %s9849_s19 }
 0x2f7   : > { %s12347_s9 = smul.u32 192, %s10657_s15 }
 0x2f8   : > { %s12348_s5 = smul.u32 48, %s9849_s19 }
 0x2f9   : > { %s1705_s28 = scalar_lea.vmem [#allocation22], %s12347_s9 }
 0x2fa   : > { %s10831_s3 = scalar_lea.hbm %s12344_s20, %s12346_s27  ;;  %s1712_s29 = sshll.u32 %s1705_s28, 4  ;;  %s10835_s29 = int_to_ptr.vmem [resolvable:$true] %s1712_s29 }
 0x2fb   : > { %s10840_s4 = scalar_lea.hbm %s12345_s7, %s12348_s5  ;;  %s9183_s11 = scalar_lea.hbm %s10831_s3, 3072 }
 0x2fc   : > { %p9184_p6 = scmp.ne.s32.totalorder %s10831_s3, %s9183_s11  ;;  %s9187_s1 = scalar_lea.hbm %s12344_s20, 12288 }
 0x2fd   : > { %p9188_p2 = scmp.lt.u32.totalorder %s10831_s3, %s12344_s20  ;;  %p9189_p8 = scmp.lt.u32.totalorder %s9187_s1, %s9183_s11 }
 0x2fe   : > { %p9185_p13 = pnand %p9184_p6, %p12334_p12  ;;  %p9191_p3 = scmp.lt.u32.totalorder %s9183_s11, %s10831_s3 }
 0x2ff   : > { %p9190_p7 = por %p9189_p8, %p9188_p2 }
 0x300   : > { %p9186_p9 = pneg %p9185_p13 }
 0x301   : > { %p9192_p4 = por %p9191_p3, %p9190_p7 }
 0x303   : > { %p9193_p11 = pnand %p9192_p4, %p9186_p9 }
 0x305   : > { %9196 = shalt.err (!%p9193_p11)
}
 0x306   : > { %s9197_s28 = scalar_lea.vmem %s10835_s29, 3072  ;;  %s9932_s5 = smov [#allocation22]  }
 0x307   : > { %p9198_p1 = scmp.ne.s32.totalorder %s10835_s29, %s9197_s28  ;;  %s9201_s23 = sshll.u32 %s9932_s5, 4  ;;  %s9202_s23 = int_to_ptr.vmem [resolvable:$false] %s9201_s23 }
 0x308   : > { %s9203_s27 = scalar_lea.vmem %s9202_s23, 6144  ;;  %p9204_p0 = scmp.lt.s32.totalorder %s10835_s29, %s9202_s23 }
 0x309   : > { %p9199_p5 = pnand %p9198_p1, %p12334_p12  ;;  %p9205_p6 = scmp.lt.s32.totalorder %s9203_s27, %s9197_s28 }
 0x30b   : > { %p9200_p10 = pneg %p9199_p5  ;;  %p9206_p13 = por %p9205_p6, %p9204_p0 }
 0x30d   : > { %p9207_p2 = pnand %p9206_p13, %p9200_p10 }
 0x30f   : > { %9210 = shalt.err (!%p9207_p2)
}
 0x310   : > { %s12349_s11 = smov 12   ;;  %s12350_s9 = smov 192  }
 0x311   : > { %s12351_s1 = sld [smem:[#allocation97_spill]]  ;;  %s12353_s28 = smul.u32 3, %s10657_s15 }
 0x312   : > { %7824 = dma.hbm_to_vmem [thread:$0]  (%p12334_p12), %s10831_s3, 3072, %s10835_s29, %s10671_s17, %s12350_s9, %s12350_s9, %s12349_s11  }
 0x313   : > { %s1726_s5 = scalar_lea.vmem [#allocation23], %s12353_s28  ;;  %s12354_s27 = sshll.u32 %s9849_s19, 10 }
 0x314   : > { %s1734_s23 = sshll.u32 %s1726_s5, 4  ;;  %s9211_s14 = scalar_lea.hbm %s10840_s4, 48  ;;  %s1735_s23 = int_to_ptr.vmem [resolvable:$true] %s1734_s23 }
 0x315   : > { %p9212_p9 = scmp.ne.s32.totalorder %s10840_s4, %s9211_s14  ;;  %s9215_s0 = scalar_lea.hbm %s12345_s7, 192 }
 0x316   : > { %p9216_p3 = scmp.lt.u32.totalorder %s10840_s4, %s12345_s7  ;;  %p9217_p4 = scmp.lt.u32.totalorder %s9215_s0, %s9211_s14 }
 0x317   : > { %s12352_s20 = smov %s12351_s1  ;;  %s10868_s24 = scalar_lea.hbm %s12351_s1, %s12354_s27 }
 0x318   : > { %p9213_p8 = pnand %p9212_p9, %p12334_p12  ;;  %p9218_p11 = por %p9217_p4, %p9216_p3 }
 0x319   : > { %p9219_p1 = scmp.lt.u32.totalorder %s9211_s14, %s10840_s4 }
 0x31a   : > { %p9214_p7 = pneg %p9213_p8 }
 0x31b   : > { %p9220_p5 = por %p9219_p1, %p9218_p11 }
 0x31d   : > { %p9221_p10 = pnand %p9220_p5, %p9214_p7 }
 0x31f   : > { %9224 = shalt.err (!%p9221_p10)
}
 0x320   : > { %s9225_s29 = scalar_lea.vmem %s1735_s23, 48  ;;  %s9933_s3 = smov [#allocation23]  }
 0x321   : > { %p9226_p0 = scmp.ne.s32.totalorder %s1735_s23, %s9225_s29  ;;  %s9229_s11 = sshll.u32 %s9933_s3, 4  ;;  %s9230_s11 = int_to_ptr.vmem [resolvable:$false] %s9229_s11 }
 0x322   : > { %s9231_s9 = scalar_lea.vmem %s9230_s11, 96  ;;  %p9232_p2 = scmp.lt.s32.totalorder %s1735_s23, %s9230_s11 }
 0x323   : > { %p9227_p6 = pnand %p9226_p0, %p12334_p12  ;;  %p9233_p9 = scmp.lt.s32.totalorder %s9231_s9, %s9225_s29 }
 0x325   : > { %p9228_p13 = pneg %p9227_p6  ;;  %p9234_p8 = por %p9233_p9, %p9232_p2 }
 0x327   : > { %p9235_p3 = pnand %p9234_p8, %p9228_p13 }
 0x329   : > { %9238 = shalt.err (!%p9235_p3)
}
 0x32a   : > { %s12355_s14 = sld [smem:[#allocation98_spill]]  ;;  %s12356_s0 = sshll.u32 %s10657_s15, 6 }
 0x32b   : > { %7825 = dma.hbm_to_vmem [thread:$0]  (%p12334_p12), %s10840_s4, 48, %s1735_s23, %s10671_s17  }
 0x32c   : > { %s1745_s1 = scalar_lea.vmem [#allocation24], %s12356_s0  ;;  %s9239_s27 = scalar_lea.hbm %s10868_s24, 1024 }
 0x32d   : > { %s1752_s28 = sshll.u32 %s1745_s1, 4  ;;  %p9240_p7 = scmp.ne.s32.totalorder %s10868_s24, %s9239_s27  ;;  %s10886_s28 = int_to_ptr.vmem [resolvable:$true] %s1752_s28 }
 0x32e   : > { %s9243_s29 = scalar_lea.hbm %s12352_s20, 4096  ;;  %p9244_p1 = scmp.lt.u32.totalorder %s10868_s24, %s12352_s20 }
 0x32f   : > { %p9241_p4 = pnand %p9240_p7, %p12334_p12  ;;  %p9245_p5 = scmp.lt.u32.totalorder %s9243_s29, %s9239_s27 }
 0x330   : > { %s10890_s5 = scalar_lea.hbm %s12355_s14, %s10742_s21  ;;  %p9247_p0 = scmp.lt.u32.totalorder %s9239_s27, %s10868_s24 }
 0x331   : > { %p9242_p11 = pneg %p9241_p4  ;;  %p9246_p10 = por %p9245_p5, %p9244_p1 }
 0x333   : > { %p9248_p6 = por %p9247_p0, %p9246_p10 }
 0x335   : > { %p9249_p13 = pnand %p9248_p6, %p9242_p11 }
 0x337   : > { %9252 = shalt.err (!%p9249_p13)
}
 0x338   : > { %s9253_s4 = scalar_lea.vmem %s10886_s28, 1024  ;;  %s9934_s23 = smov [#allocation24]  }
 0x339   : > { %p9254_p2 = scmp.ne.s32.totalorder %s10886_s28, %s9253_s4  ;;  %s9257_s3 = sshll.u32 %s9934_s23, 4  ;;  %s9258_s3 = int_to_ptr.vmem [resolvable:$false] %s9257_s3 }
 0x33a   : > { %s9259_s11 = scalar_lea.vmem %s9258_s3, 2048  ;;  %p9260_p3 = scmp.lt.s32.totalorder %s10886_s28, %s9258_s3 }
 0x33b   : > { %p9255_p9 = pnand %p9254_p2, %p12334_p12  ;;  %p9261_p7 = scmp.lt.s32.totalorder %s9259_s11, %s9253_s4 }
 0x33d   : > { %p9256_p8 = pneg %p9255_p9  ;;  %p9262_p4 = por %p9261_p7, %p9260_p3 }
 0x33f   : > { %p9263_p1 = pnand %p9262_p4, %p9256_p8 }
 0x341   : > { %9266 = shalt.err (!%p9263_p1)
}
 0x342   : > { %s12357_s9 = sld [smem:[#allocation99_spill]]  ;;  %s1765_s0 = scalar_lea.vmem [#allocation25], %s10657_s15 }
 0x343   : > { %7826 = dma.hbm_to_vmem [thread:$0]  (%p12334_p12), %s10868_s24, 1024, %s10886_s28, %s10671_s17, %s12343_s25, %s12343_s25, %s12342_s12  }
 0x344   : > { %s1772_s1 = sshll.u32 %s1765_s0, 4  ;;  %s9267_s29 = scalar_lea.hbm %s10890_s5, 16  ;;  %s1773_s1 = int_to_ptr.vmem [resolvable:$true] %s1772_s1 }
 0x345   : > { %p9268_p11 = scmp.ne.s32.totalorder %s10890_s5, %s9267_s29  ;;  %s9271_s4 = scalar_lea.hbm %s12355_s14, 64 }
 0x346   : > { %p9272_p0 = scmp.lt.u32.totalorder %s10890_s5, %s12355_s14  ;;  %p9273_p6 = scmp.lt.u32.totalorder %s9271_s4, %s9267_s29 }
 0x347   : > { %p9269_p5 = pnand %p9268_p11, %p12334_p12  ;;  %p9275_p2 = scmp.lt.u32.totalorder %s9267_s29, %s10890_s5 }
 0x348   : > { %s10916_s27 = scalar_lea.hbm %s12357_s9, %s10742_s21  ;;  %p9274_p13 = por %p9273_p6, %p9272_p0 }
 0x349   : > { %p9270_p10 = pneg %p9269_p5 }
 0x34a   : > { %p9276_p9 = por %p9275_p2, %p9274_p13 }
 0x34c   : > { %p9277_p8 = pnand %p9276_p9, %p9270_p10 }
 0x34e   : > { %9280 = shalt.err (!%p9277_p8)
}
 0x34f   : > { %s9281_s23 = scalar_lea.vmem %s1773_s1, 16  ;;  %s9935_s24 = smov [#allocation25]  }
 0x350   : > { %p9282_p3 = scmp.ne.s32.totalorder %s1773_s1, %s9281_s23  ;;  %s9285_s28 = sshll.u32 %s9935_s24, 4  ;;  %s9286_s28 = int_to_ptr.vmem [resolvable:$false] %s9285_s28 }
 0x351   : > { %s9287_s3 = scalar_lea.vmem %s9286_s28, 32  ;;  %p9288_p1 = scmp.lt.s32.totalorder %s1773_s1, %s9286_s28 }
 0x352   : > { %p9283_p7 = pnand %p9282_p3, %p12334_p12  ;;  %p9289_p11 = scmp.lt.s32.totalorder %s9287_s3, %s9281_s23 }
 0x354   : > { %p9284_p4 = pneg %p9283_p7  ;;  %p9290_p5 = por %p9289_p11, %p9288_p1 }
 0x356   : > { %p9291_p0 = pnand %p9290_p5, %p9284_p4 }
 0x358   : > { %9294 = shalt.err (!%p9291_p0)
}
 0x359   : > { %s12358_s11 = sld [smem:[#allocation100_spill]]  ;;  %s1782_s0 = scalar_lea.vmem [#allocation26], %s10657_s15 }
 0x35a   : > { %7827 = dma.hbm_to_vmem [thread:$0]  (%p12334_p12), %s10890_s5, 16, %s1773_s1, %s10671_s17  }
 0x35b   : > { %s1789_s4 = sshll.u32 %s1782_s0, 4  ;;  %s9295_s24 = scalar_lea.hbm %s10916_s27, 16  ;;  %s1790_s4 = int_to_ptr.vmem [resolvable:$true] %s1789_s4 }
 0x35c   : > { %p9296_p10 = scmp.ne.s32.totalorder %s10916_s27, %s9295_s24  ;;  %s9299_s28 = scalar_lea.hbm %s12357_s9, 64 }
 0x35d   : > { %p9300_p2 = scmp.lt.u32.totalorder %s10916_s27, %s12357_s9  ;;  %p9301_p9 = scmp.lt.u32.totalorder %s9299_s28, %s9295_s24 }
 0x35e   : > { %p9297_p6 = pnand %p9296_p10, %p12334_p12  ;;  %p9303_p3 = scmp.lt.u32.totalorder %s9295_s24, %s10916_s27 }
 0x35f   : > { %s12359_s29 = smov %s12358_s11  ;;  %s10935_s23 = scalar_lea.hbm %s12358_s11, %s10742_s21 }
 0x360   : > { %p9298_p13 = pneg %p9297_p6  ;;  %p9302_p8 = por %p9301_p9, %p9300_p2 }
 0x362   : > { %p9304_p7 = por %p9303_p3, %p9302_p8 }
 0x364   : > { %p9305_p4 = pnand %p9304_p7, %p9298_p13 }
 0x366   : > { %9308 = shalt.err (!%p9305_p4)
}
 0x367   : > { %s9309_s3 = scalar_lea.vmem %s1790_s4, 16  ;;  %s9936_s5 = smov [#allocation26]  }
 0x368   : > { %p9310_p1 = scmp.ne.s32.totalorder %s1790_s4, %s9309_s3  ;;  %s9313_s1 = sshll.u32 %s9936_s5, 4  ;;  %s9314_s1 = int_to_ptr.vmem [resolvable:$false] %s9313_s1 }
 0x369   : > { %s9315_s11 = scalar_lea.vmem %s9314_s1, 32  ;;  %p9316_p0 = scmp.lt.s32.totalorder %s1790_s4, %s9314_s1 }
 0x36a   : > { %p9311_p11 = pnand %p9310_p1, %p12334_p12  ;;  %p9317_p10 = scmp.lt.s32.totalorder %s9315_s11, %s9309_s3 }
 0x36c   : > { %p9312_p5 = pneg %p9311_p11  ;;  %p9318_p6 = por %p9317_p10, %p9316_p0 }
 0x36e   : > { %p9319_p2 = pnand %p9318_p6, %p9312_p5 }
 0x370   : > { %9322 = shalt.err (!%p9319_p2)
}
 0x371   : > { %s12360_s0 = sld [smem:[#allocation101_spill]]  ;;  %s1799_s24 = scalar_lea.vmem [#allocation27], %s10657_s15 }
 0x372   : > { %7828 = dma.hbm_to_vmem [thread:$0]  (%p12334_p12), %s10916_s27, 16, %s1790_s4, %s10671_s17  }
 0x373   : > { %s1806_s3 = sshll.u32 %s1799_s24, 4  ;;  %s9323_s1 = scalar_lea.hbm %s10935_s23, 16  ;;  %s1807_s3 = int_to_ptr.vmem [resolvable:$true] %s1806_s3 }
 0x374   : > { %p9324_p13 = scmp.ne.s32.totalorder %s10935_s23, %s9323_s1  ;;  %s9327_s11 = scalar_lea.hbm %s12359_s29, 64 }
 0x375   : > { %p9328_p3 = scmp.lt.u32.totalorder %s10935_s23, %s12359_s29  ;;  %p9329_p7 = scmp.lt.u32.totalorder %s9327_s11, %s9323_s1 }
 0x376   : > { %p9325_p9 = pnand %p9324_p13, %p12334_p12  ;;  %p9331_p1 = scmp.lt.u32.totalorder %s9323_s1, %s10935_s23 }
 0x377   : > { %s12361_s28 = smov %s12360_s0  ;;  %s10954_s5 = scalar_lea.hbm %s12360_s0, %s10798_s8 }
 0x378   : > { %p9326_p8 = pneg %p9325_p9  ;;  %p9330_p4 = por %p9329_p7, %p9328_p3 }
 0x37a   : > { %p9332_p11 = por %p9331_p1, %p9330_p4 }
 0x37c   : > { %p9333_p5 = pnand %p9332_p11, %p9326_p8 }
 0x37e   : > { %9336 = shalt.err (!%p9333_p5)
}
 0x37f   : > { %s9337_s7 = scalar_lea.vmem %s1807_s3, 16  ;;  %s9937_s27 = smov [#allocation27]  }
 0x380   : > { %p9338_p0 = scmp.ne.s32.totalorder %s1807_s3, %s9337_s7  ;;  %s9341_s4 = sshll.u32 %s9937_s27, 4  ;;  %s9342_s4 = int_to_ptr.vmem [resolvable:$false] %s9341_s4 }
 0x381   : > { %s9343_s0 = scalar_lea.vmem %s9342_s4, 32  ;;  %p9344_p2 = scmp.lt.s32.totalorder %s1807_s3, %s9342_s4 }
 0x382   : > { %p9339_p10 = pnand %p9338_p0, %p12334_p12  ;;  %p9345_p13 = scmp.lt.s32.totalorder %s9343_s0, %s9337_s7 }
 0x384   : > { %p9340_p6 = pneg %p9339_p10  ;;  %p9346_p9 = por %p9345_p13, %p9344_p2 }
 0x386   : > { %p9347_p3 = pnand %p9346_p9, %p9340_p6 }
 0x388   : > { %9350 = shalt.err (!%p9347_p3)
}
 0x389   : > { %7829 = dma.hbm_to_vmem [thread:$0]  (%p12334_p12), %s10935_s23, 16, %s1807_s3, %s10671_s17  }
 0x38a   : > { %s1817_s24 = scalar_lea.vmem [#allocation28], %s10781_s30  ;;  %s9351_s7 = scalar_lea.hbm %s10954_s5, 2048 }
 0x38b   : > { %s1824_s1 = sshll.u32 %s1817_s24, 4  ;;  %p9352_p8 = scmp.ne.s32.totalorder %s10954_s5, %s9351_s7  ;;  %s10971_s1 = int_to_ptr.vmem [resolvable:$true] %s1824_s1 }
 0x38c   : > { %s9355_s11 = scalar_lea.hbm %s12361_s28, 8192  ;;  %p9356_p1 = scmp.lt.u32.totalorder %s10954_s5, %s12361_s28 }
 0x38d   : > { %p9353_p7 = pnand %p9352_p8, %p12334_p12  ;;  %p9357_p11 = scmp.lt.u32.totalorder %s9355_s11, %s9351_s7 }
 0x38e   : > { %p9359_p0 = scmp.lt.u32.totalorder %s9351_s7, %s10954_s5 }
 0x38f   : > { %p9354_p4 = pneg %p9353_p7  ;;  %p9358_p5 = por %p9357_p11, %p9356_p1 }
 0x391   : > { %p9360_p10 = por %p9359_p0, %p9358_p5 }
 0x393   : > { %p9361_p6 = pnand %p9360_p10, %p9354_p4 }
 0x395   : > { %9364 = shalt.err (!%p9361_p6)
}
 0x396   : > { %s9365_s23 = scalar_lea.vmem %s10971_s1, 2048  ;;  %s9938_s3 = smov [#allocation28]  }
 0x397   : > { %p9366_p2 = scmp.ne.s32.totalorder %s10971_s1, %s9365_s23  ;;  %s9369_s27 = sshll.u32 %s9938_s3, 4  ;;  %s9370_s27 = int_to_ptr.vmem [resolvable:$false] %s9369_s27 }
 0x398   : > { %s9371_s4 = scalar_lea.vmem %s9370_s27, 4096  ;;  %p9372_p3 = scmp.lt.s32.totalorder %s10971_s1, %s9370_s27 }
 0x399   : > { %p9367_p13 = pnand %p9366_p2, %p12334_p12  ;;  %p9373_p8 = scmp.lt.s32.totalorder %s9371_s4, %s9365_s23 }
 0x39b   : > { %p9368_p9 = pneg %p9367_p13  ;;  %p9374_p7 = por %p9373_p8, %p9372_p3 }
 0x39d   : > { %p9375_p1 = pnand %p9374_p7, %p9368_p9 }
 0x39f   : > { %9378 = shalt.err (!%p9375_p1)
}
 0x3a0   : > { %s12203_s0 = smov 128   ;;  %s12362_s24 = sld [smem:[#allocation102_spill]] }
 0x3a1   : > { %s12364_s11 = sld [smem:[#allocation103_spill]]  ;;  %s12205_s3 = smov 8  }
 0x3a2   : > { %7830 = dma.hbm_to_vmem [thread:$0]  (%p12334_p12), %s10954_s5, 2048, %s10971_s1, %s10671_s17, %s12203_s0, %s12203_s0, %s12205_s3  }
 0x3a3   : > { %s7042_s23 = sshll.u32 %s10657_s15, 1  ;;  %s7346_s27 = sshll.u32 %s9849_s19, 5 }
 0x3a4   : > { %s1838_s14 = scalar_lea.vmem [#allocation29], %s7042_s23 }
 0x3a5   : > { %s1846_s20 = sshll.u32 %s1838_s14, 4  ;;  %s1847_s20 = int_to_ptr.vmem [resolvable:$true] %s1846_s20 }
 0x3a6   : > { %s12363_s7 = smov %s12362_s24  ;;  %s10997_s4 = scalar_lea.hbm %s12362_s24, %s7346_s27 }
 0x3a7   : > { %s12365_s9 = smov %s12364_s11  ;;  %s11001_s28 = scalar_lea.hbm %s12364_s11, %s10798_s8 }
 0x3a8   : > { %s9379_s29 = scalar_lea.hbm %s10997_s4, 32  ;;  %s9383_s13 = scalar_lea.hbm %s12363_s7, 128 }
 0x3a9   : > { %p9380_p4 = scmp.ne.s32.totalorder %s10997_s4, %s9379_s29  ;;  %p9384_p0 = scmp.lt.u32.totalorder %s10997_s4, %s12363_s7 }
 0x3aa   : > { %p9385_p10 = scmp.lt.u32.totalorder %s9383_s13, %s9379_s29  ;;  %p9387_p2 = scmp.lt.u32.totalorder %s9379_s29, %s10997_s4 }
 0x3ab   : > { %p9381_p11 = pnand %p9380_p4, %p12334_p12 }
 0x3ac   : > { %p9386_p6 = por %p9385_p10, %p9384_p0 }
 0x3ad   : > { %p9382_p5 = pneg %p9381_p11 }
 0x3ae   : > { %p9388_p13 = por %p9387_p2, %p9386_p6 }
 0x3b0   : > { %p9389_p9 = pnand %p9388_p13, %p9382_p5 }
 0x3b2   : > { %9392 = shalt.err (!%p9389_p9)
}
 0x3b3   : > { %s9393_s5 = scalar_lea.vmem %s1847_s20, 32  ;;  %s9941_s8 = smov [#allocation29]  }
 0x3b4   : > { %p9394_p3 = scmp.ne.s32.totalorder %s1847_s20, %s9393_s5  ;;  %s9397_s14 = sshll.u32 %s9941_s8, 4  ;;  %s9398_s14 = int_to_ptr.vmem [resolvable:$false] %s9397_s14 }
 0x3b5   : > { %s9399_s1 = scalar_lea.vmem %s9398_s14, 64  ;;  %p9400_p1 = scmp.lt.s32.totalorder %s1847_s20, %s9398_s14 }
 0x3b6   : > { %p9395_p8 = pnand %p9394_p3, %p12334_p12  ;;  %p9401_p4 = scmp.lt.s32.totalorder %s9399_s1, %s9393_s5 }
 0x3b8   : > { %p9396_p7 = pneg %p9395_p8  ;;  %p9402_p11 = por %p9401_p4, %p9400_p1 }
 0x3ba   : > { %p9403_p0 = pnand %p9402_p11, %p9396_p7 }
 0x3bc   : > { %9406 = shalt.err (!%p9403_p0)
}
 0x3bd   : > { %s12366_s13 = sld [smem:[#allocation104_spill]]  ;;  %s1857_s24 = scalar_lea.vmem [#allocation30], %s10781_s30 }
 0x3be   : > { %7831 = dma.hbm_to_vmem [thread:$0]  (%p12334_p12), %s10997_s4, 32, %s1847_s20, %s10671_s17  }
 0x3bf   : > { %s1864_s11 = sshll.u32 %s1857_s24, 4  ;;  %s9407_s27 = scalar_lea.hbm %s11001_s28, 2048  ;;  %s11018_s11 = int_to_ptr.vmem [resolvable:$true] %s1864_s11 }
 0x3c0   : > { %p9408_p5 = scmp.ne.s32.totalorder %s11001_s28, %s9407_s27  ;;  %s9411_s5 = scalar_lea.hbm %s12365_s9, 8192 }
 0x3c1   : > { %p9412_p2 = scmp.lt.u32.totalorder %s11001_s28, %s12365_s9  ;;  %p9413_p13 = scmp.lt.u32.totalorder %s9411_s5, %s9407_s27 }
 0x3c2   : > { %p9409_p10 = pnand %p9408_p5, %p12334_p12  ;;  %p9415_p3 = scmp.lt.u32.totalorder %s9407_s27, %s11001_s28 }
 0x3c3   : > { %s12367_s29 = smov %s12366_s13  ;;  %s11022_s23 = scalar_lea.hbm %s12366_s13, %s10742_s21 }
 0x3c4   : > { %p9410_p6 = pneg %p9409_p10  ;;  %p9414_p9 = por %p9413_p13, %p9412_p2 }
 0x3c6   : > { %p9416_p8 = por %p9415_p3, %p9414_p9 }
 0x3c8   : > { %p9417_p7 = pnand %p9416_p8, %p9410_p6 }
 0x3ca   : > { %9420 = shalt.err (!%p9417_p7)
}
 0x3cb   : > { %s9421_s30 = scalar_lea.vmem %s11018_s11, 2048  ;;  %s9942_s20 = smov [#allocation30]  }
 0x3cc   : > { %p9422_p1 = scmp.ne.s32.totalorder %s11018_s11, %s9421_s30  ;;  %s9425_s4 = sshll.u32 %s9942_s20, 4  ;;  %s9426_s4 = int_to_ptr.vmem [resolvable:$false] %s9425_s4 }
 0x3cd   : > { %s9427_s8 = scalar_lea.vmem %s9426_s4, 4096  ;;  %p9428_p0 = scmp.lt.s32.totalorder %s11018_s11, %s9426_s4 }
 0x3ce   : > { %p9423_p4 = pnand %p9422_p1, %p12334_p12  ;;  %p9429_p5 = scmp.lt.s32.totalorder %s9427_s8, %s9421_s30 }
 0x3d0   : > { %p9424_p11 = pneg %p9423_p4  ;;  %p9430_p10 = por %p9429_p5, %p9428_p0 }
 0x3d2   : > { %p9431_p2 = pnand %p9430_p10, %p9424_p11 }
 0x3d4   : > { %9434 = shalt.err (!%p9431_p2)
}
 0x3d5   : > { %s12368_s14 = sld [smem:[#allocation105_spill]]  ;;  %s1877_s1 = scalar_lea.vmem [#allocation31], %s10657_s15 }
 0x3d6   : > { %7832 = dma.hbm_to_vmem [thread:$0]  (%p12334_p12), %s11001_s28, 2048, %s11018_s11, %s10671_s17, %s12343_s25, %s12343_s25, %s12342_s12  }
 0x3d7   : > { %s1884_s13 = sshll.u32 %s1877_s1, 4  ;;  %s9435_s27 = scalar_lea.hbm %s11022_s23, 16  ;;  %s1885_s13 = int_to_ptr.vmem [resolvable:$true] %s1884_s13 }
 0x3d8   : > { %p9436_p6 = scmp.ne.s32.totalorder %s11022_s23, %s9435_s27  ;;  %s9439_s5 = scalar_lea.hbm %s12367_s29, 64 }
 0x3d9   : > { %p9440_p3 = scmp.lt.u32.totalorder %s11022_s23, %s12367_s29  ;;  %p9441_p8 = scmp.lt.u32.totalorder %s9439_s5, %s9435_s27 }
 0x3da   : > { %p9437_p13 = pnand %p9436_p6, %p12334_p12  ;;  %p9443_p1 = scmp.lt.u32.totalorder %s9435_s27, %s11022_s23 }
 0x3db   : > { %s11048_s24 = scalar_lea.hbm %s12368_s14, %s10742_s21  ;;  %p9442_p7 = por %p9441_p8, %p9440_p3 }
 0x3dc   : > { %p9438_p9 = pneg %p9437_p13 }
 0x3dd   : > { %p9444_p4 = por %p9443_p1, %p9442_p7 }
 0x3df   : > { %p9445_p11 = pnand %p9444_p4, %p9438_p9 }
 0x3e1   : > { %9448 = shalt.err (!%p9445_p11)
}
 0x3e2   : > { %s9449_s30 = scalar_lea.vmem %s1885_s13, 16  ;;  %s9943_s12 = smov [#allocation31]  }
 0x3e3   : > { %p9450_p0 = scmp.ne.s32.totalorder %s1885_s13, %s9449_s30  ;;  %s9453_s25 = sshll.u32 %s9943_s12, 4  ;;  %s9454_s25 = int_to_ptr.vmem [resolvable:$false] %s9453_s25 }
 0x3e4   : > { %s9455_s28 = scalar_lea.vmem %s9454_s25, 32  ;;  %p9456_p2 = scmp.lt.s32.totalorder %s1885_s13, %s9454_s25 }
 0x3e5   : > { %p9451_p5 = pnand %p9450_p0, %p12334_p12  ;;  %p9457_p6 = scmp.lt.s32.totalorder %s9455_s28, %s9449_s30 }
 0x3e7   : > { %p9452_p10 = pneg %p9451_p5  ;;  %p9458_p13 = por %p9457_p6, %p9456_p2 }
 0x3e9   : > { %p9459_p3 = pnand %p9458_p13, %p9452_p10 }
 0x3eb   : > { %9462 = shalt.err (!%p9459_p3)
}
 0x3ec   : > { %s12369_s11 = sld [smem:[#allocation106_spill]]  ;;  %s1894_s4 = scalar_lea.vmem [#allocation32], %s10657_s15 }
 0x3ed   : > { %7833 = dma.hbm_to_vmem [thread:$0]  (%p12334_p12), %s11022_s23, 16, %s1885_s13, %s10671_s17  }
 0x3ee   : > { %s1901_s8 = sshll.u32 %s1894_s4, 4  ;;  %s9463_s27 = scalar_lea.hbm %s11048_s24, 16  ;;  %s1902_s8 = int_to_ptr.vmem [resolvable:$true] %s1901_s8 }
 0x3ef   : > { %p9464_p9 = scmp.ne.s32.totalorder %s11048_s24, %s9463_s27  ;;  %s9467_s5 = scalar_lea.hbm %s12368_s14, 64 }
 0x3f0   : > { %p9468_p1 = scmp.lt.u32.totalorder %s11048_s24, %s12368_s14  ;;  %p9469_p4 = scmp.lt.u32.totalorder %s9467_s5, %s9463_s27 }
 0x3f1   : > { %p9465_p8 = pnand %p9464_p9, %p12334_p12  ;;  %p9471_p0 = scmp.lt.u32.totalorder %s9463_s27, %s11048_s24 }
 0x3f2   : > { %s12370_s20 = smov %s12369_s11  ;;  %s11067_s1 = scalar_lea.hbm %s12369_s11, %s10742_s21 }
 0x3f3   : > { %p9466_p7 = pneg %p9465_p8  ;;  %p9470_p11 = por %p9469_p4, %p9468_p1 }
 0x3f5   : > { %p9472_p5 = por %p9471_p0, %p9470_p11 }
 0x3f7   : > { %p9473_p10 = pnand %p9472_p5, %p9466_p7 }
 0x3f9   : > { %9476 = shalt.err (!%p9473_p10)
}
 0x3fa   : > { %s9477_s30 = scalar_lea.vmem %s1902_s8, 16  ;;  %s9944_s21 = smov [#allocation32]  }
 0x3fb   : > { %p9478_p2 = scmp.ne.s32.totalorder %s1902_s8, %s9477_s30  ;;  %s9481_s23 = sshll.u32 %s9944_s21, 4  ;;  %s9482_s23 = int_to_ptr.vmem [resolvable:$false] %s9481_s23 }
 0x3fc   : > { %s9483_s13 = scalar_lea.vmem %s9482_s23, 32  ;;  %p9484_p3 = scmp.lt.s32.totalorder %s1902_s8, %s9482_s23 }
 0x3fd   : > { %p9479_p6 = pnand %p9478_p2, %p12334_p12  ;;  %p9485_p9 = scmp.lt.s32.totalorder %s9483_s13, %s9477_s30 }
 0x3ff   : > { %p9480_p13 = pneg %p9479_p6  ;;  %p9486_p8 = por %p9485_p9, %p9484_p3 }
 0x401   : > { %p9487_p1 = pnand %p9486_p8, %p9480_p13 }
 0x403   : > { %9490 = shalt.err (!%p9487_p1)
}
 0x404   : > { %7834 = dma.hbm_to_vmem [thread:$0]  (%p12334_p12), %s11048_s24, 16, %s1902_s8, %s10671_s17  }
 0x405   : > { %s1911_s12 = scalar_lea.vmem [#allocation33], %s10657_s15  ;;  %s1927_s28 = sand.u32 1, %s9833_s26  }
 0x406   : > { %s1918_s25 = sshll.u32 %s1911_s12, 4  ;;  %s11085_s11 = sshll.u32 %s1927_s28, 7  ;;  %s1919_s25 = int_to_ptr.vmem [resolvable:$true] %s1918_s25 }
 0x407   : > { %s9491_s4 = scalar_lea.hbm %s11067_s1, 16  ;;  %s9495_s27 = scalar_lea.hbm %s12370_s20, 64 }
 0x408   : > { %p9492_p7 = scmp.ne.s32.totalorder %s11067_s1, %s9491_s4  ;;  %p9496_p0 = scmp.lt.u32.totalorder %s11067_s1, %s12370_s20 }
 0x409   : > { %p9497_p5 = scmp.lt.u32.totalorder %s9495_s27, %s9491_s4  ;;  %p9499_p2 = scmp.lt.u32.totalorder %s9491_s4, %s11067_s1 }
 0x40a   : > { %p9493_p4 = pnand %p9492_p7, %p12334_p12 }
 0x40b   : > { %p9498_p10 = por %p9497_p5, %p9496_p0 }
 0x40c   : > { %p9494_p11 = pneg %p9493_p4 }
 0x40d   : > { %p9500_p6 = por %p9499_p2, %p9498_p10 }
 0x40f   : > { %p9501_p13 = pnand %p9500_p6, %p9494_p11 }
 0x411   : > { %9504 = shalt.err (!%p9501_p13)
}
 0x412   : > { %s9505_s24 = scalar_lea.vmem %s1919_s25, 16  ;;  %s9945_s15 = smov [#allocation33]  }
 0x413   : > { %p9506_p3 = scmp.ne.s32.totalorder %s1919_s25, %s9505_s24  ;;  %s9509_s8 = sshll.u32 %s9945_s15, 4  ;;  %s9510_s8 = int_to_ptr.vmem [resolvable:$false] %s9509_s8 }
 0x414   : > { %s9511_s5 = scalar_lea.vmem %s9510_s8, 32  ;;  %p9512_p1 = scmp.lt.s32.totalorder %s1919_s25, %s9510_s8 }
 0x415   : > { %p9507_p9 = pnand %p9506_p3, %p12334_p12  ;;  %p9513_p7 = scmp.lt.s32.totalorder %s9511_s5, %s9505_s24 }
 0x417   : > { %p9508_p8 = pneg %p9507_p9  ;;  %p9514_p4 = por %p9513_p7, %p9512_p1 }
 0x419   : > { %p9515_p0 = pnand %p9514_p4, %p9508_p8 }
 0x41b   : > { %9518 = shalt.err (!%p9515_p0)
}
 0x41c   : > { %s12371_s30 = sld [smem:[#allocation140_spill]]  ;;  %s1949_s21 = sand.u32 1, %s9821_s6  }
 0x41d   : > { %7835 = dma.hbm_to_vmem [thread:$0]  (%p12334_p12), %s11067_s1, 16, %s1919_s25, %s10671_s17  }
 0x41e   : > { %s12373_s13 = sld [smem:[#allocation107_spill]]  ;;  %s7054_s4 = sshll.u32 %s1949_s21, 1 }
 0x41f   : > { %s1929_s27 = scalar_lea.vmem [#allocation34], %s11085_s11  ;;  %s1969_s15 = sand.u32 1, %s9809_s16  }
 0x420   : > { %s1937_s24 = sshll.u32 %s1929_s27, 4  ;;  %p12375_p5 = scmp.ne.s32.totalorder %s12297_s22, 0  ;;  %s11116_s24 = int_to_ptr.vmem [resolvable:$true] %s1937_s24 }
 0x421   : > { %s1951_s0 = scalar_lea.vmem [#allocation35], %s7054_s4  ;;  %s11114_s25 = sshll.u32 %s1969_s15, 7 }
 0x422   : > { %p12372_p11 = scmp.ne.s32.totalorder %s12371_s30, 0  ;;  %s1960_s1 = sshll.u32 %s1951_s0, 4  ;;  %s11120_s1 = int_to_ptr.vmem [resolvable:$true] %s1960_s1 }
 0x423   : > { %s7839_s8 = scalar_select %p12375_p5, [#allocation6], [#allocation56] }
 0x424   : > { %s7836_s23 = scalar_select %p12372_p11, [#allocation6], [#allocation55] }
 0x425   : > { %s12374_s12 = smov %s12373_s13 }
 0x426   : > { %s7837_s28 = scalar_select %p12372_p11, %s9849_s19, 0 }
 0x427   : > { %s7840_s5 = scalar_select %p12375_p5, %s9849_s19, 0 }
 0x428   : > { %s1930_s18 = sld [smem:[%s7836_s23 + %s7837_s28]]  ;;  %s9523_s0 = scalar_lea.hbm %s12374_s12, 6144 }
 0x429   : > { %s11118_s3 = sld [smem:[%s7839_s8 + %s7840_s5]] }
 0x42e   : > { %s7348_s21 = sshll.u32 %s1930_s18, 11 }
 0x42f   : > { %s11123_s11 = scalar_lea.hbm %s12373_s13, %s7348_s21 }
 0x430   : > { %s9519_s23 = scalar_lea.hbm %s11123_s11, 2048  ;;  %p9524_p6 = scmp.lt.u32.totalorder %s11123_s11, %s12374_s12 }
 0x431   : > { %p9520_p12 = scmp.ne.s32.totalorder %s11123_s11, %s9519_s23  ;;  %p9525_p13 = scmp.lt.u32.totalorder %s9523_s0, %s9519_s23 }
 0x432   : > { %p9527_p9 = scmp.lt.u32.totalorder %s9519_s23, %s11123_s11 }
 0x433   : > { %p9521_p10 = pnand %p9520_p12, %p12372_p11  ;;  %p9526_p3 = por %p9525_p13, %p9524_p6 }
 0x435   : > { %p9522_p2 = pneg %p9521_p10  ;;  %p9528_p8 = por %p9527_p9, %p9526_p3 }
 0x437   : > { %p9529_p1 = pnand %p9528_p8, %p9522_p2 }
 0x439   : > { %9532 = shalt.err (!%p9529_p1)
}
 0x43a   : > { %s9533_s13 = scalar_lea.vmem %s11116_s24, 2048  ;;  %s9946_s28 = smov [#allocation34]  }
 0x43b   : > { %p9534_p7 = scmp.ne.s32.totalorder %s11116_s24, %s9533_s13  ;;  %s9537_s4 = sshll.u32 %s9946_s28, 4  ;;  %s9538_s4 = int_to_ptr.vmem [resolvable:$false] %s9537_s4 }
 0x43c   : > { %s9539_s18 = scalar_lea.vmem %s9538_s4, 4096  ;;  %p9540_p12 = scmp.lt.s32.totalorder %s11116_s24, %s9538_s4 }
 0x43d   : > { %p9535_p4 = pnand %p9534_p7, %p12372_p11  ;;  %p9541_p10 = scmp.lt.s32.totalorder %s9539_s18, %s9533_s13 }
 0x43f   : > { %p9536_p0 = pneg %p9535_p4  ;;  %p9542_p6 = por %p9541_p10, %p9540_p12 }
 0x441   : > { %p9543_p13 = pnand %p9542_p6, %p9536_p0 }
 0x443   : > { %9546 = shalt.err (!%p9543_p13)
}
 0x444   : > { %s12376_s27 = smov 8   ;;  %s12377_s15 = smov 128  }
 0x445   : > { %s12378_s8 = sld [smem:[#allocation108_spill]]  ;;  %p12380_p2 = scmp.ne.s32.totalorder %s12302_s2, 0 }
 0x446   : > { %7838 = dma.hbm_to_vmem [thread:$0]  (%p12372_p11), %s11123_s11, 2048, %s11116_s24, %s10671_s17, %s12377_s15, %s12377_s15, %s12376_s27  }
 0x447   : > { %s7842_s5 = scalar_select %p12380_p2, [#allocation6], [#allocation57] }
 0x448   : > { %s7843_s30 = scalar_select %p12380_p2, %s9849_s19, 0 }
 0x449   : > { %s7349_s23 = sshll.u32 %s11118_s3, 5  ;;  %s1971_s0 = scalar_lea.vmem [#allocation36], %s11114_s25 }
 0x44a   : > { %s11153_s13 = sshll.u32 %s1971_s0, 4  ;;  %s11156_s4 = sld [smem:[%s7842_s5 + %s7843_s30]]  ;;  %s11172_s13 = int_to_ptr.vmem [resolvable:$true] %s11153_s13 }
 0x44b   : > { %s12379_s21 = smov %s12378_s8  ;;  %s1958_s28 = scalar_lea.hbm %s12378_s8, %s7349_s23 }
 0x44c   : > { %s9547_s18 = scalar_lea.hbm %s1958_s28, 32  ;;  %s9551_s7 = scalar_lea.hbm %s12379_s21, 96 }
 0x44d   : > { %p9548_p3 = scmp.ne.s32.totalorder %s1958_s28, %s9547_s18  ;;  %p9552_p1 = scmp.lt.u32.totalorder %s1958_s28, %s12379_s21 }
 0x44e   : > { %p9553_p7 = scmp.lt.u32.totalorder %s9551_s7, %s9547_s18  ;;  %p9555_p4 = scmp.lt.u32.totalorder %s9547_s18, %s1958_s28 }
 0x44f   : > { %p9549_p9 = pnand %p9548_p3, %p12375_p5 }
 0x450   : > { %p9554_p11 = por %p9553_p7, %p9552_p1 }
 0x451   : > { %p9550_p8 = pneg %p9549_p9 }
 0x452   : > { %p9556_p0 = por %p9555_p4, %p9554_p11 }
 0x454   : > { %p9557_p12 = pnand %p9556_p0, %p9550_p8 }
 0x456   : > { %9560 = shalt.err (!%p9557_p12)
}
 0x457   : > { %s9561_s3 = scalar_lea.vmem %s11120_s1, 32  ;;  %s9947_s24 = smov [#allocation35]  }
 0x458   : > { %p9562_p10 = scmp.ne.s32.totalorder %s11120_s1, %s9561_s3  ;;  %s9565_s25 = sshll.u32 %s9947_s24, 4  ;;  %s9566_s25 = int_to_ptr.vmem [resolvable:$false] %s9565_s25 }
 0x459   : > { %s9567_s11 = scalar_lea.vmem %s9566_s25, 64  ;;  %p9568_p3 = scmp.lt.s32.totalorder %s11120_s1, %s9566_s25 }
 0x45a   : > { %p9563_p6 = pnand %p9562_p10, %p12375_p5  ;;  %p9569_p9 = scmp.lt.s32.totalorder %s9567_s11, %s9561_s3 }
 0x45c   : > { %p9564_p13 = pneg %p9563_p6  ;;  %p9570_p1 = por %p9569_p9, %p9568_p3 }
 0x45e   : > { %p9571_p7 = pnand %p9570_p1, %p9564_p13 }
 0x460   : > { %9574 = shalt.err (!%p9571_p7)
}
 0x461   : > { %s12381_s7 = sld [smem:[#allocation147_spill]]  ;;  %s12382_s8 = sld [smem:[#allocation109_spill]] }
 0x462   : > { %7841 = dma.hbm_to_vmem [thread:$0]  (%p12375_p5), %s1958_s28, 32, %s11120_s1, %s10671_s17  }
 0x463   : > { %s1991_s5 = sand.u32 1, %s9797_s10   ;;  %s7350_s0 = sshll.u32 %s11156_s4, 11 }
 0x464   : > { %s11181_s22 = sshll.u32 %s1991_s5, 1 }
 0x467   : > { %s12383_s23 = smov %s12382_s8  ;;  %p12384_p8 = scmp.ne.s32.totalorder %s12381_s7, 0 }
 0x468   : > { %s11179_s18 = scalar_lea.hbm %s12382_s8, %s7350_s0  ;;  %s9579_s1 = scalar_lea.hbm %s12383_s23, 6144 }
 0x469   : > { %s7845_s30 = scalar_select %p12384_p8, [#allocation6], [#allocation58] }
 0x46a   : > { %s9575_s3 = scalar_lea.hbm %s11179_s18, 2048  ;;  %p9580_p5 = scmp.lt.u32.totalorder %s11179_s18, %s12383_s23 }
 0x46b   : > { %p9576_p11 = scmp.ne.s32.totalorder %s11179_s18, %s9575_s3  ;;  %p9581_p12 = scmp.lt.u32.totalorder %s9579_s1, %s9575_s3 }
 0x46c   : > { %p9583_p6 = scmp.lt.u32.totalorder %s9575_s3, %s11179_s18 }
 0x46d   : > { %p9577_p4 = pnand %p9576_p11, %p12380_p2  ;;  %p9582_p10 = por %p9581_p12, %p9580_p5 }
 0x46f   : > { %p9578_p0 = pneg %p9577_p4  ;;  %p9584_p13 = por %p9583_p6, %p9582_p10 }
 0x471   : > { %p9585_p3 = pnand %p9584_p13, %p9578_p0 }
 0x473   : > { %9588 = shalt.err (!%p9585_p3)
}
 0x474   : > { %s9589_s28 = scalar_lea.vmem %s11172_s13, 2048  ;;  %s9948_s4 = smov [#allocation36]  }
 0x475   : > { %p9590_p9 = scmp.ne.s32.totalorder %s11172_s13, %s9589_s28  ;;  %s9593_s24 = sshll.u32 %s9948_s4, 4  ;;  %s9594_s24 = int_to_ptr.vmem [resolvable:$false] %s9593_s24 }
 0x476   : > { %s9595_s25 = scalar_lea.vmem %s9594_s24, 4096  ;;  %p9596_p11 = scmp.lt.s32.totalorder %s11172_s13, %s9594_s24 }
 0x477   : > { %p9591_p1 = pnand %p9590_p9, %p12380_p2  ;;  %p9597_p4 = scmp.lt.s32.totalorder %s9595_s25, %s9589_s28 }
 0x479   : > { %p9592_p7 = pneg %p9591_p1  ;;  %p9598_p5 = por %p9597_p4, %p9596_p11 }
 0x47b   : > { %p9599_p12 = pnand %p9598_p5, %p9592_p7 }
 0x47d   : > { %9602 = shalt.err (!%p9599_p12)
}
 0x47e   : > { %s12385_s11 = sld [smem:[#allocation110_spill]]  ;;  %s12481_s19 = smov (!%p12384_p8, %s9849_s19), 0 }
 0x47f   : > { %7844 = dma.hbm_to_vmem [thread:$0]  (%p12380_p2), %s11179_s18, 2048, %s11172_s13, %s10671_s17, %s12377_s15, %s12377_s15, %s12376_s27  }
 0x480   : > { %s1994_s2 = sld [smem:[%s7845_s30 + %s12481_s19]]  ;;  %s1993_s8 = scalar_lea.vmem [#allocation37], %s11181_s22 }
 0x481   : > { %s2002_s5 = sshll.u32 %s1993_s8, 4  ;;  %s11211_s5 = int_to_ptr.vmem [resolvable:$true] %s2002_s5 }
 0x484   : > { %s12386_s3 = smov %s12385_s11 }
 0x485   : > { %s9607_s4 = scalar_lea.hbm %s12386_s3, 96 }
 0x486   : > { %s7351_s0 = sshll.u32 %s1994_s2, 5 }
 0x487   : > { %s2000_s1 = scalar_lea.hbm %s12385_s11, %s7351_s0 }
 0x488   : > { %s9603_s28 = scalar_lea.hbm %s2000_s1, 32  ;;  %p9608_p13 = scmp.lt.u32.totalorder %s2000_s1, %s12386_s3 }
 0x489   : > { %p9604_p0 = scmp.ne.s32.totalorder %s2000_s1, %s9603_s28  ;;  %p9609_p3 = scmp.lt.u32.totalorder %s9607_s4, %s9603_s28 }
 0x48a   : > { %p9611_p9 = scmp.lt.u32.totalorder %s9603_s28, %s2000_s1 }
 0x48b   : > { %p9605_p10 = pnand %p9604_p0, %p12384_p8  ;;  %p9610_p2 = por %p9609_p3, %p9608_p13 }
 0x48d   : > { %p9606_p6 = pneg %p9605_p10  ;;  %p9612_p1 = por %p9611_p9, %p9610_p2 }
 0x48f   : > { %p9613_p7 = pnand %p9612_p1, %p9606_p6 }
 0x491   : > { %9616 = shalt.err (!%p9613_p7)
}
 0x492   : > { %s9617_s19 = scalar_lea.vmem %s11211_s5, 32  ;;  %s9949_s27 = smov [#allocation37]  }
 0x493   : > { %p9618_p11 = scmp.ne.s32.totalorder %s11211_s5, %s9617_s19  ;;  %s9621_s15 = sshll.u32 %s9949_s27, 4  ;;  %s9622_s15 = int_to_ptr.vmem [resolvable:$false] %s9621_s15 }
 0x494   : > { %s9623_s13 = scalar_lea.vmem %s9622_s15, 64  ;;  %p9624_p12 = scmp.lt.s32.totalorder %s11211_s5, %s9622_s15 }
 0x495   : > { %p9619_p4 = pnand %p9618_p11, %p12384_p8  ;;  %p9625_p0 = scmp.lt.s32.totalorder %s9623_s13, %s9617_s19 }
 0x497   : > { %p9620_p5 = pneg %p9619_p4  ;;  %p9626_p10 = por %p9625_p0, %p9624_p12 }
 0x499   : > { %p9627_p13 = pnand %p9626_p10, %p9620_p5 }
 0x49b   : > { %9630 = shalt.err (!%p9627_p13)
}
 0x49c   : > { %7847 = dma.hbm_to_vmem [thread:$0]  (%p12384_p8), %s2000_s1, 32, %s11211_s5, %s10671_s17  }
 0x49d PF: > { %s12387_s30 = sld [smem:[#allocation149_spill]] }
 0x4a3   : > { %p12388_p6 = scmp.ne.s32.totalorder %s12387_s30, 0 }
 0x4a5   : > { %2011 = sbr.rel (%p12388_p6) target bundleno = 7018 (0x1b6a), region = 216 }
 0x4ac   : > { %s12389_s18 = sld [smem:[#allocation135_spill]] }
 0x4b2   : > { %p12390_p3 = scmp.eq.s32.totalorder %s12389_s18, 0 }
 0x4b4   : > { %9724 = dma.done.wait (%p12390_p3), [#allocation8], 16   ;;  %p12391_p2 = pmov %p12390_p3 }
 0x4b6   : > { %9726 = vsyncadd (%p12391_p2), [#allocation8], 4294967280  ;;  %p12392_p9 = pmov %p12391_p2 }
 0x4b7   : > { %p12393_p1 = pmov %p12391_p2 }
 0x4b8   : > { %9728 = dma.done.wait (%p12392_p9), [#allocation11], 528  }
 0x4b9   : > { %9730 = vsyncadd (%p12393_p1), [#allocation11], 4294966768  ;;  %p12394_p7 = pmov %p12393_p1 }
 0x4ba   : > { %p12395_p8 = pmov %p12393_p1 }
 0x4bb   : > { %9732 = dma.done.wait (%p12394_p7), [#allocation14], 16  }
 0x4bc   : > { %9734 = vsyncadd (%p12395_p8), [#allocation14], 4294967280  ;;  %s12396_s17 = sld [smem:[#allocation133_spill]]  ;;  %s12397_s7 = sld [smem:[#allocation139_spill]] }
 0x4bd   : > { %s2029_s22 = sand.u32 1, %s12389_s18  }
 0x4be   : > { %s11246_s11 = scalar_lea.sflag [#allocation8], %s2029_s22 }
 0x4c2   : > { %s11243_s24 = sand.u32 1, %s12396_s17   ;;  %p12398_p11 = scmp.ne.s32.totalorder %s12397_s7, 0 }
 0x4c3   : > { %s7785_s25 = smul.u32 192, %s11243_s24 }
 0x4c5   : > { %s11248_s2 = scalar_lea.vmem [#allocation15], %s7785_s25 }
 0x4c6   : > { %9736 = dma.done.wait (%p12398_p11), %s11246_s11, 14608  }
 0x4c7   : > { %9738 = vsyncadd (%p12398_p11), %s11246_s11, 4294952688  ;;  %s12399_s8 = sld [smem:[#allocation131_spill]]  ;;  %s7786_s5 = smul.u32 3, %s11243_s24 }
 0x4c8   : > { %s7068_s0 = sshll.u32 %s11243_s24, 6  ;;  %s7069_s1 = sshll.u32 %s11243_s24, 7 }
 0x4c9   : > { %s7072_s28 = sshll.u32 %s11243_s24, 1  ;;  %s11261_s27 = scalar_lea.vmem [#allocation16], %s7786_s5 }
 0x4ca   : > { %s11263_s15 = scalar_lea.vmem [#allocation17], %s7068_s0  ;;  %s12400_s17 = sld [smem:[#allocation141_spill]] }
 0x4cb   : > { %s11268_s22 = scalar_lea.vmem [#allocation21], %s7069_s1  ;;  %s11270_s3 = scalar_lea.vmem [#allocation22], %s7785_s25 }
 0x4cc   : > { %s11272_s9 = scalar_lea.vmem [#allocation23], %s7786_s5  ;;  %s11279_s20 = scalar_lea.vmem [#allocation28], %s7069_s1 }
 0x4cd   : > { %s2193_s4 = sand.u32 1, %s12399_s8   ;;  %s11274_s8 = scalar_lea.vmem [#allocation24], %s7068_s0 }
 0x4ce   : > { %s7074_s19 = sshll.u32 %s2193_s4, 7  ;;  %s11281_s21 = scalar_lea.vmem [#allocation29], %s7072_s28 }
 0x4cf   : > { %s11283_s13 = scalar_lea.vmem [#allocation30], %s7069_s1  ;;  %s11288_s29 = scalar_lea.vmem [#allocation34], %s7074_s19 }
 0x4d0   : > { %p12401_p4 = scmp.ne.s32.totalorder %s12400_s17, 0 }
 0x4d2   : > { %9740 = dma.done.wait (%p12401_p4), %s11246_s11, 2048  }
 0x4d3   : > { %9742 = vsyncadd (%p12401_p4), %s11246_s11, 4294965248  ;;  %s12402_s25 = sld [smem:[#allocation129_spill]]  ;;  %s12403_s5 = sld [smem:[#allocation142_spill]] }
 0x4d9   : > { %s2202_s0 = sand.u32 1, %s12402_s25   ;;  %p12405_p5 = scmp.ne.s32.totalorder %s12403_s5, 0 }
 0x4da   : > { %s11297_s14 = sshll.u32 %s2202_s0, 1 }
 0x4db   : > { %12404 = sst [smem:[#allocation151_spill]] %s11297_s14 }
 0x4dc   : > { %9744 = dma.done.wait (%p12405_p5), %s11246_s11, 32  }
 0x4dd   : > { %9746 = vsyncadd (%p12405_p5), %s11246_s11, 4294967264  ;;  %s12406_s28 = sld [smem:[#allocation127_spill]]  ;;  %s12407_s19 = sld [smem:[#allocation145_spill]] }
 0x4e3   : > { %s2211_s17 = sand.u32 1, %s12406_s28   ;;  %p12408_p12 = scmp.ne.s32.totalorder %s12407_s19, 0 }
 0x4e4   : > { %s7076_s7 = sshll.u32 %s2211_s17, 7 }
 0x4e5   : > { %s11307_s23 = scalar_lea.vmem [#allocation36], %s7076_s7 }
 0x4e6   : > { %9748 = dma.done.wait (%p12408_p12), %s11246_s11, 2048  }
 0x4e7   : > { %9750 = vsyncadd (%p12408_p12), %s11246_s11, 4294965248  ;;  %s12409_s25 = sld [smem:[#allocation126_spill]]  ;;  %s12410_s0 = sld [smem:[#allocation148_spill]] }
 0x4ed   : > { %s2220_s1 = sand.u32 1, %s12409_s25   ;;  %p12411_p0 = scmp.ne.s32.totalorder %s12410_s0, 0 }
 0x4ee   : > { %s11316_s5 = sshll.u32 %s2220_s1, 1 }
 0x4ef   : > { %9752 = dma.done.wait (%p12411_p0), %s11246_s11, 32  }
 0x4f0   : > { %9754 = vsyncadd (%p12411_p0), %s11246_s11, 4294967264  ;;  %p12412_p10 = pmov %p12393_p1 }
 0x4f1   : > { %p12413_p13 = pmov %p12393_p1 }
 0x4f2   : > { %9756 = dma.done.wait (%p12412_p10), [#allocation11], 16  }
 0x4f3   : > { %9758 = vsyncadd (%p12413_p13), [#allocation11], 4294967280  ;;  %p12414_p6 = pmov %p12393_p1 }
 0x4f4   : > { %p12415_p3 = pmov %p12393_p1 }
 0x4f5   : > { %9760 = dma.done.wait (%p12414_p6), [#allocation14], 16  }
 0x4f6   : > { %9762 = vsyncadd (%p12415_p3), [#allocation14], 4294967280  ;;  %p12416_p2 = pmov %p12393_p1 }
 0x4f7   : > { %p12417_p9 = pmov %p12393_p1 }
 0x4f8   : > { %9764 = dma.done.wait (%p12416_p2), [#allocation41], 1040  }
 0x4f9   : > { %9766 = vsyncadd (%p12417_p9), [#allocation41], 4294966256 }
 0x4fa   : > { %9768 = dma.done.wait (%p12393_p1), [#allocation44], 32   ;;  %p12418_p7 = pmov %p12393_p1 }
 0x4fb   : > { %p12419_p8 = pmov %p12393_p1 }
 0x4fc   : > { %9770 = vsyncadd (%p12418_p7), [#allocation44], 4294967264 }
 0x4fd   : > { %9772 = dma.done.wait (%p12419_p8), [#allocation47], 1040   ;;  %p12420_p11 = pmov %p12393_p1 }
 0x4fe   : > { %p12421_p4 = pmov %p12393_p1 }
 0x4ff   : > { %9774 = vsyncadd (%p12420_p11), [#allocation47], 4294966256 }
 0x500   : > { %9776 = dma.done.wait (%p12421_p4), [#allocation50], 1040   ;;  %p12422_p5 = pmov %p12393_p1 }
 0x501   : > { %p12423_p12 = pmov %p12393_p1 }
 0x502   : > { %9778 = vsyncadd (%p12422_p5), [#allocation50], 4294966256 }
 0x503   : > { %9780 = dma.done.wait (%p12423_p12), [#allocation53], 16   ;;  %p12424_p0 = pmov %p12393_p1 }
 0x504   : > { %s12425_s11 = sld [smem:[#allocation89_spill]]  ;;  %s12426_s7 = sld [smem:[#allocation90_spill]] }
 0x505   : > { %9782 = vsyncadd (%p12424_p0), [#allocation53], 4294967280  ;;  %s12427_s1 = sld [smem:[#allocation92_spill]]  ;;  %s12428_s28 = sld [smem:[#allocation93_spill]] }
 0x506   : > { %s12429_s19 = sld [smem:[#allocation94_spill]]  ;;  %p2495_p10 = scmp.lt.s32.totalorder %s12389_s18, 3 }
 0x507   : > { %p12430_p13 = scmp.ne.s32.totalorder %s12389_s18, 0 }
 0x508   : > { %s11355_s17 = scalar_select %p2495_p10, %s12389_s18, 3 }
 0x509   : > { %2521 = sbr.rel (%p12430_p13) target bundleno = 1837 (0x72d), region = 372  ;;  %s12431_s16 = sld [smem:[#allocation78_spill]] (!%p12430_p13)  ;;  %vm2532_vm0 = vcmask (!%p12430_p13), 523264   ;;  %v8195_v28 = vld [vmem:[#allocation12] sm:$0xff] (!%p12430_p13)   ;;  %v8196_v29 = vld [vmem:[#allocation12 + $0x8] sm:$0xff] (!%p12430_p13)   ;;  %v8197_v30 = vld [vmem:[#allocation12 + $0x10] sm:$0xff] (!%p12430_p13)  }
 0x50a   : > { %s7352_s25 = sshll.u32 %s11355_s17, 7  ;;  %s7091_s0 = sshll.u32 %s11355_s17, 1  ;;  %7517 = vmatprep.subr.bf16.mxu0 (!%p12430_p13), %v8195_v28  ;;  %v8198_v33 = vld [vmem:[#allocation12 + $0x18] sm:$0xff] (!%p12430_p13)  }
 0x50b   : > { %s11360_s30 = scalar_lea.vmem %s12425_s11, %s7352_s25  ;;  %s11363_s12 = scalar_lea.vmem %s12426_s7, %s7091_s0  ;;  %7518 = vmatpush3.bf16.msra.mxu0 (!%p12430_p13), %v8195_v28  ;;  %v7093_v48 = vld [vmem:[#allocation7] ss:$0 sm:$0xff] (!%p12430_p13)  ;;  %v7094_v54 = vld [vmem:[#allocation10] ss:$0 sm:$0xff] (!%p12430_p13) }
 0x50c   : > { %s2506_s4 = scalar_lea.vmem %s12427_s1, %s11355_s17  ;;  %s2509_s26 = scalar_lea.vmem %s12428_s28, %s11355_s17  ;;  %7519 = vmatprep.subr.bf16.mxu0 (!%p12430_p13), %v8196_v29 }
 0x50d   : > { %s2512_s6 = scalar_lea.vmem %s12429_s19, %s11355_s17 }
 0x50f   : > { %s12432_s14 = smov (!%p12430_p13), %s12431_s16  ;;  %v2526_v0 = vld [vmem:[%s12431_s16] sm:$0xff] (!%p12430_p13)  ;;  %s12433_s16 = sld [smem:[#allocation76_spill]] (!%p12430_p13)  ;;  %7520 = vmatpush3.bf16.msra.mxu0 (!%p12430_p13), %v8196_v29 }
 0x510   : > { %v2528_v1 = vld [vmem:[%s12432_s14 + $0x10] sm:$0xff]  ;;  %v2527_v2 = vld [vmem:[%s12432_s14 + $0x8] sm:$0xff]  ;;  %v2533_v3 = vsel %vm2532_vm0, %v2526_v0, 0.0  ;;  %v2529_v5 = vld [vmem:[%s12432_s14 + $0x18] sm:$0xff]  ;;  %7521 = vmatprep.subr.bf16.mxu0 %v8197_v30 }
 0x511   : > { %v2539_v4 = vsel %vm2532_vm0, %v2528_v1, 0.0  ;;  %2534 = vadd.xlane.f32.xlu0 %v2533_v3  ;;  %v2536_v6 = vsel %vm2532_vm0, %v2527_v2, 0.0  ;;  %v2542_v7 = vsel %vm2532_vm0, %v2529_v5, 0.0 }
 0x512   : > { %2540 = vadd.xlane.f32.xlu1 %v2539_v4 }
 0x513   : > { %7522 = vmatpush3.bf16.msra.mxu0 %v8197_v30 }
 0x514   : > { %7523 = vmatprep.subr.bf16.mxu0 %v8198_v33 }
 0x515   : > { %2537 = vadd.xlane.f32.xlu0 %v2536_v6  ;;  %s12434_s7 = smov %s12433_s16  ;;  %v2522_v31 = vld [vmem:[%s12433_s16] sm:$0xff] }
 0x516   : > { %2543 = vadd.xlane.f32.xlu1 %v2542_v7  ;;  %v2523_v32 = vld [vmem:[%s12434_s7 + $0x8] sm:$0xff]  ;;  %2524 = vst [vmem:[#allocation2] sm:$0xff] %v2522_v31 }
 0x517   : > { %2525 = vst [vmem:[#allocation2 + $0x8] sm:$0xff] %v2523_v32  ;;  %7524 = vmatpush3.bf16.msra.mxu0 %v8198_v33 }
 0x59e   : > { %v2535_v8 = vpop.xlane.xlu0 %2534 }
 0x59f   : > { %v2541_v9 = vpop.xlane.xlu1 %2540  ;;  %v2546_v10 = vmul.f32 0.015625, %v2535_v8 }
 0x5a0   : > { %v2548_v11 = vmul.f32 0.015625, %v2541_v9 }
 0x5a1   : > { %v2550_v12 = vsub.f32 %v2526_v0, %v2546_v10 }
 0x5a2   : > { %v2552_v13 = vsub.f32 %v2528_v1, %v2548_v11  ;;  %v2538_v14 = vpop.xlane.xlu0 %2537 }
 0x5a3   : > { %v2544_v15 = vpop.xlane.xlu1 %2543  ;;  %v2547_v16 = vmul.f32 0.015625, %v2538_v14  ;;  %v2554_v18 = vmul.f32 %v2550_v12, %v2550_v12 }
 0x5a4   : > { %v2549_v17 = vmul.f32 0.015625, %v2544_v15  ;;  %v2556_v19 = vmul.f32 %v2552_v13, %v2552_v13 }
 0x5a5   : > { %v2551_v20 = vsub.f32 %v2527_v2, %v2547_v16  ;;  %v2558_v22 = vsel %vm2532_vm0, %v2554_v18, 0.0  ;;  %v7095_v2 = vld [vmem:[#allocation13] ss:$0 sm:$0xff] }
 0x5a6   : > { %v2553_v21 = vsub.f32 %v2529_v5, %v2549_v17  ;;  %2559 = vadd.xlane.f32.xlu0 %v2558_v22  ;;  %v2564_v23 = vsel %vm2532_vm0, %v2556_v19, 0.0 }
 0x5a7   : > { %v2555_v24 = vmul.f32 %v2551_v20, %v2551_v20 }
 0x5a8   : > { %v2557_v25 = vmul.f32 %v2553_v21, %v2553_v21 }
 0x5a9   : > { %v2561_v26 = vsel %vm2532_vm0, %v2555_v24, 0.0 }
 0x5aa   : > { %2565 = vadd.xlane.f32.xlu0 %v2564_v23  ;;  %2562 = vadd.xlane.f32.xlu1 %v2561_v26  ;;  %v2567_v27 = vsel %vm2532_vm0, %v2557_v25, 0.0 }
 0x5ae   : > { %2568 = vadd.xlane.f32.xlu1 %v2567_v27 }
 0x633   : > { %v2560_v34 = vpop.xlane.xlu0 %2559 }
 0x634   : > { %v2570_v35 = vmul.f32 0.015625, %v2560_v34 }
 0x636   : > { %v2574_v36 = vadd.f32 1e-05, %v2570_v35 }
 0x637   : > { %v2563_v37 = vpop.xlane.xlu1 %2562  ;;  %v2566_v38 = vpop.xlane.xlu0 %2565 }
 0x638   : > { %8199 = vrsqrt.f32 %v2574_v36  ;;  %v2571_v39 = vmul.f32 0.015625, %v2563_v37  ;;  %v2572_v40 = vmul.f32 0.015625, %v2566_v38 }
 0x63a   : > { %v2575_v41 = vadd.f32 1e-05, %v2571_v39  ;;  %v2576_v42 = vadd.f32 1e-05, %v2572_v40 }
 0x63b   : > { %v2569_v43 = vpop.xlane.xlu1 %2568 }
 0x63c   : > { %8201 = vrsqrt.f32 %v2575_v41  ;;  %v2573_v44 = vmul.f32 0.015625, %v2569_v43 }
 0x63d   : > { %8203 = vrsqrt.f32 %v2576_v42 }
 0x63e   : > { %v2577_v45 = vadd.f32 1e-05, %v2573_v44 }
 0x640   : > { %8205 = vrsqrt.f32 %v2577_v45 }
 0x642   : > { %v8200_v46 = vpop.eup %8199 }
 0x643   : > { %v2582_v47 = vmul.f32 %v8200_v46, %v2550_v12 }
 0x645   : > { %v2592_v52 = vmul.f32 %v7093_v48, %v2582_v47 }
 0x646   : > { %v8202_v49 = vpop.eup %8201 }
 0x647   : > { %v8204_v50 = vpop.eup %8203  ;;  %v2583_v51 = vmul.f32 %v8202_v49, %v2551_v20  ;;  %v2602_v58 = vadd.f32 %v7094_v54, %v2592_v52 }
 0x648   : > { %v2584_v53 = vmul.f32 %v8204_v50, %v2552_v13 }
 0x649   : > { %v2593_v55 = vmul.f32 %v7093_v48, %v2583_v51 }
 0x64a   : > { %v8206_v56 = vpop.eup %8205  ;;  %v2594_v60 = vmul.f32 %v7093_v48, %v2584_v53 }
 0x64b   : > { %v2585_v57 = vmul.f32 %v8206_v56, %v2553_v21  ;;  %v2603_v59 = vadd.f32 %v7094_v54, %v2593_v55 }
 0x64c   : > { %v2604_v63 = vadd.f32 %v7094_v54, %v2594_v60 }
 0x64d   : > { %v2606_v61 = vpack.c.bf16 %v2603_v59, %v2602_v58  ;;  %v2595_v62 = vmul.f32 %v7093_v48, %v2585_v57 }
 0x64f   : > { %7525 = vmatprep.mubr.msk.bf16.mxu0 %vm2532_vm0, %v2606_v61  ;;  %v2605_v0 = vadd.f32 %v7094_v54, %v2595_v62 }
 0x651   : > { %v2607_v1 = vpack.c.bf16 %v2605_v0, %v2604_v63 }
 0x653   : > { %7526 = vmatmul.mubr.msk.bf16.vlgmr.msra.gmra.mrb[0].mxu0 %vm2532_vm0, %v2607_v1 }
 0x726   : > { %v7527_v3 = vpop.f32.mrb[0].mxu0 }
 0x727   : > { %v2696_v4 = vadd.f32 %v7527_v3, %v7095_v2  ;;  %v2687_v5 = vpop.f32.mrb[1].mxu0 }
 0x728   : > { %v2688_v6 = vadd.f32 %v7095_v2, %v2687_v5  ;;  %v7528_v7 = vpop.f32.mrb[2].mxu0 }
 0x729   : > { %2704 = vst [vmem:[#allocation3 + $0x10] sm:$0xff] %v2696_v4  ;;  %v2699_v8 = vadd.f32 %v7528_v7, %v7095_v2  ;;  %v2690_v9 = vpop.f32.mrb[3].mxu0 }
 0x72a   : > { %2702 = vst [vmem:[#allocation3] sm:$0xff] %v2688_v6  ;;  %v2691_v10 = vadd.f32 %v7095_v2, %v2690_v9 }
 0x72b   : > { %2705 = vst [vmem:[#allocation3 + $0x18] sm:$0xff] %v2699_v8 }
 0x72c   : > { %2703 = vst [vmem:[#allocation3 + $0x8] sm:$0xff] %v2691_v10 }
 0x72d PF: > { %v8207_v11 = vld [vmem:[%s11248_s2 + $0x4] ss:$12 sps:$4 sm:$0xff]   ;;  %v8209_v12 = vld [vmem:[%s11248_s2] ss:$12 sps:$4 sm:$0xff]   ;;  %v9950_v13 = vmov 0   ;;  %v9951_v31 = vmov 0.0   ;;  %v2745_v32 = vlaneseq }
 0x72e   : > { %2920 = vmatprep.mubr.bf16.mxu0 %v9950_v13  ;;  %2888 = vmatprep.subr.bf16.mxu0 %v8207_v11  ;;  %v8210_v14 = vld [vmem:[%s11248_s2 + $0x1c] ss:$12 sps:$4 sm:$0xff]   ;;  %v8212_v15 = vld [vmem:[%s11248_s2 + $0x18] ss:$12 sps:$4 sm:$0xff]   ;;  %v8213_v16 = vld [vmem:[%s11248_s2 + $0x34] ss:$12 sps:$4 sm:$0xff]  }
 0x72f   : > { %2889 = vmatpush1.bf16.msra.mxu0 %v8209_v12  ;;  %v8215_v17 = vld [vmem:[%s11248_s2 + $0x30] ss:$12 sps:$4 sm:$0xff]   ;;  %v8216_v18 = vld [vmem:[%s11248_s2 + $0x4c] ss:$12 sps:$4 sm:$0xff]   ;;  %v8218_v19 = vld [vmem:[%s11248_s2 + $0x48] ss:$12 sps:$4 sm:$0xff]   ;;  %7529 = vmatprep.subr.bf16.mxu1 %v9951_v31 }
 0x730   : > { %2890 = vmatprep.subr.bf16.mxu0 %v8210_v14  ;;  %v8219_v20 = vld [vmem:[%s11248_s2 + $0x64] ss:$12 sps:$4 sm:$0xff]   ;;  %v8221_v21 = vld [vmem:[%s11248_s2 + $0x60] ss:$12 sps:$4 sm:$0xff]   ;;  %v8222_v22 = vld [vmem:[%s11248_s2 + $0x7c] ss:$12 sps:$4 sm:$0xff]  }
 0x731   : > { %v8224_v23 = vld [vmem:[%s11248_s2 + $0x78] ss:$12 sps:$4 sm:$0xff]   ;;  %v8225_v24 = vld [vmem:[%s11248_s2 + $0x94] ss:$12 sps:$4 sm:$0xff]   ;;  %v8227_v25 = vld [vmem:[%s11248_s2 + $0x90] ss:$12 sps:$4 sm:$0xff]  }
 0x732   : > { %v8228_v26 = vld [vmem:[%s11248_s2 + $0xac] ss:$12 sps:$4 sm:$0xff]   ;;  %v8230_v27 = vld [vmem:[%s11248_s2 + $0xa8] ss:$12 sps:$4 sm:$0xff]   ;;  %vm9952_vm1 = vmmov 0   ;;  %v11418_v33 = vshrl.u32 %v2745_v32, 7 }
 0x733   : > { %2891 = vmatpush1.bf16.msra.mxu0 %v8212_v15  ;;  %v11406_v28 = vld [vmem:[#allocation2] sm:$0xff]  ;;  %v11408_v29 = vld [vmem:[#allocation2 + $0x8] sm:$0xff]  ;;  %7545 = vmatprep.mubr.msk.bf16.mxu1 %vm9952_vm1, %v9951_v31  ;;  %v11424_v35 = vld [vmem:[%s11261_s27] sm:$0x7]  ;;  %s12435_s18 = sld [smem:[#allocation77_spill]]  ;;  %vm3072_vm2 = vcmask 64512  }
 0x734   : > { %2892 = vmatprep.subr.bf16.mxu0 %v8213_v16  ;;  %v2710_v30 = vpack.c.bf16 %v11408_v29, %v11406_v28  ;;  %v11421_v34 = vsub.s32 1, %v11418_v33  ;;  %v11427_v36 = vsub.s32 0, %v11418_v33  ;;  %v8231_v53 = vld [vmem:[%s11248_s2 + $0x8] ss:$12 sps:$4 sm:$0xff]   ;;  %v8232_v54 = vld [vmem:[%s11248_s2 + $0x20] ss:$12 sps:$4 sm:$0xff]  }
 0x735   : > { %7530 = vmatpush3.bf16.msra.mxu1 %v8231_v53  ;;  %v8233_v55 = vld [vmem:[%s11248_s2 + $0x38] ss:$12 sps:$4 sm:$0xff]   ;;  %v8234_v56 = vld [vmem:[%s11248_s2 + $0x50] ss:$12 sps:$4 sm:$0xff]   ;;  %v8235_v57 = vld [vmem:[%s11248_s2 + $0x68] ss:$12 sps:$4 sm:$0xff]  }
 0x736   : > { %v2752_v37 = vrot.slane %v11424_v35, %v11421_v34  ;;  %v2748_v38 = vrot.slane %v11424_v35, %v11427_v36  ;;  %7531 = vmatprep.subr.bf16.mxu1 %v9951_v31  ;;  %v8236_v58 = vld [vmem:[%s11248_s2 + $0x80] ss:$12 sps:$4 sm:$0xff]   ;;  %v8237_v59 = vld [vmem:[%s11248_s2 + $0x98] ss:$12 sps:$4 sm:$0xff]   ;;  %v8238_v60 = vld [vmem:[%s11248_s2 + $0xb0] ss:$12 sps:$4 sm:$0xff]  }
 0x737   : > { %2893 = vmatpush1.bf16.msra.mxu0 %v8215_v17  ;;  %vm3100_vm3 = vcmask 1043456   ;;  %v8244_v53 = vld [vmem:[%s11263_s15 + $0x28] sm:$0xff]   ;;  %s12437_s2 = scalar_lea.vmem [#allocation18], %s11243_s24  ;;  %vm4133_vm4 = vcmask 130048  }
 0x738   : > { %2894 = vmatprep.subr.bf16.mxu0 %v8216_v18 }
 0x739   : > { %7532 = vmatpush3.bf16.msra.mxu1 %v8232_v54  ;;  %s12436_s27 = smov %s12435_s18  ;;  %v7126_v61 = vld [vmem:[%s12435_s18] ss:$0 sm:$0xff]  ;;  %v8245_v54 = vld [vmem:[%s11263_s15 + $0x30] sm:$0xff]  }
 0x73a   : > { %7533 = vmatprep.subr.bf16.mxu1 %v9951_v31  ;;  %v7127_v4 = vld [vmem:[%s12436_s27 + $0x1] ss:$0 sm:$0xff] }
 0x73b   : > { %2895 = vmatpush1.bf16.msra.mxu0 %v8218_v19 }
 0x73c   : > { %2896 = vmatprep.subr.bf16.mxu0 %v8219_v20 }
 0x73d   : > { %7534 = vmatpush3.bf16.msra.mxu1 %v8233_v55  ;;  %v8246_v55 = vld [vmem:[%s11263_s15 + $0x38] sm:$0xff]  }
 0x73e   : > { %7535 = vmatprep.subr.bf16.mxu1 %v9951_v31 }
 0x73f   : > { %2897 = vmatpush1.bf16.msra.mxu0 %v8221_v21 }
 0x740   : > { %2898 = vmatprep.subr.bf16.mxu0 %v8222_v22  ;;  %v2755_v22 = vsub.s32 2, %v11418_v33 }
 0x741   : > { %7536 = vmatpush3.bf16.msra.mxu1 %v8234_v56 }
 0x742   : > { %7537 = vmatprep.subr.bf16.mxu1 %v9951_v31 }
 0x743   : > { %2899 = vmatpush1.bf16.msra.mxu0 %v8224_v23  ;;  %v2756_v23 = vrot.slane %v11424_v35, %v2755_v22 }
 0x744   : > { %2900 = vmatprep.subr.bf16.mxu0 %v8225_v24 }
 0x745   : > { %7538 = vmatpush3.bf16.msra.mxu1 %v8235_v57 }
 0x746   : > { %7539 = vmatprep.subr.bf16.mxu1 %v9951_v31 }
 0x747   : > { %2901 = vmatpush1.bf16.msra.mxu0 %v8227_v25 }
 0x748   : > { %2902 = vmatprep.subr.bf16.mxu0 %v8228_v26 }
 0x749   : > { %7540 = vmatpush3.bf16.msra.mxu1 %v8236_v58 }
 0x74a   : > { %7541 = vmatprep.subr.bf16.mxu1 %v9951_v31 }
 0x74b   : > { %2903 = vmatpush1.bf16.msra.mxu0 %v8230_v27 }
 0x74c   : > { %7549 = vmatprep.subr.bf16.mxu0 %v9951_v31 }
 0x74d   : > { %7542 = vmatpush3.bf16.msra.mxu1 %v8237_v59 }
 0x74e   : > { %2921 = vmatmul.mubr.bf16.vlgmr.msra.gmra.mrb[0].mxu0 %v2710_v30  ;;  %7543 = vmatprep.subr.bf16.mxu1 %v9951_v31 }
 0x74f   : > { %7551 = vmatprep.mubr.msk.bf16.mxu0 %vm9952_vm1, %v9951_v31 }
 0x751   : > { %7544 = vmatpush3.bf16.msra.mxu1 %v8238_v60 }
 0x752   : > { %7567 = vmatprep.subr.bf16.mxu1 %v9951_v31 }
 0x754   : > { %7546 = vmatmul.mubr.bf16.vlgmr.msra.gmra.mrb[0].mxu1 %v2710_v30 }
 0x755   : > { %7569 = vmatprep.mubr.msk.bf16.mxu1 %vm9952_vm1, %v9951_v31 }
 0x821   : > { %v2922_v39 = vpop.f32.mrb[0].mxu0 }
 0x822   : > { %v2924_v40 = vpop.f32.mrb[1].mxu0  ;;  %v2923_v43 = vadd.f32 %v2922_v39, %v2748_v38 }
 0x823   : > { %v2925_v41 = vadd.f32 %v2924_v40, %v2752_v37  ;;  %v2926_v42 = vpop.f32.mrb[2].mxu0 }
 0x824   : > { %v2928_v44 = vpop.f32.mrb[3].mxu0  ;;  %v2972_v46 = vmul.f32 0.088388346, %v2923_v43  ;;  %v2927_v49 = vadd.f32 %v2926_v42, %v2748_v38 }
 0x825   : > { %v2976_v45 = vpack.c.bf16 %v2925_v41, %v2925_v41  ;;  %v2929_v47 = vadd.f32 %v2928_v44, %v2752_v37  ;;  %v8239_v44 = vld [vmem:[%s11263_s15] sm:$0xff]  }
 0x826   : > { %v2974_v48 = vpack.c.bf16 %v2972_v46, %v2972_v46  ;;  %v2973_v51 = vmul.f32 0.088388346, %v2927_v49  ;;  %v8240_v46 = vld [vmem:[%s11263_s15 + $0x8] sm:$0xff]   ;;  %v8241_v49 = vld [vmem:[%s11263_s15 + $0x10] sm:$0xff]  }
 0x827   : > { %7550 = vmatpush3.bf16.xpose.msra.mxu0 %v2976_v45  ;;  %v2977_v50 = vpack.c.bf16 %v2929_v47, %v2929_v47  ;;  %v2965_v24 = vpop.f32.mrb[0].mxu1 }
 0x828   : > { %7555 = vmatprep.subr.bf16.mxu0 %v9951_v31  ;;  %v2975_v52 = vpack.c.bf16 %v2973_v51, %v2973_v51  ;;  %v2966_v25 = vadd.f32 %v2965_v24, %v2756_v23  ;;  %v7547_v26 = vpop.f32.mrb[1].mxu1  ;;  %v8242_v51 = vld [vmem:[%s11263_s15 + $0x18] sm:$0xff]  }
 0x829   : > { %v2968_v32 = vpop.f32.mrb[2].mxu1  ;;  %v8258_v24 = vld [vmem:[%s11360_s30 + $0x34] ss:$8 sps:$4 sm:$0xff]   ;;  %v8261_v26 = vld [vmem:[%s11360_s30 + $0x44] ss:$8 sps:$4 sm:$0xff]  }
 0x82a   : > { %v2978_v27 = vpack.c.bf16 %v2966_v25, %v2966_v25  ;;  %v7548_v37 = vpop.f32.mrb[3].mxu1  ;;  %v2969_v38 = vadd.f32 %v2968_v32, %v2756_v23  ;;  %v8253_v23 = vld [vmem:[%s11360_s30 + $0x20] ss:$8 sps:$4 sm:$0xff]   ;;  %v8256_v25 = vld [vmem:[%s11360_s30 + $0x30] ss:$8 sps:$4 sm:$0xff]  }
 0x82b   : > { %v8262_v32 = vld [vmem:[%s11360_s30 + $0x50] ss:$8 sps:$4 sm:$0xff]   ;;  %v8267_v37 = vld [vmem:[%s11360_s30 + $0x64] ss:$8 sps:$4 sm:$0xff]  }
 0x82c   : > { %v3102_v30 = vsel %vm3100_vm3, %v2978_v27, 0  ;;  %v2979_v39 = vpack.c.bf16 %v2969_v38, %v2969_v38  ;;  %v8259_v27 = vld [vmem:[%s11360_s30 + $0x40] ss:$8 sps:$4 sm:$0xff]  }
 0x82d   : > { %v8265_v38 = vld [vmem:[%s11360_s30 + $0x60] ss:$8 sps:$4 sm:$0xff]  }
 0x82e   : > { %7552 = vmatmul.mubr.bf16.vlgmr.msra.gmra.mrb[4].mxu0 %v2974_v48  ;;  %v3148_v40 = vsel %vm3100_vm3, %v2979_v39, 0  ;;  %v8268_v39 = vld [vmem:[%s11360_s30 + $0x70] ss:$8 sps:$4 sm:$0xff]  }
 0x82f   : > { %7556 = vmatpush3.bf16.xpose.msra.mxu0 %v2977_v50  ;;  %7557 = vmatprep.mubr.msk.bf16.mxu0 %vm9952_vm1, %v9951_v31 }
 0x830   : > { %7561 = vmatprep.subr.bf16.mxu0 %v9951_v31  ;;  %7568 = vmatpush3.bf16.msra.mxu1 %v3148_v40  ;;  %v8270_v40 = vld [vmem:[%s11360_s30 + $0x74] ss:$8 sps:$4 sm:$0xff]  }
 0x836   : > { %7558 = vmatmul.mubr.bf16.vlgmr.msra.gmra.mrb[8].mxu0 %v2975_v52  ;;  %v8243_v52 = vld [vmem:[%s11263_s15 + $0x20] sm:$0xff]   ;;  %s12438_s15 = scalar_lea.vmem [#allocation19], %s11243_s24 }
 0x837   : > { %7563 = vmatprep.mubr.msk.bf16.mxu0 %vm9952_vm1, %v9951_v31  ;;  %7562 = vmatpush3.bf16.msra.mxu0 %v3102_v30  ;;  %v8264_v30 = vld [vmem:[%s11360_s30 + $0x54] ss:$8 sps:$4 sm:$0xff]  }
 0x838   : > { %7573 = vmatprep.subr.bf16.mxu0 %v9951_v31 }
 0x901   : > { %v3026_v62 = vpop.f32.mrb[4].mxu0 }
 0x902   : > { %v3027_v63 = vadd.f32 %v7126_v61, %v3026_v62  ;;  %v7553_v0 = vpop.f32.mrb[5].mxu0 }
 0x903   : > { %v3029_v1 = vpop.f32.mrb[6].mxu0 }
 0x904   : > { %v7554_v2 = vpop.f32.mrb[7].mxu0  ;;  %v3073_v3 = vsel %vm3072_vm2, %v3027_v63, -inf  ;;  %v7130_v1 = vld [vmem:[%s12437_s2] ss:$0 sm:$0xff] }
 0x905   : > { %3074 = vmax.xlane.f32.xlu0 %v3073_v3 }
 0x909   : > { %v3066_v5 = vpop.f32.mrb[8].mxu0 }
 0x90a   : > { %v3067_v6 = vadd.f32 %v7127_v4, %v3066_v5  ;;  %v7559_v7 = vpop.f32.mrb[9].mxu0 }
 0x90b   : > { %v3069_v8 = vpop.f32.mrb[10].mxu0 }
 0x90c   : > { %v7560_v9 = vpop.f32.mrb[11].mxu0  ;;  %v3076_v10 = vsel %vm3072_vm2, %v3067_v6, -inf }
 0x90d   : > { %3077 = vmax.xlane.f32.xlu0 %v3076_v10  ;;  %v8247_v10 = vld [vmem:[%s11360_s30] ss:$8 sps:$4 sm:$0xff]  }
 0x992   : > { %v3075_v11 = vpop.xlane.xlu0 %3074 }
 0x993   : > { %v3079_v12 = vsub.f32 %v3027_v63, %v3075_v11  ;;  %v8249_v11 = vld [vmem:[%s11360_s30 + $0x4] ss:$8 sps:$4 sm:$0xff]  }
 0x994   : > { %3455 = vmatprep.subr.bf16.mxu1 %v8249_v11 }
 0x995   : > { %v3081_v14 = vmul.f32 1.442695, %v3079_v12  ;;  %v8252_v12 = vld [vmem:[%s11360_s30 + $0x14] ss:$8 sps:$4 sm:$0xff]  }
 0x997   : > { %8367 = vpow2.f32 %v3081_v14  ;;  %v8250_v14 = vld [vmem:[%s11360_s30 + $0x10] ss:$8 sps:$4 sm:$0xff]  }
 0x99a   : > { %v3078_v15 = vpop.xlane.xlu0 %3077 }
 0x99b   : > { %v3080_v16 = vsub.f32 %v3067_v6, %v3078_v15 }
 0x99d   : > { %v3083_v17 = vmul.f32 1.442695, %v3080_v16 }
 0x99f   : > { %8369 = vpow2.f32 %v3083_v17 }
 0x9a1   : > { %v8368_v18 = vpop.eup %8367 }
 0x9a2   : > { %v3085_v19 = vsel %vm3072_vm2, %v8368_v18, 0.0 }
 0x9a3   : > { %3086 = vadd.xlane.f32.xlu1 %v3085_v19 }
 0x9a9   : > { %v8370_v20 = vpop.eup %8369 }
 0x9aa   : > { %v3088_v21 = vsel %vm3072_vm2, %v8370_v20, 0.0 }
 0x9ab   : > { %3089 = vadd.xlane.f32.xlu1 %v3088_v21  ;;  %v8255_v21 = vld [vmem:[%s11360_s30 + $0x24] ss:$8 sps:$4 sm:$0xff]   ;;  %s12439_s30 = scalar_lea.vmem [#allocation20], %s11243_s24 }
 0xa30   : > { %v3087_v41 = vpop.xlane.xlu1 %3086 }
 0xa31   : > { %8371 = vrcp.f32 %v3087_v41  ;;  %v8273_v41 = vld [vmem:[%s11270_s3 + $0x4] ss:$12 sps:$4 sm:$0xff]  }
 0xa38   : > { %v3090_v35 = vpop.xlane.xlu1 %3089 }
 0xa39   : > { %8373 = vrcp.f32 %v3090_v35 }
 0xa3b   : > { %v8372_v42 = vpop.eup %8371 }
 0xa3c   : > { %v3093_v43 = vmul.f32 %v8372_v42, %v8368_v18 }
 0xa3e   : > { %v3095_v45 = vpack.c.bf16 %v3093_v43, %v3093_v43 }
 0xa40   : > { %7564 = vmatmul.mubr.msk.bf16.vlgmr.msra.gmra.mrb[12].mxu0 %vm3072_vm2, %v3095_v45 }
 0xa41   : > { %7574 = vmatpush3.bf16.msra.mxu0 %v8239_v44  ;;  %7589 = vmatprep.mubr.msk.bf16.mxu0 %vm9952_vm1, %v9951_v31 }
 0xa42   : > { %7575 = vmatprep.subr.bf16.mxu0 %v9951_v31 }
 0xa43   : > { %v8374_v47 = vpop.eup %8373 }
 0xa44   : > { %v3094_v48 = vmul.f32 %v8374_v47, %v8370_v20 }
 0xa45   : > { %7576 = vmatpush3.bf16.msra.mxu0 %v8240_v46 }
 0xa46   : > { %v3096_v50 = vpack.c.bf16 %v3094_v48, %v3094_v48  ;;  %7577 = vmatprep.subr.bf16.mxu0 %v9951_v31  ;;  %v7139_v48 = vld [vmem:[%s12438_s15] ss:$0 sm:$0xff] }
 0xa48   : > { %7570 = vmatmul.mubr.msk.bf16.vlgmr.msra.gmra.mrb[4].mxu1 %vm3072_vm2, %v3096_v50 }
 0xa49   : > { %7578 = vmatpush3.bf16.msra.mxu0 %v8241_v49  ;;  %3487 = vmatprep.mubr.bf16.mxu1 %v9950_v13 }
 0xa4a   : > { %7579 = vmatprep.subr.bf16.mxu0 %v9951_v31  ;;  %3456 = vmatpush1.bf16.msra.mxu1 %v8247_v10  ;;  %v11537_v10 = vld [vmem:[#allocation3 + $0x8] sm:$0xff] }
 0xa4b   : > { %3457 = vmatprep.subr.bf16.mxu1 %v8252_v12  ;;  %v11546_v12 = vld [vmem:[#allocation3 + $0x10] sm:$0xff] }
 0xa4d   : > { %7580 = vmatpush3.bf16.msra.mxu0 %v8242_v51 }
 0xa4e   : > { %7581 = vmatprep.subr.bf16.mxu0 %v9951_v31  ;;  %3458 = vmatpush1.bf16.msra.mxu1 %v8250_v14  ;;  %v11548_v14 = vld [vmem:[#allocation3 + $0x18] sm:$0xff] }
 0xa4f   : > { %3459 = vmatprep.subr.bf16.mxu1 %v8255_v21  ;;  %v8302_v21 = vld [vmem:[%s11268_s22 + $0x18] sm:$0xff]  }
 0xa51   : > { %7582 = vmatpush3.bf16.msra.mxu0 %v8243_v52 }
 0xa52   : > { %7583 = vmatprep.subr.bf16.mxu0 %v9951_v31  ;;  %3460 = vmatpush1.bf16.msra.mxu1 %v8253_v23  ;;  %v8303_v23 = vld [vmem:[%s11268_s22 + $0x60] sm:$0xff]  }
 0xa53   : > { %3461 = vmatprep.subr.bf16.mxu1 %v8258_v24  ;;  %v8304_v24 = vld [vmem:[%s11268_s22 + $0x20] sm:$0xff]  }
 0xa55   : > { %7584 = vmatpush3.bf16.msra.mxu0 %v8244_v53  ;;  %v7140_v53 = vld [vmem:[%s12439_s30] ss:$0 sm:$0xff] }
 0xa56   : > { %7585 = vmatprep.subr.bf16.mxu0 %v9951_v31  ;;  %3462 = vmatpush1.bf16.msra.mxu1 %v8256_v25  ;;  %v8305_v25 = vld [vmem:[%s11268_s22 + $0x68] sm:$0xff]  }
 0xa57   : > { %3463 = vmatprep.subr.bf16.mxu1 %v8261_v26  ;;  %v8306_v26 = vld [vmem:[%s11268_s22 + $0x28] sm:$0xff]  }
 0xa59   : > { %7586 = vmatpush3.bf16.msra.mxu0 %v8245_v54 }
 0xa5a   : > { %7587 = vmatprep.subr.bf16.mxu0 %v9951_v31  ;;  %3464 = vmatpush1.bf16.msra.mxu1 %v8259_v27  ;;  %v8307_v27 = vld [vmem:[%s11268_s22 + $0x70] sm:$0xff]  }
 0xa5b   : > { %3465 = vmatprep.subr.bf16.mxu1 %v8264_v30  ;;  %v8308_v30 = vld [vmem:[%s11268_s22 + $0x30] sm:$0xff]  }
 0xa5d   : > { %7588 = vmatpush3.bf16.msra.mxu0 %v8246_v55 }
 0xa5e   : > { %3466 = vmatpush1.bf16.msra.mxu1 %v8262_v32  ;;  %v8309_v32 = vld [vmem:[%s11268_s22 + $0x78] sm:$0xff]  }
 0xa5f   : > { %3467 = vmatprep.subr.bf16.mxu1 %v8267_v37  ;;  %v8310_v37 = vld [vmem:[%s11268_s22 + $0x38] sm:$0xff]  }
 0xa62   : > { %3468 = vmatpush1.bf16.msra.mxu1 %v8265_v38  ;;  %v3363_v38 = vld [vmem:[%s11363_s12] sm:$0x3] }
 0xa63   : > { %3469 = vmatprep.subr.bf16.mxu1 %v8270_v40  ;;  %v3372_v40 = vrot.slane %v3363_v38, %v11421_v34 }
 0xa66   : > { %3470 = vmatpush1.bf16.msra.mxu1 %v8268_v39  ;;  %v3368_v39 = vrot.slane %v3363_v38, %v11427_v36 }
 0xa67   : > { %3939 = vmatprep.subr.bf16.mxu1 %v8273_v41 }
 0xb13   : > { %v3138_v56 = vpop.f32.mrb[12].mxu0 }
 0xb14   : > { %v7565_v57 = vpop.f32.mrb[13].mxu0 }
 0xb15   : > { %v3141_v58 = vpop.f32.mrb[14].mxu0  ;;  %v8271_v57 = vld [vmem:[%s11270_s3] ss:$12 sps:$4 sm:$0xff]  }
 0xb16   : > { %v7566_v59 = vpop.f32.mrb[15].mxu0 }
 0xb17   : > { %v8276_v59 = vld [vmem:[%s11270_s3 + $0x1c] ss:$12 sps:$4 sm:$0xff]  }
 0xb1b   : > { %v3184_v60 = vpop.f32.mrb[4].mxu1 }
 0xb1c   : > { %v3190_v61 = vpack.c.bf16 %v3184_v60, %v3138_v56  ;;  %v7571_v62 = vpop.f32.mrb[5].mxu1  ;;  %v8274_v60 = vld [vmem:[%s11270_s3 + $0x18] ss:$12 sps:$4 sm:$0xff]  }
 0xb1d   : > { %v3187_v63 = vpop.f32.mrb[6].mxu1  ;;  %v8277_v62 = vld [vmem:[%s11270_s3 + $0x30] ss:$12 sps:$4 sm:$0xff]  }
 0xb1e   : > { %v7572_v0 = vpop.f32.mrb[7].mxu1  ;;  %7590 = vmatmul.mubr.bf16.vlgmr.msra.gmra.mrb[16].mxu0 %v3190_v61  ;;  %v8279_v61 = vld [vmem:[%s11270_s3 + $0x34] ss:$12 sps:$4 sm:$0xff]   ;;  %v8282_v63 = vld [vmem:[%s11270_s3 + $0x4c] ss:$12 sps:$4 sm:$0xff]  }
 0xb1f   : > { %v8280_v0 = vld [vmem:[%s11270_s3 + $0x48] ss:$12 sps:$4 sm:$0xff]  }
 0xbf1   : > { %v3296_v2 = vpop.f32.mrb[16].mxu0 }
 0xbf2   : > { %v3297_v3 = vadd.f32 %v7130_v1, %v3296_v2  ;;  %v7591_v4 = vpop.f32.mrb[17].mxu0  ;;  %v8283_v2 = vld [vmem:[%s11270_s3 + $0x60] ss:$12 sps:$4 sm:$0xff]  }
 0xbf3   : > { %v3299_v5 = vpop.f32.mrb[18].mxu0  ;;  %v8286_v4 = vld [vmem:[%s11270_s3 + $0x78] ss:$12 sps:$4 sm:$0xff]  }
 0xbf4   : > { %v3300_v6 = vadd.f32 %v7130_v1, %v3299_v5  ;;  %v7592_v7 = vpop.f32.mrb[19].mxu0  ;;  %v3303_v8 = vadd.f32 %v3297_v3, %v11406_v28  ;;  %v8285_v1 = vld [vmem:[%s11270_s3 + $0x64] ss:$12 sps:$4 sm:$0xff]   ;;  %v8288_v3 = vld [vmem:[%s11270_s3 + $0x7c] ss:$12 sps:$4 sm:$0xff]  }
 0xbf5   : > { %v8291_v5 = vld [vmem:[%s11270_s3 + $0x94] ss:$12 sps:$4 sm:$0xff]   ;;  %v8294_v7 = vld [vmem:[%s11270_s3 + $0xac] ss:$12 sps:$4 sm:$0xff]  }
 0xbf6   : > { %3307 = vadd.xlane.f32.xlu0 %v3303_v8  ;;  %v3304_v9 = vadd.f32 %v3300_v6, %v11408_v29  ;;  %v8289_v6 = vld [vmem:[%s11270_s3 + $0x90] ss:$12 sps:$4 sm:$0xff]  }
 0xbf8   : > { %3309 = vadd.xlane.f32.xlu1 %v3304_v9 }
 0xc83   : > { %v3308_v15 = vpop.xlane.xlu0 %3307 }
 0xc84   : > { %v3312_v16 = vmul.f32 0.0078125, %v3308_v15  ;;  %v11552_v15 = vpack.c.bf16 %v11548_v14, %v11546_v12 }
 0xc85   : > { %v3310_v17 = vpop.xlane.xlu1 %3309 }
 0xc86   : > { %v3314_v28 = vsub.f32 %v3303_v8, %v3312_v16  ;;  %v3313_v29 = vmul.f32 0.0078125, %v3310_v17  ;;  %v8292_v8 = vld [vmem:[%s11270_s3 + $0xa8] ss:$12 sps:$4 sm:$0xff]   ;;  %v8295_v16 = vld [vmem:[%s11268_s22 + $0x40] sm:$0xff]  }
 0xc87   : > { %v8296_v17 = vld [vmem:[%s11268_s22] sm:$0xff]   ;;  %7385 = vmatprep.subr.bf16.mxu0 %v8295_v16 }
 0xc88   : > { %v3315_v18 = vsub.f32 %v3304_v9, %v3313_v29  ;;  %v3316_v19 = vmul.f32 %v3314_v28, %v3314_v28  ;;  %v11535_v9 = vld [vmem:[#allocation3] sm:$0xff]  ;;  %7386 = vmatpush3.bf16.msra.mxu0 %v8296_v17 }
 0xc89   : > { %v11541_v11 = vpack.c.bf16 %v11537_v10, %v11535_v9  ;;  %v8298_v29 = vld [vmem:[%s11268_s22 + $0x8] sm:$0xff]  }
 0xc8a   : > { %3318 = vadd.xlane.f32.xlu0 %v3316_v19  ;;  %v3317_v20 = vmul.f32 %v3315_v18, %v3315_v18  ;;  %v8300_v19 = vld [vmem:[%s11268_s22 + $0x10] sm:$0xff]  }
 0xc8c   : > { %3320 = vadd.xlane.f32.xlu1 %v3317_v20  ;;  %v8301_v20 = vld [vmem:[%s11268_s22 + $0x58] sm:$0xff]  }
 0xd17   : > { %v3319_v35 = vpop.xlane.xlu0 %3318 }
 0xd18   : > { %v3322_v42 = vmul.f32 0.0078125, %v3319_v35 }
 0xd19   : > { %v3321_v43 = vpop.xlane.xlu1 %3320 }
 0xd1a   : > { %v3324_v44 = vadd.f32 1e-05, %v3322_v42  ;;  %v3323_v45 = vmul.f32 0.0078125, %v3321_v43 }
 0xd1c   : > { %8375 = vrsqrt.f32 %v3324_v44  ;;  %v3325_v46 = vadd.f32 1e-05, %v3323_v45 }
 0xd1e   : > { %8377 = vrsqrt.f32 %v3325_v46 }
 0xd26   : > { %v8376_v47 = vpop.eup %8375 }
 0xd27   : > { %v3328_v49 = vmul.f32 %v8376_v47, %v3314_v28  ;;  %v8297_v28 = vld [vmem:[%s11268_s22 + $0x48] sm:$0xff]  }
 0xd28   : > { %v8378_v50 = vpop.eup %8377  ;;  %7387 = vmatprep.subr.bf16.mxu0 %v8297_v28 }
 0xd29   : > { %v3329_v51 = vmul.f32 %v8378_v50, %v3315_v18  ;;  %v3336_v52 = vmul.f32 %v7139_v48, %v3328_v49  ;;  %7388 = vmatpush3.bf16.msra.mxu0 %v8298_v29  ;;  %v8299_v18 = vld [vmem:[%s11268_s22 + $0x50] sm:$0xff]   ;;  %v11577_v29 = vld [vmem:[%s11272_s9] sm:$0x7]  ;;  %s12440_s9 = scalar_lea.vmem [#allocation25], %s11243_s24 }
 0xd2a   : > { %7389 = vmatprep.subr.bf16.mxu0 %v8299_v18  ;;  %v3803_v38 = vrot.slane %v11577_v29, %v11421_v34 }
 0xd2b   : > { %v3337_v54 = vmul.f32 %v7139_v48, %v3329_v51  ;;  %v11513_v55 = vadd.f32 %v7140_v53, %v3336_v52 }
 0xd2d   : > { %v11515_v56 = vadd.f32 %v7140_v53, %v3337_v54  ;;  %7390 = vmatpush3.bf16.msra.mxu0 %v8300_v19 }
 0xd2e   : > { %7391 = vmatprep.subr.bf16.mxu0 %v8301_v20 }
 0xd2f   : > { %v3346_v58 = vpack.c.bf16 %v11515_v56, %v11513_v55 }
 0xd31   : > { %3488 = vmatmul.mubr.bf16.vlgmr.msra.gmra.mrb[8].mxu1 %v3346_v58  ;;  %7392 = vmatpush3.bf16.msra.mxu0 %v8302_v21 }
 0xd32   : > { %3940 = vmatpush1.bf16.msra.mxu1 %v8271_v57  ;;  %3971 = vmatprep.mubr.bf16.mxu1 %v9950_v13 }
 0xd33   : > { %3941 = vmatprep.subr.bf16.mxu1 %v8276_v59  ;;  %7393 = vmatprep.subr.bf16.mxu0 %v8303_v23 }
 0xd35   : > { %7394 = vmatpush3.bf16.msra.mxu0 %v8304_v24  ;;  %v3799_v24 = vrot.slane %v11577_v29, %v11427_v36 }
 0xd36   : > { %3942 = vmatpush1.bf16.msra.mxu1 %v8274_v60  ;;  %7395 = vmatprep.subr.bf16.mxu0 %v8305_v25 }
 0xd37   : > { %3943 = vmatprep.subr.bf16.mxu1 %v8279_v61 }
 0xd39   : > { %7396 = vmatpush3.bf16.msra.mxu0 %v8306_v26 }
 0xd3a   : > { %3944 = vmatpush1.bf16.msra.mxu1 %v8277_v62  ;;  %7397 = vmatprep.subr.bf16.mxu0 %v8307_v27 }
 0xd3b   : > { %3945 = vmatprep.subr.bf16.mxu1 %v8282_v63 }
 0xd3d   : > { %7398 = vmatpush3.bf16.msra.mxu0 %v8308_v30 }
 0xd3e   : > { %3946 = vmatpush1.bf16.msra.mxu1 %v8280_v0  ;;  %7399 = vmatprep.subr.bf16.mxu0 %v8309_v32 }
 0xd3f   : > { %3947 = vmatprep.subr.bf16.mxu1 %v8285_v1 }
 0xd41   : > { %7400 = vmatpush3.bf16.msra.mxu0 %v8310_v37 }
 0xd42   : > { %3948 = vmatpush1.bf16.msra.mxu1 %v8283_v2 }
 0xd43   : > { %3949 = vmatprep.subr.bf16.mxu1 %v8288_v3 }
 0xd46   : > { %3950 = vmatpush1.bf16.msra.mxu1 %v8286_v4 }
 0xd47   : > { %3951 = vmatprep.subr.bf16.mxu1 %v8291_v5 }
 0xd4a   : > { %3952 = vmatpush1.bf16.msra.mxu1 %v8289_v6 }
 0xd4b   : > { %3953 = vmatprep.subr.bf16.mxu1 %v8294_v7 }
 0xd4e   : > { %3954 = vmatpush1.bf16.msra.mxu1 %v8292_v8 }
 0xd4f   : > { %7613 = vmatprep.subr.bf16.mxu1 %v9951_v31 }
 0xd51   : > { %3972 = vmatmul.mubr.bf16.vlgmr.msra.gmra.mrb[12].mxu1 %v11541_v11 }
 0xd52   : > { %3981 = vmatprep.mubr.bf16.mxu1 %v9950_v13 }
 0xd59   : > { %3982 = vmatmul.mubr.bf16.gmra.mrb[16].mxu1 %v11552_v15 }
 0xd5a   : > { %7615 = vmatprep.mubr.msk.bf16.mxu1 %vm9952_vm1, %v9951_v31 }
 0xe04   : > { %v3489_v41 = vpop.f32.mrb[8].mxu1 }
 0xe05   : > { %v3490_v35 = vadd.f32 %v3489_v41, %v3368_v39  ;;  %v3491_v42 = vpop.f32.mrb[9].mxu1 }
 0xe06   : > { %v3492_v43 = vadd.f32 %v3491_v42, %v3372_v40  ;;  %v3493_v44 = vpop.f32.mrb[10].mxu1 }
 0xe07   : > { %v3498_v45 = vmul.f32 %v3490_v35, %v3490_v35  ;;  %v3494_v46 = vadd.f32 %v3493_v44, %v3368_v39  ;;  %v3495_v47 = vpop.f32.mrb[11].mxu1 }
 0xe08   : > { %v3499_v48 = vmul.f32 %v3492_v43, %v3492_v43  ;;  %v3496_v49 = vadd.f32 %v3495_v47, %v3372_v40 }
 0xe09   : > { %v3502_v50 = vmul.f32 %v3498_v45, %v3490_v35  ;;  %v3500_v51 = vmul.f32 %v3494_v46, %v3494_v46 }
 0xe0a   : > { %v3503_v52 = vmul.f32 %v3499_v48, %v3492_v43  ;;  %v3501_v53 = vmul.f32 %v3496_v49, %v3496_v49 }
 0xe0b   : > { %v3506_v54 = vmul.f32 0.044715, %v3502_v50  ;;  %v3504_v57 = vmul.f32 %v3500_v51, %v3494_v46 }
 0xe0c   : > { %v3507_v58 = vmul.f32 0.044715, %v3503_v52  ;;  %v3505_v59 = vmul.f32 %v3501_v53, %v3496_v49 }
 0xe0d   : > { %v3510_v60 = vadd.f32 %v3506_v54, %v3490_v35  ;;  %v3508_v61 = vmul.f32 0.044715, %v3504_v57 }
 0xe0e   : > { %v3511_v62 = vadd.f32 %v3507_v58, %v3492_v43  ;;  %v3509_v63 = vmul.f32 0.044715, %v3505_v59 }
 0xe0f   : > { %v3514_v0 = vmul.f32 0.7978846, %v3510_v60  ;;  %v3512_v1 = vadd.f32 %v3508_v61, %v3494_v46 }
 0xe10   : > { %v3515_v2 = vmul.f32 0.7978846, %v3511_v62  ;;  %v3513_v3 = vadd.f32 %v3509_v63, %v3496_v49 }
 0xe11   : > { %8379 = vtanh.f32 %v3514_v0  ;;  %v3516_v4 = vmul.f32 0.7978846, %v3512_v1  ;;  %v8311_v0 = vld [vmem:[%s11270_s3 + $0x8] ss:$12 sps:$4 sm:$0xff]   ;;  %v8312_v1 = vld [vmem:[%s11270_s3 + $0x20] ss:$12 sps:$4 sm:$0xff]  }
 0xe12   : > { %8381 = vtanh.f32 %v3515_v2  ;;  %v3517_v5 = vmul.f32 0.7978846, %v3513_v3  ;;  %7593 = vmatprep.subr.bf16.mxu0 %v8311_v0  ;;  %v8313_v2 = vld [vmem:[%s11270_s3 + $0x38] ss:$12 sps:$4 sm:$0xff]   ;;  %v8314_v3 = vld [vmem:[%s11270_s3 + $0x50] ss:$12 sps:$4 sm:$0xff]  }
 0xe13   : > { %8383 = vtanh.f32 %v3516_v4  ;;  %v8315_v4 = vld [vmem:[%s11270_s3 + $0x68] ss:$12 sps:$4 sm:$0xff]  }
 0xe14   : > { %8385 = vtanh.f32 %v3517_v5  ;;  %v8316_v5 = vld [vmem:[%s11270_s3 + $0x80] ss:$12 sps:$4 sm:$0xff]  }
 0xe1b   : > { %v8380_v6 = vpop.eup %8379 }
 0xe1c   : > { %v8382_v7 = vpop.eup %8381  ;;  %v3522_v8 = vadd.f32 1.0, %v8380_v6  ;;  %v8317_v6 = vld [vmem:[%s11270_s3 + $0x98] ss:$12 sps:$4 sm:$0xff]  }
 0xe1d   : > { %v8384_v16 = vpop.eup %8383  ;;  %v3523_v17 = vadd.f32 1.0, %v8382_v7  ;;  %v8318_v7 = vld [vmem:[%s11270_s3 + $0xb0] ss:$12 sps:$4 sm:$0xff]   ;;  %s12443_s3 = scalar_lea.vmem [#allocation27], %s11243_s24 }
 0xe1e   : > { %v8386_v28 = vpop.eup %8385  ;;  %v3526_v18 = vmul.f32 0.5, %v3522_v8  ;;  %v3524_v19 = vadd.f32 1.0, %v8384_v16 }
 0xe1f   : > { %v3525_v20 = vadd.f32 1.0, %v8386_v28  ;;  %v3527_v21 = vmul.f32 0.5, %v3523_v17 }
 0xe20   : > { %v3528_v23 = vmul.f32 0.5, %v3524_v19  ;;  %v3530_v26 = vmul.f32 %v3526_v18, %v3490_v35 }
 0xe21   : > { %v3529_v25 = vmul.f32 0.5, %v3525_v20  ;;  %v3531_v30 = vmul.f32 %v3527_v21, %v3492_v43 }
 0xe22   : > { %v3532_v27 = vmul.f32 %v3528_v23, %v3494_v46 }
 0xe23   : > { %v3533_v32 = vmul.f32 %v3529_v25, %v3496_v49 }
 0xe24   : > { %v3973_v37 = vpop.f32.mrb[12].mxu1  ;;  %v3534_v39 = vpack.c.bf16 %v3532_v27, %v3530_v26 }
 0xe25   : > { %v3974_v40 = vadd.f32 %v3973_v37, %v3799_v24  ;;  %v3975_v41 = vpop.f32.mrb[13].mxu1  ;;  %v3535_v42 = vpack.c.bf16 %v3533_v32, %v3531_v30 }
 0xe26   : > { %v3977_v44 = vpop.f32.mrb[14].mxu1  ;;  %v3976_v48 = vadd.f32 %v3975_v41, %v3803_v38 }
 0xe27   : > { %v3978_v45 = vadd.f32 %v3977_v44, %v3799_v24  ;;  %v3979_v47 = vpop.f32.mrb[15].mxu1  ;;  %3703 = vmatprep.mubr.bf16.mxu0 %v3535_v42  ;;  %v4041_v51 = vmul.f32 0.088388346, %v3974_v40 }
 0xe28   : > { %v3980_v50 = vadd.f32 %v3979_v47, %v3803_v38  ;;  %3704 = vmatmul.mubr.bf16.vlgmr.msra.gmra.mrb[20].mxu0 %v3534_v39 }
 0xe29   : > { %v4042_v35 = vmul.f32 0.088388346, %v3978_v45  ;;  %7609 = vmatprep.mubr.bf16.mxu0 %v11541_v11  ;;  %7594 = vmatpush3.bf16.msra.mxu0 %v8311_v0 }
 0xe2a   : > { %v4047_v43 = vpack.c.bf16 %v3980_v50, %v3976_v48  ;;  %7595 = vmatprep.subr.bf16.mxu0 %v8312_v1 }
 0xe2b   : > { %v4045_v46 = vpack.c.bf16 %v4042_v35, %v4041_v51 }
 0xe2c   : > { %v3983_v49 = vpop.f32.mrb[16].mxu1  ;;  %7614 = vmatpush3.bf16.xpose.msra.mxu1 %v4047_v43 }
 0xe2d   : > { %v3984_v52 = vadd.f32 %v3983_v49, %v3799_v24  ;;  %v3985_v53 = vpop.f32.mrb[17].mxu1  ;;  %7619 = vmatprep.subr.bf16.mxu1 %v9951_v31  ;;  %7596 = vmatpush3.bf16.msra.mxu0 %v8312_v1 }
 0xe2e   : > { %v3987_v54 = vpop.f32.mrb[18].mxu1  ;;  %v3986_v59 = vadd.f32 %v3985_v53, %v3803_v38  ;;  %7597 = vmatprep.subr.bf16.mxu0 %v8313_v2 }
 0xe2f   : > { %v3988_v57 = vadd.f32 %v3987_v54, %v3799_v24  ;;  %v3989_v58 = vpop.f32.mrb[19].mxu1  ;;  %v4043_v61 = vmul.f32 0.088388346, %v3984_v52 }
 0xe30   : > { %v3990_v60 = vadd.f32 %v3989_v58, %v3803_v38 }
 0xe31   : > { %v4044_v62 = vmul.f32 0.088388346, %v3988_v57  ;;  %7598 = vmatpush3.bf16.msra.mxu0 %v8313_v2 }
 0xe32   : > { %v4048_v63 = vpack.c.bf16 %v3990_v60, %v3986_v59  ;;  %7599 = vmatprep.subr.bf16.mxu0 %v8314_v3  ;;  %v3807_v59 = vrot.slane %v11577_v29, %v2755_v22 }
 0xe33   : > { %v4046_v11 = vpack.c.bf16 %v4044_v62, %v4043_v61  ;;  %7616 = vmatmul.mubr.bf16.vlgmr.msra.gmra.mrb[20].mxu1 %v4045_v46 }
 0xe34   : > { %7620 = vmatpush3.bf16.xpose.msra.mxu1 %v4048_v63  ;;  %7621 = vmatprep.mubr.msk.bf16.mxu1 %vm9952_vm1, %v9951_v31 }
 0xe35   : > { %7625 = vmatprep.subr.bf16.mxu1 %v9951_v31  ;;  %7600 = vmatpush3.bf16.msra.mxu0 %v8314_v3 }
 0xe36   : > { %7601 = vmatprep.subr.bf16.mxu0 %v8315_v4 }
 0xe39   : > { %7602 = vmatpush3.bf16.msra.mxu0 %v8315_v4 }
 0xe3a   : > { %7603 = vmatprep.subr.bf16.mxu0 %v8316_v5 }
 0xe3b   : > { %7622 = vmatmul.mubr.bf16.vlgmr.msra.gmra.mrb[24].mxu1 %v4046_v11 }
 0xe3c   : > { %7627 = vmatprep.mubr.msk.bf16.mxu1 %vm9952_vm1, %v9951_v31 }
 0xe3d   : > { %7604 = vmatpush3.bf16.msra.mxu0 %v8316_v5  ;;  %v8319_v5 = vld [vmem:[%s11274_s8] sm:$0xff]  }
 0xe3e   : > { %7605 = vmatprep.subr.bf16.mxu0 %v8317_v6 }
 0xe41   : > { %7606 = vmatpush3.bf16.msra.mxu0 %v8317_v6 }
 0xe42   : > { %7607 = vmatprep.subr.bf16.mxu0 %v8318_v7 }
 0xe45   : > { %7608 = vmatpush3.bf16.msra.mxu0 %v8318_v7 }
 0xe46   : > { %7631 = vmatprep.subr.bf16.mxu0 %v9951_v31 }
 0xe48   : > { %7610 = vmatmul.mubr.bf16.vlgmr.msra.gmra.mrb[24].mxu0 %v11552_v15 }
 0xe49   : > { %7633 = vmatprep.mubr.msk.bf16.mxu0 %vm9952_vm1, %v9951_v31 }
 0xefb   : > { %v7401_v8 = vpop.f32.mrb[20].mxu0 }
 0xefc   : > { %v7402_v16 = vpop.f32.mrb[21].mxu0 }
 0xefd   : > { %v11602_v17 = vadd.f32 %v7402_v16, %v7401_v8  ;;  %v7404_v28 = vpop.f32.mrb[22].mxu0 }
 0xefe   : > { %v7405_v18 = vpop.f32.mrb[23].mxu0 }
 0xeff   : > { %v11604_v19 = vadd.f32 %v7405_v18, %v7404_v28 }
 0xf06   : > { %v4085_v20 = vpop.f32.mrb[20].mxu1 }
 0xf07   : > { %v7617_v21 = vpop.f32.mrb[21].mxu1  ;;  %v4134_v23 = vsel %vm4133_vm4, %v4085_v20, -inf }
 0xf08   : > { %4135 = vmax.xlane.f32.xlu0 %v4134_v23  ;;  %v4088_v24 = vpop.f32.mrb[22].mxu1  ;;  %v8320_v21 = vld [vmem:[%s11274_s8 + $0x8] sm:$0xff]  }
 0xf09   : > { %v7618_v25 = vpop.f32.mrb[23].mxu1  ;;  %v4137_v15 = vsel %vm4133_vm4, %v4088_v24, -inf }
 0xf0a   : > { %4138 = vmax.xlane.f32.xlu1 %v4137_v15 }
 0xf0e   : > { %v4126_v31 = vpop.f32.mrb[24].mxu1 }
 0xf0f   : > { %v7623_v26 = vpop.f32.mrb[25].mxu1  ;;  %v4140_v27 = vsel %vm4133_vm4, %v4126_v31, -inf }
 0xf10   : > { %4141 = vmax.xlane.f32.xlu0 %v4140_v27  ;;  %v4129_v30 = vpop.f32.mrb[26].mxu1  ;;  %v8322_v27 = vld [vmem:[%s11274_s8 + $0x18] sm:$0xff]  }
 0xf11   : > { %v7624_v32 = vpop.f32.mrb[27].mxu1  ;;  %v4143_v37 = vsel %vm4133_vm4, %v4129_v30, -inf }
 0xf12   : > { %4144 = vmax.xlane.f32.xlu1 %v4143_v37  ;;  %v8324_v32 = vld [vmem:[%s11274_s8 + $0x28] sm:$0xff]   ;;  %v8325_v37 = vld [vmem:[%s11274_s8 + $0x30] sm:$0xff]  }
 0xf1b   : > { %v7611_v60 = vpop.f32.mrb[24].mxu0 }
 0xf1c   : > { %v4026_v61 = vpop.f32.mrb[25].mxu0  ;;  %v4035_v2 = vadd.f32 %v7611_v60, %v3807_v59 }
 0xf1d   : > { %v7612_v62 = vpop.f32.mrb[26].mxu0  ;;  %v4027_v11 = vadd.f32 %v4026_v61, %v3807_v59 }
 0xf1e   : > { %v4029_v63 = vpop.f32.mrb[27].mxu0  ;;  %v4038_v3 = vadd.f32 %v7612_v62, %v3807_v59 }
 0xf1f   : > { %v4030_v0 = vadd.f32 %v4029_v63, %v3807_v59  ;;  %v8327_v63 = vld [vmem:[%s11279_s20] ss:$8 sps:$4 sm:$0xff]  }
 0xf20   : > { %v4050_v4 = vpack.c.bf16 %v4038_v3, %v4035_v2 }
 0xf21   : > { %v4049_v1 = vpack.c.bf16 %v4030_v0, %v4027_v11  ;;  %v8329_v11 = vld [vmem:[%s11279_s20 + $0x4] ss:$8 sps:$4 sm:$0xff]   ;;  %v8332_v0 = vld [vmem:[%s11279_s20 + $0x14] ss:$8 sps:$4 sm:$0xff]  }
 0xf22   : > { %7632 = vmatpush3.bf16.msra.mxu0 %v4050_v4 }
 0xf23   : > { %7626 = vmatpush3.bf16.msra.mxu1 %v4049_v1  ;;  %4570 = vmatprep.subr.bf16.mxu0 %v8329_v11  ;;  %v8330_v1 = vld [vmem:[%s11279_s20 + $0x10] ss:$8 sps:$4 sm:$0xff]  }
 0xf24   : > { %7637 = vmatprep.subr.bf16.mxu1 %v8319_v5 }
 0xf95   : > { %v4136_v38 = vpop.xlane.xlu0 %4135 }
 0xf96   : > { %v4146_v39 = vsub.f32 %v4085_v20, %v4136_v38  ;;  %v8326_v38 = vld [vmem:[%s11274_s8 + $0x38] sm:$0xff]  }
 0xf97   : > { %v4139_v40 = vpop.xlane.xlu1 %4138 }
 0xf98   : > { %v4150_v41 = vmul.f32 1.442695, %v4146_v39  ;;  %v4147_v42 = vsub.f32 %v4088_v24, %v4139_v40  ;;  %v8321_v24 = vld [vmem:[%s11274_s8 + $0x10] sm:$0xff]  }
 0xf9a   : > { %8387 = vpow2.f32 %v4150_v41  ;;  %v4152_v44 = vmul.f32 1.442695, %v4147_v42 }
 0xf9c   : > { %8389 = vpow2.f32 %v4152_v44 }
 0xf9d   : > { %v4142_v45 = vpop.xlane.xlu0 %4141 }
 0xf9e   : > { %v4148_v47 = vsub.f32 %v4126_v31, %v4142_v45 }
 0xf9f   : > { %v4145_v48 = vpop.xlane.xlu1 %4144 }
 0xfa0   : > { %v4154_v50 = vmul.f32 1.442695, %v4148_v47  ;;  %v4149_v51 = vsub.f32 %v4129_v30, %v4145_v48  ;;  %v8323_v30 = vld [vmem:[%s11274_s8 + $0x20] sm:$0xff]   ;;  %s12447_s8 = sld [smem:[#allocation135_spill]] }
 0xfa2   : > { %8391 = vpow2.f32 %v4154_v50  ;;  %v4156_v35 = vmul.f32 1.442695, %v4149_v51 }
 0xfa4   : > { %v8388_v43 = vpop.eup %8387  ;;  %8393 = vpow2.f32 %v4156_v35  ;;  %v7202_v35 = vld [vmem:[%s12440_s9] ss:$0 sm:$0xff] }
 0xfa5   : > { %v4158_v46 = vsel %vm4133_vm4, %v8388_v43, 0.0 }
 0xfa6   : > { %v8390_v49 = vpop.eup %8389  ;;  %4159 = vadd.xlane.f32.xlu0 %v4158_v46 }
 0xfa7   : > { %v4161_v52 = vsel %vm4133_vm4, %v8390_v49, 0.0 }
 0xfa8   : > { %4162 = vadd.xlane.f32.xlu1 %v4161_v52 }
 0xfac   : > { %v8392_v53 = vpop.eup %8391 }
 0xfad   : > { %v4164_v54 = vsel %vm4133_vm4, %v8392_v53, 0.0 }
 0xfae   : > { %v8394_v57 = vpop.eup %8393  ;;  %4165 = vadd.xlane.f32.xlu0 %v4164_v54 }
 0xfaf   : > { %v4167_v58 = vsel %vm4133_vm4, %v8394_v57, 0.0 }
 0xfb0   : > { %4168 = vadd.xlane.f32.xlu1 %v4167_v58 }
0x1033   : > { %v4160_v6 = vpop.xlane.xlu0 %4159 }
0x1034   : > { %8395 = vrcp.f32 %v4160_v6 }
0x1035   : > { %v4163_v7 = vpop.xlane.xlu1 %4162 }
0x1036   : > { %8397 = vrcp.f32 %v4163_v7  ;;  %v7157_v7 = vld [vmem:[%s2506_s4] ss:$0 sm:$0xff]  ;;  %s11790_s4 = sld [smem:[#allocation5 + %s12447_s8]] }
0x103b   : > { %v4166_v22 = vpop.xlane.xlu0 %4165 }
0x103c   : > { %8399 = vrcp.f32 %v4166_v22  ;;  %p7248_p6 = scmp.ne.s32.totalorder %s11790_s4, 1 }
0x103d   : > { %v4169_v29 = vpop.xlane.xlu1 %4168  ;;  %vm5034_vm5 = vcmask (!%p7248_p6), 1041409  }
0x103e   : > { %v8396_v8 = vpop.eup %8395  ;;  %8401 = vrcp.f32 %v4169_v29 }
0x103f   : > { %v4174_v28 = vmul.f32 %v8396_v8, %v8388_v43 }
0x1040   : > { %v8398_v16 = vpop.eup %8397 }
0x1041   : > { %v4175_v18 = vmul.f32 %v8398_v16, %v8390_v49 }
0x1043   : > { %v4178_v20 = vpack.c.bf16 %v4175_v18, %v4174_v28  ;;  %v3706_v28 = vadd.f32 %v11602_v17, %v7157_v7 }
0x1045   : > { %7628 = vmatmul.mubr.msk.bf16.vlgmr.msra.gmra.mrb[28].mxu1 %vm4133_vm4, %v4178_v20 }
0x1046   : > { %v8400_v23 = vpop.eup %8399  ;;  %7638 = vmatpush3.bf16.msra.mxu1 %v8319_v5 }
0x1047   : > { %7639 = vmatprep.subr.bf16.mxu1 %v8320_v21  ;;  %v4176_v15 = vmul.f32 %v8400_v23, %v8392_v53 }
0x1048   : > { %v8402_v25 = vpop.eup %8401 }
0x1049   : > { %v4177_v31 = vmul.f32 %v8402_v25, %v8394_v57  ;;  %v8333_v25 = vld [vmem:[%s11279_s20 + $0x20] ss:$8 sps:$4 sm:$0xff]  }
0x104a   : > { %7640 = vmatpush3.bf16.msra.mxu1 %v8320_v21  ;;  %v3709_v21 = vadd.f32 %v11604_v19, %v7157_v7  ;;  %v8335_v19 = vld [vmem:[%s11279_s20 + $0x24] ss:$8 sps:$4 sm:$0xff]   ;;  %v8356_v7 = vld [vmem:[%s11283_s13 + $0x10] sm:$0xff]  }
0x104b   : > { %v4179_v26 = vpack.c.bf16 %v4177_v31, %v4176_v15  ;;  %7641 = vmatprep.subr.bf16.mxu1 %v8321_v24  ;;  %v8338_v15 = vld [vmem:[%s11279_s20 + $0x34] ss:$8 sps:$4 sm:$0xff]   ;;  %v8336_v31 = vld [vmem:[%s11279_s20 + $0x30] ss:$8 sps:$4 sm:$0xff]  }
0x104c   : > { %v11664_v17 = vadd.f32 %v3709_v21, %v11515_v56  ;;  %v8344_v56 = vld [vmem:[%s11279_s20 + $0x54] ss:$8 sps:$4 sm:$0xff]  }
0x104d   : > { %7634 = vmatmul.mubr.msk.bf16.vlgmr.msra.gmra.mrb[28].mxu0 %vm4133_vm4, %v4179_v26  ;;  %v8339_v26 = vld [vmem:[%s11279_s20 + $0x40] ss:$8 sps:$4 sm:$0xff]   ;;  %v8364_v21 = vld [vmem:[%s11283_s13 + $0x30] sm:$0xff]  }
0x104e   : > { %7642 = vmatpush3.bf16.msra.mxu1 %v8321_v24  ;;  %4602 = vmatprep.mubr.bf16.mxu0 %v9950_v13  ;;  %v11660_v24 = vadd.f32 %v3706_v28, %v11513_v55  ;;  %v8341_v55 = vld [vmem:[%s11279_s20 + $0x44] ss:$8 sps:$4 sm:$0xff]  }
0x104f   : > { %7643 = vmatprep.subr.bf16.mxu1 %v8322_v27  ;;  %4571 = vmatpush1.bf16.msra.mxu0 %v8327_v63  ;;  %v8361_v28 = vld [vmem:[%s11283_s13 + $0x68] sm:$0xff]  }
0x1050   : > { %4572 = vmatprep.subr.bf16.mxu0 %v8332_v0 }
0x1052   : > { %7644 = vmatpush3.bf16.msra.mxu1 %v8322_v27  ;;  %v8342_v27 = vld [vmem:[%s11279_s20 + $0x50] ss:$8 sps:$4 sm:$0xff]  }
0x1053   : > { %7645 = vmatprep.subr.bf16.mxu1 %v8323_v30  ;;  %4573 = vmatpush1.bf16.msra.mxu0 %v8330_v1 }
0x1054   : > { %4574 = vmatprep.subr.bf16.mxu0 %v8335_v19  ;;  %v8366_v19 = vld [vmem:[%s11283_s13 + $0x38] sm:$0xff]  }
0x1056   : > { %7646 = vmatpush3.bf16.msra.mxu1 %v8323_v30  ;;  %v8347_v30 = vld [vmem:[%s11279_s20 + $0x64] ss:$8 sps:$4 sm:$0xff]  }
0x1057   : > { %7647 = vmatprep.subr.bf16.mxu1 %v8324_v32  ;;  %4575 = vmatpush1.bf16.msra.mxu0 %v8333_v25  ;;  %v4478_v25 = vld [vmem:[%s11281_s21] sm:$0x3]  ;;  %s12444_s21 = scalar_lea.vmem [#allocation31], %s11243_s24 }
0x1058   : > { %4576 = vmatprep.subr.bf16.mxu0 %v8338_v15  ;;  %v4483_v15 = vrot.slane %v4478_v25, %v11427_v36 }
0x105a   : > { %7648 = vmatpush3.bf16.msra.mxu1 %v8324_v32  ;;  %v8345_v32 = vld [vmem:[%s11279_s20 + $0x60] ss:$8 sps:$4 sm:$0xff]  }
0x105b   : > { %7649 = vmatprep.subr.bf16.mxu1 %v8325_v37  ;;  %4577 = vmatpush1.bf16.msra.mxu0 %v8336_v31  ;;  %v4487_v31 = vrot.slane %v4478_v25, %v11421_v34 }
0x105c   : > { %4578 = vmatprep.subr.bf16.mxu0 %v8341_v55 }
0x105e   : > { %7650 = vmatpush3.bf16.msra.mxu1 %v8325_v37  ;;  %v8350_v37 = vld [vmem:[%s11279_s20 + $0x74] ss:$8 sps:$4 sm:$0xff]  }
0x105f   : > { %7651 = vmatprep.subr.bf16.mxu1 %v8326_v38  ;;  %4579 = vmatpush1.bf16.msra.mxu0 %v8339_v26 }
0x1060   : > { %4580 = vmatprep.subr.bf16.mxu0 %v8344_v56 }
0x1062   : > { %7652 = vmatpush3.bf16.msra.mxu1 %v8326_v38  ;;  %v8348_v38 = vld [vmem:[%s11279_s20 + $0x70] ss:$8 sps:$4 sm:$0xff]   ;;  %s12442_s20 = scalar_lea.vmem [#allocation26], %s11243_s24 }
0x1063   : > { %4581 = vmatpush1.bf16.msra.mxu0 %v8342_v27 }
0x1064   : > { %4582 = vmatprep.subr.bf16.mxu0 %v8347_v30 }
0x1067   : > { %4583 = vmatpush1.bf16.msra.mxu0 %v8345_v32 }
0x1068   : > { %4584 = vmatprep.subr.bf16.mxu0 %v8350_v37 }
0x106b   : > { %4585 = vmatpush1.bf16.msra.mxu0 %v8348_v38 }
0x1118   : > { %v4217_v39 = vpop.f32.mrb[28].mxu1 }
0x1119   : > { %v7629_v40 = vpop.f32.mrb[29].mxu1 }
0x111a   : > { %v4220_v41 = vpop.f32.mrb[30].mxu1 }
0x111b   : > { %v4268_v42 = vpack.c.bf16 %v4220_v41, %v4217_v39  ;;  %v7630_v44 = vpop.f32.mrb[31].mxu1 }
0x111d   : > { %7653 = vmatprep.mubr.bf16.mxu1 %v4268_v42 }
0x1120   : > { %v4261_v45 = vpop.f32.mrb[28].mxu0 }
0x1121   : > { %v7635_v47 = vpop.f32.mrb[29].mxu0 }
0x1122   : > { %v4264_v48 = vpop.f32.mrb[30].mxu0 }
0x1123   : > { %v4269_v50 = vpack.c.bf16 %v4264_v48, %v4261_v45  ;;  %v7636_v51 = vpop.f32.mrb[31].mxu0 }
0x1125   : > { %7654 = vmatmul.mubr.bf16.vlgmr.msra.gmra.mrb[32].mxu1 %v4269_v50 }
0x11f8   : > { %v7655_v43 = vpop.f32.mrb[32].mxu1 }
0x11f9   : > { %v4375_v46 = vpop.f32.mrb[33].mxu1  ;;  %v4384_v54 = vadd.f32 %v7655_v43, %v7202_v35 }
0x11fa   : > { %v4376_v49 = vadd.f32 %v7202_v35, %v4375_v46  ;;  %v7656_v52 = vpop.f32.mrb[34].mxu1 }
0x11fb   : > { %v4378_v53 = vpop.f32.mrb[35].mxu1  ;;  %v4387_v59 = vadd.f32 %v7656_v52, %v7202_v35  ;;  %v4392_v61 = vadd.f32 %v4384_v54, %v11546_v12 }
0x11fc   : > { %v4379_v57 = vadd.f32 %v7202_v35, %v4378_v53  ;;  %v4390_v58 = vadd.f32 %v4376_v49, %v11535_v9  ;;  %v7211_v49 = vld [vmem:[%s12442_s20] ss:$0 sm:$0xff] }
0x11fd   : > { %v4393_v62 = vadd.f32 %v4387_v59, %v11548_v14  ;;  %v7212_v59 = vld [vmem:[%s12443_s3] ss:$0 sm:$0xff] }
0x11fe   : > { %4396 = vadd.xlane.f32.xlu0 %v4390_v58  ;;  %v4391_v60 = vadd.f32 %v4379_v57, %v11537_v10 }
0x1200   : > { %4398 = vadd.xlane.f32.xlu1 %v4391_v60 }
0x1202   : > { %4400 = vadd.xlane.f32.xlu0 %v4392_v61 }
0x1204   : > { %4402 = vadd.xlane.f32.xlu1 %v4393_v62 }
0x128b   : > { %v4397_v9 = vpop.xlane.xlu0 %4396 }
0x128c   : > { %v4404_v2 = vmul.f32 0.0078125, %v4397_v9 }
0x128d   : > { %v4399_v10 = vpop.xlane.xlu1 %4398 }
0x128e   : > { %v11638_v3 = vsub.f32 %v4390_v58, %v4404_v2  ;;  %v4405_v12 = vmul.f32 0.0078125, %v4399_v10 }
0x128f   : > { %v4401_v4 = vpop.xlane.xlu0 %4400 }
0x1290   : > { %v11640_v5 = vsub.f32 %v4391_v60, %v4405_v12  ;;  %v4406_v14 = vmul.f32 0.0078125, %v4401_v4  ;;  %v4412_v6 = vmul.f32 %v11638_v3, %v11638_v3  ;;  %v8351_v4 = vld [vmem:[%s11283_s13 + $0x40] sm:$0xff]  }
0x1291   : > { %v4403_v22 = vpop.xlane.xlu1 %4402  ;;  %7435 = vmatprep.subr.bf16.mxu1 %v8351_v4 }
0x1292   : > { %v11647_v29 = vsub.f32 %v4392_v61, %v4406_v14  ;;  %v4407_v8 = vmul.f32 0.0078125, %v4403_v22  ;;  %4416 = vadd.xlane.f32.xlu0 %v4412_v6  ;;  %v4413_v16 = vmul.f32 %v11640_v5, %v11640_v5  ;;  %v8353_v14 = vld [vmem:[%s11283_s13 + $0x48] sm:$0xff]   ;;  %v8357_v22 = vld [vmem:[%s11283_s13 + $0x58] sm:$0xff]  }
0x1293   : > { %v8354_v6 = vld [vmem:[%s11283_s13 + $0x8] sm:$0xff]  }
0x1294   : > { %v11652_v18 = vsub.f32 %v4393_v62, %v4407_v8  ;;  %4418 = vadd.xlane.f32.xlu1 %v4413_v16  ;;  %v4414_v20 = vmul.f32 %v11647_v29, %v11647_v29  ;;  %v8359_v8 = vld [vmem:[%s11283_s13 + $0x60] sm:$0xff]  }
0x1295   : > { %v8360_v16 = vld [vmem:[%s11283_s13 + $0x20] sm:$0xff]  }
0x1296   : > { %4420 = vadd.xlane.f32.xlu0 %v4414_v20  ;;  %v4415_v23 = vmul.f32 %v11652_v18, %v11652_v18  ;;  %v8363_v20 = vld [vmem:[%s11283_s13 + $0x70] sm:$0xff]  }
0x1298   : > { %4422 = vadd.xlane.f32.xlu1 %v4415_v23  ;;  %v8365_v23 = vld [vmem:[%s11283_s13 + $0x78] sm:$0xff]  }
0x129a   : > { %3716 = vadd.xlane.f32.xlu0 %v11660_v24 }
0x129c   : > { %3718 = vadd.xlane.f32.xlu1 %v11664_v17 }
0x131f   : > { %v4417_v39 = vpop.xlane.xlu0 %4416 }
0x1320   : > { %v4424_v40 = vmul.f32 0.0078125, %v4417_v39 }
0x1321   : > { %v4419_v41 = vpop.xlane.xlu1 %4418 }
0x1322   : > { %v4428_v42 = vadd.f32 1e-05, %v4424_v40  ;;  %v4425_v44 = vmul.f32 0.0078125, %v4419_v41 }
0x1323   : > { %v4421_v45 = vpop.xlane.xlu0 %4420 }
0x1324   : > { %8403 = vrsqrt.f32 %v4428_v42  ;;  %v4429_v47 = vadd.f32 1e-05, %v4425_v44  ;;  %v4426_v48 = vmul.f32 0.0078125, %v4421_v45 }
0x1325   : > { %v4423_v50 = vpop.xlane.xlu1 %4422 }
0x1326   : > { %8405 = vrsqrt.f32 %v4429_v47  ;;  %v4430_v51 = vadd.f32 1e-05, %v4426_v48  ;;  %v4427_v35 = vmul.f32 0.0078125, %v4423_v50 }
0x1328   : > { %8407 = vrsqrt.f32 %v4430_v51  ;;  %v4431_v43 = vadd.f32 1e-05, %v4427_v35 }
0x132a   : > { %8409 = vrsqrt.f32 %v4431_v43 }
0x132e   : > { %v8404_v46 = vpop.eup %8403 }
0x132f   : > { %v4436_v52 = vmul.f32 %v8404_v46, %v11638_v3 }
0x1330   : > { %v8406_v53 = vpop.eup %8405 }
0x1331   : > { %v4437_v54 = vmul.f32 %v8406_v53, %v11640_v5  ;;  %v4446_v57 = vmul.f32 %v7211_v49, %v4436_v52  ;;  %v8352_v5 = vld [vmem:[%s11283_s13] sm:$0xff]  }
0x1332   : > { %v8408_v58 = vpop.eup %8407  ;;  %7436 = vmatpush3.bf16.msra.mxu1 %v8352_v5 }
0x1333   : > { %v4447_v60 = vmul.f32 %v7211_v49, %v4437_v54  ;;  %v11685_v62 = vadd.f32 %v7212_v59, %v4446_v57  ;;  %v4438_v11 = vmul.f32 %v8408_v58, %v11647_v29  ;;  %7437 = vmatprep.subr.bf16.mxu1 %v8353_v14  ;;  %v8358_v29 = vld [vmem:[%s11283_s13 + $0x18] sm:$0xff]  }
0x1334   : > { %v8410_v61 = vpop.eup %8409 }
0x1335   : > { %v11687_v63 = vadd.f32 %v7212_v59, %v4447_v60  ;;  %v4439_v0 = vmul.f32 %v8410_v61, %v11652_v18  ;;  %v4448_v2 = vmul.f32 %v7211_v49, %v4438_v11  ;;  %v8362_v18 = vld [vmem:[%s11283_s13 + $0x28] sm:$0xff]  }
0x1336   : > { %7438 = vmatpush3.bf16.msra.mxu1 %v8354_v6 }
0x1337   : > { %v4460_v1 = vpack.c.bf16 %v11687_v63, %v11685_v62  ;;  %v4449_v9 = vmul.f32 %v7211_v49, %v4439_v0  ;;  %v11696_v3 = vadd.f32 %v7212_v59, %v4448_v2 }
0x1339   : > { %4603 = vmatmul.mubr.bf16.vlgmr.msra.gmra.mrb[32].mxu0 %v4460_v1  ;;  %v11694_v10 = vadd.f32 %v7212_v59, %v4449_v9 }
0x133a   : > { %4612 = vmatprep.mubr.bf16.mxu0 %v9950_v13  ;;  %v8355_v13 = vld [vmem:[%s11283_s13 + $0x50] sm:$0xff]  }
0x133b   : > { %v4461_v12 = vpack.c.bf16 %v11694_v10, %v11696_v3  ;;  %7439 = vmatprep.subr.bf16.mxu1 %v8355_v13 }
0x133c   : > { %7440 = vmatpush3.bf16.msra.mxu1 %v8356_v7 }
0x133d   : > { %7441 = vmatprep.subr.bf16.mxu1 %v8357_v22 }
0x1340   : > { %7442 = vmatpush3.bf16.msra.mxu1 %v8358_v29 }
0x1341   : > { %4613 = vmatmul.mubr.bf16.gmra.mrb[36].mxu0 %v4461_v12  ;;  %7443 = vmatprep.subr.bf16.mxu1 %v8359_v8 }
0x1344   : > { %7444 = vmatpush3.bf16.msra.mxu1 %v8360_v16 }
0x1345   : > { %7445 = vmatprep.subr.bf16.mxu1 %v8361_v28 }
0x1348   : > { %7446 = vmatpush3.bf16.msra.mxu1 %v8362_v18 }
0x1349   : > { %7447 = vmatprep.subr.bf16.mxu1 %v8363_v20 }
0x134c   : > { %7448 = vmatpush3.bf16.msra.mxu1 %v8364_v21 }
0x134d   : > { %7449 = vmatprep.subr.bf16.mxu1 %v8365_v23 }
0x1350   : > { %7450 = vmatpush3.bf16.msra.mxu1 %v8366_v19 }
0x140c   : > { %v4604_v55 = vpop.f32.mrb[32].mxu0 }
0x140d   : > { %v11719_v26 = vadd.f32 %v4604_v55, %v4483_v15  ;;  %v4606_v56 = vpop.f32.mrb[33].mxu0 }
0x140e   : > { %v11721_v27 = vadd.f32 %v4606_v56, %v4487_v31  ;;  %v4608_v30 = vpop.f32.mrb[34].mxu0 }
0x140f   : > { %v4623_v32 = vmul.f32 %v11719_v26, %v11719_v26  ;;  %v11725_v37 = vadd.f32 %v4608_v30, %v4483_v15  ;;  %v4610_v38 = vpop.f32.mrb[35].mxu0 }
0x1410   : > { %v4624_v39 = vmul.f32 %v11721_v27, %v11721_v27  ;;  %v11729_v40 = vadd.f32 %v4610_v38, %v4487_v31 }
0x1411   : > { %v4631_v41 = vmul.f32 %v4623_v32, %v11719_v26  ;;  %v4625_v42 = vmul.f32 %v11725_v37, %v11725_v37 }
0x1412   : > { %v4632_v44 = vmul.f32 %v4624_v39, %v11721_v27  ;;  %v4626_v45 = vmul.f32 %v11729_v40, %v11729_v40 }
0x1413   : > { %v4639_v47 = vmul.f32 0.044715, %v4631_v41  ;;  %v4633_v48 = vmul.f32 %v4625_v42, %v11725_v37 }
0x1414   : > { %v4640_v50 = vmul.f32 0.044715, %v4632_v44  ;;  %v4634_v51 = vmul.f32 %v4626_v45, %v11729_v40  ;;  %v4614_v35 = vpop.f32.mrb[36].mxu0 }
0x1415   : > { %v4647_v43 = vadd.f32 %v4639_v47, %v11719_v26  ;;  %v4641_v46 = vmul.f32 0.044715, %v4633_v48  ;;  %v11740_v49 = vadd.f32 %v4614_v35, %v4483_v15  ;;  %v4616_v52 = vpop.f32.mrb[37].mxu0 }
0x1416   : > { %v4648_v53 = vadd.f32 %v4640_v50, %v11721_v27  ;;  %v4642_v54 = vmul.f32 0.044715, %v4634_v51  ;;  %v11743_v57 = vadd.f32 %v4616_v52, %v4487_v31  ;;  %v4618_v58 = vpop.f32.mrb[38].mxu0 }
0x1417   : > { %v4655_v59 = vmul.f32 0.7978846, %v4647_v43  ;;  %v4649_v60 = vadd.f32 %v4641_v46, %v11725_v37  ;;  %v4627_v61 = vmul.f32 %v11740_v49, %v11740_v49  ;;  %v11748_v11 = vadd.f32 %v4618_v58, %v4483_v15  ;;  %v4620_v0 = vpop.f32.mrb[39].mxu0 }
0x1418   : > { %v4656_v1 = vmul.f32 0.7978846, %v4648_v53  ;;  %v4650_v9 = vadd.f32 %v4642_v54, %v11729_v40  ;;  %v4628_v2 = vmul.f32 %v11743_v57, %v11743_v57  ;;  %v11753_v12 = vadd.f32 %v4620_v0, %v4487_v31 }
0x1419   : > { %8411 = vtanh.f32 %v4655_v59  ;;  %v4657_v4 = vmul.f32 0.7978846, %v4649_v60  ;;  %v4635_v5 = vmul.f32 %v4627_v61, %v11740_v49  ;;  %v4629_v14 = vmul.f32 %v11748_v11, %v11748_v11 }
0x141a   : > { %8413 = vtanh.f32 %v4656_v1  ;;  %v4658_v6 = vmul.f32 0.7978846, %v4650_v9  ;;  %v4636_v13 = vmul.f32 %v4628_v2, %v11743_v57  ;;  %v4630_v7 = vmul.f32 %v11753_v12, %v11753_v12 }
0x141b   : > { %8415 = vtanh.f32 %v4657_v4  ;;  %v4643_v22 = vmul.f32 0.044715, %v4635_v5  ;;  %v4637_v29 = vmul.f32 %v4629_v14, %v11748_v11 }
0x141c   : > { %8417 = vtanh.f32 %v4658_v6  ;;  %v4644_v8 = vmul.f32 0.044715, %v4636_v13  ;;  %v4638_v16 = vmul.f32 %v4630_v7, %v11753_v12 }
0x141d   : > { %v4651_v28 = vadd.f32 %v4643_v22, %v11740_v49  ;;  %v4645_v18 = vmul.f32 0.044715, %v4637_v29  ;;  %v7229_v22 = vld [vmem:[%s12444_s21] ss:$0 sm:$0xff] }
0x141e   : > { %v4652_v20 = vadd.f32 %v4644_v8, %v11743_v57  ;;  %v4646_v21 = vmul.f32 0.044715, %v4638_v16 }
0x141f   : > { %v4659_v23 = vmul.f32 0.7978846, %v4651_v28  ;;  %v4653_v19 = vadd.f32 %v4645_v18, %v11748_v11 }
0x1420   : > { %v4660_v25 = vmul.f32 0.7978846, %v4652_v20  ;;  %v4654_v15 = vadd.f32 %v4646_v21, %v11753_v12  ;;  %v3717_v21 = vpop.xlane.xlu0 %3716 }
0x1421   : > { %8419 = vtanh.f32 %v4659_v23  ;;  %v4661_v31 = vmul.f32 0.7978846, %v4653_v19  ;;  %v3719_v23 = vpop.xlane.xlu1 %3718 }
0x1422   : > { %8421 = vtanh.f32 %v4660_v25  ;;  %v4662_v55 = vmul.f32 0.7978846, %v4654_v15  ;;  %v3720_v25 = vmul.f32 0.0078125, %v3717_v21 }
0x1423   : > { %v8412_v56 = vpop.eup %8411  ;;  %8423 = vtanh.f32 %v4661_v31 }
0x1424   : > { %v8414_v30 = vpop.eup %8413  ;;  %v4671_v32 = vadd.f32 1.0, %v8412_v56  ;;  %8425 = vtanh.f32 %v4662_v55  ;;  %v3721_v56 = vmul.f32 0.0078125, %v3719_v23 }
0x1425   : > { %v8416_v38 = vpop.eup %8415  ;;  %v4672_v39 = vadd.f32 1.0, %v8414_v30 }
0x1426   : > { %v8418_v41 = vpop.eup %8417  ;;  %v4679_v42 = vmul.f32 0.5, %v4671_v32  ;;  %v4673_v44 = vadd.f32 1.0, %v8416_v38  ;;  %v3722_v38 = vsub.f32 %v11660_v24, %v3720_v25 }
0x1427   : > { %v4674_v45 = vadd.f32 1.0, %v8418_v41  ;;  %v4680_v47 = vmul.f32 0.5, %v4672_v39  ;;  %v3723_v41 = vsub.f32 %v11664_v17, %v3721_v56 }
0x1428   : > { %v4681_v48 = vmul.f32 0.5, %v4673_v44  ;;  %v4687_v51 = vmul.f32 %v4679_v42, %v11719_v26  ;;  %v3724_v42 = vmul.f32 %v3722_v38, %v3722_v38 }
0x1429   : > { %v4682_v50 = vmul.f32 0.5, %v4674_v45  ;;  %v4688_v46 = vmul.f32 %v4680_v47, %v11721_v27  ;;  %v3725_v44 = vmul.f32 %v3723_v41, %v3723_v41 }
0x142a   : > { %v4689_v35 = vmul.f32 %v4681_v48, %v11725_v37 }
0x142b   : > { %v8420_v43 = vpop.eup %8419  ;;  %v4690_v52 = vmul.f32 %v4682_v50, %v11729_v40 }
0x142c   : > { %v8422_v53 = vpop.eup %8421  ;;  %v4695_v54 = vpack.c.bf16 %v4689_v35, %v4687_v51  ;;  %v4675_v58 = vadd.f32 1.0, %v8420_v43 }
0x142d   : > { %v8424_v59 = vpop.eup %8423  ;;  %v4696_v60 = vpack.c.bf16 %v4690_v52, %v4688_v46  ;;  %v4676_v61 = vadd.f32 1.0, %v8422_v53 }
0x142e   : > { %v8426_v0 = vpop.eup %8425  ;;  %v4677_v1 = vadd.f32 1.0, %v8424_v59  ;;  %v4683_v9 = vmul.f32 0.5, %v4675_v58 }
0x142f   : > { %4866 = vmatprep.mubr.bf16.mxu1 %v4696_v60  ;;  %v4678_v2 = vadd.f32 1.0, %v8426_v0  ;;  %v4684_v26 = vmul.f32 0.5, %v4676_v61 }
0x1430   : > { %4867 = vmatmul.mubr.bf16.vlgmr.msra.gmra.mrb[36].mxu1 %v4695_v54  ;;  %v4685_v37 = vmul.f32 0.5, %v4677_v1  ;;  %v4691_v27 = vmul.f32 %v4683_v9, %v11740_v49 }
0x1431   : > { %v4686_v4 = vmul.f32 0.5, %v4678_v2  ;;  %v4692_v5 = vmul.f32 %v4684_v26, %v11743_v57  ;;  %v7174_v26 = vld [vmem:[%s2509_s26] ss:$0 sm:$0xff]  ;;  %s12449_s26 = scalar_lea.vmem [#allocation33], %s11243_s24 }
0x1432   : > { %v4693_v40 = vmul.f32 %v4685_v37, %v11748_v11 }
0x1433   : > { %v4694_v14 = vmul.f32 %v4686_v4, %v11753_v12 }
0x1434   : > { %v4697_v6 = vpack.c.bf16 %v4693_v40, %v4691_v27  ;;  %v7175_v27 = vld [vmem:[%s2512_s6] ss:$0 sm:$0xff]  ;;  %s12448_s6 = scalar_lea.vmem [#allocation32], %s11243_s24 }
0x1435   : > { %v4698_v13 = vpack.c.bf16 %v4694_v14, %v4692_v5  ;;  %v7246_v23 = vld [vmem:[%s12448_s6] ss:$0 sm:$0xff] }
0x1437   : > { %4874 = vmatprep.mubr.bf16.mxu1 %v4698_v13 }
0x1438   : > { %4875 = vmatmul.mubr.bf16.gmra.mrb[40].mxu1 %v4697_v6 }
0x1503   : > { %v7451_v7 = vpop.f32.mrb[36].mxu1 }
0x1504   : > { %v7452_v29 = vpop.f32.mrb[37].mxu1 }
0x1505   : > { %v7453_v8 = vadd.f32 %v7452_v29, %v7451_v7  ;;  %v7454_v16 = vpop.f32.mrb[38].mxu1 }
0x1506   : > { %v7455_v28 = vpop.f32.mrb[39].mxu1 }
0x1507   : > { %v4869_v18 = vadd.f32 %v7453_v8, %v7229_v22  ;;  %v7456_v20 = vadd.f32 %v7455_v28, %v7454_v16 }
0x1509   : > { %v4872_v49 = vadd.f32 %v7456_v20, %v7229_v22  ;;  %v4883_v11 = vadd.f32 %v4869_v18, %v11685_v62 }
0x150b   : > { %v7457_v57 = vpop.f32.mrb[40].mxu1  ;;  %4889 = vadd.xlane.f32.xlu0 %v4883_v11  ;;  %v4884_v12 = vadd.f32 %v4872_v49, %v11687_v63 }
0x150c   : > { %v7458_v19 = vpop.f32.mrb[41].mxu1 }
0x150d   : > { %v7459_v15 = vadd.f32 %v7458_v19, %v7457_v57  ;;  %v7460_v31 = vpop.f32.mrb[42].mxu1  ;;  %4891 = vadd.xlane.f32.xlu1 %v4884_v12 }
0x150e   : > { %v7461_v55 = vpop.f32.mrb[43].mxu1 }
0x150f   : > { %v4877_v30 = vadd.f32 %v7459_v15, %v7229_v22  ;;  %v7462_v32 = vadd.f32 %v7461_v55, %v7460_v31  ;;  %v7247_v15 = vld [vmem:[%s12449_s26] ss:$0 sm:$0xff] }
0x1511   : > { %v4880_v39 = vadd.f32 %v7462_v32, %v7229_v22  ;;  %v4885_v62 = vadd.f32 %v4877_v30, %v11696_v3 }
0x1513   : > { %4893 = vadd.xlane.f32.xlu0 %v4885_v62  ;;  %v4886_v63 = vadd.f32 %v4880_v39, %v11694_v10 }
0x1515   : > { %4895 = vadd.xlane.f32.xlu1 %v4886_v63 }
0x1517   : > { %3726 = vadd.xlane.f32.xlu0 %v3724_v42 }
0x1519   : > { %3728 = vadd.xlane.f32.xlu1 %v3725_v44 }
0x1598   : > { %v4890_v45 = vpop.xlane.xlu0 %4889 }
0x1599   : > { %v4897_v47 = vmul.f32 0.0078125, %v4890_v45 }
0x159a   : > { %v4892_v48 = vpop.xlane.xlu1 %4891 }
0x159b   : > { %v4901_v50 = vsub.f32 %v4883_v11, %v4897_v47  ;;  %v4898_v51 = vmul.f32 0.0078125, %v4892_v48 }
0x159d   : > { %v4902_v35 = vsub.f32 %v4884_v12, %v4898_v51  ;;  %v4905_v24 = vmul.f32 %v4901_v50, %v4901_v50 }
0x159f   : > { %4909 = vadd.xlane.f32.xlu0 %v4905_v24  ;;  %v4906_v43 = vmul.f32 %v4902_v35, %v4902_v35 }
0x15a0   : > { %v4894_v3 = vpop.xlane.xlu0 %4893 }
0x15a1   : > { %v4899_v46 = vmul.f32 0.0078125, %v4894_v3  ;;  %4911 = vadd.xlane.f32.xlu1 %v4906_v43 }
0x15a2   : > { %v4896_v17 = vpop.xlane.xlu1 %4895 }
0x15a3   : > { %v4903_v52 = vsub.f32 %v4885_v62, %v4899_v46  ;;  %v4900_v10 = vmul.f32 0.0078125, %v4896_v17 }
0x15a4   : > { %v3727_v53 = vpop.xlane.xlu0 %3726 }
0x15a5   : > { %v4904_v54 = vsub.f32 %v4886_v63, %v4900_v10  ;;  %v3730_v58 = vmul.f32 0.0078125, %v3727_v53  ;;  %v4907_v59 = vmul.f32 %v4903_v52, %v4903_v52  ;;  %v9953_v10 = vmov (!%p7248_p6), 0   ;;  %v8441_v53 = vld [vmem:[%s11307_s23] ss:$8 sps:$4 sm:$0xff] (!%p7248_p6)  }
0x15a6   : > { %v3729_v60 = vpop.xlane.xlu1 %3728  ;;  %5308 = vmatprep.mubr.bf16.mxu1 (!%p7248_p6), %v9953_v10  ;;  %5150 = vmatprep.mubr.bf16.mxu0 (!%p7248_p6), %v9953_v10  ;;  %v8478_v10 = vld [vmem:[%s11288_s29 + $0x64] ss:$8 sps:$4 sm:$0xff] (!%p7248_p6)  }
0x15a7   : > { %v3732_v61 = vadd.f32 1e-05, %v3730_v58  ;;  %v3731_v0 = vmul.f32 0.0078125, %v3729_v60  ;;  %4913 = vadd.xlane.f32.xlu0 %v4907_v59  ;;  %v4908_v1 = vmul.f32 %v4904_v54, %v4904_v54 }
0x15a9   : > { %8427 = vrsqrt.f32 %v3732_v61  ;;  %v3733_v9 = vadd.f32 1e-05, %v3731_v0  ;;  %4915 = vadd.xlane.f32.xlu1 %v4908_v1  ;;  %v8442_v61 = vld [vmem:[%s11288_s29 + $0x4] ss:$8 sps:$4 sm:$0xff] (!%p7248_p6)   ;;  %v8444_v0 = vld [vmem:[%s11307_s23 + $0x14] ss:$8 sps:$4 sm:$0xff] (!%p7248_p6)  }
0x15aa   : > { %v8446_v1 = vld [vmem:[%s11288_s29] ss:$8 sps:$4 sm:$0xff] (!%p7248_p6)   ;;  %5118 = vmatprep.subr.bf16.mxu0 (!%p7248_p6), %v8442_v61 }
0x15ab   : > { %8429 = vrsqrt.f32 %v3733_v9  ;;  %v8447_v9 = vld [vmem:[%s11307_s23 + $0x10] ss:$8 sps:$4 sm:$0xff] (!%p7248_p6)   ;;  %5119 = vmatpush1.bf16.msra.mxu0 (!%p7248_p6), %v8446_v1 }
0x15ac   : > { %v8484_v1 = vld [vmem:[%s11288_s29 + $0x74] ss:$8 sps:$4 sm:$0xff] (!%p7248_p6)  }
0x15b3   : > { %v8428_v2 = vpop.eup %8427 }
0x15b4   : > { %v3736_v37 = vmul.f32 %v8428_v2, %v3722_v38 }
0x15b5   : > { %v8430_v4 = vpop.eup %8429 }
0x15b6   : > { %v3744_v40 = vmul.f32 %v7174_v26, %v3736_v37  ;;  %v3737_v5 = vmul.f32 %v8430_v4, %v3723_v41  ;;  %v8448_v37 = vld [vmem:[%s11288_s29 + $0x14] ss:$8 sps:$4 sm:$0xff] (!%p7248_p6)  }
0x15b7   : > { %5120 = vmatprep.subr.bf16.mxu0 (!%p7248_p6), %v8448_v37 }
0x15b8   : > { %v3752_v14 = vadd.f32 %v7175_v27, %v3744_v40  ;;  %v3745_v6 = vmul.f32 %v7174_v26, %v3737_v5  ;;  %v8450_v40 = vld [vmem:[%s11307_s23 + $0x24] ss:$8 sps:$4 sm:$0xff] (!%p7248_p6)  }
0x15b9   : > { %v8452_v5 = vld [vmem:[%s11288_s29 + $0x10] ss:$8 sps:$4 sm:$0xff] (!%p7248_p6)  }
0x15ba   : > { %3754 = vst [vmem:[#allocation2] sm:$0xff] %v3752_v14  ;;  %v3753_v13 = vadd.f32 %v7175_v27, %v3745_v6  ;;  %5121 = vmatpush1.bf16.msra.mxu0 (!%p7248_p6), %v8452_v5 }
0x15bc   : > { %3755 = vst [vmem:[#allocation2 + $0x8] sm:$0xff] %v3753_v13 }
0x15c1   : > { %v11797_v47 = vld [vmem:[#allocation2] sm:$0xff] (!%p7248_p6) }
0x15c2   : > { %5319 = vadd.xlane.f32.xlu0 (!%p7248_p6), %v11797_v47  ;;  %v4968_v43 = vrot.slane (!%p7248_p6), %v11797_v47, 4 }
0x162c   : > { %v4910_v7 = vpop.xlane.xlu0 %4909 }
0x162d   : > { %v4917_v22 = vmul.f32 0.0078125, %v4910_v7  ;;  %v8454_v7 = vld [vmem:[%s11288_s29 + $0x24] ss:$8 sps:$4 sm:$0xff] (!%p7248_p6)  }
0x162e   : > { %v4912_v29 = vpop.xlane.xlu1 %4911  ;;  %5122 = vmatprep.subr.bf16.mxu0 (!%p7248_p6), %v8454_v7 }
0x162f   : > { %v4921_v8 = vadd.f32 1e-05, %v4917_v22  ;;  %v4918_v16 = vmul.f32 0.0078125, %v4912_v29  ;;  %v8453_v29 = vld [vmem:[%s11307_s23 + $0x20] ss:$8 sps:$4 sm:$0xff] (!%p7248_p6)  }
0x1631   : > { %8431 = vrsqrt.f32 %v4921_v8  ;;  %v4922_v28 = vadd.f32 1e-05, %v4918_v16  ;;  %v8456_v8 = vld [vmem:[%s11307_s23 + $0x34] ss:$8 sps:$4 sm:$0xff] (!%p7248_p6)  }
0x1633   : > { %8433 = vrsqrt.f32 %v4922_v28  ;;  %v8458_v28 = vld [vmem:[%s11288_s29 + $0x20] ss:$8 sps:$4 sm:$0xff] (!%p7248_p6)  }
0x1634   : > { %v4914_v18 = vpop.xlane.xlu0 %4913  ;;  %5123 = vmatpush1.bf16.msra.mxu0 (!%p7248_p6), %v8458_v28 }
0x1635   : > { %v4919_v20 = vmul.f32 0.0078125, %v4914_v18 }
0x1636   : > { %v4916_v49 = vpop.xlane.xlu1 %4915 }
0x1637   : > { %v4923_v11 = vadd.f32 1e-05, %v4919_v20  ;;  %v4920_v21 = vmul.f32 0.0078125, %v4916_v49 }
0x1639   : > { %8435 = vrsqrt.f32 %v4923_v11  ;;  %v4924_v57 = vadd.f32 1e-05, %v4920_v21  ;;  %v8460_v11 = vld [vmem:[%s11288_s29 + $0x34] ss:$8 sps:$4 sm:$0xff] (!%p7248_p6)  }
0x163a   : > { %5124 = vmatprep.subr.bf16.mxu0 (!%p7248_p6), %v8460_v11 }
0x163b   : > { %v8432_v12 = vpop.eup %8431  ;;  %8437 = vrsqrt.f32 %v4924_v57  ;;  %v8459_v57 = vld [vmem:[%s11307_s23 + $0x30] ss:$8 sps:$4 sm:$0xff] (!%p7248_p6)  }
0x163c   : > { %v4929_v19 = vmul.f32 %v8432_v12, %v4901_v50  ;;  %v11801_v50 = vld [vmem:[#allocation2 + $0x8] sm:$0xff] (!%p7248_p6) }
0x163d   : > { %v8434_v25 = vpop.eup %8433  ;;  %v4974_v3 = vrot.slane (!%p7248_p6), %v11801_v50, 4  ;;  %5321 = vadd.xlane.f32.xlu0 (!%p7248_p6), %v11801_v50  ;;  %v8462_v12 = vld [vmem:[%s11307_s23 + $0x44] ss:$8 sps:$4 sm:$0xff] (!%p7248_p6)  }
0x163e   : > { %v4939_v31 = vmul.f32 %v7246_v23, %v4929_v19  ;;  %v4930_v55 = vmul.f32 %v8434_v25, %v4902_v35  ;;  %v8464_v25 = vld [vmem:[%s11288_s29 + $0x30] ss:$8 sps:$4 sm:$0xff] (!%p7248_p6)  }
0x163f   : > { %v4975_v58 = vadd.f32 (!%p7248_p6), %v4974_v3, %v11801_v50  ;;  %5125 = vmatpush1.bf16.msra.mxu0 (!%p7248_p6), %v8464_v25  ;;  %v8474_v3 = vld [vmem:[%s11307_s23 + $0x64] ss:$8 sps:$4 sm:$0xff] (!%p7248_p6)  }
0x1640   : > { %v4949_v56 = vadd.f32 %v7247_v15, %v4939_v31  ;;  %v4940_v30 = vmul.f32 %v7246_v23, %v4930_v55  ;;  %v8466_v55 = vld [vmem:[%s11288_s29 + $0x44] ss:$8 sps:$4 sm:$0xff] (!%p7248_p6)  }
0x1641   : > { %v4976_v27 = vrot.slane (!%p7248_p6), %v4975_v58, 2  ;;  %5126 = vmatprep.subr.bf16.mxu0 (!%p7248_p6), %v8466_v55 }
0x1642   : > { %4953 = vst [vmem:[#allocation3] sm:$0xff] %v4949_v56  ;;  %v4950_v32 = vadd.f32 %v7247_v15, %v4940_v30  ;;  %v8465_v30 = vld [vmem:[%s11307_s23 + $0x40] ss:$8 sps:$4 sm:$0xff] (!%p7248_p6)  }
0x1643   : > { %v8436_v38 = vpop.eup %8435  ;;  %v4977_v13 = vadd.f32 (!%p7248_p6), %v4976_v27, %v4975_v58 }
0x1644   : > { %4954 = vst [vmem:[#allocation3 + $0x8] sm:$0xff] %v4950_v32  ;;  %v4931_v39 = vmul.f32 %v8436_v38, %v4903_v52  ;;  %v8439_v52 = vld [vmem:[%s11307_s23 + $0x4] ss:$8 sps:$4 sm:$0xff] (!%p7248_p6)   ;;  %v8468_v32 = vld [vmem:[%s11307_s23 + $0x54] ss:$8 sps:$4 sm:$0xff] (!%p7248_p6)  }
0x1645   : > { %v8438_v62 = vpop.eup %8437  ;;  %5276 = vmatprep.subr.bf16.mxu1 (!%p7248_p6), %v8439_v52  ;;  %v4978_v49 = vrot.slane (!%p7248_p6), %v4977_v13, 1 }
0x1646   : > { %v4941_v41 = vmul.f32 %v7246_v23, %v4931_v39  ;;  %v4932_v63 = vmul.f32 %v8438_v62, %v4904_v54  ;;  %4961 = sbr.rel (%p7248_p6) target bundleno = 6034 (0x1792), region = 376  ;;  %v4969_v54 = vadd.f32 (!%p7248_p6), %v4968_v43, %v11797_v47  ;;  %5277 = vmatpush1.bf16.msra.mxu1 (!%p7248_p6), %v8441_v53  ;;  %v8470_v62 = vld [vmem:[%s11288_s29 + $0x40] ss:$8 sps:$4 sm:$0xff] (!%p7248_p6)   ;;  %v8477_v53 = vld [vmem:[%s11307_s23 + $0x60] ss:$8 sps:$4 sm:$0xff] (!%p7248_p6)  }
0x1647   : > { %5278 = vmatprep.subr.bf16.mxu1 (!%p7248_p6), %v8444_v0  ;;  %v4979_v31 = vadd.f32 (!%p7248_p6), %v4978_v49, %v4977_v13  ;;  %5127 = vmatpush1.bf16.msra.mxu0 (!%p7248_p6), %v8470_v62 }
0x1648   : > { %v4951_v42 = vadd.f32 %v7247_v15, %v4941_v41  ;;  %v4942_v44 = vmul.f32 %v7246_v23, %v4932_v63  ;;  %v4970_v4 = vrot.slane (!%p7248_p6), %v4969_v54, 2 }
0x1649   : > { %v11799_v48 = vld [vmem:[#allocation3] sm:$0xff] (!%p7248_p6)  ;;  %v4982_v63 = vmul.f32 (!%p7248_p6), 0.125, %v4979_v31 }
0x164a   : > { %4955 = vst [vmem:[#allocation3 + $0x10] sm:$0xff] %v4951_v42  ;;  %v4952_v45 = vadd.f32 %v7247_v15, %v4942_v44  ;;  %5357 = vadd.xlane.f32.xlu1 (!%p7248_p6), %v11799_v48  ;;  %v4971_v6 = vadd.f32 (!%p7248_p6), %v4970_v4, %v4969_v54  ;;  %5279 = vmatpush1.bf16.msra.mxu1 (!%p7248_p6), %v8447_v9  ;;  %v8472_v42 = vld [vmem:[%s11288_s29 + $0x54] ss:$8 sps:$4 sm:$0xff] (!%p7248_p6)  }
0x164b   : > { %v11805_v51 = vld [vmem:[#allocation3 + $0x8] sm:$0xff] (!%p7248_p6)  ;;  %5280 = vmatprep.subr.bf16.mxu1 (!%p7248_p6), %v8450_v40  ;;  %v8471_v44 = vld [vmem:[%s11307_s23 + $0x50] ss:$8 sps:$4 sm:$0xff] (!%p7248_p6)   ;;  %v5001_v52 = vpack.c.bf16 (!%p7248_p6), %v4982_v63, %v4982_v63  ;;  %5128 = vmatprep.subr.bf16.mxu0 (!%p7248_p6), %v8472_v42  ;;  %v9954_v42 = vmov (!%p7248_p6), 1966171168  }
0x164c   : > { %4956 = vst [vmem:[#allocation3 + $0x18] sm:$0xff] %v4952_v45  ;;  %v4983_v46 = vadd.f32 (!%p7248_p6), %v11805_v51, %v11799_v48  ;;  %v4972_v20 = vrot.slane (!%p7248_p6), %v4971_v6, 1  ;;  %v8483_v9 = vld [vmem:[%s11307_s23 + $0x70] ss:$8 sps:$4 sm:$0xff] (!%p7248_p6)  }
0x164d   : > { %v5033_v0 = vunpack.c.l.b16 %v5001_v52 }
0x164e   : > { %v4984_v59 = vrot.slane %v4983_v46, 4  ;;  %5359 = vadd.xlane.f32.xlu1 %v11805_v51  ;;  %5281 = vmatpush1.bf16.msra.mxu1 %v8453_v29  ;;  %v4973_v15 = vadd.f32 %v4972_v20, %v4971_v6 }
0x164f   : > { %5282 = vmatprep.subr.bf16.mxu1 %v8456_v8  ;;  %v5320_v40 = vpop.xlane.xlu0 %5319 }
0x1650   : > { %v4985_v2 = vadd.f32 %v4984_v59, %v4983_v46  ;;  %v4981_v41 = vmul.f32 0.125, %v4973_v15  ;;  %v8476_v46 = vld [vmem:[%s11288_s29 + $0x50] ss:$8 sps:$4 sm:$0xff]  }
0x1651   : > { %v11807_v35 = vld [vmem:[#allocation3 + $0x10] sm:$0xff]  ;;  %5129 = vmatpush1.bf16.msra.mxu0 %v8476_v46  ;;  %v8480_v59 = vld [vmem:[%s11307_s23 + $0x74] ss:$8 sps:$4 sm:$0xff]   ;;  %s12451_s23 = scalar_lea.vmem [#allocation37], %s11316_s5 }
0x1652   : > { %v4986_v14 = vrot.slane %v4985_v2, 2  ;;  %5361 = vadd.xlane.f32.xlu0 %v11807_v35  ;;  %5283 = vmatpush1.bf16.msra.mxu1 %v8459_v57 }
0x1653   : > { %v11809_v24 = vld [vmem:[#allocation3 + $0x18] sm:$0xff]  ;;  %5284 = vmatprep.subr.bf16.mxu1 %v8462_v12  ;;  %5130 = vmatprep.subr.bf16.mxu0 %v8478_v10 }
0x1654   : > { %v4990_v17 = vadd.f32 %v11809_v24, %v11807_v35  ;;  %5363 = vadd.xlane.f32.xlu1 %v11809_v24  ;;  %v4987_v16 = vadd.f32 %v4986_v14, %v4985_v2  ;;  %v5323_v14 = vmul.f32 0.0078125, %v5320_v40 }
0x1656   : > { %v4991_v60 = vrot.slane %v4990_v17, 4  ;;  %v4988_v21 = vrot.slane %v4987_v16, 1  ;;  %5285 = vmatpush1.bf16.msra.mxu1 %v8465_v30  ;;  %v11856_v13 = vsub.f32 %v11797_v47, %v5323_v14 }
0x1657   : > { %5286 = vmatprep.subr.bf16.mxu1 %v8468_v32 }
0x1658   : > { %v4992_v26 = vadd.f32 %v4991_v60, %v4990_v17  ;;  %v4989_v23 = vadd.f32 %v4988_v21, %v4987_v16  ;;  %v5000_v17 = vpack.c.bf16 %v4981_v41, %v4981_v41  ;;  %v8482_v60 = vld [vmem:[%s11288_s29 + $0x60] ss:$8 sps:$4 sm:$0xff]   ;;  %v5327_v16 = vmul.f32 %v11856_v13, %v11856_v13 }
0x1659   : > { %5131 = vmatpush1.bf16.msra.mxu0 %v8482_v60 }
0x165a   : > { %v4993_v22 = vrot.slane %v4992_v26, 2  ;;  %v4998_v38 = vmul.f32 0.0625, %v4989_v23  ;;  %5287 = vmatpush1.bf16.msra.mxu1 %v8471_v44  ;;  %v5032_v61 = vunpack.c.l.b16 %v5000_v17  ;;  %5132 = vmatprep.subr.bf16.mxu0 %v8484_v1  ;;  %v5411_v44 = vunpack.c.l.s4 %v9954_v42 }
0x165b   : > { %5288 = vmatprep.subr.bf16.mxu1 %v8474_v3  ;;  %5329 = vadd.xlane.f32.xlu0 %v5327_v16 }
0x165c   : > { %v4994_v18 = vadd.f32 %v4993_v22, %v4992_v26  ;;  %v5159_v45 = vpack.c.bf16 %v4998_v38, %v4998_v38  ;;  %v8486_v26 = vld [vmem:[%s11288_s29 + $0x70] ss:$8 sps:$4 sm:$0xff]   ;;  %v5035_v37 = vsel %vm5034_vm5, %v5033_v0, %v5032_v61  ;;  %s12450_s29 = sld [smem:[#allocation151_spill]]  ;;  %v5412_v17 = vunpack.c.0.s8 %v5411_v44 }
0x165d   : > { %v5036_v27 = vpack.c.b16 %v5035_v37, %v5035_v37  ;;  %5133 = vmatpush1.bf16.msra.mxu0 %v8486_v26 }
0x165e   : > { %v4995_v19 = vrot.slane %v4994_v18, 1  ;;  %v5191_v54 = vunpack.c.l.b16 %v5159_v45  ;;  %5289 = vmatpush1.bf16.msra.mxu1 %v8477_v53  ;;  %v5177_v45 = vld [vmem:[%s12451_s23] sm:$0x3]  ;;  %v11891_v61 = vsub.s32 %v5412_v17, %v11418_v33 }
0x165f   : > { %5290 = vmatprep.subr.bf16.mxu1 %v8480_v59  ;;  %v5182_v46 = vrot.slane %v5177_v45, %v11427_v36  ;;  %v5186_v0 = vrot.slane %v5177_v45, %v11421_v34 }
0x1660   : > { %v4996_v56 = vadd.f32 %v4995_v19, %v4994_v18  ;;  %5151 = vmatmul.mubr.bf16.vlgmr.msra.gmra.mrb[0].mxu0 %v5036_v27 }
0x1662   : > { %v4999_v39 = vmul.f32 0.0625, %v4996_v56  ;;  %5291 = vmatpush1.bf16.msra.mxu1 %v8483_v9  ;;  %s12452_s24 = scalar_lea.vmem [#allocation35], %s12450_s29 }
0x1664   : > { %v5160_v43 = vpack.c.bf16 %v4999_v39, %v4999_v39 }
0x1666   : > { %v5192_v58 = vunpack.c.l.b16 %v5160_v43 }
0x1668   : > { %v5193_v2 = vsel %vm5034_vm5, %v5192_v58, %v5191_v54  ;;  %v5018_v54 = vld [vmem:[%s12452_s24] sm:$0x3] }
0x1669   : > { %v5194_v4 = vpack.c.b16 %v5193_v2, %v5193_v2  ;;  %v5023_v2 = vrot.slane %v5018_v54, %v11427_v36  ;;  %v5027_v33 = vrot.slane %v5018_v54, %v11421_v34 }
0x166b   : > { %5309 = vmatmul.mubr.bf16.vlgmr.msra.gmra.mrb[0].mxu1 %v5194_v4 }
0x16ca   : > { %v5322_v22 = vpop.xlane.xlu0 %5321 }
0x16cb   : > { %v5324_v8 = vmul.f32 0.0078125, %v5322_v22 }
0x16cd   : > { %v11864_v18 = vsub.f32 %v11801_v50, %v5324_v8 }
0x16cf   : > { %v5328_v12 = vmul.f32 %v11864_v18, %v11864_v18 }
0x16d1   : > { %5331 = vadd.xlane.f32.xlu1 %v5328_v12 }
0x16d7   : > { %v5358_v5 = vpop.xlane.xlu1 %5357 }
0x16d8   : > { %v5365_v6 = vmul.f32 0.0078125, %v5358_v5 }
0x16da   : > { %v11859_v7 = vsub.f32 %v11799_v48, %v5365_v6 }
0x16db   : > { %v5360_v29 = vpop.xlane.xlu1 %5359 }
0x16dc   : > { %v5366_v28 = vmul.f32 0.0078125, %v5360_v29  ;;  %v5373_v49 = vmul.f32 %v11859_v7, %v11859_v7 }
0x16de   : > { %v11867_v20 = vsub.f32 %v11805_v51, %v5366_v28  ;;  %5377 = vadd.xlane.f32.xlu0 %v5373_v49 }
0x16df   : > { %v5362_v11 = vpop.xlane.xlu0 %5361 }
0x16e0   : > { %v5367_v57 = vmul.f32 0.0078125, %v5362_v11  ;;  %v5374_v15 = vmul.f32 %v11867_v20, %v11867_v20 }
0x16e1   : > { %v5364_v21 = vpop.xlane.xlu1 %5363 }
0x16e2   : > { %v5368_v23 = vmul.f32 0.0078125, %v5364_v21  ;;  %v11874_v19 = vsub.f32 %v11807_v35, %v5367_v57  ;;  %5379 = vadd.xlane.f32.xlu1 %v5374_v15  ;;  %v7281_v57 = vld [vmem:[#allocation38] ss:$0 sm:$0xff] }
0x16e4   : > { %v11877_v25 = vsub.f32 %v11809_v24, %v5368_v23  ;;  %v5375_v31 = vmul.f32 %v11874_v19, %v11874_v19 }
0x16e6   : > { %5381 = vadd.xlane.f32.xlu0 %v5375_v31  ;;  %v5376_v55 = vmul.f32 %v11877_v25, %v11877_v25  ;;  %v7282_v31 = vld [vmem:[#allocation39] ss:$0 sm:$0xff] }
0x16e8   : > { %5383 = vadd.xlane.f32.xlu1 %v5376_v55  ;;  %v5330_v43 = vpop.xlane.xlu0 %5329 }
0x16e9   : > { %v5333_v3 = vmul.f32 0.0078125, %v5330_v43 }
0x16eb   : > { %v5335_v52 = vadd.f32 1e-05, %v5333_v3 }
0x16ed   : > { %8487 = vrsqrt.f32 %v5335_v52 }
0x16f7   : > { %v8488_v11 = vpop.eup %8487 }
0x16f8   : > { %v5339_v15 = vmul.f32 %v8488_v11, %v11856_v13 }
0x16fa   : > { %v5347_v55 = vmul.f32 %v7281_v57, %v5339_v15 }
0x16fc   : > { %v5355_v13 = vadd.f32 %v7282_v31, %v5347_v55 }
0x1733   : > { %v5152_v30 = vpop.f32.mrb[0].mxu0 }
0x1734   : > { %v5154_v38 = vpop.f32.mrb[1].mxu0  ;;  %v5153_v22 = vadd.f32 %v5152_v30, %v5023_v2 }
0x1735   : > { %v5156_v62 = vpop.f32.mrb[2].mxu0  ;;  %v5155_v23 = vadd.f32 %v5154_v38, %v5027_v33 }
0x1736   : > { %v5157_v63 = vpop.f32.mrb[3].mxu0  ;;  %v5490_v12 = vrot.slane %v5153_v22, %v11891_v61 }
0x1737   : > { %v5531_v63 = vrot.slane %v5155_v23, %v11891_v61 }
0x1738   : > { %v5491_v62 = vcombine.high %v5490_v12, %v5490_v12 }
0x1739   : > { %v5532_v43 = vcombine.high %v5531_v63, %v5531_v63 }
0x173a   : > { %v5505_v54 = vrot.slane %v5491_v62, %v11891_v61 }
0x173b   : > { %v5546_v2 = vrot.slane %v5532_v43, %v11891_v61 }
0x173e   : > { %v5310_v56 = vpop.f32.mrb[0].mxu1 }
0x173f   : > { %v5312_v32 = vpop.f32.mrb[1].mxu1  ;;  %v5311_v60 = vadd.f32 %v5310_v56, %v5182_v46 }
0x1740   : > { %v5314_v39 = vpop.f32.mrb[2].mxu1  ;;  %v5313_v5 = vadd.f32 %v5312_v32, %v5186_v0 }
0x1741   : > { %v5315_v41 = vpop.f32.mrb[3].mxu1  ;;  %v5416_v40 = vrot.slane %v5311_v60, %v11891_v61 }
0x1742   : > { %v5453_v49 = vrot.slane %v5313_v5, %v11891_v61  ;;  %v5498_v41 = vrot.slane %v5490_v12, %v11891_v61 }
0x1743   : > { %v5417_v16 = vcombine.high %v5416_v40, %v5416_v40  ;;  %v5424_v28 = vrot.slane %v5416_v40, %v11891_v61 }
0x1744   : > { %v5454_v34 = vcombine.high %v5453_v49, %v5453_v49  ;;  %v5461_v32 = vrot.slane %v5453_v49, %v11891_v61  ;;  %v5554_v49 = vrot.slane %v5546_v2, %v11427_v36 }
0x1745   : > { %v5431_v56 = vrot.slane %v5417_v16, %v11891_v61  ;;  %v5435_v30 = vrot.slane %v5424_v28, %v11427_v36 }
0x1746   : > { %v5468_v45 = vrot.slane %v5454_v34, %v11891_v61  ;;  %v5472_v52 = vrot.slane %v5461_v32, %v11427_v36 }
0x1747   : > { %v5439_v46 = vrot.slane %v5431_v56, %v11427_v36  ;;  %v5442_v17 = vmul.f32 %v5435_v30, %v5355_v13 }
0x1749   : > { %v5444_v0 = vadd.f32 %v5442_v17, %v11797_v47 }
0x175e   : > { %v5332_v10 = vpop.xlane.xlu1 %5331 }
0x175f   : > { %v5334_v58 = vmul.f32 0.0078125, %v5332_v10 }
0x1761   : > { %v5336_v1 = vadd.f32 1e-05, %v5334_v58  ;;  %v5509_v58 = vrot.slane %v5498_v41, %v11427_v36 }
0x1763   : > { %8489 = vrsqrt.f32 %v5336_v1 }
0x176b   : > { %v5378_v53 = vpop.xlane.xlu0 %5377 }
0x176c   : > { %v5385_v59 = vmul.f32 0.0078125, %v5378_v53 }
0x176d   : > { %v8490_v39 = vpop.eup %8489 }
0x176e   : > { %v5389_v9 = vadd.f32 1e-05, %v5385_v59  ;;  %v5340_v38 = vmul.f32 %v8490_v39, %v11864_v18  ;;  %v5539_v18 = vrot.slane %v5531_v63, %v11891_v61 }
0x176f   : > { %v5380_v26 = vpop.xlane.xlu1 %5379 }
0x1770   : > { %v5386_v4 = vmul.f32 0.0078125, %v5380_v26  ;;  %8491 = vrsqrt.f32 %v5389_v9  ;;  %v5348_v3 = vmul.f32 %v7281_v57, %v5340_v38 }
0x1772   : > { %v5390_v14 = vadd.f32 1e-05, %v5386_v4  ;;  %v5356_v60 = vadd.f32 %v7282_v31, %v5348_v3  ;;  %v5476_v4 = vrot.slane %v5468_v45, %v11427_v36 }
0x1773   : > { %v5382_v37 = vpop.xlane.xlu0 %5381 }
0x1774   : > { %v5387_v27 = vmul.f32 0.0078125, %v5382_v37  ;;  %8493 = vrsqrt.f32 %v5390_v14  ;;  %v5443_v26 = vmul.f32 %v5439_v46, %v5356_v60  ;;  %v5513_v14 = vrot.slane %v5505_v54, %v11427_v36 }
0x1775   : > { %v5384_v29 = vpop.xlane.xlu1 %5383 }
0x1776   : > { %v5391_v6 = vadd.f32 1e-05, %v5387_v27  ;;  %v5388_v8 = vmul.f32 0.0078125, %v5384_v29  ;;  %v5479_v27 = vadd.f32 %v5472_v52, %v5444_v0 }
0x1778   : > { %8495 = vrsqrt.f32 %v5391_v6  ;;  %v5392_v21 = vadd.f32 1e-05, %v5388_v8  ;;  %5481 = vst [vmem:[#allocation2] sm:$0xff] %v5479_v27 }
0x177a   : > { %8497 = vrsqrt.f32 %v5392_v21  ;;  %v8492_v42 = vpop.eup %8491 }
0x177b   : > { %v5397_v44 = vmul.f32 %v8492_v42, %v11859_v7 }
0x177d   : > { %v5401_v53 = vmul.f32 %v7281_v57, %v5397_v44 }
0x177e   : > { %v8494_v10 = vpop.eup %8493 }
0x177f   : > { %v5398_v7 = vmul.f32 %v8494_v10, %v11867_v20  ;;  %v5405_v9 = vadd.f32 %v7282_v31, %v5401_v53  ;;  %v5550_v20 = vrot.slane %v5539_v18, %v11427_v36 }
0x1781   : > { %v5402_v37 = vmul.f32 %v7281_v57, %v5398_v7  ;;  %v5516_v6 = vmul.f32 %v5509_v58, %v5405_v9 }
0x1782   : > { %v8496_v59 = vpop.eup %8495 }
0x1783   : > { %v5399_v1 = vmul.f32 %v8496_v59, %v11874_v19  ;;  %v5406_v47 = vadd.f32 %v7282_v31, %v5402_v37  ;;  %v5445_v19 = vadd.f32 %v5443_v26, %v11801_v50  ;;  %v5520_v61 = vadd.f32 %v5516_v6, %v11799_v48 }
0x1784   : > { %v8498_v40 = vpop.eup %8497 }
0x1785   : > { %v5403_v5 = vmul.f32 %v7281_v57, %v5399_v1  ;;  %v5400_v22 = vmul.f32 %v8498_v40, %v11877_v25  ;;  %v5517_v8 = vmul.f32 %v5509_v58, %v5406_v47  ;;  %v5480_v16 = vadd.f32 %v5476_v4, %v5445_v19 }
0x1786   : > { %v5557_v11 = vadd.f32 %v5550_v20, %v5520_v61 }
0x1787   : > { %v5407_v33 = vadd.f32 %v7282_v31, %v5403_v5  ;;  %v5404_v29 = vmul.f32 %v7281_v57, %v5400_v22  ;;  %5482 = vst [vmem:[#allocation2 + $0x8] sm:$0xff] %v5480_v16  ;;  %v5521_v12 = vadd.f32 %v5517_v8, %v11805_v51 }
0x1788   : > { %5561 = vst [vmem:[#allocation3] sm:$0xff] %v5557_v11 }
0x1789   : > { %v5518_v28 = vmul.f32 %v5513_v14, %v5407_v33  ;;  %v5408_v21 = vadd.f32 %v7282_v31, %v5404_v29  ;;  %v5558_v50 = vadd.f32 %v5550_v20, %v5521_v12 }
0x178b   : > { %v5522_v25 = vadd.f32 %v5518_v28, %v11807_v35  ;;  %v5519_v23 = vmul.f32 %v5513_v14, %v5408_v21  ;;  %5562 = vst [vmem:[#allocation3 + $0x8] sm:$0xff] %v5558_v50 }
0x178d   : > { %v5559_v15 = vadd.f32 %v5554_v49, %v5522_v25  ;;  %v5523_v34 = vadd.f32 %v5519_v23, %v11809_v24 }
0x178f   : > { %5563 = vst [vmem:[#allocation3 + $0x10] sm:$0xff] %v5559_v15  ;;  %v5560_v48 = vadd.f32 %v5554_v49, %v5523_v34 }
0x1791   : > { %5564 = vst [vmem:[#allocation3 + $0x18] sm:$0xff] %v5560_v48 }
0x1792 PF: > { %s12453_s5 = sld [smem:[#allocation135_spill]] }
0x1798   : > { %p7283_p3 = scmp.ne.s32.totalorder %s12453_s5, 3 }
0x1799   : > { %s12454_s11 = sld [smem:[#allocation113_spill]] (!%p7283_p3)  ;;  %v9955_v51 = vmov (!%p7283_p3), 0.0   ;;  %vm9956_vm6 = vmmov (!%p7283_p3), 0   ;;  %v5570_v57 = vld [vmem:[#allocation2 + $0x8] sm:$0xff] (!%p7283_p3)  ;;  %v5569_v62 = vld [vmem:[#allocation2] sm:$0xff] (!%p7283_p3)  ;;  %vm5619_vm7 = vcmask (!%p7283_p3), 1041409  }
0x179a   : > { %5568 = sbr.rel (%p7283_p3) target bundleno = 6984 (0x1b48), region = 380  ;;  %7657 = vmatprep.subr.bf16.mxu0 (!%p7283_p3), %v9955_v51  ;;  %7677 = vmatprep.subr.bf16.mxu1 (!%p7283_p3), %v9955_v51  ;;  %v5590_v31 = vpack.c.bf16 (!%p7283_p3), %v5570_v57, %v5570_v57  ;;  %v8507_v55 = vld [vmem:[#allocation42] sm:$0xff] (!%p7283_p3)   ;;  %v8508_v32 = vld [vmem:[#allocation42 + $0x8] sm:$0xff] (!%p7283_p3)   ;;  %v8509_v63 = vld [vmem:[#allocation42 + $0x10] sm:$0xff] (!%p7283_p3)   ;;  %v5589_v13 = vpack.c.bf16 (!%p7283_p3), %v5569_v62, %v5569_v62  ;;  %s12456_s1 = sld [smem:[#allocation117_spill]] (!%p7283_p3)  ;;  %vm6286_vm8 = vcmask (!%p7283_p3), 25600  }
0x179b   : > { %7673 = vmatprep.mubr.msk.bf16.mxu0 (!%p7283_p3), %vm9956_vm6, %v9955_v51  ;;  %7693 = vmatprep.mubr.msk.bf16.mxu1 (!%p7283_p3), %vm9956_vm6, %v9955_v51  ;;  %v8510_v38 = vld [vmem:[#allocation42 + $0x18] sm:$0xff] (!%p7283_p3)   ;;  %v8511_v45 = vld [vmem:[#allocation42 + $0x20] sm:$0xff] (!%p7283_p3)   ;;  %v8512_v46 = vld [vmem:[#allocation42 + $0x28] sm:$0xff] (!%p7283_p3)   ;;  %s12458_s19 = sld [smem:[#allocation123_spill]] (!%p7283_p3) }
0x179c   : > { %v5617_v30 = vunpack.c.l.b16 (!%p7283_p3), %v5590_v31  ;;  %7678 = vmatpush3.bf16.msra.mxu1 (!%p7283_p3), %v8507_v55  ;;  %v5616_v43 = vunpack.c.l.b16 (!%p7283_p3), %v5589_v13  ;;  %v8513_v10 = vld [vmem:[#allocation42 + $0x30] sm:$0xff] (!%p7283_p3)   ;;  %v8514_v53 = vld [vmem:[#allocation42 + $0x38] sm:$0xff] (!%p7283_p3)   ;;  %v5574_v26 = vld [vmem:[#allocation3 + $0x18] sm:$0xff] (!%p7283_p3) }
0x179d   : > { %7679 = vmatprep.subr.bf16.mxu1 (!%p7283_p3), %v9955_v51  ;;  %v5571_v1 = vld [vmem:[#allocation3] sm:$0xff] (!%p7283_p3)  ;;  %v5572_v9 = vld [vmem:[#allocation3 + $0x8] sm:$0xff] (!%p7283_p3)  ;;  %v5573_v2 = vld [vmem:[#allocation3 + $0x10] sm:$0xff] (!%p7283_p3) }
0x179e   : > { %v5618_v41 = vrot.slane (!%p7283_p3), %v5617_v30, 7  ;;  %v5575_v37 = vmax.f32 (!%p7283_p3), %v5571_v1, %v5572_v9  ;;  %v5582_v4 = vmax.f32 (!%p7283_p3), %v5573_v2, %v5574_v26  ;;  %v7284_v27 = vld [vmem:[#allocation40] ss:$0 sm:$0xff] (!%p7283_p3)  ;;  %v8515_v33 = vld [vmem:[#allocation46] sm:$0xff] (!%p7283_p3)   ;;  %v8516_v16 = vld [vmem:[#allocation46 + $0x8] sm:$0xff] (!%p7283_p3)  }
0x179f   : > { %s12455_s28 = smov (!%p7283_p3), %s12454_s11  ;;  %v8499_v36 = vld [vmem:[%s12454_s11] sm:$0xff] (!%p7283_p3)   ;;  %v8519_v15 = vld [vmem:[#allocation46 + $0x20] sm:$0xff] (!%p7283_p3)  }
0x17a0   : > { %7658 = vmatpush3.bf16.msra.mxu0 (!%p7283_p3), %v8499_v36  ;;  %v8500_v35 = vld [vmem:[%s12455_s28 + $0x8] sm:$0xff] (!%p7283_p3)   ;;  %v8501_v24 = vld [vmem:[%s12455_s28 + $0x10] sm:$0xff] (!%p7283_p3)   ;;  %v8502_v56 = vld [vmem:[%s12455_s28 + $0x18] sm:$0xff] (!%p7283_p3)   ;;  %7680 = vmatpush3.bf16.msra.mxu1 (!%p7283_p3), %v8508_v32  ;;  %v5620_v17 = vsel (!%p7283_p3), %vm5619_vm7, %v5618_v41, %v5616_v43  ;;  %s12457_s17 = smov (!%p7283_p3), %s12456_s1  ;;  %v5576_v5 = vrot.slane (!%p7283_p3), %v5575_v37, 4  ;;  %v5583_v14 = vrot.slane (!%p7283_p3), %v5582_v4, 4 }
0x17a1   : > { %7659 = vmatprep.subr.bf16.mxu0 %v9955_v51  ;;  %v8503_v39 = vld [vmem:[%s12455_s28 + $0x20] sm:$0xff]   ;;  %v8504_v42 = vld [vmem:[%s12455_s28 + $0x28] sm:$0xff]   ;;  %7681 = vmatprep.subr.bf16.mxu1 %v9955_v51  ;;  %v8505_v44 = vld [vmem:[%s12455_s28 + $0x30] sm:$0xff]   ;;  %v5621_v52 = vpack.c.b16 %v5620_v17, %v5620_v17  ;;  %s12459_s25 = smov %s12458_s19 }
0x17a2   : > { %v8506_v3 = vld [vmem:[%s12455_s28 + $0x38] sm:$0xff]   ;;  %v8523_v54 = vld [vmem:[%s12456_s1] sm:$0xff]   ;;  %v8524_v58 = vld [vmem:[%s12457_s17 + $0x8] sm:$0xff]   ;;  %v5577_v61 = vmax.f32 %v5575_v37, %v5576_v5  ;;  %v5584_v29 = vmax.f32 %v5582_v4, %v5583_v14 }
0x17a3   : > { %v8525_v18 = vld [vmem:[%s12457_s17 + $0x10] sm:$0xff]   ;;  %v8526_v59 = vld [vmem:[%s12457_s17 + $0x18] sm:$0xff]   ;;  %v8527_v7 = vld [vmem:[%s12457_s17 + $0x20] sm:$0xff]  }
0x17a4   : > { %7660 = vmatpush3.bf16.msra.mxu0 %v8500_v35  ;;  %7682 = vmatpush3.bf16.msra.mxu1 %v8509_v63  ;;  %v8528_v60 = vld [vmem:[%s12457_s17 + $0x28] sm:$0xff]   ;;  %v8529_v0 = vld [vmem:[%s12457_s17 + $0x30] sm:$0xff]   ;;  %v5578_v28 = vrot.slane %v5577_v61, 2  ;;  %v5585_v49 = vrot.slane %v5584_v29, 2  ;;  %v8517_v11 = vld [vmem:[#allocation46 + $0x10] sm:$0xff]  }
0x17a5   : > { %7661 = vmatprep.subr.bf16.mxu0 %v9955_v51  ;;  %7683 = vmatprep.subr.bf16.mxu1 %v9955_v51  ;;  %v8518_v25 = vld [vmem:[#allocation46 + $0x18] sm:$0xff]   ;;  %v8520_v36 = vld [vmem:[#allocation46 + $0x28] sm:$0xff]   ;;  %v8521_v57 = vld [vmem:[#allocation46 + $0x30] sm:$0xff]  }
0x17a6   : > { %v5579_v21 = vmax.f32 %v5577_v61, %v5578_v28  ;;  %v5586_v12 = vmax.f32 %v5584_v29, %v5585_v49  ;;  %v7293_v62 = vld [vmem:[#allocation43] ss:$0 sm:$0xff]  ;;  %v8540_v26 = vld [vmem:[%s12459_s25 + $0x8] sm:$0xff]   ;;  %v8541_v37 = vld [vmem:[%s12459_s25 + $0x10] sm:$0xff]  }
0x17a7   : > { %v8534_v17 = vld [vmem:[#allocation49 + $0x18] sm:$0xff]   ;;  %v8542_v4 = vld [vmem:[%s12459_s25 + $0x18] sm:$0xff]   ;;  %v8545_v5 = vld [vmem:[%s12459_s25 + $0x30] sm:$0xff]  }
0x17a8   : > { %7662 = vmatpush3.bf16.msra.mxu0 %v8501_v24  ;;  %7684 = vmatpush3.bf16.msra.mxu1 %v8510_v38  ;;  %v5580_v23 = vrot.slane %v5579_v21, 1  ;;  %v5587_v50 = vrot.slane %v5586_v12, 1  ;;  %v8539_v2 = vld [vmem:[%s12458_s19] sm:$0xff]   ;;  %v8546_v14 = vld [vmem:[%s12459_s25 + $0x38] sm:$0xff]  }
0x17a9   : > { %7663 = vmatprep.subr.bf16.mxu0 %v9955_v51  ;;  %7685 = vmatprep.subr.bf16.mxu1 %v9955_v51 }
0x17aa   : > { %v5581_v34 = vmax.f32 %v5579_v21, %v5580_v23  ;;  %v5588_v48 = vmax.f32 %v5586_v12, %v5587_v50  ;;  %v7329_v21 = vld [vmem:[#allocation52] ss:$0 sm:$0xff] }
0x17ac   : > { %7664 = vmatpush3.bf16.msra.mxu0 %v8502_v56  ;;  %7686 = vmatpush3.bf16.msra.mxu1 %v8511_v45  ;;  %v5937_v35 = vpack.c.bf16 %v5581_v34, %v5581_v34  ;;  %v5938_v24 = vpack.c.bf16 %v5588_v48, %v5588_v48  ;;  %v8522_v56 = vld [vmem:[#allocation46 + $0x38] sm:$0xff]   ;;  %v8531_v45 = vld [vmem:[#allocation49] sm:$0xff]  }
0x17ad   : > { %7665 = vmatprep.subr.bf16.mxu0 %v9955_v51  ;;  %7687 = vmatprep.subr.bf16.mxu1 %v9955_v51 }
0x17ae   : > { %v5964_v31 = vunpack.c.l.b16 %v5937_v35  ;;  %v5965_v55 = vunpack.c.l.b16 %v5938_v24 }
0x17b0   : > { %7666 = vmatpush3.bf16.msra.mxu0 %v8503_v39  ;;  %7688 = vmatpush3.bf16.msra.mxu1 %v8512_v46  ;;  %v5966_v30 = vsel %vm5619_vm7, %v5965_v55, %v5964_v31  ;;  %v8530_v39 = vld [vmem:[%s12457_s17 + $0x38] sm:$0xff]  }
0x17b1   : > { %7667 = vmatprep.subr.bf16.mxu0 %v9955_v51  ;;  %7689 = vmatprep.subr.bf16.mxu1 %v9955_v51  ;;  %v5967_v32 = vpack.c.b16 %v5966_v30, %v5966_v30  ;;  %v8533_v46 = vld [vmem:[#allocation49 + $0x10] sm:$0xff]  }
0x17b4   : > { %7668 = vmatpush3.bf16.msra.mxu0 %v8504_v42  ;;  %7690 = vmatpush3.bf16.msra.mxu1 %v8513_v10  ;;  %v8536_v10 = vld [vmem:[#allocation49 + $0x28] sm:$0xff]  }
0x17b5   : > { %7669 = vmatprep.subr.bf16.mxu0 %v9955_v51  ;;  %7691 = vmatprep.subr.bf16.mxu1 %v9955_v51 }
0x17b8   : > { %7670 = vmatpush3.bf16.msra.mxu0 %v8505_v44  ;;  %7692 = vmatpush3.bf16.msra.mxu1 %v8514_v53  ;;  %v8537_v53 = vld [vmem:[#allocation49 + $0x30] sm:$0xff]  }
0x17b9   : > { %7671 = vmatprep.subr.bf16.mxu0 %v9955_v51  ;;  %7717 = vmatprep.subr.bf16.mxu1 %v9955_v51 }
0x17bc   : > { %7672 = vmatpush3.bf16.msra.mxu0 %v8506_v3  ;;  %v8532_v3 = vld [vmem:[#allocation49 + $0x8] sm:$0xff]  }
0x17bd   : > { %7697 = vmatprep.subr.bf16.mxu0 %v9955_v51 }
0x17bf   : > { %7674 = vmatmul.mubr.bf16.vlgmr.msra.gmra.mrb[0].mxu0 %v5621_v52  ;;  %v8535_v52 = vld [vmem:[#allocation49 + $0x20] sm:$0xff]  }
0x17c0   : > { %7713 = vmatprep.mubr.msk.bf16.mxu0 %vm9956_vm6, %v9955_v51  ;;  %7698 = vmatpush3.bf16.msra.mxu0 %v8523_v54  ;;  %v7311_v54 = vld [vmem:[#allocation48] ss:$0 sm:$0xff] }
0x17c1   : > { %7699 = vmatprep.subr.bf16.mxu0 %v9955_v51 }
0x17c4   : > { %7700 = vmatpush3.bf16.msra.mxu0 %v8524_v58 }
0x17c5   : > { %7701 = vmatprep.subr.bf16.mxu0 %v9955_v51 }
0x17c8   : > { %7702 = vmatpush3.bf16.msra.mxu0 %v8525_v18  ;;  %v8538_v18 = vld [vmem:[#allocation49 + $0x38] sm:$0xff]  }
0x17c9   : > { %7703 = vmatprep.subr.bf16.mxu0 %v9955_v51 }
0x17cc   : > { %7704 = vmatpush3.bf16.msra.mxu0 %v8526_v59 }
0x17cd   : > { %7705 = vmatprep.subr.bf16.mxu0 %v9955_v51 }
0x17d0   : > { %7706 = vmatpush3.bf16.msra.mxu0 %v8527_v7 }
0x17d1   : > { %7707 = vmatprep.subr.bf16.mxu0 %v9955_v51 }
0x17d4   : > { %7708 = vmatpush3.bf16.msra.mxu0 %v8528_v60 }
0x17d5   : > { %7709 = vmatprep.subr.bf16.mxu0 %v9955_v51 }
0x17d8   : > { %7710 = vmatpush3.bf16.msra.mxu0 %v8529_v0 }
0x17d9   : > { %7711 = vmatprep.subr.bf16.mxu0 %v9955_v51 }
0x17dc   : > { %7712 = vmatpush3.bf16.msra.mxu0 %v8530_v39 }
0x17dd   : > { %7737 = vmatprep.subr.bf16.mxu0 %v9955_v51 }
0x1892   : > { %v5705_v40 = vpop.f32.mrb[0].mxu0 }
0x1893   : > { %v5706_v6 = vadd.f32 %v7284_v27, %v5705_v40  ;;  %v7675_v20 = vpop.f32.mrb[1].mxu0  ;;  %v8543_v27 = vld [vmem:[%s12459_s25 + $0x20] sm:$0xff]   ;;  %v8544_v40 = vld [vmem:[%s12459_s25 + $0x28] sm:$0xff]  }
0x1894   : > { %v5708_v22 = vpop.f32.mrb[2].mxu0 }
0x1895   : > { %v5711_v47 = vmax.f32 %v5706_v6, 0.0  ;;  %v7676_v19 = vpop.f32.mrb[3].mxu0 }
0x1896   : > { %v7320_v19 = vld [vmem:[#allocation51] ss:$0 sm:$0xff] }
0x1897   : > { %v5712_v8 = vpack.c.bf16 %v5711_v47, %v5711_v47 }
0x1899   : > { %7694 = vmatmul.mubr.bf16.vlgmr.msra.gmra.mrb[0].mxu1 %v5712_v8 }
0x189a   : > { %7718 = vmatpush3.bf16.msra.mxu1 %v8515_v33  ;;  %7733 = vmatprep.mubr.msk.bf16.mxu1 %vm9956_vm6, %v9955_v51 }
0x189b   : > { %7719 = vmatprep.subr.bf16.mxu1 %v9955_v51 }
0x189e   : > { %7720 = vmatpush3.bf16.msra.mxu1 %v8516_v16 }
0x189f   : > { %7721 = vmatprep.subr.bf16.mxu1 %v9955_v51 }
0x18a2   : > { %7722 = vmatpush3.bf16.msra.mxu1 %v8517_v11  ;;  %v7302_v11 = vld [vmem:[#allocation45] ss:$0 sm:$0xff] }
0x18a3   : > { %7723 = vmatprep.subr.bf16.mxu1 %v9955_v51 }
0x18a6   : > { %7724 = vmatpush3.bf16.msra.mxu1 %v8518_v25 }
0x18a7   : > { %7725 = vmatprep.subr.bf16.mxu1 %v9955_v51 }
0x18aa   : > { %7726 = vmatpush3.bf16.msra.mxu1 %v8519_v15 }
0x18ab   : > { %7727 = vmatprep.subr.bf16.mxu1 %v9955_v51 }
0x18ae   : > { %7728 = vmatpush3.bf16.msra.mxu1 %v8520_v36 }
0x18af   : > { %7729 = vmatprep.subr.bf16.mxu1 %v9955_v51 }
0x18b2   : > { %7730 = vmatpush3.bf16.msra.mxu1 %v8521_v57 }
0x18b3   : > { %7731 = vmatprep.subr.bf16.mxu1 %v9955_v51 }
0x18b6   : > { %7732 = vmatpush3.bf16.msra.mxu1 %v8522_v56 }
0x18b7   : > { %7757 = vmatprep.subr.bf16.mxu1 %v9955_v51 }
0x18b9   : > { %7734 = vmatmul.mubr.bf16.vlgmr.msra.gmra.mrb[4].mxu1 %v5967_v32 }
0x18ba   : > { %7773 = vmatprep.mubr.msk.bf16.mxu1 %vm9956_vm6, %v9955_v51  ;;  %7758 = vmatpush3.bf16.msra.mxu1 %v8539_v2 }
0x18bb   : > { %7759 = vmatprep.subr.bf16.mxu1 %v9955_v51 }
0x18be   : > { %7760 = vmatpush3.bf16.msra.mxu1 %v8540_v26 }
0x18bf   : > { %7761 = vmatprep.subr.bf16.mxu1 %v9955_v51 }
0x18c2   : > { %7762 = vmatpush3.bf16.msra.mxu1 %v8541_v37 }
0x18c3   : > { %7763 = vmatprep.subr.bf16.mxu1 %v9955_v51 }
0x18c6   : > { %7764 = vmatpush3.bf16.msra.mxu1 %v8542_v4 }
0x18c7   : > { %7765 = vmatprep.subr.bf16.mxu1 %v9955_v51 }
0x18ca   : > { %7766 = vmatpush3.bf16.msra.mxu1 %v8543_v27 }
0x18cb   : > { %7767 = vmatprep.subr.bf16.mxu1 %v9955_v51 }
0x18ce   : > { %7768 = vmatpush3.bf16.msra.mxu1 %v8544_v40 }
0x18cf   : > { %7769 = vmatprep.subr.bf16.mxu1 %v9955_v51 }
0x18d2   : > { %7770 = vmatpush3.bf16.msra.mxu1 %v8545_v5 }
0x18d3   : > { %7771 = vmatprep.subr.bf16.mxu1 %v9955_v51 }
0x18d6   : > { %7772 = vmatpush3.bf16.msra.mxu1 %v8546_v14 }
0x196c   : > { %v5818_v41 = vpop.f32.mrb[0].mxu1 }
0x196d   : > { %v5819_v63 = vadd.f32 %v7293_v62, %v5818_v41  ;;  %v7695_v42 = vpop.f32.mrb[1].mxu1 }
0x196e   : > { %v5821_v38 = vpop.f32.mrb[2].mxu1 }
0x196f   : > { %v5824_v13 = vmax.f32 %v5819_v63, 0.0  ;;  %v7696_v44 = vpop.f32.mrb[3].mxu1 }
0x1971   : > { %v5825_v43 = vpack.c.bf16 %v5824_v13, %v5824_v13 }
0x1973   : > { %7714 = vmatmul.mubr.bf16.vlgmr.msra.gmra.mrb[4].mxu0 %v5825_v43 }
0x1974   : > { %7738 = vmatpush3.bf16.msra.mxu0 %v8531_v45  ;;  %7753 = vmatprep.mubr.msk.bf16.mxu0 %vm9956_vm6, %v9955_v51 }
0x1975   : > { %7739 = vmatprep.subr.bf16.mxu0 %v9955_v51 }
0x1978   : > { %7740 = vmatpush3.bf16.msra.mxu0 %v8532_v3 }
0x1979   : > { %7741 = vmatprep.subr.bf16.mxu0 %v9955_v51 }
0x197c   : > { %7742 = vmatpush3.bf16.msra.mxu0 %v8533_v46 }
0x197d   : > { %7743 = vmatprep.subr.bf16.mxu0 %v9955_v51 }
0x1980   : > { %7744 = vmatpush3.bf16.msra.mxu0 %v8534_v17 }
0x1981   : > { %7745 = vmatprep.subr.bf16.mxu0 %v9955_v51 }
0x1984   : > { %7746 = vmatpush3.bf16.msra.mxu0 %v8535_v52 }
0x1985   : > { %7747 = vmatprep.subr.bf16.mxu0 %v9955_v51 }
0x1988   : > { %7748 = vmatpush3.bf16.msra.mxu0 %v8536_v10 }
0x1989   : > { %7749 = vmatprep.subr.bf16.mxu0 %v9955_v51 }
0x198c   : > { %v6051_v58 = vpop.f32.mrb[4].mxu1  ;;  %7750 = vmatpush3.bf16.msra.mxu0 %v8537_v53 }
0x198d   : > { %v6052_v59 = vadd.f32 %v7311_v54, %v6051_v58  ;;  %v7735_v7 = vpop.f32.mrb[5].mxu1  ;;  %7751 = vmatprep.subr.bf16.mxu0 %v9955_v51 }
0x198e   : > { %v6054_v60 = vpop.f32.mrb[6].mxu1 }
0x198f   : > { %v6057_v0 = vmax.f32 %v6052_v59, 0.0  ;;  %v7736_v1 = vpop.f32.mrb[7].mxu1 }
0x1990   : > { %7752 = vmatpush3.bf16.msra.mxu0 %v8538_v18 }
0x1991   : > { %v6058_v9 = vpack.c.bf16 %v6057_v0, %v6057_v0 }
0x1993   : > { %7754 = vmatmul.mubr.bf16.vlgmr.msra.gmra.mrb[8].mxu0 %v6058_v9 }
0x1a46   : > { %v5931_v6 = vpop.f32.mrb[4].mxu0 }
0x1a47   : > { %v7715_v20 = vpop.f32.mrb[5].mxu0  ;;  %v5932_v12 = vadd.f32 %v7302_v11, %v5931_v6 }
0x1a48   : > { %v5934_v22 = vpop.f32.mrb[6].mxu0 }
0x1a49   : > { %v7716_v47 = vpop.f32.mrb[7].mxu0  ;;  %v6283_v15 = vmul.f32 0.5, %v5932_v12 }
0x1a66   : > { %v6164_v33 = vpop.f32.mrb[8].mxu0 }
0x1a67   : > { %v6165_v61 = vadd.f32 %v7320_v19, %v6164_v33  ;;  %v7755_v29 = vpop.f32.mrb[9].mxu0 }
0x1a68   : > { %v6167_v8 = vpop.f32.mrb[10].mxu0 }
0x1a69   : > { %v6170_v16 = vmax.f32 %v6165_v61, 0.0  ;;  %v7756_v28 = vpop.f32.mrb[11].mxu0 }
0x1a6b   : > { %v6171_v49 = vpack.c.bf16 %v6170_v16, %v6170_v16 }
0x1a6d   : > { %7774 = vmatmul.mubr.bf16.vlgmr.msra.gmra.mrb[8].mxu1 %v6171_v49 }
0x1b40   : > { %v6277_v25 = vpop.f32.mrb[8].mxu1 }
0x1b41   : > { %v6278_v51 = vadd.f32 %v7329_v21, %v6277_v25  ;;  %v7775_v23 = vpop.f32.mrb[9].mxu1 }
0x1b42   : > { %v6280_v50 = vpop.f32.mrb[10].mxu1 }
0x1b43   : > { %v6284_v34 = vmul.f32 0.5, %v6278_v51  ;;  %v7776_v48 = vpop.f32.mrb[11].mxu1 }
0x1b45   : > { %v6285_v36 = vadd.f32 %v6284_v34, %v6283_v15 }
0x1b47   : > { %6287 = vst.msk [vmem:[#allocation54] sm:$0x3] %vm6286_vm8, %v6285_v36 }
0x1b48 PF: > { %s12460_s0 = sld [smem:[#allocation135_spill]]  ;;  %s9957_s16 = smov [#allocation54]  }
0x1b49   : > { %s6295_s18 = sshll.u32 %s9957_s16, 4  ;;  %s6296_s18 = int_to_ptr.vmem [resolvable:$true] %s6295_s18 }
0x1b4a   : > { %s9631_s2 = scalar_lea.vmem %s6296_s18, 32  ;;  %p9638_p8 = scmp.lt.s32.totalorder %s6296_s18, %s6296_s18 }
0x1b4b   : > { %p9632_p9 = scmp.ne.s32.totalorder %s6296_s18, %s9631_s2  ;;  %p9639_p11 = scmp.lt.s32.totalorder %s9631_s2, %s9631_s2 }
0x1b4d   : > { %p9640_p4 = por %p9639_p11, %p9638_p8 }
0x1b4e   : > { %p7981_p2 = scmp.eq.s32.totalorder %s12460_s0, 3 }
0x1b50   : > { %p9633_p1 = pnand %p9632_p9, %p7981_p2 }
0x1b52   : > { %p9634_p7 = pneg %p9633_p1 }
0x1b54   : > { %p9641_p5 = pnand %p9640_p4, %p9634_p7 }
0x1b56   : > { %9644 = shalt.err (!%p9641_p5)
}
0x1b57   : > { %s12461_s15 = sld [smem:[#allocation125_spill]] }
0x1b5d   : > { %s9645_s30 = scalar_lea.hbm %s12461_s15, 32 }
0x1b5e   : > { %p9646_p12 = scmp.ne.s32.totalorder %s12461_s15, %s9645_s30  ;;  %p9651_p13 = scmp.lt.u32.totalorder %s9645_s30, %s12461_s15 }
0x1b60   : > { %p9647_p0 = pnand %p9646_p12, %p7981_p2 }
0x1b62   : > { %p9648_p10 = pneg %p9647_p0 }
0x1b64   : > { %p9653_p6 = pnand %p9651_p13, %p9648_p10 }
0x1b66   : > { %9656 = shalt.err (!%p9653_p6)
}
0x1b67   : > { %7902 = dma.vmem_to_hbm [thread:$0]  (%p7981_p2), %s6296_s18, 32, %s12461_s15, [#allocation9]  }
0x1b68   : > { %9784 = dma.done.wait (%p7981_p2), [#allocation9], 32  }
0x1b69   : > { %9786 = vsyncadd (%p7981_p2), [#allocation9], 4294967264 }
0x1b6a PF: > { %s12462_s19 = sld [smem:[#allocation136_spill]]  ;;  %s12463_s0 = sld [smem:[#allocation126_spill]] }
0x1b6b   : > { %s12464_s9 = sld [smem:[#allocation150_spill]]  ;;  %s12465_s13 = sld [smem:[#allocation127_spill]] }
0x1b6c   : > { %s12466_s11 = sld [smem:[#allocation128_spill]]  ;;  %s12467_s16 = sld [smem:[#allocation146_spill]] }
0x1b6d   : > { %s12468_s30 = sld [smem:[#allocation129_spill]]  ;;  %s12469_s24 = sld [smem:[#allocation130_spill]] }
0x1b6e   : > { %s12470_s6 = sld [smem:[#allocation144_spill]]  ;;  %s12471_s18 = sld [smem:[#allocation131_spill]] }
0x1b6f   : > { %s12472_s22 = sld [smem:[#allocation132_spill]]  ;;  %s12473_s26 = sld [smem:[#allocation143_spill]] }
0x1b70   : > { %s12474_s1 = sld [smem:[#allocation133_spill]]  ;;  %s12475_s2 = sld [smem:[#allocation134_spill]] }
0x1b71   : > { %s12476_s8 = sld [smem:[#allocation137_spill]]  ;;  %p125_p3 = scmp.ge.s32.totalorder %s12462_s19, 6  }
0x1b72   : > { %s12478_s5 = smov %s9797_s10  ;;  %s12479_s10 = smov %s12464_s9 }
0x1b73   :  { %127 = sbr.rel (!%p125_p3) target bundleno = 141 (0x8d), region = 632 }
0x1b7a   :  { %6308 = vsyncpa [#allocation8], 1 }
0x1b7b   :  { %6310 = vsyncpa [#allocation8 + $0x1], 1 }
0x1b7c   :  { %6311 = vsyncpa [#allocation11], 1 }
0x1b7d   :  { %6312 = vsyncpa [#allocation14], 1 }
0x1b7e   :  { %6313 = vsyncpa [#allocation41], 1 }
0x1b7f   :  { %6314 = vsyncpa [#allocation44], 1 }
0x1b80   :  { %6315 = vsyncpa [#allocation47], 1 }
0x1b81   :  { %6316 = vsyncpa [#allocation50], 1 }
0x1b82   :  { %6317 = vsyncpa [#allocation53], 1 }
0x1b83   :  { %6318 = vsyncpa [#allocation9], 1 }
0x1b84   :  { %6320 = vsyncpa [#allocation9 + $0x1], 1 }

</bundles_post_ra>
